<compile_context>
chip_gen: v5e
topology: v5e:2x2
jax: 0.10.0
libtpu: 0.0.40
codegen_flags: <defaults>
</compile_context>

<pallas_src>
import math

import jax
import jax.numpy as jnp
from jax.experimental import pallas as pl
from jax.experimental.pallas import tpu as pltpu

# ----- stand-in for STFT_PARAMS -----
WINDOW_SIZE = 128   # n_fft / window length
HOP_SIZE = 64
F_BINS = 64         # frequency bins kept (stft[:, :F])
T_SEG = 16          # frames per segment in batchifyAudio

C_IN = 2            # stereo
C1 = 8              # stand-in UNet hidden widths
C2 = 16


# --------------------------- fused Pallas kernel -----------------------------

def _conv_block(x, w_ref, b_ref, act):
    """3x3 'same' conv over (time, freq) for one segment, both stems fused.

    x:     (Ci*T, F) f32 activation, rows = (channel-major, time-minor), F on lanes.
    w_ref: (Co*T, 3*Ci*T) bf16 banded-Toeplitz expansion of the 3x3 weights
           (time taps inside the band, the 3 frequency taps along K blocks).
    b_ref: (Co*T, 1) f32 bias, pre-repeated across the T rows of each channel.
    """
    rows, f = x.shape
    xb = x.astype(jnp.bfloat16)
    z = jnp.zeros((rows, 1), jnp.bfloat16)
    x_m = jnp.concatenate([z, xb[:, :f - 1]], axis=1)    # frequency tap f-1
    x_p = jnp.concatenate([xb[:, 1:], z], axis=1)        # frequency tap f+1
    xcat = jnp.concatenate([x_m, xb, x_p], axis=0)       # (3*Ci*T, F)
    y = jnp.dot(w_ref[...], xcat, preferred_element_type=jnp.float32) + b_ref[...]
    if act == "relu":
        return jnp.maximum(y, 0.0)
    return jax.nn.sigmoid(y)


def _isolator_kernel(frames_ref, dft_ref,
                     w1_ref, b1_ref, w2_ref, b2_ref,
                     w3_ref, b3_ref, w4_ref, b4_ref,
                     out_ref):
    t, f = T_SEG, F_BINS

    # ---- STFT: one lane-dense bf16 matmul, re|im packed on 2F = 128 lanes ----
    st = jnp.dot(frames_ref[0], dft_ref[...],
                 preferred_element_type=jnp.float32)         # (2T, 2F) f32
    re = st[:, :f]
    im = st[:, f:]
    mag = jnp.sqrt(re * re + im * im)                        # (2T, F), rows (c, t)

    # ---- both stems' stand-in UNets, fused (channels = [stem0 | stem1] blocks) ----
    e1 = _conv_block(mag, w1_ref, b1_ref, "relu")            # (2*C1*T, F)
    e2 = _conv_block(e1, w2_ref, b2_ref, "relu")             # (2*C2*T, F)
    d1 = _conv_block(e2, w3_ref, b3_ref, "relu")             # (2*C1*T, F)
    cat = jnp.concatenate([d1, e1], axis=0)                  # (4*C1*T, F) skip
    m = _conv_block(cat, w4_ref, b4_ref, "sigmoid")          # (4T, F): [s0c0|s0c1|s1c0|s1c1] x T

    # ---- mask normalization across stems (per audio channel) + apply ----
    m2 = m * m
    s0 = m2[:2 * t]                                          # stem0, rows (c, t)
    s1 = m2[2 * t:]                                          # stem1, rows (c, t)
    inv = pl.reciprocal(s0 + s1 + 1e-10, approx=True)        # EUP, frees VALU slots
    n0 = (s0 + 0.5e-10) * inv
    n1 = (s1 + 0.5e-10) * inv
    out_ref[0, 0] = st * jnp.concatenate([n0, n0], axis=1)   # 128-lane-dense stores
    out_ref[1, 0] = st * jnp.concatenate([n1, n1], axis=1)


# ------------------------ host-side weight packing ---------------------------

def _combine_cat(wa, wb):
    """Layer 1: shared input, concatenate stems along cout."""
    return jnp.concatenate([wa, wb], axis=-1)


def _combine_blockdiag(wa, wb):
    """Layers 2/3: per-stem inputs, block-diagonal over (cin, cout)."""
    top = jnp.concatenate([wa, jnp.zeros_like(wb)], axis=-1)
    bot = jnp.concatenate([jnp.zeros_like(wa), wb], axis=-1)
    return jnp.concatenate([top, bot], axis=2)


def _combine_layer4(wa, wb):
    """Layer 4: per-stem input is concat([d1, e1]); fused cin order is
    [d1_s0, d1_s1, e1_s0, e1_s1]; fused cout order is [s0(2), s1(2)]."""
    h = wa.shape[2] // 2
    zd = jnp.zeros((3, 3, h, wa.shape[3]), wa.dtype)
    ca = jnp.concatenate([wa[:, :, :h], zd, wa[:, :, h:], zd], axis=2)
    cb = jnp.concatenate([zd, wb[:, :, :h], zd, wb[:, :, h:]], axis=2)
    return jnp.concatenate([ca, cb], axis=-1)


def _toeplitz_expand(wc, t):
    """(3, 3, Ci, Co) conv weights -> (Co*t, 3*Ci*t) banded matrix so a full
    'same' 3x3 conv becomes one matmul against concat([x(f-1), x, x(f+1)], rows)."""
    kh, kw, ci, co = wc.shape
    tt = jnp.arange(t)
    band = (tt[None, None, :] - tt[None, :, None] + 1
            == jnp.arange(kh)[:, None, None]).astype(wc.dtype)      # (3, t, t)
    m = jnp.einsum('dfio,dts->fisot', wc, band)                     # (kw, ci, t, co, t)
    return m.transpose(3, 4, 0, 1, 2).reshape(co * t, kw * ci * t)


def _expand_bias(ba, bb, t):
    return jnp.repeat(jnp.concatenate([ba, bb]), t).reshape(-1, 1).astype(jnp.float32)


# ------------------------------ forward pass ---------------------------------

def isolator_forward(wav, params):
    """wav: (2, L) f32 -> dict of per-stem masked STFTs, each (2, F, n_frames, 2)."""
    names = list(params.keys())
    assert len(names) == 2  # TODO(synk): fused kernel is specialized to exactly 2 stems
    _, length = wav.shape
    w, h, f, t = WINDOW_SIZE, HOP_SIZE, F_BINS, T_SEG
    n_frames = length // h + 1
    n_seg = math.ceil(n_frames / t)
    n_pad = n_seg * t

    # centered framing (torch.stft center=True, pad_mode='constant'), padded to a
    # whole number of segments so every kernel tile is a clean (32, 128).
    pad_l = w // 2
    pad_r = max((n_pad - 1) * h + w - pad_l - length, 0)
    padded = jnp.pad(wav, ((0, 0), (pad_l, pad_r)))
    idx = jnp.arange(n_pad)[:, None] * h + jnp.arange(w)[None, :]
    frames = padded[:, idx]                                   # (2, n_pad, W)
    frames = (frames.reshape(2, n_seg, t, w)
              .transpose(1, 0, 2, 3)
              .reshape(n_seg, 2 * t, w)
              .astype(jnp.bfloat16))                          # rows (c, t) per segment

    # windowed real-DFT matrix with cos | -sin fused to 2F = 128 lanes
    # TODO(synk): STFT_PARAMS.WINDOW unknown; periodic Hann used.
    n = jnp.arange(w, dtype=jnp.float32)
    window = 0.5 * (1.0 - jnp.cos(2.0 * jnp.pi * n / w))
    ang = 2.0 * jnp.pi * n[:, None] * jnp.arange(f, dtype=jnp.float32)[None, :] / w
    dft = (jnp.concatenate([jnp.cos(ang), -jnp.sin(ang)], axis=1)
           * window[:, None]).astype(jnp.bfloat16)            # (W, 2F)

    pa, pb = params[names[0]], params[names[1]]
    w1 = _toeplitz_expand(_combine_cat(pa["w1"], pb["w1"]), t).astype(jnp.bfloat16)
    w2 = _toeplitz_expand(_combine_blockdiag(pa["w2"], pb["w2"]), t).astype(jnp.bfloat16)
    w3 = _toeplitz_expand(_combine_blockdiag(pa["w3"], pb["w3"]), t).astype(jnp.bfloat16)
    w4 = _toeplitz_expand(_combine_layer4(pa["w4"], pb["w4"]), t).astype(jnp.bfloat16)
    b1 = _expand_bias(pa["b1"], pb["b1"], t)
    b2 = _expand_bias(pa["b2"], pb["b2"], t)
    b3 = _expand_bias(pa["b3"], pb["b3"], t)
    b4 = _expand_bias(pa["b4"], pb["b4"], t)

    def _const_spec(arr):
        nd = arr.ndim
        return pl.BlockSpec(arr.shape, lambda s, nd=nd: (0,) * nd)

    grid_spec = pltpu.PrefetchScalarGridSpec(
        num_scalar_prefetch=0,
        grid=(n_seg,),
        in_specs=[
            pl.BlockSpec((1, 2 * t, w), lambda s: (s, 0, 0)),   # per-segment frames
            _const_spec(dft),
            _const_spec(w1), _const_spec(b1),
            _const_spec(w2), _const_spec(b2),
            _const_spec(w3), _const_spec(b3),
            _const_spec(w4), _const_spec(b4),
        ],
        out_specs=pl.BlockSpec((2, 1, 2 * t, 2 * f), lambda s: (0, s, 0, 0)),
    )
    out = pl.pallas_call(
        _isolator_kernel,
        out_shape=jax.ShapeDtypeStruct((2, n_seg, 2 * t, 2 * f), jnp.float32),
        grid_spec=grid_spec,
        compiler_params=pltpu.CompilerParams(
            dimension_semantics=("parallel",)),
    )(frames, dft, w1, b1, w2, b2, w3, b3, w4, b4)

    def to_torch_layout(o):                                   # (n_seg, 2T, 2F)
        o = o.reshape(n_seg, 2, t, 2, f)                      # (seg, c, t, ri, f)
        o = o.transpose(1, 4, 0, 2, 3)                        # (c, f, seg, t, ri)
        return o.reshape(2, f, n_seg * t, 2)[:, :, :n_frames, :]

    return {names[0]: to_torch_layout(out[0]),
            names[1]: to_torch_layout(out[1])}


def init_unet_params(key):
    # TODO(synk): stand-in parameters; the real UNet definition is not in the source.
    shapes = {"w1": (3, 3, C_IN, C1), "b1": (C1,),
              "w2": (3, 3, C1, C2), "b2": (C2,),
              "w3": (3, 3, C2, C1), "b3": (C1,),
              "w4": (3, 3, 2 * C1, C_IN), "b4": (C_IN,)}
    keys = jax.random.split(key, len(shapes))
    params = {}
    for (name, shp), k in zip(shapes.items(), keys):
        if name.startswith("w"):
            fan_in = shp[0] * shp[1] * shp[2]
            params[name] = jax.random.normal(k, shp, jnp.float32) / math.sqrt(fan_in)
        else:
            params[name] = jnp.zeros(shp, jnp.float32)
    return params


if __name__ == "__main__":
    key = jax.random.PRNGKey(0)
    k_wav, k_voc, k_acc = jax.random.split(key, 3)
    wav = jax.random.normal(k_wav, (2, 2048), dtype=jnp.float32)
    params = {"vocals": init_unet_params(k_voc),
              "accompaniment": init_unet_params(k_acc)}

    fwd = jax.jit(isolator_forward)
    out = jax.block_until_ready(fwd(wav, params))

    n_frames = 2048 // HOP_SIZE + 1
    for name, stft_masked in out.items():
        assert stft_masked.shape == (2, F_BINS, n_frames, 2), stft_masked.shape
        assert bool(jnp.all(jnp.isfinite(stft_masked)))
    print("KERNEL_OK")
</pallas_src>

<mosaic_0001>
module attributes {stable_mosaic.version = 11 : i64} {
  func.func @_isolator_kernel(%arg0: i32, %arg1: memref<1x32x128xbf16, #tpu.memory_space<vmem>>, %arg2: memref<128x128xbf16, #tpu.memory_space<vmem>>, %arg3: memref<256x96xbf16, #tpu.memory_space<vmem>>, %arg4: memref<256x1xf32, #tpu.memory_space<vmem>>, %arg5: memref<512x768xbf16, #tpu.memory_space<vmem>>, %arg6: memref<512x1xf32, #tpu.memory_space<vmem>>, %arg7: memref<256x1536xbf16, #tpu.memory_space<vmem>>, %arg8: memref<256x1xf32, #tpu.memory_space<vmem>>, %arg9: memref<64x1536xbf16, #tpu.memory_space<vmem>>, %arg10: memref<64x1xf32, #tpu.memory_space<vmem>>, %arg11: memref<2x1x32x128xf32, #tpu.memory_space<vmem>>) attributes {dimension_semantics = [#tpu.dimension_semantics<parallel>], iteration_bounds = array<i64: 3>, scalar_prefetch = 0 : i64, scratch_operands = 0 : i64, tpu.core_type = #tpu.core_type<tc>, window_params = [{transform_indices = @transform_0, window_bounds = array<i64: 1, 32, 128>}, {pipeline_mode = #tpu.pipeline_mode<synchronous>, transform_indices = @transform_1, window_bounds = array<i64: 128, 128>}, {pipeline_mode = #tpu.pipeline_mode<synchronous>, transform_indices = @transform_2, window_bounds = array<i64: 256, 96>}, {pipeline_mode = #tpu.pipeline_mode<synchronous>, transform_indices = @transform_3, window_bounds = array<i64: 256, 1>}, {pipeline_mode = #tpu.pipeline_mode<synchronous>, transform_indices = @transform_4, window_bounds = array<i64: 512, 768>}, {pipeline_mode = #tpu.pipeline_mode<synchronous>, transform_indices = @transform_5, window_bounds = array<i64: 512, 1>}, {pipeline_mode = #tpu.pipeline_mode<synchronous>, transform_indices = @transform_6, window_bounds = array<i64: 256, 1536>}, {pipeline_mode = #tpu.pipeline_mode<synchronous>, transform_indices = @transform_7, window_bounds = array<i64: 256, 1>}, {pipeline_mode = #tpu.pipeline_mode<synchronous>, transform_indices = @transform_8, window_bounds = array<i64: 64, 1536>}, {pipeline_mode = #tpu.pipeline_mode<synchronous>, transform_indices = @transform_9, window_bounds = array<i64: 64, 1>}, {transform_indices = @transform_10, window_bounds = array<i64: 2, 1, 32, 128>}]} {
    %c0 = arith.constant 0 : index
    %c0_0 = arith.constant 0 : index
    %c0_1 = arith.constant 0 : index
    %0 = vector.load %arg1[%c0, %c0_0, %c0_1] : memref<1x32x128xbf16, #tpu.memory_space<vmem>>, vector<1x32x128xbf16>
    %1 = vector.shape_cast %0 : vector<1x32x128xbf16> to vector<32x128xbf16>
    %c0_2 = arith.constant 0 : index
    %c0_3 = arith.constant 0 : index
    %2 = vector.load %arg2[%c0_2, %c0_3] : memref<128x128xbf16, #tpu.memory_space<vmem>>, vector<128x128xbf16>
    %cst = arith.constant dense<0.000000e+00> : vector<32x128xf32>
    %3 = tpu.matmul %1, %2, %cst {dimension_numbers = #tpu.dot_dimension_numbers<[1], [0], [0], [1], [0, 0, 1, 1], [], []>} : vector<32x128xbf16>, vector<128x128xbf16>, vector<32x128xf32> -> vector<32x128xf32>
    %4 = vector.extract_strided_slice %3 {offsets = [0, 0], sizes = [32, 64], strides = [1, 1]} : vector<32x128xf32> to vector<32x64xf32>
    %5 = vector.extract_strided_slice %3 {offsets = [0, 64], sizes = [32, 64], strides = [1, 1]} : vector<32x128xf32> to vector<32x64xf32>
    %6 = arith.mulf %4, %4 : vector<32x64xf32>
    %7 = arith.mulf %5, %5 : vector<32x64xf32>
    %8 = arith.addf %6, %7 : vector<32x64xf32>
    %9 = math.sqrt %8 : vector<32x64xf32>
    %10 = arith.truncf %9 : vector<32x64xf32> to vector<32x64xbf16>
    %cst_4 = arith.constant 0.000000e+00 : bf16
    %11 = vector.broadcast %cst_4 : bf16 to vector<32x1xbf16>
    %12 = vector.extract_strided_slice %10 {offsets = [0, 0], sizes = [32, 63], strides = [1, 1]} : vector<32x64xbf16> to vector<32x63xbf16>
    %13 = tpu.concatenate %11, %12 in 1 : vector<32x1xbf16>, vector<32x63xbf16> -> vector<32x64xbf16>
    %14 = vector.extract_strided_slice %10 {offsets = [0, 1], sizes = [32, 63], strides = [1, 1]} : vector<32x64xbf16> to vector<32x63xbf16>
    %15 = tpu.concatenate %14, %11 in 1 : vector<32x63xbf16>, vector<32x1xbf16> -> vector<32x64xbf16>
    %16 = tpu.concatenate %13, %10, %15 in 0 : vector<32x64xbf16>, vector<32x64xbf16>, vector<32x64xbf16> -> vector<96x64xbf16>
    %c0_5 = arith.constant 0 : index
    %c0_6 = arith.constant 0 : index
    %17 = vector.load %arg3[%c0_5, %c0_6] : memref<256x96xbf16, #tpu.memory_space<vmem>>, vector<256x96xbf16>
    %cst_7 = arith.constant dense<0.000000e+00> : vector<256x64xf32>
    %18 = tpu.matmul %17, %16, %cst_7 {dimension_numbers = #tpu.dot_dimension_numbers<[1], [0], [0], [1], [0, 0, 1, 1], [], []>} : vector<256x96xbf16>, vector<96x64xbf16>, vector<256x64xf32> -> vector<256x64xf32>
    %c0_8 = arith.constant 0 : index
    %c0_9 = arith.constant 0 : index
    %19 = vector.load %arg4[%c0_8, %c0_9] : memref<256x1xf32, #tpu.memory_space<vmem>>, vector<256x1xf32>
    %20 = vector.broadcast %19 : vector<256x1xf32> to vector<256x64xf32>
    %21 = arith.addf %18, %20 : vector<256x64xf32>
    %cst_10 = arith.constant 0.000000e+00 : f32
    %22 = vector.broadcast %cst_10 : f32 to vector<256x64xf32>
    %23 = arith.maximumf %21, %22 : vector<256x64xf32>
    %24 = arith.truncf %23 : vector<256x64xf32> to vector<256x64xbf16>
    %cst_11 = arith.constant 0.000000e+00 : bf16
    %25 = vector.broadcast %cst_11 : bf16 to vector<256x1xbf16>
    %26 = vector.extract_strided_slice %24 {offsets = [0, 0], sizes = [256, 63], strides = [1, 1]} : vector<256x64xbf16> to vector<256x63xbf16>
    %27 = tpu.concatenate %25, %26 in 1 : vector<256x1xbf16>, vector<256x63xbf16> -> vector<256x64xbf16>
    %28 = vector.extract_strided_slice %24 {offsets = [0, 1], sizes = [256, 63], strides = [1, 1]} : vector<256x64xbf16> to vector<256x63xbf16>
    %29 = tpu.concatenate %28, %25 in 1 : vector<256x63xbf16>, vector<256x1xbf16> -> vector<256x64xbf16>
    %30 = tpu.concatenate %27, %24, %29 in 0 : vector<256x64xbf16>, vector<256x64xbf16>, vector<256x64xbf16> -> vector<768x64xbf16>
    %c0_12 = arith.constant 0 : index
    %c0_13 = arith.constant 0 : index
    %31 = vector.load %arg5[%c0_12, %c0_13] : memref<512x768xbf16, #tpu.memory_space<vmem>>, vector<512x768xbf16>
    %cst_14 = arith.constant dense<0.000000e+00> : vector<512x64xf32>
    %32 = tpu.matmul %31, %30, %cst_14 {dimension_numbers = #tpu.dot_dimension_numbers<[1], [0], [0], [1], [0, 0, 1, 1], [], []>} : vector<512x768xbf16>, vector<768x64xbf16>, vector<512x64xf32> -> vector<512x64xf32>
    %c0_15 = arith.constant 0 : index
    %c0_16 = arith.constant 0 : index
    %33 = vector.load %arg6[%c0_15, %c0_16] : memref<512x1xf32, #tpu.memory_space<vmem>>, vector<512x1xf32>
    %34 = vector.broadcast %33 : vector<512x1xf32> to vector<512x64xf32>
    %35 = arith.addf %32, %34 : vector<512x64xf32>
    %cst_17 = arith.constant 0.000000e+00 : f32
    %36 = vector.broadcast %cst_17 : f32 to vector<512x64xf32>
    %37 = arith.maximumf %35, %36 : vector<512x64xf32>
    %38 = arith.truncf %37 : vector<512x64xf32> to vector<512x64xbf16>
    %cst_18 = arith.constant 0.000000e+00 : bf16
    %39 = vector.broadcast %cst_18 : bf16 to vector<512x1xbf16>
    %40 = vector.extract_strided_slice %38 {offsets = [0, 0], sizes = [512, 63], strides = [1, 1]} : vector<512x64xbf16> to vector<512x63xbf16>
    %41 = tpu.concatenate %39, %40 in 1 : vector<512x1xbf16>, vector<512x63xbf16> -> vector<512x64xbf16>
    %42 = vector.extract_strided_slice %38 {offsets = [0, 1], sizes = [512, 63], strides = [1, 1]} : vector<512x64xbf16> to vector<512x63xbf16>
    %43 = tpu.concatenate %42, %39 in 1 : vector<512x63xbf16>, vector<512x1xbf16> -> vector<512x64xbf16>
    %44 = tpu.concatenate %41, %38, %43 in 0 : vector<512x64xbf16>, vector<512x64xbf16>, vector<512x64xbf16> -> vector<1536x64xbf16>
    %c0_19 = arith.constant 0 : index
    %c0_20 = arith.constant 0 : index
    %45 = vector.load %arg7[%c0_19, %c0_20] : memref<256x1536xbf16, #tpu.memory_space<vmem>>, vector<256x1536xbf16>
    %cst_21 = arith.constant dense<0.000000e+00> : vector<256x64xf32>
    %46 = tpu.matmul %45, %44, %cst_21 {dimension_numbers = #tpu.dot_dimension_numbers<[1], [0], [0], [1], [0, 0, 1, 1], [], []>} : vector<256x1536xbf16>, vector<1536x64xbf16>, vector<256x64xf32> -> vector<256x64xf32>
    %c0_22 = arith.constant 0 : index
    %c0_23 = arith.constant 0 : index
    %47 = vector.load %arg8[%c0_22, %c0_23] : memref<256x1xf32, #tpu.memory_space<vmem>>, vector<256x1xf32>
    %48 = vector.broadcast %47 : vector<256x1xf32> to vector<256x64xf32>
    %49 = arith.addf %46, %48 : vector<256x64xf32>
    %cst_24 = arith.constant 0.000000e+00 : f32
    %50 = vector.broadcast %cst_24 : f32 to vector<256x64xf32>
    %51 = arith.maximumf %49, %50 : vector<256x64xf32>
    %52 = tpu.concatenate %51, %23 in 0 : vector<256x64xf32>, vector<256x64xf32> -> vector<512x64xf32>
    %53 = arith.truncf %52 : vector<512x64xf32> to vector<512x64xbf16>
    %cst_25 = arith.constant 0.000000e+00 : bf16
    %54 = vector.broadcast %cst_25 : bf16 to vector<512x1xbf16>
    %55 = vector.extract_strided_slice %53 {offsets = [0, 0], sizes = [512, 63], strides = [1, 1]} : vector<512x64xbf16> to vector<512x63xbf16>
    %56 = tpu.concatenate %54, %55 in 1 : vector<512x1xbf16>, vector<512x63xbf16> -> vector<512x64xbf16>
    %57 = vector.extract_strided_slice %53 {offsets = [0, 1], sizes = [512, 63], strides = [1, 1]} : vector<512x64xbf16> to vector<512x63xbf16>
    %58 = tpu.concatenate %57, %54 in 1 : vector<512x63xbf16>, vector<512x1xbf16> -> vector<512x64xbf16>
    %59 = tpu.concatenate %56, %53, %58 in 0 : vector<512x64xbf16>, vector<512x64xbf16>, vector<512x64xbf16> -> vector<1536x64xbf16>
    %c0_26 = arith.constant 0 : index
    %c0_27 = arith.constant 0 : index
    %60 = vector.load %arg9[%c0_26, %c0_27] : memref<64x1536xbf16, #tpu.memory_space<vmem>>, vector<64x1536xbf16>
    %cst_28 = arith.constant dense<0.000000e+00> : vector<64x64xf32>
    %61 = tpu.matmul %60, %59, %cst_28 {dimension_numbers = #tpu.dot_dimension_numbers<[1], [0], [0], [1], [0, 0, 1, 1], [], []>} : vector<64x1536xbf16>, vector<1536x64xbf16>, vector<64x64xf32> -> vector<64x64xf32>
    %c0_29 = arith.constant 0 : index
    %c0_30 = arith.constant 0 : index
    %62 = vector.load %arg10[%c0_29, %c0_30] : memref<64x1xf32, #tpu.memory_space<vmem>>, vector<64x1xf32>
    %63 = vector.broadcast %62 : vector<64x1xf32> to vector<64x64xf32>
    %64 = arith.addf %61, %63 : vector<64x64xf32>
    %65 = arith.negf %64 : vector<64x64xf32>
    %66 = math.exp %65 : vector<64x64xf32>
    %cst_31 = arith.constant 1.000000e+00 : f32
    %67 = vector.broadcast %cst_31 : f32 to vector<64x64xf32>
    %68 = arith.addf %67, %66 : vector<64x64xf32>
    %69 = arith.divf %67, %68 : vector<64x64xf32>
    %70 = arith.mulf %69, %69 : vector<64x64xf32>
    %71 = vector.extract_strided_slice %70 {offsets = [0, 0], sizes = [32, 64], strides = [1, 1]} : vector<64x64xf32> to vector<32x64xf32>
    %72 = vector.extract_strided_slice %70 {offsets = [32, 0], sizes = [32, 64], strides = [1, 1]} : vector<64x64xf32> to vector<32x64xf32>
    %73 = arith.addf %71, %72 : vector<32x64xf32>
    %cst_32 = arith.constant 1.000000e-10 : f32
    %74 = vector.broadcast %cst_32 : f32 to vector<32x64xf32>
    %75 = arith.addf %73, %74 : vector<32x64xf32>
    %76 = tpu.reciprocal %75 {approx = true} : vector<32x64xf32> -> vector<32x64xf32>
    %cst_33 = arith.constant 5.000000e-11 : f32
    %77 = vector.broadcast %cst_33 : f32 to vector<32x64xf32>
    %78 = arith.addf %71, %77 : vector<32x64xf32>
    %79 = arith.mulf %78, %76 : vector<32x64xf32>
    %cst_34 = arith.constant 5.000000e-11 : f32
    %80 = vector.broadcast %cst_34 : f32 to vector<32x64xf32>
    %81 = arith.addf %72, %80 : vector<32x64xf32>
    %82 = arith.mulf %81, %76 : vector<32x64xf32>
    %83 = tpu.concatenate %79, %79 in 1 : vector<32x64xf32>, vector<32x64xf32> -> vector<32x128xf32>
    %84 = arith.mulf %3, %83 : vector<32x128xf32>
    %c0_35 = arith.constant 0 : index
    %c0_36 = arith.constant 0 : index
    %c0_37 = arith.constant 0 : index
    %c0_38 = arith.constant 0 : index
    %85 = vector.load %arg11[%c0_35, %c0_36, %c0_37, %c0_38] : memref<2x1x32x128xf32, #tpu.memory_space<vmem>>, vector<1x1x32x128xf32>
    %86 = vector.shape_cast %85 : vector<1x1x32x128xf32> to vector<32x128xf32>
    %87 = vector.shape_cast %84 : vector<32x128xf32> to vector<1x1x32x128xf32>
    tpu.vector_store %arg11[%c0_35, %c0_36, %c0_37, %c0_38], %87 {strides = array<i32>} : memref<2x1x32x128xf32, #tpu.memory_space<vmem>>, vector<1x1x32x128xf32>,
    %88 = tpu.concatenate %82, %82 in 1 : vector<32x64xf32>, vector<32x64xf32> -> vector<32x128xf32>
    %89 = arith.mulf %3, %88 : vector<32x128xf32>
    %c1 = arith.constant 1 : index
    %c0_39 = arith.constant 0 : index
    %c0_40 = arith.constant 0 : index
    %c0_41 = arith.constant 0 : index
    %90 = vector.load %arg11[%c1, %c0_39, %c0_40, %c0_41] : memref<2x1x32x128xf32, #tpu.memory_space<vmem>>, vector<1x1x32x128xf32>
    %91 = vector.shape_cast %90 : vector<1x1x32x128xf32> to vector<32x128xf32>
    %92 = vector.shape_cast %89 : vector<32x128xf32> to vector<1x1x32x128xf32>
    tpu.vector_store %arg11[%c1, %c0_39, %c0_40, %c0_41], %92 {strides = array<i32>} : memref<2x1x32x128xf32, #tpu.memory_space<vmem>>, vector<1x1x32x128xf32>,
    return
  }
  func.func @transform_0(%arg0: i32) -> (i32, i32, i32) {
    %c0_i32 = arith.constant 0 : i32
    %c0_i32_0 = arith.constant 0 : i32
    %c0_i32_1 = arith.constant 0 : i32
    return %arg0, %c0_i32, %c0_i32_0 : i32, i32, i32
  }
  func.func @transform_1(%arg0: i32) -> (i32, i32) {
    %c0_i32 = arith.constant 0 : i32
    %c0_i32_0 = arith.constant 0 : i32
    %c0_i32_1 = arith.constant 0 : i32
    return %c0_i32, %c0_i32_0 : i32, i32
  }
  func.func @transform_2(%arg0: i32) -> (i32, i32) {
    %c0_i32 = arith.constant 0 : i32
    %c0_i32_0 = arith.constant 0 : i32
    %c0_i32_1 = arith.constant 0 : i32
    return %c0_i32, %c0_i32_0 : i32, i32
  }
  func.func @transform_3(%arg0: i32) -> (i32, i32) {
    %c0_i32 = arith.constant 0 : i32
    %c0_i32_0 = arith.constant 0 : i32
    %c0_i32_1 = arith.constant 0 : i32
    return %c0_i32, %c0_i32_0 : i32, i32
  }
  func.func @transform_4(%arg0: i32) -> (i32, i32) {
    %c0_i32 = arith.constant 0 : i32
    %c0_i32_0 = arith.constant 0 : i32
    %c0_i32_1 = arith.constant 0 : i32
    return %c0_i32, %c0_i32_0 : i32, i32
  }
  func.func @transform_5(%arg0: i32) -> (i32, i32) {
    %c0_i32 = arith.constant 0 : i32
    %c0_i32_0 = arith.constant 0 : i32
    %c0_i32_1 = arith.constant 0 : i32
    return %c0_i32, %c0_i32_0 : i32, i32
  }
  func.func @transform_6(%arg0: i32) -> (i32, i32) {
    %c0_i32 = arith.constant 0 : i32
    %c0_i32_0 = arith.constant 0 : i32
    %c0_i32_1 = arith.constant 0 : i32
    return %c0_i32, %c0_i32_0 : i32, i32
  }
  func.func @transform_7(%arg0: i32) -> (i32, i32) {
    %c0_i32 = arith.constant 0 : i32
    %c0_i32_0 = arith.constant 0 : i32
    %c0_i32_1 = arith.constant 0 : i32
    return %c0_i32, %c0_i32_0 : i32, i32
  }
  func.func @transform_8(%arg0: i32) -> (i32, i32) {
    %c0_i32 = arith.constant 0 : i32
    %c0_i32_0 = arith.constant 0 : i32
    %c0_i32_1 = arith.constant 0 : i32
    return %c0_i32, %c0_i32_0 : i32, i32
  }
  func.func @transform_9(%arg0: i32) -> (i32, i32) {
    %c0_i32 = arith.constant 0 : i32
    %c0_i32_0 = arith.constant 0 : i32
    %c0_i32_1 = arith.constant 0 : i32
    return %c0_i32, %c0_i32_0 : i32, i32
  }
  func.func @transform_10(%arg0: i32) -> (i32, i32, i32, i32) {
    %c0_i32 = arith.constant 0 : i32
    %c0_i32_0 = arith.constant 0 : i32
    %c0_i32_1 = arith.constant 0 : i32
    %c0_i32_2 = arith.constant 0 : i32
    return %c0_i32, %arg0, %c0_i32_0, %c0_i32_1 : i32, i32, i32, i32
  }
}

</mosaic_0001>

<bundles_post_ra>
// kernel: squeeze.3
= control target key start
LH: loop header
LB: loop body
LE: loop exit
PB: predicated region body
PF: predicated region fallthrough
CT: control target
= control target key end

     0   :  { %s884_s10 = smov 64   ;;  %vm3_vm0 = vcmask 523264   ;;  %s1275_s0 = inlined_call_operand.vmem [shape: f32[1,3,32,128], index: 0, kind: input, shape index: {}]   ;;  %s1276_s1 = inlined_call_operand.vmem [shape: f32[3,2,16,2,64], index: 1, kind: output, shape index: {}]  }
   0x1   :  { %v778_v0 = vld [vmem:[%s1275_s0 + $0x10] sm:$0xff]   ;;  %v83_v1 = vld [vmem:[%s1275_s0] sm:$0xff]   ;;  %v779_v3 = vld [vmem:[%s1275_s0 + $0x18] sm:$0xff]  }
   0x2   :  { %102 = vrot.lane.b32.xlu1 %v778_v0, %s884_s10  ;;  %84 = vrot.lane.b32.xlu0 %v83_v1, %s884_s10  ;;  %v780_v2 = vld [vmem:[%s1275_s0 + $0x20] sm:$0xff]   ;;  %v777_v4 = vld [vmem:[%s1275_s0 + $0x8] sm:$0xff]   ;;  %17 = vst.msk [vmem:[#allocation0 + $0x80] ss:$8 sm:$0xf] %vm3_vm0, %v778_v0  }
   0x3   :  { %120 = vrot.lane.b32.xlu2 %v780_v2, %s884_s10  ;;  %v781_v5 = vld [vmem:[%s1275_s0 + $0x28] sm:$0xff]   ;;  %v783_v6 = vld [vmem:[%s1275_s0 + $0x38] sm:$0xff]   ;;  %v782_v7 = vld [vmem:[%s1275_s0 + $0x30] sm:$0xff]   ;;  %31 = vst.msk [vmem:[#allocation0 + $0x100] ss:$8 sm:$0xf] %vm3_vm0, %v780_v2  }
   0x4   :  { %v784_v8 = vld [vmem:[%s1275_s0 + $0x40] sm:$0xff]   ;;  %v786_v9 = vld [vmem:[%s1275_s0 + $0x50] sm:$0xff]   ;;  %v785_v10 = vld [vmem:[%s1275_s0 + $0x48] sm:$0xff]   ;;  %33 = vst.msk [vmem:[#allocation0 + $0x100] ss:$8 sm:$0xf0] %vm3_vm0, %v780_v2  }
   0x5   :  { %v787_v11 = vld [vmem:[%s1275_s0 + $0x58] sm:$0xff]   ;;  %19 = vst.msk [vmem:[#allocation0 + $0x80] ss:$8 sm:$0xf0] %vm3_vm0, %v778_v0  }
   0x6   :  { %4 = vst.msk [vmem:[#allocation0] ss:$8 sm:$0xf] %vm3_vm0, %v83_v1  }
   0x7   :  { %5 = vst.msk [vmem:[#allocation0] ss:$8 sm:$0xf0] %vm3_vm0, %v83_v1  }
   0x8   :  { %38 = vst.msk [vmem:[#allocation0 + $0x140] ss:$8 sm:$0xf] %vm3_vm0, %v781_v5  }
   0x9   :  { %40 = vst.msk [vmem:[#allocation0 + $0x140] ss:$8 sm:$0xf0] %vm3_vm0, %v781_v5  }
   0xa   :  { %111 = vrot.lane.b32.xlu1 %v779_v3, %s884_s10  ;;  %93 = vrot.lane.b32.xlu0 %v777_v4, %s884_s10  ;;  %24 = vst.msk [vmem:[#allocation0 + $0xc0] ss:$8 sm:$0xf] %vm3_vm0, %v779_v3  }
   0xb   :  { %129 = vrot.lane.b32.xlu2 %v781_v5, %s884_s10  ;;  %26 = vst.msk [vmem:[#allocation0 + $0xc0] ss:$8 sm:$0xf0] %vm3_vm0, %v779_v3  }
   0xc   :  { %10 = vst.msk [vmem:[#allocation0 + $0x40] ss:$8 sm:$0xf] %vm3_vm0, %v777_v4  }
   0xd   :  { %12 = vst.msk [vmem:[#allocation0 + $0x40] ss:$8 sm:$0xf0] %vm3_vm0, %v777_v4  }
   0xe   :  { %59 = vst.msk [vmem:[#allocation0 + $0x200] ss:$8 sm:$0xf] %vm3_vm0, %v784_v8  }
   0xf   :  { %61 = vst.msk [vmem:[#allocation0 + $0x200] ss:$8 sm:$0xf0] %vm3_vm0, %v784_v8  }
  0x10   :  { %52 = vst.msk [vmem:[#allocation0 + $0x1c0] ss:$8 sm:$0xf] %vm3_vm0, %v783_v6  }
  0x11   :  { %54 = vst.msk [vmem:[#allocation0 + $0x1c0] ss:$8 sm:$0xf0] %vm3_vm0, %v783_v6  }
  0x12   :  { %147 = vrot.lane.b32.xlu1 %v783_v6, %s884_s10  ;;  %138 = vrot.lane.b32.xlu0 %v782_v7, %s884_s10  ;;  %45 = vst.msk [vmem:[#allocation0 + $0x180] ss:$8 sm:$0xf] %vm3_vm0, %v782_v7  }
  0x13   :  { %156 = vrot.lane.b32.xlu2 %v784_v8, %s884_s10  ;;  %47 = vst.msk [vmem:[#allocation0 + $0x180] ss:$8 sm:$0xf0] %vm3_vm0, %v782_v7  }
  0x14   :  { %80 = vst.msk [vmem:[#allocation0 + $0x2c0] ss:$8 sm:$0xf] %vm3_vm0, %v787_v11  }
  0x15   :  { %82 = vst.msk [vmem:[#allocation0 + $0x2c0] ss:$8 sm:$0xf0] %vm3_vm0, %v787_v11  }
  0x16   :  { %73 = vst.msk [vmem:[#allocation0 + $0x280] ss:$8 sm:$0xf] %vm3_vm0, %v786_v9  }
  0x17   :  { %75 = vst.msk [vmem:[#allocation0 + $0x280] ss:$8 sm:$0xf0] %vm3_vm0, %v786_v9  }
  0x18   :  { %66 = vst.msk [vmem:[#allocation0 + $0x240] ss:$8 sm:$0xf] %vm3_vm0, %v785_v10  }
  0x19   :  { %68 = vst.msk [vmem:[#allocation0 + $0x240] ss:$8 sm:$0xf0] %vm3_vm0, %v785_v10  }
  0x1a   :  { %174 = vrot.lane.b32.xlu1 %v786_v9, %s884_s10  ;;  %165 = vrot.lane.b32.xlu0 %v785_v10, %s884_s10 }
  0x1b   :  { %183 = vrot.lane.b32.xlu2 %v787_v11, %s884_s10 }
  0x5d   :  { %v121_v12 = vpop.permute.xlu2 %120  }
  0x5e   :  { %124 = vst.msk [vmem:[#allocation0 + $0x101] ss:$8 sm:$0xf] %vm3_vm0, %v121_v12  }
  0x5f   :  { %126 = vst.msk [vmem:[#allocation0 + $0x101] ss:$8 sm:$0xf0] %vm3_vm0, %v121_v12  }
  0x65   :  { %v383_v13 = vld [vmem:[#allocation0 + $0x100] sm:$0x3]  ;;  %v389_v14 = vld [vmem:[#allocation0 + $0x108] sm:$0x3]  ;;  %v395_v15 = vld [vmem:[#allocation0 + $0x110] sm:$0x3]  ;;  %v130_v21 = vpop.permute.xlu2 %129  }
  0x66   :  { %819 = vst [vmem:[%s1276_s1 + $0x40] sm:$0x3] %v383_v13  ;;  %v401_v16 = vld [vmem:[#allocation0 + $0x118] sm:$0x3]  ;;  %v407_v17 = vld [vmem:[#allocation0 + $0x120] sm:$0x3] }
  0x67   :  { %820 = vst [vmem:[%s1276_s1 + $0x42] sm:$0x3] %v389_v14  ;;  %v413_v18 = vld [vmem:[#allocation0 + $0x128] sm:$0x3]  ;;  %v419_v19 = vld [vmem:[#allocation0 + $0x130] sm:$0x3] }
  0x68   :  { %821 = vst [vmem:[%s1276_s1 + $0x44] sm:$0x3] %v395_v15  ;;  %v425_v20 = vld [vmem:[#allocation0 + $0x138] sm:$0x3] }
  0x69   :  { %822 = vst [vmem:[%s1276_s1 + $0x46] sm:$0x3] %v401_v16 }
  0x6a   :  { %823 = vst [vmem:[%s1276_s1 + $0x48] sm:$0x3] %v407_v17 }
  0x6b   :  { %824 = vst [vmem:[%s1276_s1 + $0x4a] sm:$0x3] %v413_v18 }
  0x6c   :  { %825 = vst [vmem:[%s1276_s1 + $0x4c] sm:$0x3] %v419_v19 }
  0x6d   :  { %826 = vst [vmem:[%s1276_s1 + $0x4e] sm:$0x3] %v425_v20  ;;  %v157_v44 = vpop.permute.xlu2 %156  }
  0x6e   :  { %133 = vst.msk [vmem:[#allocation0 + $0x141] ss:$8 sm:$0xf] %vm3_vm0, %v130_v21  }
  0x6f   :  { %135 = vst.msk [vmem:[#allocation0 + $0x141] ss:$8 sm:$0xf0] %vm3_vm0, %v130_v21  }
  0x70   :  { %160 = vst.msk [vmem:[#allocation0 + $0x201] ss:$8 sm:$0xf] %vm3_vm0, %v157_v44  }
  0x71   :  { %162 = vst.msk [vmem:[#allocation0 + $0x201] ss:$8 sm:$0xf0] %vm3_vm0, %v157_v44  }
  0x74   :  { %v103_v22 = vpop.permute.xlu1 %102   ;;  %v85_v23 = vpop.permute.xlu0 %84  }
  0x75   :  { %106 = vst.msk [vmem:[#allocation0 + $0x81] ss:$8 sm:$0xf] %vm3_vm0, %v103_v22   ;;  %v431_v24 = vld [vmem:[#allocation0 + $0x140] sm:$0x3]  ;;  %v184_v4 = vpop.permute.xlu2 %183  }
  0x76   :  { %108 = vst.msk [vmem:[#allocation0 + $0x81] ss:$8 sm:$0xf0] %vm3_vm0, %v103_v22   ;;  %v437_v25 = vld [vmem:[#allocation0 + $0x148] sm:$0x3] }
  0x77   :  { %88 = vst.msk [vmem:[#allocation0 + $0x1] ss:$8 sm:$0xf] %vm3_vm0, %v85_v23   ;;  %v443_v26 = vld [vmem:[#allocation0 + $0x150] sm:$0x3] }
  0x78   :  { %90 = vst.msk [vmem:[#allocation0 + $0x1] ss:$8 sm:$0xf0] %vm3_vm0, %v85_v23   ;;  %v449_v47 = vld [vmem:[#allocation0 + $0x158] sm:$0x3] }
  0x79   :  { %827 = vst [vmem:[%s1276_s1 + $0x50] sm:$0x3] %v431_v24  ;;  %v455_v48 = vld [vmem:[#allocation0 + $0x160] sm:$0x3]  ;;  %v461_v49 = vld [vmem:[#allocation0 + $0x168] sm:$0x3] }
  0x7a   :  { %828 = vst [vmem:[%s1276_s1 + $0x52] sm:$0x3] %v437_v25  ;;  %v467_v50 = vld [vmem:[#allocation0 + $0x170] sm:$0x3]  ;;  %v473_v51 = vld [vmem:[#allocation0 + $0x178] sm:$0x3] }
  0x7b   :  { %829 = vst [vmem:[%s1276_s1 + $0x54] sm:$0x3] %v443_v26  ;;  %v575_v6 = vld [vmem:[#allocation0 + $0x200] sm:$0x3]  ;;  %v581_v7 = vld [vmem:[#allocation0 + $0x208] sm:$0x3] }
  0x7c   :  { %v287_v27 = vld [vmem:[#allocation0 + $0x80] sm:$0x3]  ;;  %v293_v28 = vld [vmem:[#allocation0 + $0x88] sm:$0x3]  ;;  %v299_v29 = vld [vmem:[#allocation0 + $0x90] sm:$0x3]  ;;  %v112_v30 = vpop.permute.xlu1 %111   ;;  %v94_v31 = vpop.permute.xlu0 %93  }
  0x7d   :  { %803 = vst [vmem:[%s1276_s1 + $0x20] sm:$0x3] %v287_v27  ;;  %v305_v32 = vld [vmem:[#allocation0 + $0x98] sm:$0x3]  ;;  %v311_v33 = vld [vmem:[#allocation0 + $0xa0] sm:$0x3] }
  0x7e   :  { %804 = vst [vmem:[%s1276_s1 + $0x22] sm:$0x3] %v293_v28  ;;  %v317_v34 = vld [vmem:[#allocation0 + $0xa8] sm:$0x3]  ;;  %v323_v35 = vld [vmem:[#allocation0 + $0xb0] sm:$0x3] }
  0x7f   :  { %805 = vst [vmem:[%s1276_s1 + $0x24] sm:$0x3] %v299_v29  ;;  %v329_v36 = vld [vmem:[#allocation0 + $0xb8] sm:$0x3]  ;;  %v192_v37 = vld [vmem:[#allocation0] sm:$0x3] }
  0x80   :  { %806 = vst [vmem:[%s1276_s1 + $0x26] sm:$0x3] %v305_v32  ;;  %v197_v38 = vld [vmem:[#allocation0 + $0x8] sm:$0x3]  ;;  %v203_v39 = vld [vmem:[#allocation0 + $0x10] sm:$0x3] }
  0x81   :  { %807 = vst [vmem:[%s1276_s1 + $0x28] sm:$0x3] %v311_v33  ;;  %v209_v40 = vld [vmem:[#allocation0 + $0x18] sm:$0x3]  ;;  %v215_v41 = vld [vmem:[#allocation0 + $0x20] sm:$0x3] }
  0x82   :  { %808 = vst [vmem:[%s1276_s1 + $0x2a] sm:$0x3] %v317_v34  ;;  %v221_v42 = vld [vmem:[#allocation0 + $0x28] sm:$0x3]  ;;  %v227_v43 = vld [vmem:[#allocation0 + $0x30] sm:$0x3] }
  0x83   :  { %809 = vst [vmem:[%s1276_s1 + $0x2c] sm:$0x3] %v323_v35  ;;  %v233_v46 = vld [vmem:[#allocation0 + $0x38] sm:$0x3]  ;;  %v587_v8 = vld [vmem:[#allocation0 + $0x210] sm:$0x3] }
  0x84   :  { %810 = vst [vmem:[%s1276_s1 + $0x2e] sm:$0x3] %v329_v36  ;;  %v1032_v45 = vpop.permute.xlu1 %147   ;;  %v1064_v52 = vpop.permute.xlu0 %138   ;;  %v593_v9 = vld [vmem:[#allocation0 + $0x218] sm:$0x3]  ;;  %v599_v10 = vld [vmem:[#allocation0 + $0x220] sm:$0x3] }
  0x85   :  { %195 = vst [vmem:[%s1276_s1] sm:$0x3] %v192_v37  ;;  %v605_v11 = vld [vmem:[#allocation0 + $0x228] sm:$0x3]  ;;  %v611_v12 = vld [vmem:[#allocation0 + $0x230] sm:$0x3] }
  0x86   :  { %788 = vst [vmem:[%s1276_s1 + $0x2] sm:$0x3] %v197_v38  ;;  %v617_v14 = vld [vmem:[#allocation0 + $0x238] sm:$0x3] }
  0x87   :  { %789 = vst [vmem:[%s1276_s1 + $0x4] sm:$0x3] %v203_v39 }
  0x88   :  { %790 = vst [vmem:[%s1276_s1 + $0x6] sm:$0x3] %v209_v40 }
  0x89   :  { %791 = vst [vmem:[%s1276_s1 + $0x8] sm:$0x3] %v215_v41 }
  0x8a   :  { %792 = vst [vmem:[%s1276_s1 + $0xa] sm:$0x3] %v221_v42 }
  0x8b   :  { %793 = vst [vmem:[%s1276_s1 + $0xc] sm:$0x3] %v227_v43 }
  0x8c   :  { %794 = vst [vmem:[%s1276_s1 + $0xe] sm:$0x3] %v233_v46  ;;  %v175_v13 = vpop.permute.xlu1 %174   ;;  %v166_v19 = vpop.permute.xlu0 %165  }
  0x8d   :  { %830 = vst [vmem:[%s1276_s1 + $0x56] sm:$0x3] %v449_v47 }
  0x8e   :  { %831 = vst [vmem:[%s1276_s1 + $0x58] sm:$0x3] %v455_v48 }
  0x8f   :  { %832 = vst [vmem:[%s1276_s1 + $0x5a] sm:$0x3] %v461_v49 }
  0x90   :  { %833 = vst [vmem:[%s1276_s1 + $0x5c] sm:$0x3] %v467_v50 }
  0x91   :  { %834 = vst [vmem:[%s1276_s1 + $0x5e] sm:$0x3] %v473_v51 }
  0x92   :  { %115 = vst.msk [vmem:[#allocation0 + $0xc1] ss:$8 sm:$0xf] %vm3_vm0, %v112_v30  }
  0x93   :  { %117 = vst.msk [vmem:[#allocation0 + $0xc1] ss:$8 sm:$0xf0] %vm3_vm0, %v112_v30  }
  0x94   :  { %97 = vst.msk [vmem:[#allocation0 + $0x41] ss:$8 sm:$0xf] %vm3_vm0, %v94_v31  }
  0x95   :  { %99 = vst.msk [vmem:[#allocation0 + $0x41] ss:$8 sm:$0xf0] %vm3_vm0, %v94_v31  }
  0x96   :  { %151 = vst.msk [vmem:[#allocation0 + $0x1c1] ss:$8 sm:$0xf] %vm3_vm0, %v1032_v45  }
  0x97   :  { %851 = vst [vmem:[%s1276_s1 + $0x80] sm:$0x3] %v575_v6 }
  0x98   :  { %852 = vst [vmem:[%s1276_s1 + $0x82] sm:$0x3] %v581_v7 }
  0x99   :  { %v335_v53 = vld [vmem:[#allocation0 + $0xc0] sm:$0x3]  ;;  %v341_v54 = vld [vmem:[#allocation0 + $0xc8] sm:$0x3]  ;;  %v347_v55 = vld [vmem:[#allocation0 + $0xd0] sm:$0x3] }
  0x9a   :  { %811 = vst [vmem:[%s1276_s1 + $0x30] sm:$0x3] %v335_v53  ;;  %v353_v56 = vld [vmem:[#allocation0 + $0xd8] sm:$0x3]  ;;  %v359_v57 = vld [vmem:[#allocation0 + $0xe0] sm:$0x3] }
  0x9b   :  { %812 = vst [vmem:[%s1276_s1 + $0x32] sm:$0x3] %v341_v54  ;;  %v365_v58 = vld [vmem:[#allocation0 + $0xe8] sm:$0x3]  ;;  %v371_v59 = vld [vmem:[#allocation0 + $0xf0] sm:$0x3] }
  0x9c   :  { %813 = vst [vmem:[%s1276_s1 + $0x34] sm:$0x3] %v347_v55  ;;  %v377_v60 = vld [vmem:[#allocation0 + $0xf8] sm:$0x3]  ;;  %v239_v61 = vld [vmem:[#allocation0 + $0x40] sm:$0x3] }
  0x9d   :  { %814 = vst [vmem:[%s1276_s1 + $0x36] sm:$0x3] %v353_v56  ;;  %v245_v62 = vld [vmem:[#allocation0 + $0x48] sm:$0x3]  ;;  %v251_v63 = vld [vmem:[#allocation0 + $0x50] sm:$0x3] }
  0x9e   :  { %815 = vst [vmem:[%s1276_s1 + $0x38] sm:$0x3] %v359_v57  ;;  %v257_v0 = vld [vmem:[#allocation0 + $0x58] sm:$0x3]  ;;  %v263_v1 = vld [vmem:[#allocation0 + $0x60] sm:$0x3] }
  0x9f   :  { %816 = vst [vmem:[%s1276_s1 + $0x3a] sm:$0x3] %v365_v58  ;;  %v269_v2 = vld [vmem:[#allocation0 + $0x68] sm:$0x3]  ;;  %v275_v3 = vld [vmem:[#allocation0 + $0x70] sm:$0x3] }
  0xa0   :  { %817 = vst [vmem:[%s1276_s1 + $0x3c] sm:$0x3] %v371_v59  ;;  %v281_v5 = vld [vmem:[#allocation0 + $0x78] sm:$0x3]  ;;  %v527_v15 = vld [vmem:[#allocation0 + $0x1c0] sm:$0x3] }
  0xa1   :  { %818 = vst [vmem:[%s1276_s1 + $0x3e] sm:$0x3] %v377_v60  ;;  %v533_v16 = vld [vmem:[#allocation0 + $0x1c8] sm:$0x3]  ;;  %v539_v17 = vld [vmem:[#allocation0 + $0x1d0] sm:$0x3] }
  0xa2   :  { %795 = vst [vmem:[%s1276_s1 + $0x10] sm:$0x3] %v239_v61  ;;  %v545_v18 = vld [vmem:[#allocation0 + $0x1d8] sm:$0x3] }
  0xa3   :  { %796 = vst [vmem:[%s1276_s1 + $0x12] sm:$0x3] %v245_v62 }
  0xa4   :  { %797 = vst [vmem:[%s1276_s1 + $0x14] sm:$0x3] %v251_v63 }
  0xa5   :  { %798 = vst [vmem:[%s1276_s1 + $0x16] sm:$0x3] %v257_v0 }
  0xa6   :  { %799 = vst [vmem:[%s1276_s1 + $0x18] sm:$0x3] %v263_v1 }
  0xa7   :  { %800 = vst [vmem:[%s1276_s1 + $0x1a] sm:$0x3] %v269_v2 }
  0xa8   :  { %801 = vst [vmem:[%s1276_s1 + $0x1c] sm:$0x3] %v275_v3 }
  0xa9   :  { %802 = vst [vmem:[%s1276_s1 + $0x1e] sm:$0x3] %v281_v5 }
  0xaa   :  { %853 = vst [vmem:[%s1276_s1 + $0x84] sm:$0x3] %v587_v8 }
  0xab   :  { %854 = vst [vmem:[%s1276_s1 + $0x86] sm:$0x3] %v593_v9 }
  0xac   :  { %855 = vst [vmem:[%s1276_s1 + $0x88] sm:$0x3] %v599_v10 }
  0xad   :  { %856 = vst [vmem:[%s1276_s1 + $0x8a] sm:$0x3] %v605_v11 }
  0xae   :  { %857 = vst [vmem:[%s1276_s1 + $0x8c] sm:$0x3] %v611_v12 }
  0xaf   :  { %858 = vst [vmem:[%s1276_s1 + $0x8e] sm:$0x3] %v617_v14 }
  0xb0   :  { %153 = vst.msk [vmem:[#allocation0 + $0x1c1] ss:$8 sm:$0xf0] %vm3_vm0, %v1032_v45  }
  0xb1   :  { %843 = vst [vmem:[%s1276_s1 + $0x70] sm:$0x3] %v527_v15 }
  0xb2   :  { %844 = vst [vmem:[%s1276_s1 + $0x72] sm:$0x3] %v533_v16 }
  0xb3   :  { %845 = vst [vmem:[%s1276_s1 + $0x74] sm:$0x3] %v539_v17 }
  0xb4   :  { %846 = vst [vmem:[%s1276_s1 + $0x76] sm:$0x3] %v545_v18 }
  0xb5   :  { %142 = vst.msk [vmem:[#allocation0 + $0x181] ss:$8 sm:$0xf] %vm3_vm0, %v1064_v52  }
  0xb6   :  { %144 = vst.msk [vmem:[#allocation0 + $0x181] ss:$8 sm:$0xf0] %vm3_vm0, %v1064_v52  }
  0xb7   :  { %v551_v20 = vld [vmem:[#allocation0 + $0x1e0] sm:$0x3]  ;;  %v557_v21 = vld [vmem:[#allocation0 + $0x1e8] sm:$0x3]  ;;  %v563_v22 = vld [vmem:[#allocation0 + $0x1f0] sm:$0x3] }
  0xb8   :  { %847 = vst [vmem:[%s1276_s1 + $0x78] sm:$0x3] %v551_v20  ;;  %v569_v23 = vld [vmem:[#allocation0 + $0x1f8] sm:$0x3] }
  0xb9   :  { %848 = vst [vmem:[%s1276_s1 + $0x7a] sm:$0x3] %v557_v21 }
  0xba   :  { %849 = vst [vmem:[%s1276_s1 + $0x7c] sm:$0x3] %v563_v22 }
  0xbb   :  { %850 = vst [vmem:[%s1276_s1 + $0x7e] sm:$0x3] %v569_v23 }
  0xbc   :  { %v479_v24 = vld [vmem:[#allocation0 + $0x180] sm:$0x3]  ;;  %v485_v25 = vld [vmem:[#allocation0 + $0x188] sm:$0x3]  ;;  %v491_v26 = vld [vmem:[#allocation0 + $0x190] sm:$0x3] }
  0xbd   :  { %835 = vst [vmem:[%s1276_s1 + $0x60] sm:$0x3] %v479_v24  ;;  %v497_v27 = vld [vmem:[#allocation0 + $0x198] sm:$0x3]  ;;  %v503_v28 = vld [vmem:[#allocation0 + $0x1a0] sm:$0x3] }
  0xbe   :  { %836 = vst [vmem:[%s1276_s1 + $0x62] sm:$0x3] %v485_v25  ;;  %v509_v29 = vld [vmem:[#allocation0 + $0x1a8] sm:$0x3]  ;;  %v515_v30 = vld [vmem:[#allocation0 + $0x1b0] sm:$0x3] }
  0xbf   :  { %837 = vst [vmem:[%s1276_s1 + $0x64] sm:$0x3] %v491_v26  ;;  %v521_v31 = vld [vmem:[#allocation0 + $0x1b8] sm:$0x3] }
  0xc0   :  { %838 = vst [vmem:[%s1276_s1 + $0x66] sm:$0x3] %v497_v27 }
  0xc1   :  { %839 = vst [vmem:[%s1276_s1 + $0x68] sm:$0x3] %v503_v28 }
  0xc2   :  { %840 = vst [vmem:[%s1276_s1 + $0x6a] sm:$0x3] %v509_v29 }
  0xc3   :  { %841 = vst [vmem:[%s1276_s1 + $0x6c] sm:$0x3] %v515_v30 }
  0xc4   :  { %842 = vst [vmem:[%s1276_s1 + $0x6e] sm:$0x3] %v521_v31 }
  0xc5   :  { %187 = vst.msk [vmem:[#allocation0 + $0x2c1] ss:$8 sm:$0xf] %vm3_vm0, %v184_v4  }
  0xc6   :  { %189 = vst.msk [vmem:[#allocation0 + $0x2c1] ss:$8 sm:$0xf0] %vm3_vm0, %v184_v4  }
  0xc7   :  { %178 = vst.msk [vmem:[#allocation0 + $0x281] ss:$8 sm:$0xf] %vm3_vm0, %v175_v13  }
  0xc8   :  { %180 = vst.msk [vmem:[#allocation0 + $0x281] ss:$8 sm:$0xf0] %vm3_vm0, %v175_v13  }
  0xc9   :  { %169 = vst.msk [vmem:[#allocation0 + $0x241] ss:$8 sm:$0xf] %vm3_vm0, %v166_v19  }
  0xca   :  { %171 = vst.msk [vmem:[#allocation0 + $0x241] ss:$8 sm:$0xf0] %vm3_vm0, %v166_v19  }
  0xcc   :  { %v719_v32 = vld [vmem:[#allocation0 + $0x2c0] sm:$0x3]  ;;  %v725_v33 = vld [vmem:[#allocation0 + $0x2c8] sm:$0x3]  ;;  %v731_v34 = vld [vmem:[#allocation0 + $0x2d0] sm:$0x3] }
  0xcd   :  { %875 = vst [vmem:[%s1276_s1 + $0xb0] sm:$0x3] %v719_v32  ;;  %v737_v35 = vld [vmem:[#allocation0 + $0x2d8] sm:$0x3]  ;;  %v743_v36 = vld [vmem:[#allocation0 + $0x2e0] sm:$0x3] }
  0xce   :  { %876 = vst [vmem:[%s1276_s1 + $0xb2] sm:$0x3] %v725_v33  ;;  %v749_v37 = vld [vmem:[#allocation0 + $0x2e8] sm:$0x3]  ;;  %v755_v38 = vld [vmem:[#allocation0 + $0x2f0] sm:$0x3] }
  0xcf   :  { %877 = vst [vmem:[%s1276_s1 + $0xb4] sm:$0x3] %v731_v34  ;;  %v761_v39 = vld [vmem:[#allocation0 + $0x2f8] sm:$0x3]  ;;  %v671_v40 = vld [vmem:[#allocation0 + $0x280] sm:$0x3] }
  0xd0   :  { %878 = vst [vmem:[%s1276_s1 + $0xb6] sm:$0x3] %v737_v35  ;;  %v677_v41 = vld [vmem:[#allocation0 + $0x288] sm:$0x3]  ;;  %v683_v42 = vld [vmem:[#allocation0 + $0x290] sm:$0x3] }
  0xd1   :  { %879 = vst [vmem:[%s1276_s1 + $0xb8] sm:$0x3] %v743_v36  ;;  %v689_v43 = vld [vmem:[#allocation0 + $0x298] sm:$0x3]  ;;  %v695_v44 = vld [vmem:[#allocation0 + $0x2a0] sm:$0x3] }
  0xd2   :  { %880 = vst [vmem:[%s1276_s1 + $0xba] sm:$0x3] %v749_v37  ;;  %v701_v45 = vld [vmem:[#allocation0 + $0x2a8] sm:$0x3]  ;;  %v707_v46 = vld [vmem:[#allocation0 + $0x2b0] sm:$0x3] }
  0xd3   :  { %881 = vst [vmem:[%s1276_s1 + $0xbc] sm:$0x3] %v755_v38  ;;  %v713_v47 = vld [vmem:[#allocation0 + $0x2b8] sm:$0x3]  ;;  %v623_v48 = vld [vmem:[#allocation0 + $0x240] sm:$0x3] }
  0xd4   :  { %882 = vst [vmem:[%s1276_s1 + $0xbe] sm:$0x3] %v761_v39  ;;  %v629_v49 = vld [vmem:[#allocation0 + $0x248] sm:$0x3]  ;;  %v635_v50 = vld [vmem:[#allocation0 + $0x250] sm:$0x3] }
  0xd5   :  { %867 = vst [vmem:[%s1276_s1 + $0xa0] sm:$0x3] %v671_v40  ;;  %v641_v51 = vld [vmem:[#allocation0 + $0x258] sm:$0x3]  ;;  %v647_v52 = vld [vmem:[#allocation0 + $0x260] sm:$0x3] }
  0xd6   :  { %868 = vst [vmem:[%s1276_s1 + $0xa2] sm:$0x3] %v677_v41  ;;  %v653_v53 = vld [vmem:[#allocation0 + $0x268] sm:$0x3]  ;;  %v659_v54 = vld [vmem:[#allocation0 + $0x270] sm:$0x3] }
  0xd7   :  { %869 = vst [vmem:[%s1276_s1 + $0xa4] sm:$0x3] %v683_v42  ;;  %v665_v55 = vld [vmem:[#allocation0 + $0x278] sm:$0x3] }
  0xd8   :  { %870 = vst [vmem:[%s1276_s1 + $0xa6] sm:$0x3] %v689_v43 }
  0xd9   :  { %871 = vst [vmem:[%s1276_s1 + $0xa8] sm:$0x3] %v695_v44 }
  0xda   :  { %872 = vst [vmem:[%s1276_s1 + $0xaa] sm:$0x3] %v701_v45 }
  0xdb   :  { %873 = vst [vmem:[%s1276_s1 + $0xac] sm:$0x3] %v707_v46 }
  0xdc   :  { %874 = vst [vmem:[%s1276_s1 + $0xae] sm:$0x3] %v713_v47 }
  0xdd   :  { %859 = vst [vmem:[%s1276_s1 + $0x90] sm:$0x3] %v623_v48 }
  0xde   :  { %860 = vst [vmem:[%s1276_s1 + $0x92] sm:$0x3] %v629_v49 }
  0xdf   :  { %861 = vst [vmem:[%s1276_s1 + $0x94] sm:$0x3] %v635_v50 }
  0xe0   :  { %862 = vst [vmem:[%s1276_s1 + $0x96] sm:$0x3] %v641_v51 }
  0xe1   :  { %863 = vst [vmem:[%s1276_s1 + $0x98] sm:$0x3] %v647_v52 }
  0xe2   :  { %864 = vst [vmem:[%s1276_s1 + $0x9a] sm:$0x3] %v653_v53 }
  0xe3   :  { %865 = vst [vmem:[%s1276_s1 + $0x9c] sm:$0x3] %v659_v54 }
  0xe4   :  { %866 = vst [vmem:[%s1276_s1 + $0x9e] sm:$0x3] %v665_v55 }

// kernel: isolator_forward.1
= control target key start
LH: loop header
LB: loop body
LE: loop exit
PB: predicated region body
PF: predicated region fallthrough
CT: control target
= control target key end

     0   :  { %s10967_s13 = smov 0   ;;  %s10969_s14 = smov 0   ;;  %s16807_s0 = inlined_call_operand.vmem [shape: bf16[3,32,128], index: 0, kind: input, shape index: {}]   ;;  %s16808_s1 = inlined_call_operand.vmem [shape: bf16[128,128], index: 1, kind: input, shape index: {}]   ;;  %s16809_s2 = inlined_call_operand.vmem [shape: bf16[256,96], index: 2, kind: input, shape index: {}]   ;;  %s16810_s3 = inlined_call_operand.vmem [shape: f32[256,1], index: 3, kind: input, shape index: {}]   ;;  %s16811_s4 = inlined_call_operand.vmem [shape: bf16[512,768], index: 4, kind: input, shape index: {}]   ;;  %s16812_s5 = inlined_call_operand.vmem [shape: f32[512,1], index: 5, kind: input, shape index: {}]   ;;  %s16813_s6 = inlined_call_operand.vmem [shape: bf16[256,1536], index: 6, kind: input, shape index: {}]   ;;  %s16814_s7 = inlined_call_operand.vmem [shape: f32[256,1], index: 7, kind: input, shape index: {}]   ;;  %s16815_s8 = inlined_call_operand.vmem [shape: bf16[64,1536], index: 8, kind: input, shape index: {}]   ;;  %s16816_s9 = inlined_call_operand.vmem [shape: f32[64,1], index: 9, kind: input, shape index: {}]   ;;  %s16817_s10 = inlined_call_operand.vmem [shape: f32[2,3,32,128], index: 10, kind: output, shape index: {}]  }
   0x1   :  { %s10971_s15 = smov 0  }
   0x2 LB: > { %s10980_s16 = sadd.s32 4294967295, %s10906_s15   ;;  %s10982_s17 = sadd.s32 1, %s10906_s15   ;;  %s10906_s15 = sphi %s10971_s15, %s17367_s15   ;;  %s10902_s14 = sphi %s10969_s14, %s17366_s14   ;;  %s10898_s13 = sphi %s10967_s13, %s17365_s13  }
   0x3   : > { %s239_s18 = ssub.s32 %s10906_s15, %s10982_s17  ;;  %s242_s19 = sadd.s32 1, %s10902_s14 }
   0x4   : > { %p240_p0 = scmp.eq.s32.totalorder %s239_s18, 0  ;;  %p252_p1 = scmp.ne.s32.totalorder %s10902_s14, %s10898_s13 }
   0x5   : > { %p253_p2 = scmp.eq.s32.totalorder %s10980_s16, 2  ;;  %p8304_p3 = scmp.ge.s32.totalorder %s10906_s15, 1 }
   0x6   : > { %s10990_s20 = scalar_select %p240_p0, %s10902_s14, %s242_s19  }
   0x7   : > { %p10992_p4 = por %p253_p2, %p252_p1  ;;  %p312_p5 = scmp.lt.s32.totalorder %s10906_s15, 4 }
   0x9   : > { %p313_p6 = pnand %p8304_p3, %p312_p5 }
   0xb   : > { %316 = sbr.rel (%p313_p6) target bundleno = 3908 (0xf44), region = 60 }
  0x10   : > { %v10347_v0 = vld [vmem:[%s16808_s1 + $0x38] sm:$0xff]  ;;  %v10346_v1 = vld [vmem:[%s16808_s1 + $0x30] sm:$0xff]  ;;  %v10345_v2 = vld [vmem:[%s16808_s1 + $0x28] sm:$0xff]  ;;  %p349_p7 = scmp.lt.s32.totalorder %s10980_s16, 2  ;;  %s10908_s29 = smov 64   ;;  %v10909_v51 = vmov 0  }
  0x11   : > { %435 = vmatpush.bf16.msra.mxu0 %v10347_v0  ;;  %v10344_v3 = vld [vmem:[%s16808_s1 + $0x20] sm:$0xff]  ;;  %v10343_v4 = vld [vmem:[%s16808_s1 + $0x18] sm:$0xff]  ;;  %v10342_v5 = vld [vmem:[%s16808_s1 + $0x10] sm:$0xff]  ;;  %10835 = vset.pattern.permute.xlu1 %v10909_v51  ;;  %s10910_s30 = smov 1   ;;  %s10911_s19 = smov 127   ;;  %vm556_vm8 = vcmask 515072  }
  0x12   : > { %s350_s18 = scalar_select %p349_p7, %s10980_s16, 2  ;;  %v10341_v6 = vld [vmem:[%s16808_s1 + $0x8] sm:$0xff]  ;;  %v10340_v7 = vld [vmem:[%s16808_s1] sm:$0xff]  ;;  %10833 = vset.pattern.permute.xlu2 %v10909_v51  ;;  %10834 = vset.pattern.permute.xlu0 %v10909_v51  ;;  %vm544_vm9 = vcmask 7168   ;;  %vm869_vm11 = vcmask 785408  }
  0x13   : > { %vm11131_vm10 = vmneg %vm544_vm9  ;;  %v10348_v51 = vld [vmem:[%s16809_s2] sm:$0xff] }
  0x14   : > { %s10337_s23 = sshll.u32 %s350_s18, 4 }
  0x15   : > { %436 = vmatpush.bf16.msra.mxu0 %v10346_v1  ;;  %s353_s28 = scalar_lea.vmem %s16807_s0, %s10337_s23 }
  0x16   : > { %v10338_v8 = vld [vmem:[%s353_s28] sm:$0xff]  ;;  %v10339_v9 = vld [vmem:[%s353_s28 + $0x8] sm:$0xff]  ;;  %s346_s28 = sand.u32 1, %s10898_s13   ;;  %s10796_s13 = sshll.u32 (%p10992_p4), %s10980_s16, 5 }
  0x17   : > { %s8188_s15 = scalar_lea.vmem (%p10992_p4), %s16817_s10, %s10796_s13 }
  0x19   : > { %437 = vmatpush.bf16.msra.mxu0 %v10345_v2 }
  0x1d   : > { %438 = vmatpush.bf16.msra.mxu0 %v10344_v3 }
  0x21   : > { %439 = vmatpush.bf16.msra.mxu0 %v10343_v4  ;;  %v627_v4 = vld [vmem:[%s16810_s3 + $0xf0] sm:$0xff] }
  0x25   : > { %440 = vmatpush.bf16.msra.mxu0 %v10342_v5 }
  0x29   : > { %441 = vmatpush.bf16.msra.mxu0 %v10341_v6 }
  0x2d   : > { %442 = vmatpush.bf16.msra.mxu0 %v10340_v7 }
  0x30   : > { %443 = vmatmul.bf16.vlgmr.msra.gmra.mxu0 %v10338_v8 }
  0x40   : > { %448 = vmatmul.bf16.gmra.mxu0 %v10339_v9 }
  0xad   : > { %v11025_v10 = vpop.f32.mrf.mxu0 }
  0xae   : > { %16906 = vst [vmem:[#allocation3_spill] sm:$0xff] %v11025_v10  ;;  %v454_v11 = vmul.f32 %v11025_v10, %v11025_v10 }
  0xb0   : > { %462 = vrot.lane.b32.xlu1 %v454_v11, %s10908_s29 }
  0xb5   : > { %v11030_v12 = vpop.f32.mrf.mxu0 }
  0xb6   : > { %16907 = vst [vmem:[#allocation4_spill] sm:$0xff] %v11030_v12  ;;  %v455_v13 = vmul.f32 %v11030_v12, %v11030_v12  ;;  %v8532_v12 = vld [vmem:[%s16811_s4 + $0xd8] sm:$0xf0] }
  0xb8   : > { %464 = vrot.lane.b32.xlu1 %v455_v13, %s10908_s29 }
  0xbd   : > { %v11035_v14 = vpop.f32.mrf.mxu0 }
  0xbe   : > { %16908 = vst [vmem:[#allocation5_spill] sm:$0xff] %v11035_v14  ;;  %v456_v15 = vmul.f32 %v11035_v14, %v11035_v14 }
  0xc0   : > { %466 = vrot.lane.b32.xlu0 %v456_v15, %s10908_s29 }
  0xc5   : > { %v11040_v16 = vpop.f32.mrf.mxu0 }
  0xc6   : > { %16909 = vst [vmem:[#allocation6_spill] sm:$0xff] %v11040_v16  ;;  %v457_v17 = vmul.f32 %v11040_v16, %v11040_v16 }
  0xc8   : > { %468 = vrot.lane.b32.xlu0 %v457_v17, %s10908_s29 }
 0x122   : > { %v463_v18 = vpop.permute.xlu1 %462 }
 0x123   : > { %v474_v19 = vadd.f32 %v463_v18, %v454_v11  ;;  %v609_v18 = vld [vmem:[%s16810_s3 + $0x60] sm:$0xff] }
 0x125   : > { %10836 = vrsqrt.f32 %v474_v19  ;;  %vm485_vm0 = vcmp.eq.f32.partialorder %v474_v19, inf  ;;  %v488_v40 = vand.u32 2147483648, %v474_v19  ;;  %vm487_vm1 = vcmp.eq.f32.partialorder %v474_v19, 0.0 }
 0x12a   : > { %v465_v20 = vpop.permute.xlu1 %464 }
 0x12b   : > { %v10837_v21 = vpop.eup %10836  ;;  %v475_v22 = vadd.f32 %v465_v20, %v455_v13  ;;  %v611_v20 = vld [vmem:[%s16810_s3 + $0x70] sm:$0xff] }
 0x12c   : > { %v479_v23 = vmul.f32 %v10837_v21, %v474_v19 }
 0x12d   : > { %10838 = vrsqrt.f32 %v475_v22  ;;  %vm497_vm2 = vcmp.eq.f32.partialorder %v475_v22, inf  ;;  %vm499_vm3 = vcmp.eq.f32.partialorder %v475_v22, 0.0  ;;  %v500_v46 = vand.u32 2147483648, %v475_v22 }
 0x12e   : > { %v480_v24 = vmul.f32 %v10837_v21, %v479_v23  ;;  %v612_v23 = vld [vmem:[%s16810_s3 + $0x78] sm:$0xff] }
 0x130   : > { %v481_v25 = vmul.f32 0.5, %v480_v24  ;;  %v628_v24 = vld [vmem:[%s16810_s3 + $0xf8] sm:$0xff] }
 0x132   : > { %v467_v26 = vpop.permute.xlu0 %466  ;;  %v482_v27 = vsub.f32 1.5, %v481_v25  ;;  %v603_v25 = vld [vmem:[%s16810_s3 + $0x30] sm:$0xff] }
 0x133   : > { %v10839_v28 = vpop.eup %10838  ;;  %v476_v29 = vadd.f32 %v467_v26, %v456_v15  ;;  %v625_v26 = vld [vmem:[%s16810_s3 + $0xe0] sm:$0xff] }
 0x134   : > { %v483_v30 = vmul.f32 %v10837_v21, %v482_v27  ;;  %v491_v31 = vmul.f32 %v10839_v28, %v475_v22  ;;  %v623_v21 = vld [vmem:[%s16810_s3 + $0xd0] sm:$0xff]  ;;  %v610_v27 = vld [vmem:[%s16810_s3 + $0x68] sm:$0xff] }
 0x135   : > { %10840 = vrsqrt.f32 %v476_v29  ;;  %vm509_vm4 = vcmp.eq.f32.partialorder %v476_v29, inf  ;;  %v512_v1 = vand.u32 2147483648, %v476_v29  ;;  %vm511_vm5 = vcmp.eq.f32.partialorder %v476_v29, 0.0 }
 0x136   : > { %v484_v32 = vmul.f32 %v483_v30, %v474_v19  ;;  %v492_v33 = vmul.f32 %v10839_v28, %v491_v31  ;;  %v607_v30 = vld [vmem:[%s16810_s3 + $0x50] sm:$0xff]  ;;  %v617_v31 = vld [vmem:[%s16810_s3 + $0xa0] sm:$0xff] }
 0x138   : > { %v493_v34 = vmul.f32 0.5, %v492_v33  ;;  %v486_v36 = vsel %vm485_vm0, %v474_v19, %v484_v32  ;;  %v626_v19 = vld [vmem:[%s16810_s3 + $0xe8] sm:$0xff]  ;;  %v605_v32 = vld [vmem:[%s16810_s3 + $0x40] sm:$0xff]  ;;  %v624_v33 = vld [vmem:[%s16810_s3 + $0xd8] sm:$0xff] }
 0x139   : > { %v489_v43 = vsel %vm487_vm1, %v488_v40, %v486_v36  ;;  %v622_v36 = vld [vmem:[%s16810_s3 + $0xc8] sm:$0xff]  ;;  %v597_v40 = vld [vmem:[%s16810_s3] sm:$0xff] }
 0x13a   : > { %v469_v35 = vpop.permute.xlu0 %468  ;;  %v494_v37 = vsub.f32 1.5, %v493_v34  ;;  %v526_v48 = vpack.c.bf16 %v489_v43, %v489_v43  ;;  %v604_v43 = vld [vmem:[%s16810_s3 + $0x38] sm:$0xff] }
 0x13b   : > { %v10841_v38 = vpop.eup %10840  ;;  %v477_v39 = vadd.f32 %v469_v35, %v457_v17  ;;  %v600_v35 = vld [vmem:[%s16810_s3 + $0x18] sm:$0xff] }
 0x13c   : > { %v495_v41 = vmul.f32 %v10839_v28, %v494_v37  ;;  %v503_v42 = vmul.f32 %v10841_v38, %v476_v29  ;;  %v534_v55 = vunpack.c.l.b16 %v526_v48  ;;  %v620_v28 = vld [vmem:[%s16810_s3 + $0xb8] sm:$0xff]  ;;  %v599_v48 = vld [vmem:[%s16810_s3 + $0x10] sm:$0xff] }
 0x13d   : > { %10842 = vrsqrt.f32 %v477_v39  ;;  %vm521_vm6 = vcmp.eq.f32.partialorder %v477_v39, inf  ;;  %v524_v6 = vand.u32 2147483648, %v477_v39  ;;  %vm523_vm7 = vcmp.eq.f32.partialorder %v477_v39, 0.0 }
 0x13e   : > { %v496_v44 = vmul.f32 %v495_v41, %v475_v22  ;;  %v504_v45 = vmul.f32 %v10841_v38, %v503_v42  ;;  %v619_v41 = vld [vmem:[%s16810_s3 + $0xb0] sm:$0xff] }
 0x140   : > { %v498_v47 = vsel %vm497_vm2, %v475_v22, %v496_v44  ;;  %v505_v49 = vmul.f32 0.5, %v504_v45  ;;  %v606_v22 = vld [vmem:[%s16810_s3 + $0x48] sm:$0xff]  ;;  %v601_v45 = vld [vmem:[%s16810_s3 + $0x20] sm:$0xff] }
 0x141   : > { %v501_v50 = vsel %vm499_vm3, %v500_v46, %v498_v47  ;;  %v602_v44 = vld [vmem:[%s16810_s3 + $0x28] sm:$0xff]  ;;  %v16910_v46 = vmov 0 }
 0x142   : > { %v527_v52 = vpack.c.bf16 %v501_v50, %v501_v50  ;;  %v506_v53 = vsub.f32 1.5, %v505_v49  ;;  %v16911_v46 = vsel %vm11131_vm10, 4294967295, %v16910_v46  ;;  %v618_v49 = vld [vmem:[%s16810_s3 + $0xa8] sm:$0xff] }
 0x143   : > { %v10843_v54 = vpop.eup %10842  ;;  %16912 = vst [vmem:[#allocation7_spill] sm:$0xff] %v16911_v46 }
 0x144   : > { %v535_v56 = vunpack.c.l.b16 %v527_v52  ;;  %v507_v57 = vmul.f32 %v10841_v38, %v506_v53  ;;  %v515_v58 = vmul.f32 %v10843_v54, %v477_v39  ;;  %v621_v38 = vld [vmem:[%s16810_s3 + $0xc0] sm:$0xff]  ;;  %v615_v52 = vld [vmem:[%s16810_s3 + $0x90] sm:$0xff]  ;;  %v598_v53 = vld [vmem:[%s16810_s3 + $0x8] sm:$0xff] }
 0x146   : > { %v11045_v59 = vpack.c.b16 %v535_v56, %v534_v55  ;;  %v508_v60 = vmul.f32 %v507_v57, %v476_v29  ;;  %v516_v61 = vmul.f32 %v10843_v54, %v515_v58  ;;  %v10350_v55 = vld [vmem:[%s16809_s2 + $0x10] sm:$0xff] }
 0x148   : > { %540 = vrot.lane.b32.xlu1 %v11045_v59, %s10910_s30  ;;  %v517_v62 = vmul.f32 0.5, %v516_v61  ;;  %v510_v63 = vsel %vm509_vm4, %v476_v29, %v508_v60  ;;  %v608_v29 = vld [vmem:[%s16810_s3 + $0x58] sm:$0xff] }
 0x149   : > { %v513_v3 = vsel %vm511_vm5, %v512_v1, %v510_v63  ;;  %v10352_v63 = vld [vmem:[%s16809_s2 + $0x20] sm:$0xff] }
 0x14a   : > { %v518_v0 = vsub.f32 1.5, %v517_v62  ;;  %v528_v8 = vpack.c.bf16 %v513_v3, %v513_v3 }
 0x14c   : > { %v519_v2 = vmul.f32 %v10843_v54, %v518_v0  ;;  %v536_v13 = vunpack.c.l.b16 %v528_v8  ;;  %v10349_v54 = vld [vmem:[%s16809_s2 + $0x8] sm:$0xff] }
 0x14e   : > { %v520_v5 = vmul.f32 %v519_v2, %v477_v39 }
 0x150   : > { %v522_v7 = vsel %vm521_vm6, %v477_v39, %v520_v5  ;;  %781 = vperm.xlu1 %10835, %v627_v4   ;;  %v10353_v5 = vld [vmem:[%s16809_s2 + $0x28] sm:$0xff] }
 0x151   : > { %v525_v9 = vsel %vm523_vm7, %v524_v6, %v522_v7 }
 0x152   : > { %v529_v11 = vpack.c.bf16 %v525_v9, %v525_v9 }
 0x154   : > { %v537_v15 = vunpack.c.l.b16 %v529_v11 }
 0x156   : > { %v539_v17 = vpack.c.b16 %v537_v15, %v536_v13  ;;  %v10354_v13 = vld [vmem:[%s16809_s2 + $0x30] sm:$0xff] }
 0x158   : > { %542 = vrot.lane.b32.xlu0 %v539_v17, %s10910_s30  ;;  %554 = vrot.lane.b32.xlu2 %v539_v17, %s10911_s19 }
 0x159   : > { %691 = vperm.xlu1 %10835, %v609_v18  }
 0x160   : > { %552 = vrot.lane.b32.xlu2 %v11045_v59, %s10911_s19  ;;  %706 = vperm.xlu0 %10834, %v612_v23  }
 0x161   : > { %776 = vperm.xlu1 %10835, %v626_v19  }
 0x168   : > { %701 = vperm.xlu2 %10833, %v611_v20   ;;  %771 = vperm.xlu0 %10834, %v625_v26  }
 0x169   : > { %761 = vperm.xlu1 %10835, %v623_v21   ;;  %v613_v21 = vld [vmem:[%s16810_s3 + $0x80] sm:$0xff] }
 0x170   : > { %786 = vperm.xlu2 %10833, %v628_v24   ;;  %686 = vperm.xlu0 %10834, %v608_v29   ;;  %v10356_v29 = vld [vmem:[%s16809_s2 + $0x40] sm:$0xff] }
 0x171   : > { %676 = vperm.xlu1 %10835, %v606_v22   ;;  %v10355_v22 = vld [vmem:[%s16809_s2 + $0x38] sm:$0xff] }
 0x178   : > { %696 = vperm.xlu2 %10833, %v610_v27   ;;  %671 = vperm.xlu0 %10834, %v605_v32  }
 0x179   : > { %661 = vperm.xlu1 %10835, %v603_v25   ;;  %v614_v25 = vld [vmem:[%s16810_s3 + $0x88] sm:$0xff] }
 0x180   : > { %681 = vperm.xlu2 %10833, %v607_v30   ;;  %756 = vperm.xlu0 %10834, %v622_v36  }
 0x181   : > { %746 = vperm.xlu1 %10835, %v620_v28  }
 0x188   : > { %766 = vperm.xlu2 %10833, %v624_v33   ;;  %741 = vperm.xlu0 %10834, %v619_v41  }
 0x189   : > { %731 = vperm.xlu1 %10835, %v617_v31  }
 0x190   : > { %751 = vperm.xlu2 %10833, %v621_v38   ;;  %656 = vperm.xlu0 %10834, %v602_v44  }
 0x191   : > { %646 = vperm.xlu1 %10835, %v600_v35  }
 0x198   : > { %666 = vperm.xlu2 %10833, %v604_v43   ;;  %641 = vperm.xlu0 %10834, %v599_v48   ;;  %v10357_v43 = vld [vmem:[%s16809_s2 + $0x48] sm:$0xff] }
 0x199   : > { %631 = vperm.xlu1 %10835, %v597_v40  }
 0x1a0   : > { %651 = vperm.xlu2 %10833, %v601_v45  }
 0x1a1   : > { %716 = vperm.xlu1 %10835, %v614_v25  }
 0x1a8   : > { %736 = vperm.xlu2 %10833, %v618_v49  }
 0x1b0   : > { %721 = vperm.xlu2 %10833, %v615_v52  }
 0x1b2   : > { %v555_v34 = vpop.permute.xlu2 %554 }
 0x1b3   : > { %v561_v37 = vsel %vm556_vm8, %v555_v34, 0 }
 0x1b4   : > { %920 = vmatpush.bf16.msra.mxu1 %v561_v37 }
 0x1b8   : > { %636 = vperm.xlu2 %10833, %v598_v53  }
 0x1ba   : > { %v553_v39 = vpop.permute.xlu2 %552  ;;  %v541_v50 = vpop.permute.xlu1 %540 }
 0x1bb   : > { %v558_v42 = vsel %vm556_vm8, %v553_v39, 0 }
 0x1bc   : > { %921 = vmatpush.bf16.msra.mxu1 %v558_v42 }
 0x1c0   : > { %922 = vmatpush.bf16.msra.mxu1 %v539_v17  ;;  %v616_v17 = vld [vmem:[%s16810_s3 + $0x98] sm:$0xff] }
 0x1c1   : > { %726 = vperm.xlu0 %10834, %v616_v17  }
 0x1c2   : > { %v11162_v56 = vpop.permute.xlu2 %701  ;;  %v11165_v57 = vpop.permute.xlu1 %781 }
 0x1c4   : > { %923 = vmatpush.bf16.msra.mxu1 %v11045_v59  ;;  %v10351_v59 = vld [vmem:[%s16809_s2 + $0x18] sm:$0xff] }
 0x1c9   : > { %711 = vperm.xlu0 %10834, %v613_v21  }
 0x1ca   : > { %v543_v47 = vpop.permute.xlu0 %542  ;;  %v11167_v58 = vpop.permute.xlu2 %786 }
 0x1cb   : > { %8413 = vmatpush.bf16.msk.msra.mxu1 %vm11131_vm10, %v543_v47  ;;  %v11172_v60 = vpop.permute.xlu1 %691 }
 0x1cf   : > { %8415 = vmatpush.bf16.msk.msra.mxu1 %vm11131_vm10, %v541_v50 }
 0x1d2   : > { %8416 = vmatmul.msk.bf16.vlgmr.msra.gmra.mxu1 %vm869_vm11, %v10348_v51  ;;  %v11175_v61 = vpop.permute.xlu2 %696  ;;  %v11187_v2 = vpop.permute.xlu0 %706 }
 0x1d3   : > { %v11177_v62 = vpop.permute.xlu1 %776 }
 0x1da   : > { %v11182_v0 = vpop.permute.xlu2 %681  ;;  %v11197_v6 = vpop.permute.xlu0 %771 }
 0x1db   : > { %v11185_v1 = vpop.permute.xlu1 %761 }
 0x1e2   : > { %8417 = vmatmul.msk.bf16.gmra.mxu1 %vm869_vm11, %v10349_v54  ;;  %v11189_v3 = vpop.permute.xlu2 %766  ;;  %v11203_v9 = vpop.permute.xlu0 %686 }
 0x1e3   : > { %v11191_v4 = vpop.permute.xlu1 %676 }
 0x1ea   : > { %v11199_v7 = vpop.permute.xlu2 %751  ;;  %v11216_v18 = vpop.permute.xlu0 %671 }
 0x1eb   : > { %v11201_v8 = vpop.permute.xlu1 %661 }
 0x1f2   : > { %8418 = vmatmul.msk.bf16.gmra.mxu1 %vm869_vm11, %v10350_v55  ;;  %v11205_v11 = vpop.permute.xlu2 %666  ;;  %v11226_v23 = vpop.permute.xlu0 %756 }
 0x1f3   : > { %v11210_v15 = vpop.permute.xlu1 %746 }
 0x1fa   : > { %v652_v19 = vpop.permute.xlu2 %651  ;;  %v11234_v27 = vpop.permute.xlu0 %741 }
 0x1fb   : > { %v11218_v20 = vpop.permute.xlu1 %731 }
 0x202   : > { %8419 = vmatmul.msk.bf16.gmra.mxu1 %vm869_vm11, %v10351_v59  ;;  %v11228_v24 = vpop.permute.xlu2 %736  ;;  %v657_v33 = vpop.permute.xlu0 %656 }
 0x203   : > { %v647_v26 = vpop.permute.xlu1 %646 }
 0x20a   : > { %v11236_v28 = vpop.permute.xlu2 %721  ;;  %v642_v44 = vpop.permute.xlu0 %641 }
 0x20b   : > { %v632_v30 = vpop.permute.xlu1 %631 }
 0x212   : > { %8420 = vmatmul.msk.bf16.gmra.mxu1 %vm869_vm11, %v10352_v63  ;;  %v637_v34 = vpop.permute.xlu2 %636  ;;  %v10358_v63 = vld [vmem:[%s16809_s2 + $0x50] sm:$0xff] }
 0x222   : > { %8421 = vmatmul.msk.bf16.gmra.mxu1 %vm869_vm11, %v10353_v5 }
 0x232   : > { %8422 = vmatmul.msk.bf16.gmra.mxu1 %vm869_vm11, %v10354_v13 }
 0x242   : > { %8423 = vmatmul.msk.bf16.gmra.mxu1 %vm869_vm11, %v10355_v22 }
 0x24f   : > { %v927_v31 = vpop.f32.mrf.mxu1 }
 0x250   : > { %v928_v32 = vadd.f32 %v927_v31, %v632_v30 }
 0x252   : > { %8424 = vmatmul.msk.bf16.gmra.mxu1 %vm869_vm11, %v10356_v29  ;;  %v1007_v35 = vmax.f32 %v928_v32, 0.0 }
 0x254   : > { %v1039_v38 = vpack.c.bf16 %v1007_v35, %v1007_v35 }
 0x256   : > { %v1103_v41 = vunpack.c.l.b16 %v1039_v38 }
 0x257   : > { %v929_v36 = vpop.f32.mrf.mxu1 }
 0x258   : > { %v930_v37 = vadd.f32 %v929_v36, %v637_v34  ;;  %v10359_v34 = vld [vmem:[%s16809_s2 + $0x58] sm:$0xff] }
 0x25a   : > { %v1008_v39 = vmax.f32 %v930_v37, 0.0 }
 0x25c   : > { %v1040_v40 = vpack.c.bf16 %v1008_v39, %v1008_v39 }
 0x25e   : > { %v1104_v42 = vunpack.c.l.b16 %v1040_v40 }
 0x25f   : > { %v932_v45 = vpop.f32.mrf.mxu1 }
 0x260   : > { %v11245_v47 = vpack.c.b16 %v1104_v42, %v1103_v41  ;;  %v933_v48 = vadd.f32 %v932_v45, %v642_v44  ;;  %v10360_v44 = vld [vmem:[%s16809_s2 + $0x60] sm:$0xff] }
 0x262   : > { %16913 = vst [vmem:[#allocation8_spill] sm:$0xff] %v11245_v47  ;;  %8425 = vmatmul.msk.bf16.gmra.mxu1 %vm869_vm11, %v10357_v43  ;;  %v1009_v49 = vmax.f32 %v933_v48, 0.0 }
 0x264   : > { %v1041_v52 = vpack.c.bf16 %v1009_v49, %v1009_v49 }
 0x266   : > { %v1105_v55 = vunpack.c.l.b16 %v1041_v52 }
 0x267   : > { %v934_v50 = vpop.f32.mrf.mxu1 }
 0x268   : > { %v935_v51 = vadd.f32 %v934_v50, %v647_v26 }
 0x26a   : > { %v1010_v53 = vmax.f32 %v935_v51, 0.0 }
 0x26c   : > { %v1042_v54 = vpack.c.bf16 %v1010_v53, %v1010_v53 }
 0x26e   : > { %v1106_v59 = vunpack.c.l.b16 %v1042_v54 }
 0x26f   : > { %v937_v5 = vpop.f32.mrf.mxu1 }
 0x270   : > { %v11251_v13 = vpack.c.b16 %v1106_v59, %v1105_v55  ;;  %v938_v17 = vadd.f32 %v937_v5, %v652_v19  ;;  %v10361_v59 = vld [vmem:[%s16809_s2 + $0x68] sm:$0xff] }
 0x272   : > { %16914 = vst [vmem:[#allocation9_spill] sm:$0xff] %v11251_v13  ;;  %8426 = vmatmul.msk.bf16.gmra.mxu1 %vm869_vm11, %v10358_v63  ;;  %v1011_v21 = vmax.f32 %v938_v17, 0.0 }
 0x274   : > { %v1043_v29 = vpack.c.bf16 %v1011_v21, %v1011_v21 }
 0x276   : > { %v1107_v31 = vunpack.c.l.b16 %v1043_v29 }
 0x277   : > { %v939_v22 = vpop.f32.mrf.mxu1 }
 0x278   : > { %v940_v25 = vadd.f32 %v939_v22, %v657_v33 }
 0x27a   : > { %v1012_v26 = vmax.f32 %v940_v25, 0.0 }
 0x27c   : > { %v1044_v30 = vpack.c.bf16 %v1012_v26, %v1012_v26 }
 0x27e   : > { %v1108_v32 = vunpack.c.l.b16 %v1044_v30 }
 0x27f   : > { %v942_v35 = vpop.f32.mrf.mxu1 }
 0x280   : > { %v11257_v36 = vpack.c.b16 %v1108_v32, %v1107_v31  ;;  %v943_v37 = vadd.f32 %v942_v35, %v11201_v8  ;;  %v10362_v31 = vld [vmem:[%s16809_s2 + $0x70] sm:$0xff] }
 0x282   : > { %16915 = vst [vmem:[#allocation10_spill] sm:$0xff] %v11257_v36  ;;  %8427 = vmatmul.msk.bf16.gmra.mxu1 %vm869_vm11, %v10359_v34  ;;  %v1013_v19 = vmax.f32 %v943_v37, 0.0 }
 0x284   : > { %v1045_v39 = vpack.c.bf16 %v1013_v19, %v1013_v19 }
 0x286   : > { %v1109_v42 = vunpack.c.l.b16 %v1045_v39 }
 0x287   : > { %v944_v38 = vpop.f32.mrf.mxu1 }
 0x288   : > { %v945_v33 = vadd.f32 %v944_v38, %v11205_v11 }
 0x28a   : > { %v1014_v40 = vmax.f32 %v945_v33, 0.0 }
 0x28c   : > { %v1046_v41 = vpack.c.bf16 %v1014_v40, %v1014_v40 }
 0x28e   : > { %v1110_v43 = vunpack.c.l.b16 %v1046_v41  ;;  %v10363_v41 = vld [vmem:[%s16809_s2 + $0x78] sm:$0xff] }
 0x28f   : > { %v947_v45 = vpop.f32.mrf.mxu1 }
 0x290   : > { %v11265_v48 = vpack.c.b16 %v1110_v43, %v1109_v42  ;;  %v948_v8 = vadd.f32 %v947_v45, %v11216_v18 }
 0x292   : > { %16916 = vst [vmem:[#allocation11_spill] sm:$0xff] %v11265_v48  ;;  %8428 = vmatmul.msk.bf16.gmra.mxu1 %vm869_vm11, %v10360_v44  ;;  %v1015_v49 = vmax.f32 %v948_v8, 0.0 }
 0x294   : > { %v1047_v51 = vpack.c.bf16 %v1015_v49, %v1015_v49 }
 0x296   : > { %v1111_v54 = vunpack.c.l.b16 %v1047_v51 }
 0x297   : > { %v949_v50 = vpop.f32.mrf.mxu1 }
 0x298   : > { %v950_v11 = vadd.f32 %v949_v50, %v11191_v4 }
 0x29a   : > { %v1016_v52 = vmax.f32 %v950_v11, 0.0 }
 0x29c   : > { %v1048_v53 = vpack.c.bf16 %v1016_v52, %v1016_v52 }
 0x29e   : > { %v1112_v55 = vunpack.c.l.b16 %v1048_v53 }
 0x29f   : > { %v952_v63 = vpop.f32.mrf.mxu1 }
 0x2a0   : > { %v11273_v5 = vpack.c.b16 %v1112_v55, %v1111_v54  ;;  %v953_v18 = vadd.f32 %v952_v63, %v11182_v0 }
 0x2a2   : > { %16917 = vst [vmem:[#allocation12_spill] sm:$0xff] %v11273_v5  ;;  %8429 = vmatmul.msk.bf16.gmra.mxu1 %vm869_vm11, %v10361_v59  ;;  %1159 = vrot.lane.b32.xlu2 %v11273_v5, %s10910_s30  ;;  %v1017_v4 = vmax.f32 %v953_v18, 0.0 }
 0x2a4   : > { %v1049_v22 = vpack.c.bf16 %v1017_v4, %v1017_v4 }
 0x2a6   : > { %v1113_v26 = vunpack.c.l.b16 %v1049_v22 }
 0x2a7   : > { %v954_v17 = vpop.f32.mrf.mxu1 }
 0x2a8   : > { %v955_v21 = vadd.f32 %v954_v17, %v11203_v9 }
 0x2aa   : > { %v1018_v25 = vmax.f32 %v955_v21, 0.0 }
 0x2ac   : > { %v1050_v29 = vpack.c.bf16 %v1018_v25, %v1018_v25 }
 0x2ae   : > { %v1114_v30 = vunpack.c.l.b16 %v1050_v29  ;;  %v11325_v29 = vpop.permute.xlu0 %726 }
 0x2af   : > { %v957_v32 = vpop.f32.mrf.mxu1 }
 0x2b0   : > { %v11283_v0 = vpack.c.b16 %v1114_v30, %v1113_v26  ;;  %v958_v34 = vadd.f32 %v957_v32, %v11172_v60 }
 0x2b2   : > { %16918 = vst [vmem:[#allocation13_spill] sm:$0xff] %v11283_v0  ;;  %8430 = vmatmul.msk.bf16.gmra.mxu1 %vm869_vm11, %v10362_v31  ;;  %1161 = vrot.lane.b32.xlu0 %v11283_v0, %s10910_s30  ;;  %v1019_v9 = vmax.f32 %v958_v34, 0.0 }
 0x2b4   : > { %v1051_v19 = vpack.c.bf16 %v1019_v9, %v1019_v9  ;;  %v717_v9 = vpop.permute.xlu1 %716 }
 0x2b6   : > { %v1115_v39 = vunpack.c.l.b16 %v1051_v19 }
 0x2b7   : > { %v959_v35 = vpop.f32.mrf.mxu1 }
 0x2b8   : > { %v960_v37 = vadd.f32 %v959_v35, %v11175_v61 }
 0x2ba   : > { %v1020_v38 = vmax.f32 %v960_v37, 0.0 }
 0x2bc   : > { %v1052_v33 = vpack.c.bf16 %v1020_v38, %v1020_v38 }
 0x2be   : > { %v1116_v40 = vunpack.c.l.b16 %v1052_v33  ;;  %v712_v33 = vpop.permute.xlu0 %711 }
 0x2bf   : > { %v962_v42 = vpop.f32.mrf.mxu1 }
 0x2c0   : > { %v11293_v60 = vpack.c.b16 %v1116_v40, %v1115_v39  ;;  %v963_v43 = vadd.f32 %v962_v42, %v11162_v56 }
 0x2c2   : > { %16919 = vst [vmem:[#allocation14_spill] sm:$0xff] %v11293_v60  ;;  %8431 = vmatmul.msk.bf16.gmra.mxu1 %vm869_vm11, %v10363_v41  ;;  %1163 = vrot.lane.b32.xlu1 %v11293_v60, %s10910_s30  ;;  %v1021_v61 = vmax.f32 %v963_v43, 0.0 }
 0x2c4   : > { %v1053_v8 = vpack.c.bf16 %v1021_v61, %v1021_v61 }
 0x2c6   : > { %v1117_v11 = vunpack.c.l.b16 %v1053_v8 }
 0x2c7   : > { %v964_v44 = vpop.f32.mrf.mxu1 }
 0x2c8   : > { %v965_v45 = vadd.f32 %v964_v44, %v11187_v2 }
 0x2ca   : > { %v1022_v49 = vmax.f32 %v965_v45, 0.0 }
 0x2cc   : > { %v1054_v50 = vpack.c.bf16 %v1022_v49, %v1022_v49 }
 0x2ce   : > { %v1118_v51 = vunpack.c.l.b16 %v1054_v50 }
 0x2cf   : > { %v11300_v52 = vpop.f32.mrf.mxu1 }
 0x2d0   : > { %v11302_v53 = vpack.c.b16 %v1118_v51, %v1117_v11 }
 0x2d2   : > { %16920 = vst [vmem:[#allocation15_spill] sm:$0xff] %v11302_v53  ;;  %1165 = vrot.lane.b32.xlu2 %v11302_v53, %s10910_s30  ;;  %3201 = vmatpush.bf16.msrb.mxu0 %v11302_v53 }
 0x2d6   : > { %3202 = vmatpush.bf16.msrb.mxu0 %v11293_v60 }
 0x2d7   : > { %v11308_v56 = vpop.f32.mrf.mxu1 }
 0x2da   : > { %3203 = vmatpush.bf16.msrb.mxu0 %v11283_v0 }
 0x2de   : > { %3204 = vmatpush.bf16.msrb.mxu0 %v11273_v5 }
 0x2df   : > { %v11312_v2 = vpop.f32.mrf.mxu1 }
 0x2e2   : > { %3205 = vmatpush.bf16.msrb.mxu0 %v11265_v48 }
 0x2e6   : > { %3206 = vmatpush.bf16.msrb.mxu0 %v11257_v36 }
 0x2e7   : > { %v11316_v54 = vpop.f32.mrf.mxu1 }
 0x2ea   : > { %3207 = vmatpush.bf16.msrb.mxu0 %v11251_v13 }
 0x2ee   : > { %3208 = vmatpush.bf16.msrb.mxu0 %v11245_v47 }
 0x2ef   : > { %v977_v55 = vpop.f32.mrf.mxu1 }
 0x2f7   : > { %v979_v59 = vpop.f32.mrf.mxu1 }
 0x2f8   : > { %v980_v39 = vadd.f32 %v979_v59, %v11228_v24 }
 0x2fa   : > { %v1028_v42 = vmax.f32 %v980_v39, 0.0 }
 0x2fc   : > { %v11323_v25 = vpop.permute.xlu2 %1159  ;;  %v1060_v24 = vpack.c.bf16 %v1028_v42, %v1028_v42 }
 0x2fd   : > { %16921 = vst [vmem:[#allocation16_spill] sm:$0xff] %v11323_v25 }
 0x2ff   : > { %v982_v63 = vpop.f32.mrf.mxu1 }
 0x300   : > { %v983_v50 = vadd.f32 %v982_v63, %v11234_v27 }
 0x307   : > { %v984_v18 = vpop.f32.mrf.mxu1 }
 0x308   : > { %v985_v8 = vadd.f32 %v984_v18, %v11210_v15  ;;  %v1029_v15 = vmax.f32 %v983_v50, 0.0 }
 0x30a   : > { %v1030_v59 = vmax.f32 %v985_v8, 0.0 }
 0x30c   : > { %v1062_v27 = vpack.c.bf16 %v1030_v59, %v1030_v59 }
 0x30f   : > { %v11320_v4 = vpop.f32.mrf.mxu1 }
 0x317   : > { %v989_v17 = vpop.f32.mrf.mxu1 }
 0x31f   : > { %v992_v21 = vpop.f32.mrf.mxu1 }
 0x320   : > { %v993_v22 = vadd.f32 %v992_v21, %v11185_v1 }
 0x322   : > { %v1033_v26 = vmax.f32 %v993_v22, 0.0 }
 0x324   : > { %v1065_v32 = vpack.c.bf16 %v1033_v26, %v1033_v26  ;;  %v11346_v49 = vpop.permute.xlu0 %1161 }
 0x325   : > { %16925 = vst [vmem:[#allocation20_spill] sm:$0xff] %v11346_v49 }
 0x326   : > { %v1129_v19 = vunpack.c.l.b16 %v1065_v32 }
 0x327   : > { %v994_v30 = vpop.f32.mrf.mxu1 }
 0x328   : > { %v995_v31 = vadd.f32 %v994_v30, %v11189_v3  ;;  %v978_v3 = vadd.f32 %v977_v55, %v11218_v20  ;;  %v1124_v55 = vunpack.c.l.b16 %v1060_v24 }
 0x32a   : > { %v1034_v34 = vmax.f32 %v995_v31, 0.0  ;;  %v1027_v61 = vmax.f32 %v978_v3, 0.0  ;;  %v1061_v31 = vpack.c.bf16 %v1029_v15, %v1029_v15 }
 0x32c   : > { %v1066_v35 = vpack.c.bf16 %v1034_v34, %v1034_v34  ;;  %v11328_v37 = vpop.permute.xlu2 %1165  ;;  %v1059_v20 = vpack.c.bf16 %v1027_v61, %v1027_v61  ;;  %v1126_v34 = vunpack.c.l.b16 %v1062_v27  ;;  %v1534_v27 = vld [vmem:[%s16812_s5 + $0x78] sm:$0xff] }
 0x32d   : > { %16922 = vst [vmem:[#allocation17_spill] sm:$0xff] %v11328_v37  ;;  %9201 = vmatpush.bf16.msk.msra.mxu2 %vm11131_vm10, %v11328_v37  ;;  %v8914_v37 = vld [vmem:[%s16811_s4 + $0x3c0] sm:$0xf] }
 0x32e   : > { %v1130_v1 = vunpack.c.l.b16 %v1066_v35  ;;  %v1125_v35 = vunpack.c.l.b16 %v1061_v31  ;;  %v1547_v31 = vld [vmem:[%s16812_s5 + $0xe0] sm:$0xff] }
 0x32f   : > { %v997_v38 = vpop.f32.mrf.mxu1 }
 0x330   : > { %v11334_v40 = vpack.c.b16 %v1130_v1, %v1129_v19  ;;  %v998_v41 = vadd.f32 %v997_v38, %v11197_v6  ;;  %v970_v38 = vadd.f32 %v11308_v56, %v717_v9  ;;  %v11368_v39 = vpack.c.b16 %v1126_v34, %v1125_v35  ;;  %v1530_v34 = vld [vmem:[%s16812_s5 + $0x58] sm:$0xff]  ;;  %v1548_v35 = vld [vmem:[%s16812_s5 + $0xe8] sm:$0xff] }
 0x332   : > { %16923 = vst [vmem:[#allocation18_spill] sm:$0xff] %v11334_v40  ;;  %1177 = vrot.lane.b32.xlu1 %v11334_v40, %s10910_s30  ;;  %v1035_v44 = vmax.f32 %v998_v41, 0.0  ;;  %v990_v41 = vadd.f32 %v989_v17, %v11226_v23  ;;  %v1024_v56 = vmax.f32 %v970_v38, 0.0  ;;  %v1549_v38 = vld [vmem:[%s16812_s5 + $0xf0] sm:$0xff] }
 0x333   : > { %16928 = vst [vmem:[#allocation23_spill] sm:$0xff] %v11368_v39 }
 0x334   : > { %v11340_v43 = vpop.permute.xlu1 %1163  ;;  %v1067_v11 = vpack.c.bf16 %v1035_v44, %v1035_v44  ;;  %v988_v44 = vadd.f32 %v11320_v4, %v11199_v7  ;;  %v1056_v17 = vpack.c.bf16 %v1024_v56, %v1024_v56  ;;  %v1525_v56 = vld [vmem:[%s16812_s5 + $0x30] sm:$0xff] }
 0x335   : > { %16924 = vst [vmem:[#allocation19_spill] sm:$0xff] %v11340_v43  ;;  %9203 = vmatpush.bf16.msk.msra.mxu2 %vm11131_vm10, %v11340_v43  ;;  %v8890_v43 = vld [vmem:[%s16811_s4 + $0x390] sm:$0xf] }
 0x336   : > { %v1131_v18 = vunpack.c.l.b16 %v1067_v11  ;;  %v1031_v23 = vmax.f32 %v988_v44, 0.0  ;;  %v1120_v7 = vunpack.c.l.b16 %v1056_v17 }
 0x337   : > { %v999_v45 = vpop.f32.mrf.mxu1 }
 0x338   : > { %v1000_v6 = vadd.f32 %v999_v45, %v11177_v62  ;;  %v1123_v62 = vunpack.c.l.b16 %v1059_v20  ;;  %v1032_v45 = vmax.f32 %v990_v41, 0.0  ;;  %v1063_v20 = vpack.c.bf16 %v1031_v23, %v1031_v23  ;;  %v1521_v23 = vld [vmem:[%s16812_s5 + $0x10] sm:$0xff] }
 0x339   : > { %9205 = vmatpush.bf16.msk.msra.mxu2 %vm11131_vm10, %v11346_v49  ;;  %v8866_v49 = vld [vmem:[%s16811_s4 + $0x360] sm:$0xf] }
 0x33a   : > { %v1036_v51 = vmax.f32 %v1000_v6, 0.0  ;;  %1157 = vrot.lane.b32.xlu1 %v11265_v48, %s10910_s30  ;;  %v11358_v30 = vpack.c.b16 %v1124_v55, %v1123_v62  ;;  %v1127_v11 = vunpack.c.l.b16 %v1063_v20  ;;  %v975_v55 = vadd.f32 %v11316_v54, %v11325_v29  ;;  %v1538_v20 = vld [vmem:[%s16812_s5 + $0x98] sm:$0xff] }
 0x33c   : > { %v1068_v21 = vpack.c.bf16 %v1036_v51, %v1036_v51  ;;  %16926 = vst [vmem:[#allocation21_spill] sm:$0xff] %v11358_v30  ;;  %v1026_v62 = vmax.f32 %v975_v55, 0.0  ;;  %v1526_v55 = vld [vmem:[%s16812_s5 + $0x38] sm:$0xff] }
 0x33d   : > { %9207 = vmatpush.bf16.msk.msra.mxu2 %vm11131_vm10, %v11323_v25 }
 0x33e   : > { %v1132_v22 = vunpack.c.l.b16 %v1068_v21  ;;  %v973_v21 = vadd.f32 %v11312_v2, %v11236_v28  ;;  %v1058_v54 = vpack.c.bf16 %v1026_v62, %v1026_v62  ;;  %v8442_v62 = vld [vmem:[%s16811_s4 + $0x8] sm:$0xf] }
 0x33f   : > { %v1002_v26 = vpop.f32.mrf.mxu1 }
 0x340   : > { %v11360_v63 = vpack.c.b16 %v1132_v22, %v1131_v18  ;;  %v1003_v32 = vadd.f32 %v1002_v26, %v11165_v57  ;;  %v968_v57 = vadd.f32 %v11300_v52, %v712_v33  ;;  %v1064_v33 = vpack.c.bf16 %v1032_v45, %v1032_v45  ;;  %v1533_v22 = vld [vmem:[%s16812_s5 + $0x70] sm:$0xff]  ;;  %v1550_v26 = vld [vmem:[%s16812_s5 + $0xf8] sm:$0xff]  ;;  %v1524_v45 = vld [vmem:[%s16812_s5 + $0x28] sm:$0xff] }
 0x341   : > { %v1025_v15 = vmax.f32 %v973_v21, 0.0  ;;  %v1122_v28 = vunpack.c.l.b16 %v1058_v54  ;;  %v1535_v21 = vld [vmem:[%s16812_s5 + $0x80] sm:$0xff] }
 0x342   : > { %16927 = vst [vmem:[#allocation22_spill] sm:$0xff] %v11360_v63  ;;  %1179 = vrot.lane.b32.xlu2 %v11360_v63, %s10910_s30  ;;  %1171 = vrot.lane.b32.xlu1 %v11358_v30, %s10910_s30  ;;  %v1037_v19 = vmax.f32 %v1003_v32, 0.0  ;;  %v1023_v24 = vmax.f32 %v968_v57, 0.0  ;;  %v1128_v4 = vunpack.c.l.b16 %v1064_v33  ;;  %v1531_v32 = vld [vmem:[%s16812_s5 + $0x60] sm:$0xff]  ;;  %v1528_v57 = vld [vmem:[%s16812_s5 + $0x48] sm:$0xff] }
 0x343   : > { %v1057_v29 = vpack.c.bf16 %v1025_v15, %v1025_v15  ;;  %v1539_v33 = vld [vmem:[%s16812_s5 + $0xa0] sm:$0xff] }
 0x344   : > { %v1069_v42 = vpack.c.bf16 %v1037_v19, %v1037_v19  ;;  %v1055_v6 = vpack.c.bf16 %v1023_v24, %v1023_v24  ;;  %v11393_v59 = vpack.c.b16 %v1128_v4, %v1127_v11  ;;  %v1527_v19 = vld [vmem:[%s16812_s5 + $0x40] sm:$0xff]  ;;  %v1522_v11 = vld [vmem:[%s16812_s5 + $0x18] sm:$0xff] }
 0x345   : > { %v1121_v2 = vunpack.c.l.b16 %v1057_v29  ;;  %v10368_v15 = vld [vmem:[%s16811_s4 + $0x1c] sm:$0xf0] }
 0x346   : > { %v1119_v50 = vunpack.c.l.b16 %v1055_v6  ;;  %16931 = vst [vmem:[#allocation26_spill] sm:$0xff] %v11393_v59  ;;  %v1543_v6 = vld [vmem:[%s16812_s5 + $0xc0] sm:$0xff]  ;;  %v8443_v29 = vor.u32 %v10368_v15, %v8442_v62 }
 0x347   : > { %v1004_v1 = vpop.f32.mrf.mxu1  ;;  %v11413_v18 = vpack.c.b16 %v1122_v28, %v1121_v2  ;;  %v10365_v28 = vld [vmem:[%s16811_s4 + $0xc] sm:$0xf]  ;;  %v8444_v2 = vld [vmem:[%s16811_s4 + $0x20] sm:$0xf0] }
 0x348   : > { %v1005_v3 = vadd.f32 %v1004_v1, %v11167_v58  ;;  %v1133_v58 = vunpack.c.l.b16 %v1069_v42  ;;  %v11389_v51 = vpack.c.b16 %v1120_v7, %v1119_v50  ;;  %v1545_v1 = vld [vmem:[%s16812_s5 + $0xd0] sm:$0xff]  ;;  %v1532_v42 = vld [vmem:[%s16812_s5 + $0x68] sm:$0xff]  ;;  %3209 = vmatmul.bf16.vlgmr.msrb.gmra.mxu0 %v8443_v29 }
 0x349   : > { %16932 = vst [vmem:[#allocation27_spill] sm:$0xff] %v11413_v18 }
 0x34a   : > { %v1038_v61 = vmax.f32 %v1005_v3, 0.0  ;;  %1173 = vrot.lane.b32.xlu2 %v11368_v39, %s10910_s30  ;;  %1151 = vrot.lane.b32.xlu1 %v11245_v47, %s10910_s30  ;;  %16930 = vst [vmem:[#allocation25_spill] sm:$0xff] %v11389_v51  ;;  %v1544_v3 = vld [vmem:[%s16812_s5 + $0xc8] sm:$0xff] }
 0x34c   : > { %v1070_v9 = vpack.c.bf16 %v1038_v61, %v1038_v61  ;;  %v1541_v61 = vld [vmem:[%s16812_s5 + $0xb0] sm:$0xff] }
 0x34e   : > { %v1134_v8 = vunpack.c.l.b16 %v1070_v9  ;;  %v1529_v9 = vld [vmem:[%s16812_s5 + $0x50] sm:$0xff] }
 0x350   : > { %v11379_v52 = vpack.c.b16 %v1134_v8, %v1133_v58  ;;  %v1542_v58 = vld [vmem:[%s16812_s5 + $0xb8] sm:$0xff] }
 0x351   : > { %v1546_v8 = vld [vmem:[%s16812_s5 + $0xd8] sm:$0xff] }
 0x352   : > { %16929 = vst [vmem:[#allocation24_spill] sm:$0xff] %v11379_v52  ;;  %1153 = vrot.lane.b32.xlu2 %v11251_v13, %s10910_s30  ;;  %3370 = vmatpush.bf16.msrb.mxu1 %v11379_v52 }
 0x353   : > { %1181 = vrot.lane.b32.xlu0 %v11379_v52, %s10910_s30  ;;  %1241 = vrot.lane.b32.xlu1 %v11283_v0, %s10911_s19 }
 0x356   : > { %3371 = vmatpush.bf16.msrb.mxu1 %v11360_v63 }
 0x35a   : > { %1167 = vrot.lane.b32.xlu2 %v11389_v51, %s10910_s30  ;;  %3372 = vmatpush.bf16.msrb.mxu1 %v11334_v40 }
 0x35b   : > { %1175 = vrot.lane.b32.xlu0 %v11393_v59, %s10910_s30  ;;  %1261 = vrot.lane.b32.xlu1 %v11379_v52, %s10911_s19 }
 0x35e   : > { %3373 = vmatpush.bf16.msrb.mxu1 %v11393_v59 }
 0x362   : > { %1243 = vrot.lane.b32.xlu2 %v11293_v60, %s10911_s19  ;;  %3374 = vmatpush.bf16.msrb.mxu1 %v11368_v39 }
 0x363   : > { %1155 = vrot.lane.b32.xlu0 %v11257_v36, %s10910_s30  ;;  %1255 = vrot.lane.b32.xlu1 %v11393_v59, %s10911_s19  ;;  %v8660_v59 = vld [vmem:[%s16811_s4 + $0x1d0] sm:$0xf0] }
 0x366   : > { %3375 = vmatpush.bf16.msrb.mxu1 %v11358_v30 }
 0x36a   : > { %1257 = vrot.lane.b32.xlu2 %v11334_v40, %s10911_s19  ;;  %3376 = vmatpush.bf16.msrb.mxu1 %v11413_v18 }
 0x36b   : > { %1169 = vrot.lane.b32.xlu0 %v11413_v18, %s10910_s30  ;;  %1235 = vrot.lane.b32.xlu1 %v11257_v36, %s10911_s19  ;;  %v8626_v36 = vld [vmem:[%s16811_s4 + $0x180] sm:$0xf] }
 0x36e   : > { %3377 = vmatpush.bf16.msrb.mxu1 %v11389_v51 }
 0x372   : > { %1237 = vrot.lane.b32.xlu2 %v11265_v48, %s10911_s19  ;;  %v10412_v48 = vld [vmem:[%s16811_s4 + $0x184] sm:$0xf] }
 0x373   : > { %1245 = vrot.lane.b32.xlu0 %v11302_v53, %s10911_s19  ;;  %1249 = vrot.lane.b32.xlu1 %v11413_v18, %s10911_s19 }
 0x37a   : > { %1251 = vrot.lane.b32.xlu2 %v11358_v30, %s10911_s19 }
 0x37b   : > { %1259 = vrot.lane.b32.xlu0 %v11360_v63, %s10911_s19  ;;  %1655 = vperm.xlu1 %10835, %v1533_v22  }
 0x382   : > { %1231 = vrot.lane.b32.xlu2 %v11245_v47, %s10911_s19  ;;  %v10406_v47 = vld [vmem:[%s16811_s4 + $0x154] sm:$0xf] }
 0x383   : > { %1239 = vrot.lane.b32.xlu0 %v11273_v5, %s10911_s19  ;;  %1740 = vperm.xlu1 %10835, %v1550_v26   ;;  %v8447_v26 = vor.u32 %v10365_v28, %v8444_v2  ;;  %v1520_v28 = vld [vmem:[%s16812_s5 + $0x8] sm:$0xff] }
 0x385   : > { %3378 = vmatmul.bf16.vlgmr.msrb.gmra.mxu1 %v8447_v26  ;;  %v8458_v26 = vld [vmem:[%s16811_s4 + $0x30] sm:$0xf] }
 0x38a   : > { %1660 = vperm.xlu2 %10833, %v1534_v27   ;;  %v1519_v27 = vld [vmem:[%s16812_s5] sm:$0xff] }
 0x38b   : > { %1253 = vrot.lane.b32.xlu0 %v11368_v39, %s10911_s19  ;;  %1725 = vperm.xlu1 %10835, %v1547_v31  }
 0x392   : > { %1645 = vperm.xlu2 %10833, %v1531_v32   ;;  %v1523_v32 = vld [vmem:[%s16812_s5 + $0x20] sm:$0xff] }
 0x393   : > { %1233 = vrot.lane.b32.xlu0 %v11251_v13, %s10911_s19  ;;  %1640 = vperm.xlu1 %10835, %v1530_v34  }
 0x39a   : > { %1730 = vperm.xlu2 %10833, %v1548_v35  }
 0x39b   : > { %1247 = vrot.lane.b32.xlu0 %v11389_v51, %s10911_s19  ;;  %1625 = vperm.xlu1 %10835, %v1527_v19   ;;  %v1540_v19 = vld [vmem:[%s16812_s5 + $0xa8] sm:$0xff]  ;;  %v8602_v51 = vld [vmem:[%s16811_s4 + $0x150] sm:$0xf] }
 0x39c   : > { %v11501_v24 = vpop.permute.xlu2 %1179 }
 0x39d   : > { %16935 = vst [vmem:[#allocation30_spill] sm:$0xff] %v11501_v24 }
 0x3a2   : > { %1715 = vperm.xlu2 %10833, %v1545_v1   ;;  %v1536_v1 = vld [vmem:[%s16812_s5 + $0x88] sm:$0xff] }
 0x3a3   : > { %1735 = vperm.xlu0 %10834, %v1549_v38   ;;  %1710 = vperm.xlu1 %10835, %v1544_v3   ;;  %v8434_v38 = vld [vmem:[%s16811_s4] sm:$0xf] }
 0x3a4   : > { %v11476_v41 = vpop.permute.xlu1 %1177  ;;  %v11512_v17 = vpop.permute.xlu2 %1173 }
 0x3a5   : > { %16933 = vst [vmem:[#allocation28_spill] sm:$0xff] %v11476_v41 }
 0x3a6   : > { %16936 = vst [vmem:[#allocation31_spill] sm:$0xff] %v11512_v17 }
 0x3aa   : > { %1630 = vperm.xlu2 %10833, %v1528_v57   ;;  %v10367_v57 = vld [vmem:[%s16811_s4 + $0x14] sm:$0xf0] }
 0x3ab   : > { %1650 = vperm.xlu0 %10834, %v1532_v42   ;;  %1695 = vperm.xlu1 %10835, %v1541_v61   ;;  %v8466_v42 = vld [vmem:[%s16811_s4 + $0x38] sm:$0xf]  ;;  %v10374_v61 = vld [vmem:[%s16811_s4 + $0x4c] sm:$0xf0] }
 0x3ac   : > { %v11487_v44 = vpop.permute.xlu1 %1157  ;;  %v11527_v50 = vpop.permute.xlu2 %1153 }
 0x3ad   : > { %16934 = vst [vmem:[#allocation29_spill] sm:$0xff] %v11487_v44  ;;  %9209 = vmatpush.bf16.msk.msra.mxu2 %vm11131_vm10, %v11487_v44 }
 0x3ae   : > { %16939 = vst [vmem:[#allocation34_spill] sm:$0xff] %v11527_v50 }
 0x3b2   : > { %1615 = vperm.xlu2 %10833, %v1525_v56   ;;  %v8467_v56 = vor.u32 %v10374_v61, %v8466_v42 }
 0x3b3   : > { %1635 = vperm.xlu0 %10834, %v1529_v9   ;;  %1610 = vperm.xlu1 %10835, %v1524_v45   ;;  %v10371_v9 = vld [vmem:[%s16811_s4 + $0x3c] sm:$0xf]  ;;  %v8468_v45 = vld [vmem:[%s16811_s4 + $0x50] sm:$0xf0] }
 0x3b4   : > { %v11523_v7 = vpop.permute.xlu1 %1171  ;;  %v11566_v31 = vpop.permute.xlu2 %1167  ;;  %3214 = vmatmul.bf16.gmra.mxu0 %v8467_v56 }
 0x3b5   : > { %16937 = vst [vmem:[#allocation32_spill] sm:$0xff] %v11523_v7 }
 0x3b6   : > { %16942 = vst [vmem:[#allocation37_spill] sm:$0xff] %v11566_v31 }
 0x3ba   : > { %1700 = vperm.xlu2 %10833, %v1542_v58  }
 0x3bb   : > { %1720 = vperm.xlu0 %10834, %v1546_v8   ;;  %1595 = vperm.xlu1 %10835, %v1521_v23   ;;  %v8435_v8 = vor.u32 %v10367_v57, %v8434_v38  ;;  %v8471_v23 = vor.u32 %v10371_v9, %v8468_v45  ;;  %v10377_v38 = vld [vmem:[%s16811_s4 + $0x6c] sm:$0xf] }
 0x3bc   : > { %v11550_v54 = vpop.permute.xlu1 %1151  ;;  %v1244_v3 = vpop.permute.xlu2 %1243 }
 0x3bd   : > { %16940 = vst [vmem:[#allocation35_spill] sm:$0xff] %v11550_v54  ;;  %3383 = vmatmul.bf16.gmra.mxu1 %v8471_v23  ;;  %v11644_v2 = vsel %vm556_vm8, %v1244_v3, 0  ;;  %v8492_v3 = vld [vmem:[%s16811_s4 + $0x80] sm:$0xf0]  ;;  %v8460_v23 = vld [vmem:[%s16811_s4 + $0x48] sm:$0xf0] }
 0x3be   : > { %16947 = vst [vmem:[#allocation42_spill] sm:$0xff] %v11644_v2  ;;  %v8495_v61 = vor.u32 %v10377_v38, %v8492_v3  ;;  %v10383_v38 = vld [vmem:[%s16811_s4 + $0x9c] sm:$0xf]  ;;  %v8516_v3 = vld [vmem:[%s16811_s4 + $0xb0] sm:$0xf0] }
 0x3c2   : > { %1685 = vperm.xlu2 %10833, %v1539_v33   ;;  %v10364_v33 = vld [vmem:[%s16811_s4 + $0x4] sm:$0xf] }
 0x3c3   : > { %1705 = vperm.xlu0 %10834, %v1543_v6   ;;  %1680 = vperm.xlu1 %10835, %v1538_v20   ;;  %v8436_v6 = vld [vmem:[%s16811_s4 + $0x18] sm:$0xf0] }
 0x3c4   : > { %v1258_v62 = vpop.permute.xlu2 %1257 }
 0x3c5   : > { %v11525_v4 = vpop.permute.xlu0 %1181  ;;  %v1242_v34 = vpop.permute.xlu1 %1241 }
 0x3c6   : > { %16938 = vst [vmem:[#allocation33_spill] sm:$0xff] %v11525_v4  ;;  %9217 = vmatpush.bf16.msk.msra.mxu3 %vm11131_vm10, %v11525_v4  ;;  %v11666_v9 = vsel %vm556_vm8, %v1242_v34, 0 }
 0x3c7   : > { %16948 = vst [vmem:[#allocation43_spill] sm:$0xff] %v11666_v9 }
 0x3ca   : > { %9219 = vmatpush.bf16.msk.msra.mxu3 %vm11131_vm10, %v11501_v24  ;;  %1600 = vperm.xlu2 %10833, %v1522_v11   ;;  %v1537_v11 = vld [vmem:[%s16812_s5 + $0x90] sm:$0xff] }
 0x3cb   : > { %1620 = vperm.xlu0 %10834, %v1526_v55   ;;  %1665 = vperm.xlu1 %10835, %v1535_v21   ;;  %v8439_v55 = vor.u32 %v10364_v33, %v8436_v6  ;;  %v11680_v6 = vsel %vm556_vm8, %v1258_v62, 0  ;;  %v8482_v62 = vld [vmem:[%s16811_s4 + $0x60] sm:$0xf] }
 0x3cc   : > { %v1238_v56 = vpop.permute.xlu2 %1237  ;;  %16950 = vst [vmem:[#allocation45_spill] sm:$0xff] %v11680_v6 }
 0x3cd   : > { %v11558_v22 = vpop.permute.xlu0 %1175  ;;  %v1262_v20 = vpop.permute.xlu1 %1261  ;;  %3388 = vmatmul.bf16.gmra.mxu1 %v8495_v61  ;;  %v8519_v61 = vor.u32 %v10383_v38, %v8516_v3  ;;  %v10385_v38 = vld [vmem:[%s16811_s4 + $0xa4] sm:$0xf0] }
 0x3ce   : > { %16941 = vst [vmem:[#allocation36_spill] sm:$0xff] %v11558_v22  ;;  %9221 = vmatpush.bf16.msk.msra.mxu3 %vm11131_vm10, %v11476_v41  ;;  %v11633_v21 = vsel %vm556_vm8, %v1262_v20, 0  ;;  %v8538_v3 = vld [vmem:[%s16811_s4 + $0xc8] sm:$0xf] }
 0x3cf   : > { %16945 = vst [vmem:[#allocation40_spill] sm:$0xff] %v11633_v21 }
 0x3d2   : > { %9223 = vmatpush.bf16.msk.msra.mxu3 %vm11131_vm10, %v11558_v22  ;;  %1585 = vperm.xlu2 %10833, %v1519_v27   ;;  %v10373_v27 = vld [vmem:[%s16811_s4 + $0x44] sm:$0xf0] }
 0x3d3   : > { %1605 = vperm.xlu0 %10834, %v1523_v32   ;;  %v8490_v32 = vld [vmem:[%s16811_s4 + $0x68] sm:$0xf]  ;;  %v8459_v42 = vor.u32 %v10373_v27, %v8458_v26  ;;  %v11692_v26 = vsel %vm556_vm8, %v1238_v56, 0  ;;  %v10379_v27 = vld [vmem:[%s16811_s4 + $0x74] sm:$0xf0] }
 0x3d4   : > { %16953 = vst [vmem:[#allocation48_spill] sm:$0xff] %v11692_v26 }
 0x3d5   : > { %v11574_v35 = vpop.permute.xlu0 %1155  ;;  %v1256_v33 = vpop.permute.xlu1 %1255 }
 0x3d6   : > { %16943 = vst [vmem:[#allocation38_spill] sm:$0xff] %v11574_v35  ;;  %9211 = vmatpush.bf16.msk.msra.mxu2 %vm11131_vm10, %v11574_v35  ;;  %9225 = vmatpush.bf16.msk.msra.mxu3 %vm11131_vm10, %v11512_v17  ;;  %v8842_v35 = vld [vmem:[%s16811_s4 + $0x330] sm:$0xf] }
 0x3da   : > { %9213 = vmatpush.bf16.msk.msra.mxu2 %vm11131_vm10, %v11527_v50  ;;  %9227 = vmatpush.bf16.msk.msra.mxu3 %vm11131_vm10, %v11523_v7 }
 0x3db   : > { %1690 = vperm.xlu0 %10834, %v1540_v19   ;;  %1670 = vperm.xlu2 %10833, %v1536_v1   ;;  %v10380_v19 = vld [vmem:[%s16811_s4 + $0x7c] sm:$0xf0] }
 0x3dc   : > { %v8491_v1 = vor.u32 %v10380_v19, %v8490_v32  ;;  %v8514_v32 = vld [vmem:[%s16811_s4 + $0x98] sm:$0xf]  ;;  %v10386_v19 = vld [vmem:[%s16811_s4 + $0xac] sm:$0xf0] }
 0x3dd   : > { %v11612_v58 = vpop.permute.xlu0 %1169  ;;  %3393 = vmatmul.bf16.gmra.mxu1 %v8519_v61 }
 0x3de   : > { %16944 = vst [vmem:[#allocation39_spill] sm:$0xff] %v11612_v58  ;;  %9215 = vmatpush.bf16.msk.msra.mxu2 %vm11131_vm10, %v11550_v54  ;;  %9229 = vmatpush.bf16.msk.msra.mxu3 %vm11131_vm10, %v11612_v58 }
 0x3df   : > { %3219 = vmatmul.bf16.gmra.mxu0 %v8491_v1  ;;  %v8515_v1 = vor.u32 %v10386_v19, %v8514_v32 }
 0x3e1   : > { %2871 = vmatmul.bf16.vlgmr.msra.gmra.mxu2 %v8435_v8  ;;  %v10370_v8 = vld [vmem:[%s16811_s4 + $0x34] sm:$0xf] }
 0x3e2   : > { %9231 = vmatpush.bf16.msk.msra.mxu3 %vm11131_vm10, %v11566_v31  ;;  %v8463_v34 = vor.u32 %v10370_v8, %v8460_v23  ;;  %v10376_v23 = vld [vmem:[%s16811_s4 + $0x64] sm:$0xf]  ;;  %v10418_v31 = vld [vmem:[%s16811_s4 + $0x1b4] sm:$0xf] }
 0x3e3   : > { %1675 = vperm.xlu0 %10834, %v1537_v11  }
 0x3e5   : > { %v1246_v15 = vpop.permute.xlu0 %1245  ;;  %3040 = vmatmul.bf16.vlgmr.msra.gmra.mxu3 %v8439_v55  ;;  %v11687_v55 = vsel %vm556_vm8, %v1256_v33, 0  ;;  %v8484_v33 = vld [vmem:[%s16811_s4 + $0x78] sm:$0xf0] }
 0x3e6   : > { %3708 = vmatpush.bf16.msrb.mxu3 %v11633_v21  ;;  %v11637_v29 = vsel %vm556_vm8, %v1246_v15, 0  ;;  %16952 = vst [vmem:[#allocation47_spill] sm:$0xff] %v11687_v55  ;;  %v1252_v15 = vpop.permute.xlu2 %1251 }
 0x3e7   : > { %16946 = vst [vmem:[#allocation41_spill] sm:$0xff] %v11637_v29  ;;  %3539 = vmatpush.bf16.msrb.mxu2 %v11637_v29  ;;  %v10400_v29 = vld [vmem:[%s16811_s4 + $0x124] sm:$0xf] }
 0x3eb   : > { %1590 = vperm.xlu0 %10834, %v1520_v28   ;;  %3540 = vmatpush.bf16.msrb.mxu2 %v11644_v2  ;;  %v1236_v28 = vpop.permute.xlu1 %1235 }
 0x3ec   : > { %v11714_v56 = vsel %vm556_vm8, %v1236_v28, 0  ;;  %v11728_v28 = vsel %vm556_vm8, %v1252_v15, 0  ;;  %v8506_v15 = vld [vmem:[%s16811_s4 + $0x90] sm:$0xf] }
 0x3ed   : > { %v1260_v57 = vpop.permute.xlu0 %1259  ;;  %16954 = vst [vmem:[#allocation49_spill] sm:$0xff] %v11714_v56 }
 0x3ee   : > { %v11669_v45 = vsel %vm556_vm8, %v1260_v57, 0  ;;  %16956 = vst [vmem:[#allocation51_spill] sm:$0xff] %v11728_v28 }
 0x3ef   : > { %16949 = vst [vmem:[#allocation44_spill] sm:$0xff] %v11669_v45  ;;  %3541 = vmatpush.bf16.msrb.mxu2 %v11666_v9  ;;  %3709 = vmatpush.bf16.msrb.mxu3 %v11669_v45  ;;  %v8578_v9 = vld [vmem:[%s16811_s4 + $0x120] sm:$0xf]  ;;  %v8628_v45 = vld [vmem:[%s16811_s4 + $0x198] sm:$0xf0] }
 0x3f0   : > { %3224 = vmatmul.bf16.gmra.mxu0 %v8515_v1 }
 0x3f1   : > { %2876 = vmatmul.bf16.gmra.mxu2 %v8459_v42  ;;  %v8483_v42 = vor.u32 %v10379_v27, %v8482_v62 }
 0x3f3   : > { %3710 = vmatpush.bf16.msrb.mxu3 %v11680_v6  ;;  %v1250_v62 = vpop.permute.xlu1 %1249  ;;  %v10419_v6 = vld [vmem:[%s16811_s4 + $0x1bc] sm:$0xf] }
 0x3f4   : > { %v11735_v19 = vsel %vm556_vm8, %v1250_v62, 0 }
 0x3f5   : > { %v1240_v20 = vpop.permute.xlu0 %1239  ;;  %3045 = vmatmul.bf16.gmra.mxu3 %v8463_v34  ;;  %v8487_v34 = vor.u32 %v10376_v23, %v8484_v33  ;;  %16958 = vst [vmem:[#allocation53_spill] sm:$0xff] %v11735_v19  ;;  %v10389_v23 = vld [vmem:[%s16811_s4 + $0xcc] sm:$0xf]  ;;  %v8540_v33 = vld [vmem:[%s16811_s4 + $0xe0] sm:$0xf0] }
 0x3f6   : > { %v11684_v11 = vsel %vm556_vm8, %v1240_v20, 0  ;;  %v1232_v20 = vpop.permute.xlu2 %1231  ;;  %v8543_v62 = vor.u32 %v10389_v23, %v8540_v33  ;;  %v8562_v23 = vld [vmem:[%s16811_s4 + $0xf8] sm:$0xf]  ;;  %v10398_v33 = vld [vmem:[%s16811_s4 + $0x10c] sm:$0xf0] }
 0x3f7   : > { %16951 = vst [vmem:[#allocation46_spill] sm:$0xff] %v11684_v11  ;;  %3542 = vmatpush.bf16.msrb.mxu2 %v11684_v11  ;;  %3711 = vmatpush.bf16.msrb.mxu3 %v11687_v55  ;;  %v11740_v1 = vsel %vm556_vm8, %v1232_v20, 0  ;;  %v8507_v20 = vor.u32 %v10385_v38, %v8506_v15  ;;  %v8530_v38 = vld [vmem:[%s16811_s4 + $0xc0] sm:$0xf] }
 0x3f8   : > { %16959 = vst [vmem:[#allocation54_spill] sm:$0xff] %v11740_v1  ;;  %3398 = vmatmul.bf16.gmra.mxu1 %v8543_v62  ;;  %v8564_v62 = vld [vmem:[%s16811_s4 + $0x110] sm:$0xf0] }
 0x3fb   : > { %3543 = vmatpush.bf16.msrb.mxu2 %v11692_v26 }
 0x3fd   : > { %v1254_v57 = vpop.permute.xlu0 %1253 }
 0x3fe   : > { %v11717_v8 = vsel %vm556_vm8, %v1254_v57, 0  ;;  %v10392_v57 = vld [vmem:[%s16811_s4 + $0xdc] sm:$0xf0]  ;;  %v11755_v61 = vpop.permute.xlu2 %1660 }
 0x3ff   : > { %16955 = vst [vmem:[#allocation50_spill] sm:$0xff] %v11717_v8  ;;  %3544 = vmatpush.bf16.msrb.mxu2 %v11714_v56  ;;  %3712 = vmatpush.bf16.msrb.mxu3 %v11717_v8  ;;  %v8556_v56 = vld [vmem:[%s16811_s4 + $0x108] sm:$0xf0] }
 0x401   : > { %2881 = vmatmul.bf16.gmra.mxu2 %v8483_v42  ;;  %v8539_v42 = vor.u32 %v10392_v57, %v8538_v3  ;;  %v10382_v3 = vld [vmem:[%s16811_s4 + $0x94] sm:$0xf]  ;;  %v8508_v57 = vld [vmem:[%s16811_s4 + $0xa8] sm:$0xf0] }
 0x402   : > { %v8511_v16 = vor.u32 %v10382_v3, %v8508_v57  ;;  %v10388_v57 = vld [vmem:[%s16811_s4 + $0xc4] sm:$0xf] }
 0x403   : > { %3713 = vmatpush.bf16.msrb.mxu3 %v11728_v28  ;;  %3229 = vmatmul.bf16.gmra.mxu0 %v8539_v42  ;;  %v10391_v42 = vld [vmem:[%s16811_s4 + $0xd4] sm:$0xf0]  ;;  %v10409_v28 = vld [vmem:[%s16811_s4 + $0x164] sm:$0xf0] }
 0x405   : > { %v1234_v27 = vpop.permute.xlu0 %1233  ;;  %3050 = vmatmul.bf16.gmra.mxu3 %v8487_v34 }
 0x406   : > { %v11732_v32 = vsel %vm556_vm8, %v1234_v27, 0  ;;  %v11775_v15 = vpop.permute.xlu2 %1645 }
 0x407   : > { %16957 = vst [vmem:[#allocation52_spill] sm:$0xff] %v11732_v32  ;;  %3545 = vmatpush.bf16.msrb.mxu2 %v11732_v32  ;;  %3714 = vmatpush.bf16.msrb.mxu3 %v11735_v19  ;;  %v8554_v32 = vld [vmem:[%s16811_s4 + $0xf0] sm:$0xf] }
 0x40b   : > { %3546 = vmatpush.bf16.msrb.mxu2 %v11740_v1 }
 0x40d   : > { %v1248_v34 = vpop.permute.xlu0 %1247 }
 0x40e   : > { %v11764_v27 = vsel %vm556_vm8, %v1248_v34, 0  ;;  %v8563_v34 = vor.u32 %v10398_v33, %v8562_v23  ;;  %v8535_v23 = vor.u32 %v10388_v57, %v8532_v12  ;;  %v11805_v33 = vpop.permute.xlu1 %1655  ;;  %v10404_v12 = vld [vmem:[%s16811_s4 + $0x13c] sm:$0xf0]  ;;  %v10401_v57 = vld [vmem:[%s16811_s4 + $0x12c] sm:$0xf] }
 0x40f   : > { %16960 = vst [vmem:[#allocation55_spill] sm:$0xff] %v11764_v27  ;;  %3715 = vmatpush.bf16.msrb.mxu3 %v11764_v27  ;;  %v8580_v27 = vld [vmem:[%s16811_s4 + $0x138] sm:$0xf0] }
 0x411   : > { %2886 = vmatmul.bf16.gmra.mxu2 %v8507_v20  ;;  %v10395_v20 = vld [vmem:[%s16811_s4 + $0xfc] sm:$0xf] }
 0x413   : > { %3234 = vmatmul.bf16.gmra.mxu0 %v8563_v34  ;;  %v10397_v34 = vld [vmem:[%s16811_s4 + $0x104] sm:$0xf0] }
 0x415   : > { %v11773_v10 = vpop.permute.xlu0 %1735  ;;  %3055 = vmatmul.bf16.gmra.mxu3 %v8511_v16  ;;  %v8531_v16 = vor.u32 %v10391_v42, %v8530_v38  ;;  %v8567_v38 = vor.u32 %v10395_v20, %v8564_v62  ;;  %v11803_v42 = vpop.permute.xlu2 %1730  ;;  %v8555_v62 = vor.u32 %v10397_v34, %v8554_v32 }
 0x417   : > { %3403 = vmatmul.bf16.gmra.mxu1 %v8567_v38  ;;  %v8588_v38 = vld [vmem:[%s16811_s4 + $0x140] sm:$0xf0] }
 0x418   : > { %v8591_v26 = vor.u32 %v10401_v57, %v8588_v38 }
 0x41d   : > { %v11795_v3 = vpop.permute.xlu0 %1650  ;;  %v11809_v1 = vpop.permute.xlu2 %1715 }
 0x421   : > { %2891 = vmatmul.bf16.gmra.mxu2 %v8531_v16  ;;  %v8586_v16 = vld [vmem:[%s16811_s4 + $0x128] sm:$0xf] }
 0x422   : > { %v8587_v20 = vor.u32 %v10404_v12, %v8586_v16  ;;  %v11835_v16 = vpop.permute.xlu1 %1740 }
 0x424   : > { %3239 = vmatmul.bf16.gmra.mxu0 %v8587_v20  ;;  %v10403_v20 = vld [vmem:[%s16811_s4 + $0x134] sm:$0xf0] }
 0x425   : > { %3060 = vmatmul.bf16.gmra.mxu3 %v8535_v23  ;;  %v11807_v14 = vpop.permute.xlu0 %1635  ;;  %v10394_v23 = vld [vmem:[%s16811_s4 + $0xf4] sm:$0xf]  ;;  %v11839_v12 = vpop.permute.xlu2 %1630  ;;  %v8579_v38 = vor.u32 %v10403_v20, %v8578_v9  ;;  %v8583_v20 = vor.u32 %v10400_v29, %v8580_v27  ;;  %v8634_v29 = vld [vmem:[%s16811_s4 + $0x188] sm:$0xf]  ;;  %v10416_v27 = vld [vmem:[%s16811_s4 + $0x19c] sm:$0xf0] }
 0x426   : > { %v8559_v32 = vor.u32 %v10394_v23, %v8556_v56  ;;  %v10410_v56 = vld [vmem:[%s16811_s4 + $0x16c] sm:$0xf0]  ;;  %v10407_v23 = vld [vmem:[%s16811_s4 + $0x15c] sm:$0xf] }
 0x427   : > { %3408 = vmatmul.bf16.gmra.mxu1 %v8591_v26  ;;  %v8610_v26 = vld [vmem:[%s16811_s4 + $0x158] sm:$0xf] }
 0x428   : > { %v8611_v57 = vor.u32 %v10410_v56, %v8610_v26 }
 0x42a   : > { %v11841_v11 = vpop.permute.xlu1 %1725 }
 0x42d   : > { %v11837_v34 = vpop.permute.xlu0 %1720  ;;  %v11863_v2 = vpop.permute.xlu2 %1615 }
 0x431   : > { %2896 = vmatmul.bf16.gmra.mxu2 %v8555_v62 }
 0x432   : > { %v11871_v26 = vpop.permute.xlu1 %1640 }
 0x434   : > { %3244 = vmatmul.bf16.gmra.mxu0 %v8611_v57  ;;  %v3210_v57 = vpop.f32.mrf.mxu0 }
 0x435   : > { %3065 = vmatmul.bf16.gmra.mxu3 %v8559_v32  ;;  %v11855_v62 = vpop.permute.xlu0 %1705  ;;  %v8612_v32 = vld [vmem:[%s16811_s4 + $0x170] sm:$0xf0]  ;;  %v11875_v19 = vpop.permute.xlu2 %1700 }
 0x436   : > { %v8615_v9 = vor.u32 %v10407_v23, %v8612_v32  ;;  %v8603_v23 = vor.u32 %v10409_v28, %v8602_v51  ;;  %v3379_v32 = vpop.f32.mrf.mxu1 }
 0x438   : > { %3413 = vmatmul.bf16.gmra.mxu1 %v8615_v9  ;;  %v10413_v9 = vld [vmem:[%s16811_s4 + $0x18c] sm:$0xf] }
 0x43a   : > { %v11895_v18 = vpop.permute.xlu1 %1625 }
 0x43c   : > { %v3212_v30 = vpop.f32.mrf.mxu0 }
 0x43d   : > { %v11873_v56 = vpop.permute.xlu0 %1620  ;;  %v11905_v8 = vpop.permute.xlu2 %1685 }
 0x43e   : > { %v3381_v13 = vpop.f32.mrf.mxu1 }
 0x441   : > { %2901 = vmatmul.bf16.gmra.mxu2 %v8579_v38  ;;  %v8635_v38 = vor.u32 %v10416_v27, %v8634_v29  ;;  %v8604_v29 = vld [vmem:[%s16811_s4 + $0x168] sm:$0xf0] }
 0x442   : > { %v8607_v27 = vor.u32 %v10406_v47, %v8604_v29  ;;  %v11907_v55 = vpop.permute.xlu1 %1710  ;;  %v8658_v47 = vld [vmem:[%s16811_s4 + $0x1b8] sm:$0xf] }
 0x444   : > { %3249 = vmatmul.bf16.gmra.mxu0 %v8635_v38  ;;  %v10415_v38 = vld [vmem:[%s16811_s4 + $0x194] sm:$0xf0] }
 0x445   : > { %3070 = vmatmul.bf16.gmra.mxu3 %v8583_v20  ;;  %v8636_v20 = vld [vmem:[%s16811_s4 + $0x1a0] sm:$0xf0]  ;;  %v11903_v28 = vpop.permute.xlu0 %1605 }
 0x446   : > { %v8639_v51 = vor.u32 %v10413_v9, %v8636_v20  ;;  %v11917_v9 = vpop.f32.mrf.mxu0  ;;  %v11925_v20 = vpop.permute.xlu2 %1600 }
 0x448   : > { %3418 = vmatmul.bf16.gmra.mxu1 %v8639_v51  ;;  %v8627_v51 = vor.u32 %v10415_v38, %v8626_v36  ;;  %v8663_v36 = vor.u32 %v10419_v6, %v8660_v59  ;;  %v8631_v38 = vor.u32 %v10412_v48, %v8628_v45  ;;  %v8650_v59 = vld [vmem:[%s16811_s4 + $0x1b0] sm:$0xf]  ;;  %v10421_v48 = vld [vmem:[%s16811_s4 + $0x1c4] sm:$0xf0] }
 0x44d   : > { %v11909_v39 = vpop.permute.xlu0 %1690 }
 0x44e   : > { %v1586_v63 = vpop.permute.xlu2 %1585 }
 0x451   : > { %2906 = vmatmul.bf16.gmra.mxu2 %v8603_v23  ;;  %v10422_v23 = vld [vmem:[%s16811_s4 + $0x1cc] sm:$0xf0] }
 0x452   : > { %v8659_v29 = vor.u32 %v10422_v23, %v8658_v47  ;;  %v11941_v47 = vpop.permute.xlu1 %1695  ;;  %v11943_v23 = vpop.f32.mrf.mxu0 }
 0x454   : > { %3254 = vmatmul.bf16.gmra.mxu0 %v8659_v29  ;;  %v8682_v29 = vld [vmem:[%s16811_s4 + $0x1e8] sm:$0xf] }
 0x455   : > { %3075 = vmatmul.bf16.gmra.mxu3 %v8607_v27  ;;  %v11927_v27 = vpop.f32.mrf.mxu1  ;;  %v11945_v40 = vpop.permute.xlu0 %1675 }
 0x458   : > { %3423 = vmatmul.bf16.gmra.mxu1 %v8663_v36  ;;  %v8651_v36 = vor.u32 %v10421_v48, %v8650_v59 }
 0x45c   : > { %v11955_v45 = vpop.f32.mrf.mxu0 }
 0x45d   : > { %v11947_v21 = vpop.f32.mrf.mxu1  ;;  %v1591_v53 = vpop.permute.xlu0 %1590 }
 0x461   : > { %2911 = vmatmul.bf16.gmra.mxu2 %v8627_v51 }
 0x464   : > { %v2872_v5 = vpop.f32.mrf.mxu2  ;;  %v11981_v58 = vpop.f32.mrf.mxu0 }
 0x465   : > { %3080 = vmatmul.bf16.gmra.mxu3 %v8631_v38  ;;  %v2873_v0 = vadd.f32 %v2872_v5, %v1586_v63  ;;  %v10428_v5 = vld [vmem:[%s16811_s4 + $0x1fc] sm:$0xf0]  ;;  %v11967_v38 = vpop.f32.mrf.mxu1 }
 0x468   : > { %v3041_v52 = vpop.f32.mrf.mxu3 }
 0x469   : > { %v3042_v60 = vadd.f32 %v3041_v52, %v2873_v0  ;;  %v11963_v0 = vpop.permute.xlu1 %1610  ;;  %v8683_v52 = vor.u32 %v10428_v5, %v8682_v29 }
 0x46b   : > { %v3211_v6 = vadd.f32 %v3210_v57, %v3042_v60  ;;  %v10425_v60 = vld [vmem:[%s16811_s4 + $0x1ec] sm:$0xf]  ;;  %v8684_v57 = vld [vmem:[%s16811_s4 + $0x200] sm:$0xf0]  ;;  %3259 = vmatmul.bf16.gmra.mxu0 %v8683_v52 }
 0x46c   : > { %v2874_v63 = vpop.f32.mrf.mxu2  ;;  %v8687_v59 = vor.u32 %v10425_v60, %v8684_v57  ;;  %v10431_v60 = vld [vmem:[%s16811_s4 + $0x21c] sm:$0xf]  ;;  %v10424_v57 = vld [vmem:[%s16811_s4 + $0x1e4] sm:$0xf] }
 0x46d   : > { %v11965_v51 = vadd.f32 %v3379_v32, %v3211_v6  ;;  %v8652_v32 = vld [vmem:[%s16811_s4 + $0x1c8] sm:$0xf0]  ;;  %v2875_v48 = vadd.f32 %v2874_v63, %v1591_v53  ;;  %v11985_v41 = vpop.f32.mrf.mxu1  ;;  %v8674_v53 = vld [vmem:[%s16811_s4 + $0x1e0] sm:$0xf]  ;;  %v11993_v63 = vpop.f32.mrf.mxu0 }
 0x46e   : > { %3428 = vmatmul.bf16.gmra.mxu1 %v8687_v59  ;;  %v8655_v5 = vor.u32 %v10418_v31, %v8652_v32  ;;  %v10427_v31 = vld [vmem:[%s16811_s4 + $0x1f4] sm:$0xf0]  ;;  %v8676_v32 = vld [vmem:[%s16811_s4 + $0x1f8] sm:$0xf0] }
 0x470   : > { %v3043_v6 = vpop.f32.mrf.mxu3 }
 0x471   : > { %v3044_v29 = vadd.f32 %v3043_v6, %v2875_v48  ;;  %2916 = vmatmul.bf16.gmra.mxu2 %v8651_v36  ;;  %v1596_v24 = vpop.permute.xlu1 %1595 }
 0x473   : > { %v3213_v7 = vadd.f32 %v3212_v30, %v3044_v29  ;;  %v8706_v30 = vld [vmem:[%s16811_s4 + $0x218] sm:$0xf]  ;;  %v8679_v29 = vor.u32 %v10424_v57, %v8676_v32 }
 0x474   : > { %v2877_v17 = vpop.f32.mrf.mxu2 }
 0x475   : > { %v11983_v22 = vadd.f32 %v3381_v13, %v3213_v7  ;;  %3085 = vmatmul.bf16.gmra.mxu3 %v8655_v5  ;;  %v2878_v4 = vadd.f32 %v2877_v17, %v1596_v24  ;;  %v10434_v24 = vld [vmem:[%s16811_s4 + $0x22c] sm:$0xf0]  ;;  %v3394_v36 = vpop.f32.mrf.mxu1  ;;  %v12018_v5 = vpop.f32.mrf.mxu0 }
 0x476   : > { %v8707_v7 = vor.u32 %v10434_v24, %v8706_v30 }
 0x478   : > { %v3046_v54 = vpop.f32.mrf.mxu3 }
 0x479   : > { %v3047_v52 = vadd.f32 %v3046_v54, %v2878_v4  ;;  %v8675_v54 = vor.u32 %v10427_v31, %v8674_v53 }
 0x47b   : > { %v3216_v13 = vadd.f32 %v11917_v9, %v3047_v52  ;;  %v8708_v9 = vld [vmem:[%s16811_s4 + $0x230] sm:$0xf0]  ;;  %3264 = vmatmul.bf16.gmra.mxu0 %v8707_v7 }
 0x47c   : > { %v2879_v17 = vpop.f32.mrf.mxu2 }
 0x47d   : > { %v12003_v4 = vadd.f32 %v11927_v27, %v3216_v13  ;;  %v8711_v27 = vor.u32 %v10431_v60, %v8708_v9  ;;  %v2880_v59 = vadd.f32 %v2879_v17, %v11925_v20  ;;  %v3396_v13 = vpop.f32.mrf.mxu1  ;;  %v8698_v20 = vld [vmem:[%s16811_s4 + $0x210] sm:$0xf]  ;;  %v10433_v17 = vld [vmem:[%s16811_s4 + $0x224] sm:$0xf0] }
 0x47e   : > { %v8699_v32 = vor.u32 %v10433_v17, %v8698_v20 }
 0x47f   : > { %3433 = vmatmul.bf16.gmra.mxu1 %v8711_v27 }
 0x480   : > { %v3048_v48 = vpop.f32.mrf.mxu3 }
 0x481   : > { %v3049_v6 = vadd.f32 %v3048_v48, %v2880_v59  ;;  %2921 = vmatmul.bf16.gmra.mxu2 %v8675_v54  ;;  %v12031_v54 = vpop.f32.mrf.mxu0  ;;  %v10437_v59 = vld [vmem:[%s16811_s4 + $0x24c] sm:$0xf]  ;;  %v10430_v48 = vld [vmem:[%s16811_s4 + $0x214] sm:$0xf] }
 0x483   : > { %v3218_v52 = vadd.f32 %v11943_v23, %v3049_v6  ;;  %v8700_v6 = vld [vmem:[%s16811_s4 + $0x228] sm:$0xf0] }
 0x484   : > { %v2882_v53 = vpop.f32.mrf.mxu2 }
 0x485   : > { %v12022_v31 = vadd.f32 %v11947_v21, %v3218_v52  ;;  %3090 = vmatmul.bf16.gmra.mxu3 %v8679_v29  ;;  %v2883_v30 = vadd.f32 %v2882_v53, %v11903_v28  ;;  %v8730_v21 = vld [vmem:[%s16811_s4 + $0x248] sm:$0xf]  ;;  %v10440_v28 = vld [vmem:[%s16811_s4 + $0x25c] sm:$0xf0]  ;;  %v3399_v27 = vpop.f32.mrf.mxu1 }
 0x486   : > { %v8731_v9 = vor.u32 %v10440_v28, %v8730_v21 }
 0x488   : > { %v3051_v24 = vpop.f32.mrf.mxu3 }
 0x489   : > { %v3052_v7 = vadd.f32 %v3051_v24, %v2883_v30  ;;  %v8703_v30 = vor.u32 %v10430_v48, %v8700_v6  ;;  %v12056_v24 = vpop.f32.mrf.mxu0 }
 0x48b   : > { %v3221_v23 = vadd.f32 %v11955_v45, %v3052_v7  ;;  %v8732_v45 = vld [vmem:[%s16811_s4 + $0x260] sm:$0xf0]  ;;  %3269 = vmatmul.bf16.gmra.mxu0 %v8731_v9  ;;  %v10439_v9 = vld [vmem:[%s16811_s4 + $0x254] sm:$0xf0] }
 0x48c   : > { %v2884_v60 = vpop.f32.mrf.mxu2 }
 0x48d   : > { %v12041_v57 = vadd.f32 %v11967_v38, %v3221_v23  ;;  %v8735_v38 = vor.u32 %v10437_v59, %v8732_v45  ;;  %v2885_v29 = vadd.f32 %v2884_v60, %v11963_v0  ;;  %v12062_v23 = vpop.f32.mrf.mxu1  ;;  %v8722_v60 = vld [vmem:[%s16811_s4 + $0x240] sm:$0xf] }
 0x48e   : > { %v8723_v6 = vor.u32 %v10439_v9, %v8722_v60 }
 0x48f   : > { %3438 = vmatmul.bf16.gmra.mxu1 %v8735_v38 }
 0x490   : > { %v3053_v52 = vpop.f32.mrf.mxu3 }
 0x491   : > { %v3054_v53 = vadd.f32 %v3053_v52, %v2885_v29  ;;  %2926 = vmatmul.bf16.gmra.mxu2 %v8699_v32  ;;  %v3235_v32 = vpop.f32.mrf.mxu0  ;;  %v10443_v29 = vld [vmem:[%s16811_s4 + $0x27c] sm:$0xf]  ;;  %v10436_v52 = vld [vmem:[%s16811_s4 + $0x244] sm:$0xf] }
 0x493   : > { %v3223_v7 = vadd.f32 %v11981_v58, %v3054_v53  ;;  %v8724_v53 = vld [vmem:[%s16811_s4 + $0x258] sm:$0xf0] }
 0x494   : > { %v2887_v20 = vpop.f32.mrf.mxu2 }
 0x495   : > { %v12060_v17 = vadd.f32 %v11985_v41, %v3223_v7  ;;  %3095 = vmatmul.bf16.gmra.mxu3 %v8703_v30  ;;  %v2888_v21 = vadd.f32 %v2887_v20, %v11863_v2  ;;  %v8754_v41 = vld [vmem:[%s16811_s4 + $0x278] sm:$0xf]  ;;  %v10446_v2 = vld [vmem:[%s16811_s4 + $0x28c] sm:$0xf0]  ;;  %v3404_v38 = vpop.f32.mrf.mxu1 }
 0x496   : > { %v8755_v45 = vor.u32 %v10446_v2, %v8754_v41 }
 0x498   : > { %v3056_v28 = vpop.f32.mrf.mxu3 }
 0x499   : > { %v3057_v0 = vadd.f32 %v3056_v28, %v2888_v21  ;;  %v8727_v21 = vor.u32 %v10436_v52, %v8724_v53 }
 0x49b   : > { %v3226_v58 = vadd.f32 %v11993_v63, %v3057_v0  ;;  %v8756_v63 = vld [vmem:[%s16811_s4 + $0x290] sm:$0xf0]  ;;  %3274 = vmatmul.bf16.gmra.mxu0 %v8755_v45  ;;  %v12094_v0 = vpop.f32.mrf.mxu0 }
 0x49c   : > { %v2889_v59 = vpop.f32.mrf.mxu2 }
 0x49d   : > { %v12078_v48 = vadd.f32 %v3394_v36, %v3226_v58  ;;  %v8759_v36 = vor.u32 %v10443_v29, %v8756_v63  ;;  %v2890_v30 = vadd.f32 %v2889_v59, %v11873_v56  ;;  %v12098_v58 = vpop.f32.mrf.mxu1  ;;  %v8746_v56 = vld [vmem:[%s16811_s4 + $0x270] sm:$0xf] }
 0x49f   : > { %3443 = vmatmul.bf16.gmra.mxu1 %v8759_v36 }
 0x4a0   : > { %v3058_v7 = vpop.f32.mrf.mxu3 }
 0x4a1   : > { %v3059_v20 = vadd.f32 %v3058_v7, %v2890_v30  ;;  %2931 = vmatmul.bf16.gmra.mxu2 %v8723_v6  ;;  %v10449_v30 = vld [vmem:[%s16811_s4 + $0x2ac] sm:$0xf]  ;;  %v10442_v7 = vld [vmem:[%s16811_s4 + $0x274] sm:$0xf] }
 0x4a3   : > { %v3228_v28 = vadd.f32 %v12018_v5, %v3059_v20  ;;  %v10445_v5 = vld [vmem:[%s16811_s4 + $0x284] sm:$0xf0]  ;;  %v3240_v6 = vpop.f32.mrf.mxu0  ;;  %v8748_v20 = vld [vmem:[%s16811_s4 + $0x288] sm:$0xf0] }
 0x4a4   : > { %v2892_v60 = vpop.f32.mrf.mxu2  ;;  %v8747_v53 = vor.u32 %v10445_v5, %v8746_v56 }
 0x4a5   : > { %v12096_v9 = vadd.f32 %v3396_v13, %v3228_v28  ;;  %3100 = vmatmul.bf16.gmra.mxu3 %v8727_v21  ;;  %v2893_v41 = vadd.f32 %v2892_v60, %v11895_v18  ;;  %v8778_v13 = vld [vmem:[%s16811_s4 + $0x2a8] sm:$0xf]  ;;  %v10452_v18 = vld [vmem:[%s16811_s4 + $0x2bc] sm:$0xf0]  ;;  %v3409_v36 = vpop.f32.mrf.mxu1 }
 0x4a6   : > { %v8779_v63 = vor.u32 %v10452_v18, %v8778_v13  ;;  %v10451_v18 = vld [vmem:[%s16811_s4 + $0x2b4] sm:$0xf0] }
 0x4a8   : > { %v3061_v2 = vpop.f32.mrf.mxu3 }
 0x4a9   : > { %v3062_v45 = vadd.f32 %v3061_v2, %v2893_v41  ;;  %v8751_v41 = vor.u32 %v10442_v7, %v8748_v20 }
 0x4ab   : > { %v3231_v59 = vadd.f32 %v12031_v54, %v3062_v45  ;;  %v8780_v54 = vld [vmem:[%s16811_s4 + $0x2c0] sm:$0xf0]  ;;  %3279 = vmatmul.bf16.gmra.mxu0 %v8779_v63  ;;  %v12131_v2 = vpop.f32.mrf.mxu0 }
 0x4ac   : > { %v2894_v29 = vpop.f32.mrf.mxu2 }
 0x4ad   : > { %v12114_v52 = vadd.f32 %v3399_v27, %v3231_v59  ;;  %v8783_v27 = vor.u32 %v10449_v30, %v8780_v54  ;;  %v2895_v21 = vadd.f32 %v2894_v29, %v11839_v12  ;;  %v12133_v56 = vpop.f32.mrf.mxu1  ;;  %v8770_v12 = vld [vmem:[%s16811_s4 + $0x2a0] sm:$0xf] }
 0x4ae   : > { %v8771_v20 = vor.u32 %v10451_v18, %v8770_v12 }
 0x4af   : > { %3448 = vmatmul.bf16.gmra.mxu1 %v8783_v27 }
 0x4b0   : > { %v3063_v28 = vpop.f32.mrf.mxu3 }
 0x4b1   : > { %v12129_v60 = vadd.f32 %v3063_v28, %v2895_v21  ;;  %2936 = vmatmul.bf16.gmra.mxu2 %v8747_v53  ;;  %v8802_v53 = vld [vmem:[%s16811_s4 + $0x2d8] sm:$0xf]  ;;  %v10455_v21 = vld [vmem:[%s16811_s4 + $0x2dc] sm:$0xf]  ;;  %v10448_v28 = vld [vmem:[%s16811_s4 + $0x2a4] sm:$0xf] }
 0x4b3   : > { %v3245_v63 = vpop.f32.mrf.mxu0 }
 0x4b4   : > { %v2897_v45 = vpop.f32.mrf.mxu2 }
 0x4b5   : > { %3105 = vmatmul.bf16.gmra.mxu3 %v8751_v41  ;;  %v2898_v5 = vadd.f32 %v2897_v45, %v11807_v14  ;;  %v10458_v14 = vld [vmem:[%s16811_s4 + $0x2ec] sm:$0xf0]  ;;  %v3414_v27 = vpop.f32.mrf.mxu1  ;;  %v8772_v41 = vld [vmem:[%s16811_s4 + $0x2b8] sm:$0xf0] }
 0x4b6   : > { %v8803_v54 = vor.u32 %v10458_v14, %v8802_v53 }
 0x4b8   : > { %v3066_v59 = vpop.f32.mrf.mxu3 }
 0x4b9   : > { %v3067_v13 = vadd.f32 %v3066_v59, %v2898_v5 }
 0x4bb   : > { %v3236_v29 = vadd.f32 %v3235_v32, %v3067_v13  ;;  %v8804_v32 = vld [vmem:[%s16811_s4 + $0x2f0] sm:$0xf0]  ;;  %3284 = vmatmul.bf16.gmra.mxu0 %v8803_v54  ;;  %v8775_v13 = vor.u32 %v10448_v28, %v8772_v41  ;;  %v12165_v12 = vpop.f32.mrf.mxu0  ;;  %v8796_v41 = vld [vmem:[%s16811_s4 + $0x2e8] sm:$0xf0] }
 0x4bc   : > { %v2899_v30 = vpop.f32.mrf.mxu2 }
 0x4bd   : > { %v12148_v7 = vadd.f32 %v3404_v38, %v3236_v29  ;;  %v8807_v38 = vor.u32 %v10455_v21, %v8804_v32  ;;  %v2900_v45 = vadd.f32 %v2899_v30, %v11871_v26  ;;  %v12167_v29 = vpop.f32.mrf.mxu1  ;;  %v8794_v26 = vld [vmem:[%s16811_s4 + $0x2d0] sm:$0xf]  ;;  %v10457_v30 = vld [vmem:[%s16811_s4 + $0x2e4] sm:$0xf0] }
 0x4be   : > { %v8795_v28 = vor.u32 %v10457_v30, %v8794_v26  ;;  %v8818_v30 = vld [vmem:[%s16811_s4 + $0x300] sm:$0xf] }
 0x4bf   : > { %3453 = vmatmul.bf16.gmra.mxu1 %v8807_v38 }
 0x4c0   : > { %v3068_v5 = vpop.f32.mrf.mxu3 }
 0x4c1   : > { %v12163_v59 = vadd.f32 %v3068_v5, %v2900_v45  ;;  %2941 = vmatmul.bf16.gmra.mxu2 %v8771_v20 }
 0x4c3   : > { %v3250_v21 = vpop.f32.mrf.mxu0 }
 0x4c4   : > { %v2902_v18 = vpop.f32.mrf.mxu2 }
 0x4c5   : > { %3110 = vmatmul.bf16.gmra.mxu3 %v8775_v13  ;;  %v2903_v53 = vadd.f32 %v2902_v18, %v11775_v15  ;;  %v10454_v15 = vld [vmem:[%s16811_s4 + $0x2d4] sm:$0xf]  ;;  %v3419_v38 = vpop.f32.mrf.mxu1 }
 0x4c8   : > { %v3071_v14 = vpop.f32.mrf.mxu3 }
 0x4c9   : > { %v3072_v50 = vadd.f32 %v3071_v14, %v2903_v53 }
 0x4cb   : > { %v3241_v54 = vadd.f32 %v3240_v6, %v3072_v50  ;;  %v8799_v50 = vor.u32 %v10454_v15, %v8796_v41 }
 0x4cc   : > { %v2904_v20 = vpop.f32.mrf.mxu2 }
 0x4cd   : > { %v12176_v32 = vadd.f32 %v3409_v36, %v3241_v54  ;;  %v2905_v45 = vadd.f32 %v2904_v20, %v11795_v3  ;;  %v12187_v36 = vpop.f32.mrf.mxu0  ;;  %v12190_v14 = vpop.f32.mrf.mxu1  ;;  %v10463_v3 = vld [vmem:[%s16811_s4 + $0x314] sm:$0xf0] }
 0x4ce   : > { %v1681_v20 = vpop.permute.xlu1 %1680  ;;  %v8819_v41 = vor.u32 %v10463_v3, %v8818_v30 }
 0x4d0   : > { %v3073_v5 = vpop.f32.mrf.mxu3 }
 0x4d1   : > { %v12185_v13 = vadd.f32 %v3073_v5, %v2905_v45  ;;  %2946 = vmatmul.bf16.gmra.mxu2 %v8795_v28  ;;  %v8820_v45 = vld [vmem:[%s16811_s4 + $0x318] sm:$0xf0] }
 0x4d4   : > { %v2907_v6 = vpop.f32.mrf.mxu2 }
 0x4d5   : > { %3115 = vmatmul.bf16.gmra.mxu3 %v8799_v50  ;;  %v2908_v18 = vadd.f32 %v2907_v6, %v11805_v33  ;;  %v10460_v33 = vld [vmem:[%s16811_s4 + $0x304] sm:$0xf]  ;;  %v3255_v6 = vpop.f32.mrf.mxu0 }
 0x4d8   : > { %v3076_v53 = vpop.f32.mrf.mxu3 }
 0x4d9   : > { %v3077_v26 = vadd.f32 %v3076_v53, %v2908_v18  ;;  %v3424_v53 = vpop.f32.mrf.mxu1 }
 0x4db   : > { %v3246_v54 = vadd.f32 %v3245_v63, %v3077_v26  ;;  %v8823_v63 = vor.u32 %v10460_v33, %v8820_v45  ;;  %v1666_v26 = vpop.permute.xlu1 %1665 }
 0x4dc   : > { %v2909_v28 = vpop.f32.mrf.mxu2 }
 0x4dd   : > { %v12198_v15 = vadd.f32 %v3414_v27, %v3246_v54  ;;  %v2910_v5 = vadd.f32 %v2909_v28, %v11755_v61  ;;  %v10469_v61 = vld [vmem:[%s16811_s4 + $0x344] sm:$0xf0]  ;;  %v12215_v28 = vpop.f32.mrf.mxu0 }
 0x4e0   : > { %v3078_v50 = vpop.f32.mrf.mxu3 }
 0x4e1   : > { %v12207_v18 = vadd.f32 %v3078_v50, %v2910_v5  ;;  %2951 = vmatmul.bf16.gmra.mxu2 %v8819_v41  ;;  %v12217_v33 = vpop.f32.mrf.mxu1  ;;  %v8843_v50 = vor.u32 %v10469_v61, %v8842_v35 }
 0x4e4   : > { %v2912_v27 = vpop.f32.mrf.mxu2 }
 0x4e5   : > { %3120 = vmatmul.bf16.gmra.mxu3 %v8823_v63  ;;  %v2913_v30 = vadd.f32 %v2912_v27, %v1666_v26  ;;  %v1671_v63 = vpop.permute.xlu2 %1670  ;;  %v10466_v27 = vld [vmem:[%s16811_s4 + $0x334] sm:$0xf]  ;;  %v8844_v26 = vld [vmem:[%s16811_s4 + $0x348] sm:$0xf0] }
 0x4e8   : > { %v3081_v3 = vpop.f32.mrf.mxu3  ;;  %v3260_v25 = vpop.f32.mrf.mxu0 }
 0x4e9   : > { %v3082_v54 = vadd.f32 %v3081_v3, %v2913_v30 }
 0x4eb   : > { %v3251_v5 = vadd.f32 %v3250_v21, %v3082_v54  ;;  %v8847_v21 = vor.u32 %v10466_v27, %v8844_v26  ;;  %v10472_v26 = vld [vmem:[%s16811_s4 + $0x364] sm:$0xf] }
 0x4ec   : > { %v2914_v41 = vpop.f32.mrf.mxu2 }
 0x4ed   : > { %v12219_v45 = vadd.f32 %v3419_v38, %v3251_v5  ;;  %v2915_v30 = vadd.f32 %v2914_v41, %v1671_v63  ;;  %v3429_v38 = vpop.f32.mrf.mxu1  ;;  %v10475_v41 = vld [vmem:[%s16811_s4 + $0x374] sm:$0xf0] }
 0x4ee   : > { %v8867_v27 = vor.u32 %v10475_v41, %v8866_v49 }
 0x4f0   : > { %v3083_v3 = vpop.f32.mrf.mxu3 }
 0x4f1   : > { %v12227_v44 = vadd.f32 %v3083_v3, %v2915_v30  ;;  %2956 = vmatmul.bf16.gmra.mxu2 %v8843_v50  ;;  %v12244_v3 = vpop.f32.mrf.mxu0 }
 0x4f4   : > { %v2917_v54 = vpop.f32.mrf.mxu2 }
 0x4f5   : > { %3125 = vmatmul.bf16.gmra.mxu3 %v8847_v21  ;;  %v2918_v35 = vadd.f32 %v2917_v54, %v11945_v40  ;;  %v8868_v40 = vld [vmem:[%s16811_s4 + $0x378] sm:$0xf0] }
 0x4f8   : > { %v3086_v61 = vpop.f32.mrf.mxu3 }
 0x4f9   : > { %v3087_v5 = vadd.f32 %v3086_v61, %v2918_v35  ;;  %v12246_v35 = vpop.f32.mrf.mxu1  ;;  %v3265_v41 = vpop.f32.mrf.mxu0 }
 0x4fb   : > { %v3256_v63 = vadd.f32 %v3255_v6, %v3087_v5  ;;  %v8871_v6 = vor.u32 %v10472_v26, %v8868_v40  ;;  %v8892_v40 = vld [vmem:[%s16811_s4 + $0x3a8] sm:$0xf0] }
 0x4fc   : > { %v2919_v30 = vpop.f32.mrf.mxu2 }
 0x4fd   : > { %v12236_v50 = vadd.f32 %v3424_v53, %v3256_v63  ;;  %v2920_v21 = vadd.f32 %v2919_v30, %v1681_v20  ;;  %v10481_v20 = vld [vmem:[%s16811_s4 + $0x3a4] sm:$0xf0] }
 0x4fe   : > { %v8891_v26 = vor.u32 %v10481_v20, %v8890_v43 }
 0x500   : > { %v3088_v54 = vpop.f32.mrf.mxu3 }
 0x501   : > { %v12248_v61 = vadd.f32 %v3088_v54, %v2920_v21  ;;  %2961 = vmatmul.bf16.gmra.mxu2 %v8867_v27  ;;  %v3434_v30 = vpop.f32.mrf.mxu1 }
 0x504   : > { %v2922_v53 = vpop.f32.mrf.mxu2 }
 0x505   : > { %3130 = vmatmul.bf16.gmra.mxu3 %v8871_v6  ;;  %v2923_v49 = vadd.f32 %v2922_v53, %v11905_v8  ;;  %v10478_v8 = vld [vmem:[%s16811_s4 + $0x394] sm:$0xf] }
 0x508   : > { %v3091_v5 = vpop.f32.mrf.mxu3 }
 0x509   : > { %v3092_v63 = vadd.f32 %v3091_v5, %v2923_v49  ;;  %v8895_v5 = vor.u32 %v10478_v8, %v8892_v40 }
 0x50b   : > { %v3261_v21 = vadd.f32 %v3260_v25, %v3092_v63  ;;  %v12268_v25 = vpop.f32.mrf.mxu0  ;;  %v12270_v63 = vpop.f32.mrf.mxu1 }
 0x50c   : > { %v2924_v54 = vpop.f32.mrf.mxu2  ;;  %16961 = vst [vmem:[#allocation56_spill] sm:$0xff] %v12270_v63  ;;  %v8938_v63 = vld [vmem:[%s16811_s4 + $0x3f0] sm:$0xf] }
 0x50d   : > { %v12257_v27 = vadd.f32 %v3429_v38, %v3261_v21  ;;  %v2925_v6 = vadd.f32 %v2924_v54, %v11909_v39  ;;  %v10487_v39 = vld [vmem:[%s16811_s4 + $0x3d4] sm:$0xf0] }
 0x510   : > { %v3093_v53 = vpop.f32.mrf.mxu3 }
 0x511   : > { %v12266_v49 = vadd.f32 %v3093_v53, %v2925_v6  ;;  %2966 = vmatmul.bf16.gmra.mxu2 %v8891_v26  ;;  %v8915_v6 = vor.u32 %v10487_v39, %v8914_v37  ;;  %v8916_v53 = vld [vmem:[%s16811_s4 + $0x3d8] sm:$0xf0] }
 0x513   : > { %v3270_v8 = vpop.f32.mrf.mxu0 }
 0x514   : > { %v2927_v38 = vpop.f32.mrf.mxu2 }
 0x515   : > { %3135 = vmatmul.bf16.gmra.mxu3 %v8895_v5  ;;  %v2928_v43 = vadd.f32 %v2927_v38, %v11941_v47  ;;  %v10484_v47 = vld [vmem:[%s16811_s4 + $0x3c4] sm:$0xf]  ;;  %v3439_v5 = vpop.f32.mrf.mxu1 }
 0x518   : > { %v3096_v20 = vpop.f32.mrf.mxu3 }
 0x519   : > { %v3097_v21 = vadd.f32 %v3096_v20, %v2928_v43 }
 0x51b   : > { %v3266_v54 = vadd.f32 %v3265_v41, %v3097_v21  ;;  %v8919_v41 = vor.u32 %v10484_v47, %v8916_v53 }
 0x51c   : > { %v2929_v26 = vpop.f32.mrf.mxu2 }
 0x51d   : > { %v12279_v40 = vadd.f32 %v3434_v30, %v3266_v54  ;;  %v2930_v38 = vadd.f32 %v2929_v26, %v11875_v19  ;;  %v12290_v30 = vpop.f32.mrf.mxu0  ;;  %v12293_v54 = vpop.f32.mrf.mxu1  ;;  %v10493_v19 = vld [vmem:[%s16811_s4 + $0x404] sm:$0xf0] }
 0x51e   : > { %v8939_v53 = vor.u32 %v10493_v19, %v8938_v63 }
 0x520   : > { %v3098_v43 = vpop.f32.mrf.mxu3 }
 0x521   : > { %v12288_v20 = vadd.f32 %v3098_v43, %v2930_v38  ;;  %2971 = vmatmul.bf16.gmra.mxu2 %v8915_v6  ;;  %v8940_v38 = vld [vmem:[%s16811_s4 + $0x408] sm:$0xf0] }
 0x524   : > { %v2932_v21 = vpop.f32.mrf.mxu2 }
 0x525   : > { %3140 = vmatmul.bf16.gmra.mxu3 %v8919_v41  ;;  %v2933_v37 = vadd.f32 %v2932_v21, %v11855_v62  ;;  %v10490_v62 = vld [vmem:[%s16811_s4 + $0x3f4] sm:$0xf]  ;;  %v3275_v21 = vpop.f32.mrf.mxu0 }
 0x528   : > { %v3101_v39 = vpop.f32.mrf.mxu3 }
 0x529   : > { %v3102_v46 = vadd.f32 %v3101_v39, %v2933_v37 }
 0x52b   : > { %v3271_v26 = vadd.f32 %v3270_v8, %v3102_v46  ;;  %v8943_v46 = vor.u32 %v10490_v62, %v8940_v38  ;;  %v3444_v8 = vpop.f32.mrf.mxu1 }
 0x52c   : > { %v2934_v6 = vpop.f32.mrf.mxu2 }
 0x52d   : > { %v12301_v47 = vadd.f32 %v3439_v5, %v3271_v26  ;;  %v2935_v43 = vadd.f32 %v2934_v6, %v11907_v55  ;;  %v8962_v26 = vld [vmem:[%s16811_s4 + $0x420] sm:$0xf]  ;;  %v10499_v55 = vld [vmem:[%s16811_s4 + $0x434] sm:$0xf0]  ;;  %v12319_v6 = vpop.f32.mrf.mxu0 }
 0x530   : > { %v3103_v41 = vpop.f32.mrf.mxu3 }
 0x531   : > { %v12310_v37 = vadd.f32 %v3103_v41, %v2935_v43  ;;  %2976 = vmatmul.bf16.gmra.mxu2 %v8939_v53  ;;  %v8963_v41 = vor.u32 %v10499_v55, %v8962_v26 }
 0x533   : > { %v12321_v62 = vpop.f32.mrf.mxu1 }
 0x534   : > { %v2937_v5 = vpop.f32.mrf.mxu2  ;;  %16962 = vst [vmem:[#allocation57_spill] sm:$0xff] %v12321_v62 }
 0x535   : > { %3145 = vmatmul.bf16.gmra.mxu3 %v8943_v46  ;;  %v2938_v63 = vadd.f32 %v2937_v5, %v11809_v1  ;;  %v10496_v1 = vld [vmem:[%s16811_s4 + $0x424] sm:$0xf]  ;;  %v8964_v46 = vld [vmem:[%s16811_s4 + $0x438] sm:$0xf0]  ;;  %v3280_v62 = vpop.f32.mrf.mxu0 }
 0x538   : > { %v3106_v39 = vpop.f32.mrf.mxu3 }
 0x539   : > { %v3107_v19 = vadd.f32 %v3106_v39, %v2938_v63 }
 0x53b   : > { %v3276_v43 = vadd.f32 %v3275_v21, %v3107_v19  ;;  %v8967_v21 = vor.u32 %v10496_v1, %v8964_v46 }
 0x53c   : > { %v2939_v53 = vpop.f32.mrf.mxu2 }
 0x53d   : > { %v12323_v38 = vadd.f32 %v3444_v8, %v3276_v43  ;;  %v2940_v5 = vadd.f32 %v2939_v53, %v11837_v34  ;;  %v3449_v8 = vpop.f32.mrf.mxu1  ;;  %v10505_v34 = vld [vmem:[%s16811_s4 + $0x464] sm:$0xf0]  ;;  %v12343_v46 = vpop.f32.mrf.mxu0 }
 0x53e   : > { %16965 = vst [vmem:[#allocation60_spill] sm:$0xff] %v12343_v46  ;;  %v9010_v46 = vld [vmem:[%s16811_s4 + $0x480] sm:$0xf] }
 0x53f   : > { %16963 = vst [vmem:[#allocation58_spill] sm:$0xff] %v12323_v38  ;;  %v8986_v38 = vld [vmem:[%s16811_s4 + $0x450] sm:$0xf] }
 0x540   : > { %v3108_v63 = vpop.f32.mrf.mxu3  ;;  %v8987_v1 = vor.u32 %v10505_v34, %v8986_v38 }
 0x541   : > { %v12332_v39 = vadd.f32 %v3108_v63, %v2940_v5  ;;  %2981 = vmatmul.bf16.gmra.mxu2 %v8963_v41  ;;  %v8988_v63 = vld [vmem:[%s16811_s4 + $0x468] sm:$0xf0] }
 0x544   : > { %v2942_v19 = vpop.f32.mrf.mxu2 }
 0x545   : > { %3150 = vmatmul.bf16.gmra.mxu3 %v8967_v21  ;;  %v2943_v26 = vadd.f32 %v2942_v19, %v11841_v11  ;;  %v10502_v11 = vld [vmem:[%s16811_s4 + $0x454] sm:$0xf]  ;;  %v3285_v34 = vpop.f32.mrf.mxu0 }
 0x548   : > { %v3111_v55 = vpop.f32.mrf.mxu3 }
 0x549   : > { %v3112_v43 = vadd.f32 %v3111_v55, %v2943_v26  ;;  %v12352_v26 = vpop.f32.mrf.mxu1 }
 0x54b   : > { %v3281_v53 = vadd.f32 %v3280_v62, %v3112_v43 }
 0x54c   : > { %v2944_v5 = vpop.f32.mrf.mxu2 }
 0x54d   : > { %v12341_v41 = vadd.f32 %v3449_v8, %v3281_v53  ;;  %v2945_v21 = vadd.f32 %v2944_v5, %v11803_v42  ;;  %v8991_v8 = vor.u32 %v10502_v11, %v8988_v63  ;;  %v10511_v42 = vld [vmem:[%s16811_s4 + $0x494] sm:$0xf0]  ;;  %v9012_v63 = vld [vmem:[%s16811_s4 + $0x498] sm:$0xf0] }
 0x54e   : > { %v9011_v11 = vor.u32 %v10511_v42, %v9010_v46  ;;  %v9034_v46 = vld [vmem:[%s16811_s4 + $0x4b0] sm:$0xf]  ;;  %v10514_v42 = vld [vmem:[%s16811_s4 + $0x4b4] sm:$0xf] }
 0x54f   : > { %16964 = vst [vmem:[#allocation59_spill] sm:$0xff] %v12341_v41 }
 0x550   : > { %v3113_v19 = vpop.f32.mrf.mxu3 }
 0x551   : > { %v12354_v62 = vadd.f32 %v3113_v19, %v2945_v21  ;;  %2986 = vmatmul.bf16.gmra.mxu2 %v8987_v1  ;;  %v3454_v41 = vpop.f32.mrf.mxu1 }
 0x554   : > { %v2947_v38 = vpop.f32.mrf.mxu2 }
 0x555   : > { %3155 = vmatmul.bf16.gmra.mxu3 %v8991_v8  ;;  %v2948_v55 = vadd.f32 %v2947_v38, %v11773_v10  ;;  %v10508_v10 = vld [vmem:[%s16811_s4 + $0x484] sm:$0xf] }
 0x558   : > { %v3116_v43 = vpop.f32.mrf.mxu3 }
 0x559   : > { %v3117_v53 = vadd.f32 %v3116_v43, %v2948_v55  ;;  %v9015_v55 = vor.u32 %v10508_v10, %v9012_v63 }
 0x55b   : > { %v3286_v5 = vadd.f32 %v3285_v34, %v3117_v53  ;;  %v10517_v34 = vld [vmem:[%s16811_s4 + $0x4c4] sm:$0xf0] }
 0x55c   : > { %v2949_v21 = vpop.f32.mrf.mxu2 }
 0x55d   : > { %v12363_v1 = vadd.f32 %v3454_v41, %v3286_v5  ;;  %v2950_v19 = vadd.f32 %v2949_v21, %v11835_v16  ;;  %v9035_v16 = vor.u32 %v10517_v34, %v9034_v46  ;;  %v9036_v5 = vld [vmem:[%s16811_s4 + $0x4c8] sm:$0xf0]  ;;  %v10520_v34 = vld [vmem:[%s16811_s4 + $0x4e4] sm:$0xf] }
 0x560   : > { %v3118_v8 = vpop.f32.mrf.mxu3 }
 0x561   : > { %v12372_v38 = vadd.f32 %v3118_v8, %v2950_v19  ;;  %2991 = vmatmul.bf16.gmra.mxu2 %v9011_v11  ;;  %v9039_v11 = vor.u32 %v10514_v42, %v9036_v5  ;;  %v9058_v19 = vld [vmem:[%s16811_s4 + $0x4e0] sm:$0xf]  ;;  %v10523_v8 = vld [vmem:[%s16811_s4 + $0x4f4] sm:$0xf0] }
 0x562   : > { %v9059_v46 = vor.u32 %v10523_v8, %v9058_v19  ;;  %v9082_v19 = vld [vmem:[%s16811_s4 + $0x510] sm:$0xf]  ;;  %v10529_v8 = vld [vmem:[%s16811_s4 + $0x524] sm:$0xf0] }
 0x564   : > { %v12374_v43 = vpop.f32.mrf.mxu2 }
 0x565   : > { %16966 = vst [vmem:[#allocation61_spill] sm:$0xff] %v12374_v43  ;;  %3160 = vmatmul.bf16.gmra.mxu3 %v9015_v55 }
 0x568   : > { %v12376_v41 = vpop.f32.mrf.mxu3 }
 0x569   : > { %16967 = vst [vmem:[#allocation62_spill] sm:$0xff] %v12376_v41  ;;  %v9083_v41 = vor.u32 %v10529_v8, %v9082_v19  ;;  %v9106_v19 = vld [vmem:[%s16811_s4 + $0x540] sm:$0xf]  ;;  %v10535_v8 = vld [vmem:[%s16811_s4 + $0x554] sm:$0xf0] }
 0x56c   : > { %v12384_v53 = vpop.f32.mrf.mxu2 }
 0x56d   : > { %16968 = vst [vmem:[#allocation63_spill] sm:$0xff] %v12384_v53 }
 0x570   : > { %v12392_v21 = vpop.f32.mrf.mxu3 }
 0x571   : > { %16969 = vst [vmem:[#allocation64_spill] sm:$0xff] %v12392_v21  ;;  %2996 = vmatmul.bf16.gmra.mxu2 %v9035_v16  ;;  %v9060_v16 = vld [vmem:[%s16811_s4 + $0x4f8] sm:$0xf0] }
 0x572   : > { %v9063_v5 = vor.u32 %v10520_v34, %v9060_v16  ;;  %v9084_v34 = vld [vmem:[%s16811_s4 + $0x528] sm:$0xf0] }
 0x574   : > { %v12394_v10 = vpop.f32.mrf.mxu2 }
 0x575   : > { %16970 = vst [vmem:[#allocation65_spill] sm:$0xff] %v12394_v10  ;;  %3165 = vmatmul.bf16.gmra.mxu3 %v9039_v11 }
 0x578   : > { %v12396_v63 = vpop.f32.mrf.mxu3 }
 0x579   : > { %16971 = vst [vmem:[#allocation66_spill] sm:$0xff] %v12396_v63 }
 0x57c   : > { %v12404_v55 = vpop.f32.mrf.mxu2 }
 0x57d   : > { %16972 = vst [vmem:[#allocation67_spill] sm:$0xff] %v12404_v55 }
 0x580   : > { %v12412_v42 = vpop.f32.mrf.mxu3 }
 0x581   : > { %16973 = vst [vmem:[#allocation68_spill] sm:$0xff] %v12412_v42  ;;  %3001 = vmatmul.bf16.gmra.mxu2 %v9059_v46  ;;  %v10526_v46 = vld [vmem:[%s16811_s4 + $0x514] sm:$0xf]  ;;  %v9107_v42 = vor.u32 %v10535_v8, %v9106_v19  ;;  %v9130_v19 = vld [vmem:[%s16811_s4 + $0x570] sm:$0xf] }
 0x582   : > { %v10541_v8 = vld [vmem:[%s16811_s4 + $0x584] sm:$0xf0] }
 0x583   : > { %v9131_v43 = vor.u32 %v10541_v8, %v9130_v19  ;;  %v9154_v19 = vld [vmem:[%s16811_s4 + $0x5a0] sm:$0xf]  ;;  %v10547_v8 = vld [vmem:[%s16811_s4 + $0x5b4] sm:$0xf0] }
 0x584   : > { %v12414_v11 = vpop.f32.mrf.mxu2 }
 0x585   : > { %16974 = vst [vmem:[#allocation69_spill] sm:$0xff] %v12414_v11  ;;  %3170 = vmatmul.bf16.gmra.mxu3 %v9063_v5  ;;  %v9087_v5 = vor.u32 %v10526_v46, %v9084_v34  ;;  %v9108_v46 = vld [vmem:[%s16811_s4 + $0x558] sm:$0xf0] }
 0x588   : > { %v12416_v63 = vpop.f32.mrf.mxu3 }
 0x589   : > { %16975 = vst [vmem:[#allocation70_spill] sm:$0xff] %v12416_v63 }
 0x58c   : > { %v12424_v10 = vpop.f32.mrf.mxu2 }
 0x58d   : > { %16976 = vst [vmem:[#allocation71_spill] sm:$0xff] %v12424_v10 }
 0x590   : > { %v12432_v16 = vpop.f32.mrf.mxu3 }
 0x591   : > { %16977 = vst [vmem:[#allocation72_spill] sm:$0xff] %v12432_v16  ;;  %3006 = vmatmul.bf16.gmra.mxu2 %v9083_v41  ;;  %v10532_v41 = vld [vmem:[%s16811_s4 + $0x544] sm:$0xf] }
 0x594   : > { %v12434_v63 = vpop.f32.mrf.mxu2 }
 0x595   : > { %16978 = vst [vmem:[#allocation73_spill] sm:$0xff] %v12434_v63  ;;  %3175 = vmatmul.bf16.gmra.mxu3 %v9087_v5  ;;  %v9111_v5 = vor.u32 %v10532_v41, %v9108_v46  ;;  %v9132_v41 = vld [vmem:[%s16811_s4 + $0x588] sm:$0xf0] }
 0x598   : > { %v12436_v11 = vpop.f32.mrf.mxu3 }
 0x599   : > { %16979 = vst [vmem:[#allocation74_spill] sm:$0xff] %v12436_v11 }
 0x59c   : > { %v12444_v10 = vpop.f32.mrf.mxu2 }
 0x59d   : > { %16980 = vst [vmem:[#allocation75_spill] sm:$0xff] %v12444_v10  ;;  %v9155_v10 = vor.u32 %v10547_v8, %v9154_v19  ;;  %v9178_v19 = vld [vmem:[%s16811_s4 + $0x5d0] sm:$0xf]  ;;  %v10553_v8 = vld [vmem:[%s16811_s4 + $0x5e4] sm:$0xf0] }
 0x5a0   : > { %v12452_v34 = vpop.f32.mrf.mxu3 }
 0x5a1   : > { %16981 = vst [vmem:[#allocation76_spill] sm:$0xff] %v12452_v34  ;;  %3011 = vmatmul.bf16.gmra.mxu2 %v9107_v42  ;;  %v10538_v42 = vld [vmem:[%s16811_s4 + $0x574] sm:$0xf] }
 0x5a4   : > { %v12454_v16 = vpop.f32.mrf.mxu2 }
 0x5a5   : > { %16982 = vst [vmem:[#allocation77_spill] sm:$0xff] %v12454_v16  ;;  %3180 = vmatmul.bf16.gmra.mxu3 %v9111_v5  ;;  %v9135_v5 = vor.u32 %v10538_v42, %v9132_v41  ;;  %v9156_v42 = vld [vmem:[%s16811_s4 + $0x5b8] sm:$0xf0] }
 0x5a8   : > { %v12456_v55 = vpop.f32.mrf.mxu3 }
 0x5a9   : > { %16983 = vst [vmem:[#allocation78_spill] sm:$0xff] %v12456_v55 }
 0x5ac   : > { %v12464_v21 = vpop.f32.mrf.mxu2 }
 0x5ad   : > { %16984 = vst [vmem:[#allocation79_spill] sm:$0xff] %v12464_v21 }
 0x5b0   : > { %v12472_v46 = vpop.f32.mrf.mxu3 }
 0x5b1   : > { %16985 = vst [vmem:[#allocation80_spill] sm:$0xff] %v12472_v46  ;;  %3016 = vmatmul.bf16.gmra.mxu2 %v9131_v43  ;;  %v10544_v43 = vld [vmem:[%s16811_s4 + $0x5a4] sm:$0xf] }
 0x5b4   : > { %v12474_v53 = vpop.f32.mrf.mxu2 }
 0x5b5   : > { %16986 = vst [vmem:[#allocation81_spill] sm:$0xff] %v12474_v53  ;;  %3185 = vmatmul.bf16.gmra.mxu3 %v9135_v5  ;;  %v9159_v5 = vor.u32 %v10544_v43, %v9156_v42  ;;  %v9180_v43 = vld [vmem:[%s16811_s4 + $0x5e8] sm:$0xf0] }
 0x5b8   : > { %v12476_v34 = vpop.f32.mrf.mxu3 }
 0x5b9   : > { %16987 = vst [vmem:[#allocation82_spill] sm:$0xff] %v12476_v34 }
 0x5bc   : > { %v12484_v11 = vpop.f32.mrf.mxu2 }
 0x5bd   : > { %16988 = vst [vmem:[#allocation83_spill] sm:$0xff] %v12484_v11  ;;  %v9179_v11 = vor.u32 %v10553_v8, %v9178_v19  ;;  %v8450_v19 = vld [vmem:[%s16811_s4 + $0x10] sm:$0xf]  ;;  %v10369_v8 = vld [vmem:[%s16811_s4 + $0x24] sm:$0xf0] }
 0x5be   : > { %v8451_v34 = vor.u32 %v10369_v8, %v8450_v19  ;;  %v8474_v19 = vld [vmem:[%s16811_s4 + $0x40] sm:$0xf]  ;;  %v10375_v8 = vld [vmem:[%s16811_s4 + $0x54] sm:$0xf0] }
 0x5c0   : > { %v12492_v41 = vpop.f32.mrf.mxu3 }
 0x5c1   : > { %16989 = vst [vmem:[#allocation84_spill] sm:$0xff] %v12492_v41  ;;  %3021 = vmatmul.bf16.gmra.mxu2 %v9155_v10  ;;  %v10550_v10 = vld [vmem:[%s16811_s4 + $0x5d4] sm:$0xf] }
 0x5c4   : > { %v12494_v63 = vpop.f32.mrf.mxu2 }
 0x5c5   : > { %16990 = vst [vmem:[#allocation85_spill] sm:$0xff] %v12494_v63  ;;  %3190 = vmatmul.bf16.gmra.mxu3 %v9159_v5  ;;  %v9183_v5 = vor.u32 %v10550_v10, %v9180_v43  ;;  %v8452_v10 = vld [vmem:[%s16811_s4 + $0x28] sm:$0xf0] }
 0x5c8   : > { %v12496_v55 = vpop.f32.mrf.mxu3 }
 0x5c9   : > { %16991 = vst [vmem:[#allocation86_spill] sm:$0xff] %v12496_v55 }
 0x5cc   : > { %v12504_v16 = vpop.f32.mrf.mxu2 }
 0x5cd   : > { %16992 = vst [vmem:[#allocation87_spill] sm:$0xff] %v12504_v16 }
 0x5d0   : > { %v12512_v42 = vpop.f32.mrf.mxu3 }
 0x5d1   : > { %16993 = vst [vmem:[#allocation88_spill] sm:$0xff] %v12512_v42  ;;  %3026 = vmatmul.bf16.gmra.mxu2 %v9179_v11  ;;  %v10366_v11 = vld [vmem:[%s16811_s4 + $0x14] sm:$0xf] }
 0x5d4   : > { %v12514_v41 = vpop.f32.mrf.mxu2 }
 0x5d5   : > { %16994 = vst [vmem:[#allocation89_spill] sm:$0xff] %v12514_v41  ;;  %3195 = vmatmul.bf16.gmra.mxu3 %v9183_v5  ;;  %v8455_v5 = vor.u32 %v10366_v11, %v8452_v10  ;;  %v8475_v41 = vor.u32 %v10375_v8, %v8474_v19  ;;  %v8476_v11 = vld [vmem:[%s16811_s4 + $0x58] sm:$0xf0]  ;;  %v8498_v19 = vld [vmem:[%s16811_s4 + $0x70] sm:$0xf] }
 0x5d6   : > { %v10381_v8 = vld [vmem:[%s16811_s4 + $0x84] sm:$0xf0] }
 0x5d8   : > { %v12516_v46 = vpop.f32.mrf.mxu3 }
 0x5d9   : > { %16995 = vst [vmem:[#allocation90_spill] sm:$0xff] %v12516_v46 }
 0x5dc   : > { %v12524_v21 = vpop.f32.mrf.mxu2 }
 0x5dd   : > { %16996 = vst [vmem:[#allocation91_spill] sm:$0xff] %v12524_v21 }
 0x5e0   : > { %v12532_v43 = vpop.f32.mrf.mxu3 }
 0x5e1   : > { %16997 = vst [vmem:[#allocation92_spill] sm:$0xff] %v12532_v43  ;;  %3547 = vmatmul.bf16.vlgmr.msrb.gmra.mxu2 %v8451_v34  ;;  %v10372_v34 = vld [vmem:[%s16811_s4 + $0x44] sm:$0xf]  ;;  %v8499_v43 = vor.u32 %v10381_v8, %v8498_v19  ;;  %v8522_v19 = vld [vmem:[%s16811_s4 + $0xa0] sm:$0xf] }
 0x5e2   : > { %v10387_v8 = vld [vmem:[%s16811_s4 + $0xb4] sm:$0xf0] }
 0x5e4   : > { %v12534_v53 = vpop.f32.mrf.mxu2 }
 0x5e5   : > { %16998 = vst [vmem:[#allocation93_spill] sm:$0xff] %v12534_v53  ;;  %3716 = vmatmul.bf16.vlgmr.msrb.gmra.mxu3 %v8455_v5  ;;  %v8479_v5 = vor.u32 %v10372_v34, %v8476_v11  ;;  %v8500_v34 = vld [vmem:[%s16811_s4 + $0x88] sm:$0xf0] }
 0x5e8   : > { %v12536_v46 = vpop.f32.mrf.mxu3 }
 0x5e9   : > { %16999 = vst [vmem:[#allocation94_spill] sm:$0xff] %v12536_v46 }
 0x5ec   : > { %v12544_v21 = vpop.f32.mrf.mxu2 }
 0x5ed   : > { %17000 = vst [vmem:[#allocation95_spill] sm:$0xff] %v12544_v21 }
 0x5f0   : > { %v12552_v10 = vpop.f32.mrf.mxu3 }
 0x5f1   : > { %17001 = vst [vmem:[#allocation96_spill] sm:$0xff] %v12552_v10  ;;  %3552 = vmatmul.bf16.gmra.mxu2 %v8475_v41  ;;  %v10378_v41 = vld [vmem:[%s16811_s4 + $0x74] sm:$0xf] }
 0x5f4   : > { %v12554_v46 = vpop.f32.mrf.mxu2 }
 0x5f5   : > { %17002 = vst [vmem:[#allocation97_spill] sm:$0xff] %v12554_v46  ;;  %3721 = vmatmul.bf16.gmra.mxu3 %v8479_v5  ;;  %v8503_v5 = vor.u32 %v10378_v41, %v8500_v34  ;;  %v8523_v46 = vor.u32 %v10387_v8, %v8522_v19  ;;  %v8524_v41 = vld [vmem:[%s16811_s4 + $0xb8] sm:$0xf0]  ;;  %v8546_v19 = vld [vmem:[%s16811_s4 + $0xd0] sm:$0xf] }
 0x5f6   : > { %v10393_v8 = vld [vmem:[%s16811_s4 + $0xe4] sm:$0xf0] }
 0x5f8   : > { %v12556_v53 = vpop.f32.mrf.mxu3 }
 0x5f9   : > { %17003 = vst [vmem:[#allocation98_spill] sm:$0xff] %v12556_v53 }
 0x5fc   : > { %v12564_v21 = vpop.f32.mrf.mxu2 }
 0x5fd   : > { %17004 = vst [vmem:[#allocation99_spill] sm:$0xff] %v12564_v21 }
 0x600   : > { %v12572_v11 = vpop.f32.mrf.mxu3 }
 0x601   : > { %17005 = vst [vmem:[#allocation100_spill] sm:$0xff] %v12572_v11  ;;  %3557 = vmatmul.bf16.gmra.mxu2 %v8499_v43  ;;  %v10384_v43 = vld [vmem:[%s16811_s4 + $0xa4] sm:$0xf] }
 0x604   : > { %v12574_v10 = vpop.f32.mrf.mxu2 }
 0x605   : > { %17006 = vst [vmem:[#allocation101_spill] sm:$0xff] %v12574_v10  ;;  %3726 = vmatmul.bf16.gmra.mxu3 %v8503_v5  ;;  %v8527_v5 = vor.u32 %v10384_v43, %v8524_v41  ;;  %v8547_v10 = vor.u32 %v10393_v8, %v8546_v19  ;;  %v8548_v43 = vld [vmem:[%s16811_s4 + $0xe8] sm:$0xf0]  ;;  %v8570_v19 = vld [vmem:[%s16811_s4 + $0x100] sm:$0xf] }
 0x606   : > { %v10399_v8 = vld [vmem:[%s16811_s4 + $0x114] sm:$0xf0] }
 0x608   : > { %v12576_v53 = vpop.f32.mrf.mxu3 }
 0x609   : > { %17007 = vst [vmem:[#allocation102_spill] sm:$0xff] %v12576_v53 }
 0x60c   : > { %v12584_v21 = vpop.f32.mrf.mxu2 }
 0x60d   : > { %17008 = vst [vmem:[#allocation103_spill] sm:$0xff] %v12584_v21 }
 0x610   : > { %v12592_v34 = vpop.f32.mrf.mxu3 }
 0x611   : > { %17009 = vst [vmem:[#allocation104_spill] sm:$0xff] %v12592_v34  ;;  %3562 = vmatmul.bf16.gmra.mxu2 %v8523_v46  ;;  %v10390_v46 = vld [vmem:[%s16811_s4 + $0xd4] sm:$0xf] }
 0x614   : > { %v12594_v11 = vpop.f32.mrf.mxu2 }
 0x615   : > { %17010 = vst [vmem:[#allocation105_spill] sm:$0xff] %v12594_v11  ;;  %3731 = vmatmul.bf16.gmra.mxu3 %v8527_v5  ;;  %v8551_v5 = vor.u32 %v10390_v46, %v8548_v43  ;;  %v8571_v11 = vor.u32 %v10399_v8, %v8570_v19  ;;  %v8572_v46 = vld [vmem:[%s16811_s4 + $0x118] sm:$0xf0]  ;;  %v8594_v19 = vld [vmem:[%s16811_s4 + $0x130] sm:$0xf] }
 0x616   : > { %v10405_v8 = vld [vmem:[%s16811_s4 + $0x144] sm:$0xf0] }
 0x618   : > { %v12596_v53 = vpop.f32.mrf.mxu3 }
 0x619   : > { %17011 = vst [vmem:[#allocation106_spill] sm:$0xff] %v12596_v53 }
 0x61c   : > { %v12604_v21 = vpop.f32.mrf.mxu2 }
 0x61d   : > { %17012 = vst [vmem:[#allocation107_spill] sm:$0xff] %v12604_v21 }
 0x620   : > { %v12612_v41 = vpop.f32.mrf.mxu3 }
 0x621   : > { %17013 = vst [vmem:[#allocation108_spill] sm:$0xff] %v12612_v41  ;;  %3567 = vmatmul.bf16.gmra.mxu2 %v8547_v10  ;;  %v10396_v10 = vld [vmem:[%s16811_s4 + $0x104] sm:$0xf] }
 0x624   : > { %v12614_v34 = vpop.f32.mrf.mxu2 }
 0x625   : > { %17014 = vst [vmem:[#allocation109_spill] sm:$0xff] %v12614_v34  ;;  %3736 = vmatmul.bf16.gmra.mxu3 %v8551_v5  ;;  %v8575_v5 = vor.u32 %v10396_v10, %v8572_v46  ;;  %v8595_v34 = vor.u32 %v10405_v8, %v8594_v19  ;;  %v8596_v10 = vld [vmem:[%s16811_s4 + $0x148] sm:$0xf0]  ;;  %v8618_v19 = vld [vmem:[%s16811_s4 + $0x160] sm:$0xf] }
 0x626   : > { %v10411_v8 = vld [vmem:[%s16811_s4 + $0x174] sm:$0xf0] }
 0x628   : > { %v12616_v53 = vpop.f32.mrf.mxu3 }
 0x629   : > { %17015 = vst [vmem:[#allocation110_spill] sm:$0xff] %v12616_v53 }
 0x62c   : > { %v12624_v21 = vpop.f32.mrf.mxu2 }
 0x62d   : > { %17016 = vst [vmem:[#allocation111_spill] sm:$0xff] %v12624_v21 }
 0x630   : > { %v12632_v43 = vpop.f32.mrf.mxu3 }
 0x631   : > { %17017 = vst [vmem:[#allocation112_spill] sm:$0xff] %v12632_v43  ;;  %3572 = vmatmul.bf16.gmra.mxu2 %v8571_v11  ;;  %v10402_v11 = vld [vmem:[%s16811_s4 + $0x134] sm:$0xf] }
 0x634   : > { %v12634_v41 = vpop.f32.mrf.mxu2 }
 0x635   : > { %17018 = vst [vmem:[#allocation113_spill] sm:$0xff] %v12634_v41  ;;  %3741 = vmatmul.bf16.gmra.mxu3 %v8575_v5  ;;  %v8599_v5 = vor.u32 %v10402_v11, %v8596_v10  ;;  %v8619_v41 = vor.u32 %v10411_v8, %v8618_v19  ;;  %v8620_v11 = vld [vmem:[%s16811_s4 + $0x178] sm:$0xf0]  ;;  %v10464_v19 = vld [vmem:[%s16811_s4 + $0x31c] sm:$0xf0] }
 0x638   : > { %v12636_v53 = vpop.f32.mrf.mxu3 }
 0x639   : > { %17019 = vst [vmem:[#allocation114_spill] sm:$0xff] %v12636_v53 }
 0x63c   : > { %v12644_v21 = vpop.f32.mrf.mxu2 }
 0x63d   : > { %17020 = vst [vmem:[#allocation115_spill] sm:$0xff] %v12644_v21 }
 0x640   : > { %v12652_v46 = vpop.f32.mrf.mxu3 }
 0x641   : > { %17021 = vst [vmem:[#allocation116_spill] sm:$0xff] %v12652_v46  ;;  %3577 = vmatmul.bf16.gmra.mxu2 %v8595_v34  ;;  %v10408_v34 = vld [vmem:[%s16811_s4 + $0x164] sm:$0xf] }
 0x644   : > { %v12654_v43 = vpop.f32.mrf.mxu2 }
 0x645   : > { %17022 = vst [vmem:[#allocation117_spill] sm:$0xff] %v12654_v43  ;;  %3746 = vmatmul.bf16.gmra.mxu3 %v8599_v5  ;;  %v8623_v5 = vor.u32 %v10408_v34, %v8620_v11  ;;  %v10461_v43 = vld [vmem:[%s16811_s4 + $0x30c] sm:$0xf] }
 0x648   : > { %v12656_v53 = vpop.f32.mrf.mxu3 }
 0x649   : > { %17023 = vst [vmem:[#allocation118_spill] sm:$0xff] %v12656_v53  ;;  %v8826_v53 = vld [vmem:[%s16811_s4 + $0x308] sm:$0xf] }
 0x64a   : > { %v8827_v8 = vor.u32 %v10464_v19, %v8826_v53  ;;  %v8642_v53 = vld [vmem:[%s16811_s4 + $0x190] sm:$0xf]  ;;  %v10417_v19 = vld [vmem:[%s16811_s4 + $0x1a4] sm:$0xf0] }
 0x64c   : > { %v12664_v21 = vpop.f32.mrf.mxu2  ;;  %3289 = vmatmul.bf16.gmra.mxu0 %v8827_v8 }
 0x64d   : > { %17024 = vst [vmem:[#allocation119_spill] sm:$0xff] %v12664_v21 }
 0x650   : > { %v12672_v10 = vpop.f32.mrf.mxu3 }
 0x651   : > { %17025 = vst [vmem:[#allocation120_spill] sm:$0xff] %v12672_v10  ;;  %3582 = vmatmul.bf16.gmra.mxu2 %v8619_v41  ;;  %v8828_v41 = vld [vmem:[%s16811_s4 + $0x320] sm:$0xf0] }
 0x652   : > { %v8831_v34 = vor.u32 %v10461_v43, %v8828_v41  ;;  %v8644_v43 = vld [vmem:[%s16811_s4 + $0x1a8] sm:$0xf0] }
 0x654   : > { %v12680_v21 = vpop.f32.mrf.mxu2  ;;  %3458 = vmatmul.bf16.gmra.mxu1 %v8831_v34  ;;  %v8850_v34 = vld [vmem:[%s16811_s4 + $0x338] sm:$0xf] }
 0x655   : > { %17026 = vst [vmem:[#allocation121_spill] sm:$0xff] %v12680_v21  ;;  %3751 = vmatmul.bf16.gmra.mxu3 %v8623_v5  ;;  %v8643_v21 = vor.u32 %v10417_v19, %v8642_v53  ;;  %v10414_v5 = vld [vmem:[%s16811_s4 + $0x194] sm:$0xf]  ;;  %v10470_v53 = vld [vmem:[%s16811_s4 + $0x34c] sm:$0xf0] }
 0x656   : > { %v8647_v41 = vor.u32 %v10414_v5, %v8644_v43  ;;  %v8851_v19 = vor.u32 %v10470_v53, %v8850_v34  ;;  %v8666_v34 = vld [vmem:[%s16811_s4 + $0x1c0] sm:$0xf]  ;;  %v10423_v53 = vld [vmem:[%s16811_s4 + $0x1d4] sm:$0xf0] }
 0x657   : > { %v8667_v55 = vor.u32 %v10423_v53, %v8666_v34 }
 0x658   : > { %v12688_v11 = vpop.f32.mrf.mxu3 }
 0x659   : > { %17027 = vst [vmem:[#allocation122_spill] sm:$0xff] %v12688_v11  ;;  %v10467_v11 = vld [vmem:[%s16811_s4 + $0x33c] sm:$0xf] }
 0x65c   : > { %v12696_v10 = vpop.f32.mrf.mxu2  ;;  %3294 = vmatmul.bf16.gmra.mxu0 %v8851_v19 }
 0x65d   : > { %17028 = vst [vmem:[#allocation123_spill] sm:$0xff] %v12696_v10 }
 0x660   : > { %v12704_v8 = vpop.f32.mrf.mxu3 }
 0x661   : > { %17029 = vst [vmem:[#allocation124_spill] sm:$0xff] %v12704_v8  ;;  %3587 = vmatmul.bf16.gmra.mxu2 %v8643_v21  ;;  %v8852_v8 = vld [vmem:[%s16811_s4 + $0x350] sm:$0xf0] }
 0x662   : > { %v8855_v5 = vor.u32 %v10467_v11, %v8852_v8 }
 0x664   : > { %v3548_v10 = vpop.f32.mrf.mxu2  ;;  %3463 = vmatmul.bf16.gmra.mxu1 %v8855_v5 }
 0x665   : > { %v3549_v21 = vadd.f32 %v3548_v10, %v11965_v51  ;;  %3756 = vmatmul.bf16.gmra.mxu3 %v8647_v41  ;;  %v10420_v51 = vld [vmem:[%s16811_s4 + $0x1c4] sm:$0xf]  ;;  %v8668_v10 = vld [vmem:[%s16811_s4 + $0x1d8] sm:$0xf0] }
 0x666   : > { %v8671_v19 = vor.u32 %v10420_v51, %v8668_v10 }
 0x668   : > { %v3717_v43 = vpop.f32.mrf.mxu3 }
 0x669   : > { %v3718_v46 = vadd.f32 %v3717_v43, %v3549_v21  ;;  %v8874_v21 = vld [vmem:[%s16811_s4 + $0x368] sm:$0xf] }
 0x66b   : > { %v3877_v11 = vmax.f32 %v3718_v46, 0.0  ;;  %v10473_v46 = vld [vmem:[%s16811_s4 + $0x36c] sm:$0xf] }
 0x66c   : > { %v3550_v42 = vpop.f32.mrf.mxu2 }
 0x66d   : > { %v3551_v16 = vadd.f32 %v3550_v42, %v11983_v22  ;;  %v10476_v22 = vld [vmem:[%s16811_s4 + $0x37c] sm:$0xf0]  ;;  %v3941_v42 = vpack.c.bf16 %v3877_v11, %v3877_v11 }
 0x66e   : > { %v8875_v43 = vor.u32 %v10476_v22, %v8874_v21  ;;  %v8690_v22 = vld [vmem:[%s16811_s4 + $0x1f0] sm:$0xf] }
 0x66f   : > { %v4069_v10 = vunpack.c.l.b16 %v3941_v42  ;;  %v10426_v42 = vld [vmem:[%s16811_s4 + $0x1f4] sm:$0xf] }
 0x670   : > { %v3719_v8 = vpop.f32.mrf.mxu3  ;;  %3299 = vmatmul.bf16.gmra.mxu0 %v8875_v43  ;;  %v8692_v43 = vld [vmem:[%s16811_s4 + $0x208] sm:$0xf0] }
 0x671   : > { %v3720_v41 = vadd.f32 %v3719_v8, %v3551_v16  ;;  %3592 = vmatmul.bf16.gmra.mxu2 %v8667_v55  ;;  %v8876_v55 = vld [vmem:[%s16811_s4 + $0x380] sm:$0xf0] }
 0x672   : > { %v8879_v51 = vor.u32 %v10473_v46, %v8876_v55 }
 0x673   : > { %v3878_v5 = vmax.f32 %v3720_v41, 0.0 }
 0x674   : > { %v3553_v34 = vpop.f32.mrf.mxu2  ;;  %3468 = vmatmul.bf16.gmra.mxu1 %v8879_v51 }
 0x675   : > { %v3942_v16 = vpack.c.bf16 %v3878_v5, %v3878_v5  ;;  %v3554_v53 = vadd.f32 %v3553_v34, %v12003_v4  ;;  %3761 = vmatmul.bf16.gmra.mxu3 %v8671_v19  ;;  %v10429_v5 = vld [vmem:[%s16811_s4 + $0x204] sm:$0xf0] }
 0x676   : > { %v8691_v19 = vor.u32 %v10429_v5, %v8690_v22 }
 0x677   : > { %v4070_v8 = vunpack.c.l.b16 %v3942_v16  ;;  %v8695_v16 = vor.u32 %v10426_v42, %v8692_v43 }
 0x678   : > { %v3722_v11 = vpop.f32.mrf.mxu3 }
 0x679   : > { %v3723_v41 = vadd.f32 %v3722_v11, %v3554_v53  ;;  %v12745_v21 = vpack.c.b16 %v4070_v8, %v4069_v10  ;;  %v8898_v53 = vld [vmem:[%s16811_s4 + $0x398] sm:$0xf]  ;;  %v10479_v11 = vld [vmem:[%s16811_s4 + $0x39c] sm:$0xf] }
 0x67b   : > { %17030 = vst [vmem:[#allocation125_spill] sm:$0xff] %v12745_v21  ;;  %v3879_v34 = vmax.f32 %v3723_v41, 0.0  ;;  %v8900_v41 = vld [vmem:[%s16811_s4 + $0x3b0] sm:$0xf0] }
 0x67c   : > { %v3555_v63 = vpop.f32.mrf.mxu2 }
 0x67d   : > { %v3556_v4 = vadd.f32 %v3555_v63, %v12022_v31  ;;  %v10482_v31 = vld [vmem:[%s16811_s4 + $0x3ac] sm:$0xf0]  ;;  %v3943_v63 = vpack.c.bf16 %v3879_v34, %v3879_v34 }
 0x67e   : > { %v8899_v10 = vor.u32 %v10482_v31, %v8898_v53  ;;  %v10435_v53 = vld [vmem:[%s16811_s4 + $0x234] sm:$0xf0] }
 0x680   : > { %v3724_v46 = vpop.f32.mrf.mxu3  ;;  %3304 = vmatmul.bf16.gmra.mxu0 %v8899_v10 }
 0x681   : > { %v3725_v55 = vadd.f32 %v3724_v46, %v3556_v4  ;;  %3597 = vmatmul.bf16.gmra.mxu2 %v8691_v19  ;;  %v8903_v4 = vor.u32 %v10479_v11, %v8900_v41  ;;  %v4071_v19 = vunpack.c.l.b16 %v3943_v63  ;;  %v10432_v63 = vld [vmem:[%s16811_s4 + $0x224] sm:$0xf] }
 0x683   : > { %v3880_v51 = vmax.f32 %v3725_v55, 0.0  ;;  %v8714_v55 = vld [vmem:[%s16811_s4 + $0x220] sm:$0xf] }
 0x684   : > { %v3558_v8 = vpop.f32.mrf.mxu2  ;;  %3473 = vmatmul.bf16.gmra.mxu1 %v8903_v4 }
 0x685   : > { %v3944_v22 = vpack.c.bf16 %v3880_v51, %v3880_v51  ;;  %v3559_v5 = vadd.f32 %v3558_v8, %v12041_v57  ;;  %3766 = vmatmul.bf16.gmra.mxu3 %v8695_v16  ;;  %v8715_v16 = vor.u32 %v10435_v53, %v8714_v55  ;;  %v8716_v51 = vld [vmem:[%s16811_s4 + $0x238] sm:$0xf0] }
 0x686   : > { %v8719_v41 = vor.u32 %v10432_v63, %v8716_v51 }
 0x687   : > { %v4072_v42 = vunpack.c.l.b16 %v3944_v22  ;;  %v8922_v22 = vld [vmem:[%s16811_s4 + $0x3c8] sm:$0xf] }
 0x688   : > { %v3727_v43 = vpop.f32.mrf.mxu3 }
 0x689   : > { %v3728_v34 = vadd.f32 %v3727_v43, %v3559_v5  ;;  %v12773_v46 = vpack.c.b16 %v4072_v42, %v4071_v19  ;;  %v10485_v43 = vld [vmem:[%s16811_s4 + $0x3cc] sm:$0xf] }
 0x68b   : > { %17031 = vst [vmem:[#allocation126_spill] sm:$0xff] %v12773_v46  ;;  %v3881_v10 = vmax.f32 %v3728_v34, 0.0  ;;  %v8924_v34 = vld [vmem:[%s16811_s4 + $0x3e0] sm:$0xf0] }
 0x68c   : > { %v3560_v31 = vpop.f32.mrf.mxu2 }
 0x68d   : > { %v3561_v57 = vadd.f32 %v3560_v31, %v12060_v17  ;;  %v10488_v17 = vld [vmem:[%s16811_s4 + $0x3dc] sm:$0xf0]  ;;  %v3945_v5 = vpack.c.bf16 %v3881_v10, %v3881_v10  ;;  %v8927_v31 = vor.u32 %v10485_v43, %v8924_v34  ;;  %v8946_v34 = vld [vmem:[%s16811_s4 + $0x3f8] sm:$0xf] }
 0x68e   : > { %v8923_v19 = vor.u32 %v10488_v17, %v8922_v22  ;;  %v10438_v17 = vld [vmem:[%s16811_s4 + $0x254] sm:$0xf] }
 0x690   : > { %v3729_v8 = vpop.f32.mrf.mxu3  ;;  %3309 = vmatmul.bf16.gmra.mxu0 %v8923_v19 }
 0x691   : > { %v3730_v11 = vadd.f32 %v3729_v8, %v3561_v57  ;;  %3602 = vmatmul.bf16.gmra.mxu2 %v8715_v16  ;;  %v4073_v57 = vunpack.c.l.b16 %v3945_v5  ;;  %v8738_v8 = vld [vmem:[%s16811_s4 + $0x250] sm:$0xf]  ;;  %v8740_v5 = vld [vmem:[%s16811_s4 + $0x268] sm:$0xf0] }
 0x692   : > { %v8743_v43 = vor.u32 %v10438_v17, %v8740_v5 }
 0x693   : > { %v3882_v4 = vmax.f32 %v3730_v11, 0.0  ;;  %v10441_v11 = vld [vmem:[%s16811_s4 + $0x264] sm:$0xf0] }
 0x694   : > { %v3563_v42 = vpop.f32.mrf.mxu2  ;;  %3478 = vmatmul.bf16.gmra.mxu1 %v8927_v31 }
 0x695   : > { %v3946_v55 = vpack.c.bf16 %v3882_v4, %v3882_v4  ;;  %v3564_v53 = vadd.f32 %v3563_v42, %v12078_v48  ;;  %3771 = vmatmul.bf16.gmra.mxu3 %v8719_v41  ;;  %v8739_v41 = vor.u32 %v10441_v11, %v8738_v8 }
 0x697   : > { %v4074_v16 = vunpack.c.l.b16 %v3946_v55 }
 0x698   : > { %v3732_v63 = vpop.f32.mrf.mxu3 }
 0x699   : > { %v3733_v51 = vadd.f32 %v3732_v63, %v3564_v53  ;;  %v12801_v10 = vpack.c.b16 %v4074_v16, %v4073_v57  ;;  %v10491_v16 = vld [vmem:[%s16811_s4 + $0x3fc] sm:$0xf]  ;;  %v8948_v63 = vld [vmem:[%s16811_s4 + $0x410] sm:$0xf0] }
 0x69a   : > { %v8951_v8 = vor.u32 %v10491_v16, %v8948_v63  ;;  %v8970_v16 = vld [vmem:[%s16811_s4 + $0x428] sm:$0xf] }
 0x69b   : > { %17032 = vst [vmem:[#allocation127_spill] sm:$0xff] %v12801_v10  ;;  %v3883_v4 = vmax.f32 %v3733_v51, 0.0 }
 0x69c   : > { %v3565_v22 = vpop.f32.mrf.mxu2 }
 0x69d   : > { %v3566_v48 = vadd.f32 %v3565_v22, %v12096_v9  ;;  %v10494_v9 = vld [vmem:[%s16811_s4 + $0x40c] sm:$0xf0]  ;;  %v3947_v55 = vpack.c.bf16 %v3883_v4, %v3883_v4  ;;  %v8762_v4 = vld [vmem:[%s16811_s4 + $0x280] sm:$0xf] }
 0x69e   : > { %v8947_v31 = vor.u32 %v10494_v9, %v8946_v34 }
 0x69f   : > { %v4075_v11 = vunpack.c.l.b16 %v3947_v55 }
 0x6a0   : > { %v3734_v19 = vpop.f32.mrf.mxu3  ;;  %3314 = vmatmul.bf16.gmra.mxu0 %v8947_v31 }
 0x6a1   : > { %v3735_v42 = vadd.f32 %v3734_v19, %v3566_v48  ;;  %3607 = vmatmul.bf16.gmra.mxu2 %v8739_v41  ;;  %v3233_v41 = vadd.f32 %v12056_v24, %v12129_v60  ;;  %v10447_v19 = vld [vmem:[%s16811_s4 + $0x294] sm:$0xf0]  ;;  %v10444_v24 = vld [vmem:[%s16811_s4 + $0x284] sm:$0xf] }
 0x6a2   : > { %v8763_v9 = vor.u32 %v10447_v19, %v8762_v4 }
 0x6a3   : > { %v3884_v53 = vmax.f32 %v3735_v42, 0.0  ;;  %v3402_v34 = vadd.f32 %v12062_v23, %v3233_v41  ;;  %v10500_v23 = vld [vmem:[%s16811_s4 + $0x43c] sm:$0xf0] }
 0x6a4   : > { %v3568_v57 = vpop.f32.mrf.mxu2  ;;  %3483 = vmatmul.bf16.gmra.mxu1 %v8951_v8  ;;  %v8971_v8 = vor.u32 %v10500_v23, %v8970_v16 }
 0x6a5   : > { %v3948_v51 = vpack.c.bf16 %v3884_v53, %v3884_v53  ;;  %3776 = vmatmul.bf16.gmra.mxu3 %v8743_v43  ;;  %v3569_v17 = vadd.f32 %v3568_v57, %v12114_v52  ;;  %v8764_v52 = vld [vmem:[%s16811_s4 + $0x298] sm:$0xf0] }
 0x6a6   : > { %v8767_v57 = vor.u32 %v10444_v24, %v8764_v52  ;;  %v8786_v24 = vld [vmem:[%s16811_s4 + $0x2b0] sm:$0xf]  ;;  %v10453_v52 = vld [vmem:[%s16811_s4 + $0x2c4] sm:$0xf0] }
 0x6a7   : > { %v4076_v22 = vunpack.c.l.b16 %v3948_v51 }
 0x6a8   : > { %v3737_v48 = vpop.f32.mrf.mxu3 }
 0x6a9   : > { %v12831_v5 = vpack.c.b16 %v4076_v22, %v4075_v11  ;;  %v3738_v42 = vadd.f32 %v3737_v48, %v3569_v17  ;;  %v10497_v22 = vld [vmem:[%s16811_s4 + $0x42c] sm:$0xf]  ;;  %v8972_v48 = vld [vmem:[%s16811_s4 + $0x440] sm:$0xf0] }
 0x6aa   : > { %v8975_v17 = vor.u32 %v10497_v22, %v8972_v48 }
 0x6ab   : > { %17033 = vst [vmem:[#allocation128_spill] sm:$0xff] %v12831_v5  ;;  %v3885_v60 = vmax.f32 %v3738_v42, 0.0 }
 0x6ac   : > { %v3570_v43 = vpop.f32.mrf.mxu2 }
 0x6ad   : > { %v3571_v55 = vadd.f32 %v3570_v43, %v3402_v34  ;;  %v3949_v63 = vpack.c.bf16 %v3885_v60, %v3885_v60  ;;  %v3238_v43 = vadd.f32 %v12094_v0, %v12163_v59  ;;  %v8787_v0 = vor.u32 %v10453_v52, %v8786_v24  ;;  %v8788_v59 = vld [vmem:[%s16811_s4 + $0x2c8] sm:$0xf0] }
 0x6ae   : > { %v3243_v24 = vadd.f32 %v12131_v2, %v12185_v13  ;;  %v8812_v13 = vld [vmem:[%s16811_s4 + $0x2f8] sm:$0xf0] }
 0x6af   : > { %v4077_v4 = vunpack.c.l.b16 %v3949_v63 }
 0x6b0   : > { %v3739_v53 = vpop.f32.mrf.mxu3  ;;  %3319 = vmatmul.bf16.gmra.mxu0 %v8971_v8 }
 0x6b1   : > { %v3740_v31 = vadd.f32 %v3739_v53, %v3571_v55  ;;  %3612 = vmatmul.bf16.gmra.mxu2 %v8763_v9  ;;  %v3407_v53 = vadd.f32 %v12098_v58, %v3238_v43  ;;  %v10506_v58 = vld [vmem:[%s16811_s4 + $0x46c] sm:$0xf0] }
 0x6b3   : > { %v3886_v51 = vmax.f32 %v3740_v31, 0.0 }
 0x6b4   : > { %v3573_v11 = vpop.f32.mrf.mxu2  ;;  %3488 = vmatmul.bf16.gmra.mxu1 %v8975_v17  ;;  %v8996_v17 = vld [vmem:[%s16811_s4 + $0x470] sm:$0xf0] }
 0x6b5   : > { %v3950_v41 = vpack.c.bf16 %v3886_v51, %v3886_v51  ;;  %3781 = vmatmul.bf16.gmra.mxu3 %v8767_v57  ;;  %v3574_v34 = vadd.f32 %v3573_v11, %v12148_v7  ;;  %v10450_v7 = vld [vmem:[%s16811_s4 + $0x2b4] sm:$0xf]  ;;  %v8994_v51 = vld [vmem:[%s16811_s4 + $0x458] sm:$0xf] }
 0x6b6   : > { %v8791_v63 = vor.u32 %v10450_v7, %v8788_v59  ;;  %v8995_v22 = vor.u32 %v10506_v58, %v8994_v51  ;;  %v3412_v59 = vadd.f32 %v12133_v56, %v3243_v24  ;;  %v9018_v51 = vld [vmem:[%s16811_s4 + $0x488] sm:$0xf]  ;;  %v10512_v56 = vld [vmem:[%s16811_s4 + $0x49c] sm:$0xf0] }
 0x6b7   : > { %v4078_v19 = vunpack.c.l.b16 %v3950_v41  ;;  %v10503_v41 = vld [vmem:[%s16811_s4 + $0x45c] sm:$0xf] }
 0x6b8   : > { %v3742_v42 = vpop.f32.mrf.mxu3 }
 0x6b9   : > { %v12861_v9 = vpack.c.b16 %v4078_v19, %v4077_v4  ;;  %v3743_v60 = vadd.f32 %v3742_v42, %v3574_v34  ;;  %v8999_v19 = vor.u32 %v10503_v41, %v8996_v17  ;;  %v9020_v41 = vld [vmem:[%s16811_s4 + $0x4a0] sm:$0xf0] }
 0x6bb   : > { %17034 = vst [vmem:[#allocation129_spill] sm:$0xff] %v12861_v9  ;;  %4173 = vrot.lane.b32.xlu0 %v12861_v9, %s10910_s30  ;;  %v3887_v31 = vmax.f32 %v3743_v60, 0.0 }
 0x6bc   : > { %v3575_v55 = vpop.f32.mrf.mxu2 }
 0x6bd   : > { %v3576_v57 = vadd.f32 %v3575_v55, %v3407_v53  ;;  %v3951_v8 = vpack.c.bf16 %v3887_v31, %v3887_v31  ;;  %v8810_v55 = vld [vmem:[%s16811_s4 + $0x2e0] sm:$0xf]  ;;  %v10459_v53 = vld [vmem:[%s16811_s4 + $0x2f4] sm:$0xf0] }
 0x6be   : > { %v8811_v2 = vor.u32 %v10459_v53, %v8810_v55  ;;  %v8834_v55 = vld [vmem:[%s16811_s4 + $0x310] sm:$0xf]  ;;  %v10465_v53 = vld [vmem:[%s16811_s4 + $0x324] sm:$0xf0] }
 0x6bf   : > { %v4079_v42 = vunpack.c.l.b16 %v3951_v8 }
 0x6c0   : > { %v3744_v16 = vpop.f32.mrf.mxu3  ;;  %3324 = vmatmul.bf16.gmra.mxu0 %v8995_v22 }
 0x6c1   : > { %v3745_v23 = vadd.f32 %v3744_v16, %v3576_v57  ;;  %3617 = vmatmul.bf16.gmra.mxu2 %v8787_v0 }
 0x6c3   : > { %v3888_v11 = vmax.f32 %v3745_v23, 0.0 }
 0x6c4   : > { %v3578_v48 = vpop.f32.mrf.mxu2  ;;  %3493 = vmatmul.bf16.gmra.mxu1 %v8999_v19 }
 0x6c5   : > { %v3952_v4 = vpack.c.bf16 %v3888_v11, %v3888_v11  ;;  %3786 = vmatmul.bf16.gmra.mxu3 %v8791_v63  ;;  %v3579_v52 = vadd.f32 %v3578_v48, %v12176_v32  ;;  %v10456_v32 = vld [vmem:[%s16811_s4 + $0x2e4] sm:$0xf]  ;;  %v9019_v11 = vor.u32 %v10512_v56, %v9018_v51  ;;  %v10509_v48 = vld [vmem:[%s16811_s4 + $0x48c] sm:$0xf] }
 0x6c6   : > { %v8815_v63 = vor.u32 %v10456_v32, %v8812_v13 }
 0x6c7   : > { %v4080_v43 = vunpack.c.l.b16 %v3952_v4  ;;  %v9023_v4 = vor.u32 %v10509_v48, %v9020_v41  ;;  %v3253_v41 = vadd.f32 %v12187_v36, %v12227_v44 }
 0x6c8   : > { %v3747_v34 = vpop.f32.mrf.mxu3 }
 0x6c9   : > { %v12893_v60 = vpack.c.b16 %v4080_v43, %v4079_v42  ;;  %v3748_v0 = vadd.f32 %v3747_v34, %v3579_v52  ;;  %v3248_v34 = vadd.f32 %v12165_v12, %v12207_v18  ;;  %v8835_v12 = vor.u32 %v10465_v53, %v8834_v55  ;;  %v8836_v18 = vld [vmem:[%s16811_s4 + $0x328] sm:$0xf0]  ;;  %v10468_v53 = vld [vmem:[%s16811_s4 + $0x344] sm:$0xf] }
 0x6cb   : > { %17035 = vst [vmem:[#allocation130_spill] sm:$0xff] %v12893_v60  ;;  %4175 = vrot.lane.b32.xlu1 %v12893_v60, %s10910_s30  ;;  %v3889_v31 = vmax.f32 %v3748_v0, 0.0 }
 0x6cc   : > { %v3580_v7 = vpop.f32.mrf.mxu2 }
 0x6cd   : > { %v3581_v57 = vadd.f32 %v3580_v7, %v3412_v59  ;;  %v3953_v58 = vpack.c.bf16 %v3889_v31, %v3889_v31  ;;  %v3417_v59 = vadd.f32 %v12167_v29, %v3248_v34  ;;  %v10518_v29 = vld [vmem:[%s16811_s4 + $0x4cc] sm:$0xf0]  ;;  %v8858_v34 = vld [vmem:[%s16811_s4 + $0x340] sm:$0xf] }
 0x6cf   : > { %v4081_v19 = vunpack.c.l.b16 %v3953_v58  ;;  %v10515_v58 = vld [vmem:[%s16811_s4 + $0x4bc] sm:$0xf] }
 0x6d0   : > { %v3749_v16 = vpop.f32.mrf.mxu3  ;;  %3329 = vmatmul.bf16.gmra.mxu0 %v9019_v11 }
 0x6d1   : > { %v3750_v23 = vadd.f32 %v3749_v16, %v3581_v57  ;;  %3622 = vmatmul.bf16.gmra.mxu2 %v8811_v2  ;;  %v9042_v16 = vld [vmem:[%s16811_s4 + $0x4b8] sm:$0xf] }
 0x6d2   : > { %v9043_v51 = vor.u32 %v10518_v29, %v9042_v16  ;;  %v9068_v16 = vld [vmem:[%s16811_s4 + $0x500] sm:$0xf0] }
 0x6d3   : > { %v3890_v8 = vmax.f32 %v3750_v23, 0.0 }
 0x6d4   : > { %v3583_v22 = vpop.f32.mrf.mxu2  ;;  %3498 = vmatmul.bf16.gmra.mxu1 %v9023_v4 }
 0x6d5   : > { %v3954_v17 = vpack.c.bf16 %v3890_v8, %v3890_v8  ;;  %3791 = vmatmul.bf16.gmra.mxu3 %v8815_v63  ;;  %v3584_v24 = vadd.f32 %v3583_v22, %v12198_v15  ;;  %v10462_v15 = vld [vmem:[%s16811_s4 + $0x314] sm:$0xf] }
 0x6d6   : > { %v8839_v57 = vor.u32 %v10462_v15, %v8836_v18  ;;  %v9044_v8 = vld [vmem:[%s16811_s4 + $0x4d0] sm:$0xf0]  ;;  %v9066_v15 = vld [vmem:[%s16811_s4 + $0x4e8] sm:$0xf]  ;;  %v10524_v18 = vld [vmem:[%s16811_s4 + $0x4fc] sm:$0xf0] }
 0x6d7   : > { %v4082_v42 = vunpack.c.l.b16 %v3954_v17  ;;  %v9047_v48 = vor.u32 %v10515_v58, %v9044_v8 }
 0x6d8   : > { %v3752_v43 = vpop.f32.mrf.mxu3 }
 0x6d9   : > { %v12925_v52 = vpack.c.b16 %v4082_v42, %v4081_v19  ;;  %v3753_v0 = vadd.f32 %v3752_v43, %v3584_v24  ;;  %v3422_v24 = vadd.f32 %v12190_v14, %v3253_v41 }
 0x6db   : > { %17036 = vst [vmem:[#allocation131_spill] sm:$0xff] %v12925_v52  ;;  %4177 = vrot.lane.b32.xlu2 %v12925_v52, %s10910_s30  ;;  %v3891_v2 = vmax.f32 %v3753_v0, 0.0  ;;  %v8860_v0 = vld [vmem:[%s16811_s4 + $0x358] sm:$0xf0] }
 0x6dc   : > { %v3585_v7 = vpop.f32.mrf.mxu2 }
 0x6dd   : > { %v3586_v32 = vadd.f32 %v3585_v7, %v3417_v59  ;;  %v3955_v23 = vpack.c.bf16 %v3891_v2, %v3891_v2 }
 0x6df   : > { %v4083_v17 = vunpack.c.l.b16 %v3955_v23 }
 0x6e0   : > { %v3754_v13 = vpop.f32.mrf.mxu3  ;;  %3334 = vmatmul.bf16.gmra.mxu0 %v9043_v51  ;;  %v3258_v51 = vadd.f32 %v12215_v28, %v12248_v61  ;;  %v13002_v28 = vpop.f32.mrf.mxu0 }
 0x6e1   : > { %v3755_v31 = vadd.f32 %v3754_v13, %v3586_v32  ;;  %3627 = vmatmul.bf16.gmra.mxu2 %v8835_v12  ;;  %v8863_v12 = vor.u32 %v10468_v53, %v8860_v0  ;;  %v9067_v13 = vor.u32 %v10524_v18, %v9066_v15  ;;  %v9092_v15 = vld [vmem:[%s16811_s4 + $0x530] sm:$0xf0] }
 0x6e2   : > { %v3427_v41 = vadd.f32 %v12217_v33, %v3258_v51  ;;  %v8906_v51 = vld [vmem:[%s16811_s4 + $0x3a0] sm:$0xf] }
 0x6e3   : > { %v3892_v63 = vmax.f32 %v3755_v31, 0.0 }
 0x6e4   : > { %v3588_v56 = vpop.f32.mrf.mxu2  ;;  %3503 = vmatmul.bf16.gmra.mxu1 %v9047_v48  ;;  %v8882_v48 = vld [vmem:[%s16811_s4 + $0x370] sm:$0xf] }
 0x6e5   : > { %v3956_v11 = vpack.c.bf16 %v3892_v63, %v3892_v63  ;;  %v3589_v22 = vadd.f32 %v3588_v56, %v12219_v45  ;;  %3796 = vmatmul.bf16.gmra.mxu3 %v8839_v57  ;;  %v10471_v45 = vld [vmem:[%s16811_s4 + $0x354] sm:$0xf0]  ;;  %v10521_v57 = vld [vmem:[%s16811_s4 + $0x4ec] sm:$0xf] }
 0x6e6   : > { %v8859_v55 = vor.u32 %v10471_v45, %v8858_v34  ;;  %v9071_v63 = vor.u32 %v10521_v57, %v9068_v16  ;;  %v8884_v34 = vld [vmem:[%s16811_s4 + $0x388] sm:$0xf0] }
 0x6e7   : > { %v4084_v4 = vunpack.c.l.b16 %v3956_v11 }
 0x6e8   : > { %v3757_v19 = vpop.f32.mrf.mxu3  ;;  %v13020_v53 = vpop.f32.mrf.mxu0 }
 0x6e9   : > { %v12957_v42 = vpack.c.b16 %v4084_v4, %v4083_v17  ;;  %v3758_v43 = vadd.f32 %v3757_v19, %v3589_v22  ;;  %v13005_v17 = vpop.f32.mrf.mxu1  ;;  %17039 = vst [vmem:[#allocation134_spill] sm:$0xff] %v13020_v53 }
 0x6eb   : > { %17037 = vst [vmem:[#allocation132_spill] sm:$0xff] %v12957_v42  ;;  %6217 = vmatpush.bf16.msra.mxu2 %v12957_v42  ;;  %4179 = vrot.lane.b32.xlu0 %v12957_v42, %s10910_s30  ;;  %v3893_v7 = vmax.f32 %v3758_v43, 0.0  ;;  %v10474_v43 = vld [vmem:[%s16811_s4 + $0x374] sm:$0xf]  ;;  %v10540_v42 = vld [vmem:[%s16811_s4 + $0x584] sm:$0xf] }
 0x6ec   : > { %v3590_v44 = vpop.f32.mrf.mxu2 }
 0x6ed   : > { %v3591_v36 = vadd.f32 %v3590_v44, %v3422_v24  ;;  %v3957_v2 = vpack.c.bf16 %v3893_v7, %v3893_v7  ;;  %v8887_v44 = vor.u32 %v10474_v43, %v8884_v34  ;;  %v10536_v43 = vld [vmem:[%s16811_s4 + $0x55c] sm:$0xf0] }
 0x6ef   : > { %6218 = vmatpush.bf16.msra.mxu2 %v12925_v52  ;;  %v4085_v56 = vunpack.c.l.b16 %v3957_v2 }
 0x6f0   : > { %v3759_v14 = vpop.f32.mrf.mxu3  ;;  %3339 = vmatmul.bf16.gmra.mxu0 %v9067_v13 }
 0x6f1   : > { %v3760_v59 = vadd.f32 %v3759_v14, %v3591_v36  ;;  %3632 = vmatmul.bf16.gmra.mxu2 %v8859_v55  ;;  %v9090_v36 = vld [vmem:[%s16811_s4 + $0x518] sm:$0xf]  ;;  %v10530_v55 = vld [vmem:[%s16811_s4 + $0x52c] sm:$0xf0]  ;;  %v13029_v18 = vpop.f32.mrf.mxu1 }
 0x6f2   : > { %v9091_v14 = vor.u32 %v10530_v55, %v9090_v36  ;;  %17040 = vst [vmem:[#allocation135_spill] sm:$0xff] %v13029_v18  ;;  %v9116_v36 = vld [vmem:[%s16811_s4 + $0x560] sm:$0xf0] }
 0x6f3   : > { %v3894_v32 = vmax.f32 %v3760_v59, 0.0  ;;  %6219 = vmatpush.bf16.msra.mxu2 %v12893_v60 }
 0x6f4   : > { %v3593_v31 = vpop.f32.mrf.mxu2  ;;  %3508 = vmatmul.bf16.gmra.mxu1 %v9071_v63 }
 0x6f5   : > { %v3958_v29 = vpack.c.bf16 %v3894_v32, %v3894_v32  ;;  %v3594_v23 = vadd.f32 %v3593_v31, %v12236_v50  ;;  %3801 = vmatmul.bf16.gmra.mxu3 %v8863_v12  ;;  %v10477_v50 = vld [vmem:[%s16811_s4 + $0x384] sm:$0xf0]  ;;  %v10527_v12 = vld [vmem:[%s16811_s4 + $0x51c] sm:$0xf]  ;;  %v3263_v31 = vadd.f32 %v12244_v3, %v12266_v49  ;;  %v13044_v49 = vpop.f32.mrf.mxu0 }
 0x6f6   : > { %v8883_v19 = vor.u32 %v10477_v50, %v8882_v48  ;;  %v9095_v13 = vor.u32 %v10527_v12, %v9092_v15  ;;  %17042 = vst [vmem:[#allocation137_spill] sm:$0xff] %v13044_v49  ;;  %v8908_v48 = vld [vmem:[%s16811_s4 + $0x3b8] sm:$0xf0] }
 0x6f7   : > { %v4086_v58 = vunpack.c.l.b16 %v3958_v29  ;;  %6220 = vmatpush.bf16.msra.mxu2 %v12861_v9 }
 0x6f8   : > { %v3762_v8 = vpop.f32.mrf.mxu3 }
 0x6f9   : > { %v3763_v11 = vadd.f32 %v3762_v8, %v3594_v23  ;;  %v12993_v22 = vpack.c.b16 %v4086_v58, %v4085_v56  ;;  %v3432_v56 = vadd.f32 %v12246_v35, %v3263_v31  ;;  %v13052_v50 = vpop.f32.mrf.mxu1 }
 0x6fa   : > { %17043 = vst [vmem:[#allocation138_spill] sm:$0xff] %v13052_v50 }
 0x6fb   : > { %17038 = vst [vmem:[#allocation133_spill] sm:$0xff] %v12993_v22  ;;  %6221 = vmatpush.bf16.msra.mxu2 %v12831_v5  ;;  %v3895_v45 = vmax.f32 %v3763_v11, 0.0  ;;  %v10480_v11 = vld [vmem:[%s16811_s4 + $0x3a4] sm:$0xf] }
 0x6fc   : > { %v3595_v61 = vpop.f32.mrf.mxu2  ;;  %v8911_v35 = vor.u32 %v10480_v11, %v8908_v48  ;;  %v9138_v48 = vld [vmem:[%s16811_s4 + $0x578] sm:$0xf] }
 0x6fd   : > { %v3596_v4 = vadd.f32 %v3595_v61, %v3427_v41  ;;  %v3959_v0 = vpack.c.bf16 %v3895_v45, %v3895_v45 }
 0x6ff   : > { %6222 = vmatpush.bf16.msra.mxu2 %v12801_v10  ;;  %v4087_v57 = vunpack.c.l.b16 %v3959_v0 }
 0x700   : > { %v3764_v33 = vpop.f32.mrf.mxu3  ;;  %3344 = vmatmul.bf16.gmra.mxu0 %v9091_v14  ;;  %v13067_v14 = vpop.f32.mrf.mxu0 }
 0x701   : > { %v3765_v24 = vadd.f32 %v3764_v33, %v3596_v4  ;;  %3637 = vmatmul.bf16.gmra.mxu2 %v8883_v19  ;;  %v9114_v19 = vld [vmem:[%s16811_s4 + $0x548] sm:$0xf]  ;;  %17044 = vst [vmem:[#allocation139_spill] sm:$0xff] %v13067_v14 }
 0x702   : > { %v9115_v33 = vor.u32 %v10536_v43, %v9114_v19 }
 0x703   : > { %v3896_v7 = vmax.f32 %v3765_v24, 0.0  ;;  %6223 = vmatpush.bf16.msra.mxu2 %v12773_v46 }
 0x704   : > { %v3598_v59 = vpop.f32.mrf.mxu2  ;;  %3513 = vmatmul.bf16.gmra.mxu1 %v9095_v13 }
 0x705   : > { %v3960_v2 = vpack.c.bf16 %v3896_v7, %v3896_v7  ;;  %v3599_v32 = vadd.f32 %v3598_v59, %v12257_v27  ;;  %3806 = vmatmul.bf16.gmra.mxu3 %v8887_v44  ;;  %v10483_v27 = vld [vmem:[%s16811_s4 + $0x3b4] sm:$0xf0]  ;;  %v10533_v44 = vld [vmem:[%s16811_s4 + $0x54c] sm:$0xf] }
 0x706   : > { %v8907_v8 = vor.u32 %v10483_v27, %v8906_v51  ;;  %v9119_v7 = vor.u32 %v10533_v44, %v9116_v36 }
 0x707   : > { %v4088_v16 = vunpack.c.l.b16 %v3960_v2  ;;  %6224 = vmatpush.bf16.msra.mxu2 %v12745_v21  ;;  %v3268_v2 = vadd.f32 %v12268_v25, %v12288_v20  ;;  %v10486_v25 = vld [vmem:[%s16811_s4 + $0x3d4] sm:$0xf]  ;;  %v8932_v20 = vld [vmem:[%s16811_s4 + $0x3e8] sm:$0xf0] }
 0x708   : > { %v3767_v29 = vpop.f32.mrf.mxu3  ;;  %v8935_v11 = vor.u32 %v10486_v25, %v8932_v20 }
 0x709   : > { %v3768_v23 = vadd.f32 %v3767_v29, %v3599_v32  ;;  %v13035_v63 = vpack.c.b16 %v4088_v16, %v4087_v57  ;;  %v13071_v32 = vpop.f32.mrf.mxu1  ;;  %v10489_v57 = vld [vmem:[%s16811_s4 + $0x3e4] sm:$0xf0] }
 0x70a   : > { %17045 = vst [vmem:[#allocation140_spill] sm:$0xff] %v13071_v32  ;;  %v17047_v29 = vld [vmem:[#allocation56_spill] sm:$0xff] }
 0x70b   : > { %17041 = vst [vmem:[#allocation136_spill] sm:$0xff] %v13035_v63  ;;  %v3897_v41 = vmax.f32 %v3768_v23, 0.0  ;;  %v3437_v23 = vadd.f32 %v17047_v29, %v3268_v2 }
 0x70c   : > { %v3600_v3 = vpop.f32.mrf.mxu2 }
 0x70d   : > { %v3601_v58 = vadd.f32 %v3600_v3, %v3432_v56  ;;  %v3961_v34 = vpack.c.bf16 %v3897_v41, %v3897_v41  ;;  %v10542_v41 = vld [vmem:[%s16811_s4 + $0x58c] sm:$0xf0] }
 0x70e   : > { %v9139_v19 = vor.u32 %v10542_v41, %v9138_v48  ;;  %v10545_v48 = vld [vmem:[%s16811_s4 + $0x5ac] sm:$0xf]  ;;  %v9164_v41 = vld [vmem:[%s16811_s4 + $0x5c0] sm:$0xf0] }
 0x70f   : > { %v4089_v59 = vunpack.c.l.b16 %v3961_v34  ;;  %v10539_v34 = vld [vmem:[%s16811_s4 + $0x57c] sm:$0xf] }
 0x710   : > { %v3769_v61 = vpop.f32.mrf.mxu3  ;;  %3349 = vmatmul.bf16.gmra.mxu0 %v9115_v33 }
 0x711   : > { %v3770_v4 = vadd.f32 %v3769_v61, %v3601_v58  ;;  %3642 = vmatmul.bf16.gmra.mxu2 %v8907_v8  ;;  %v13088_v58 = vpop.f32.mrf.mxu0  ;;  %v13096_v61 = vpop.f32.mrf.mxu1 }
 0x712   : > { %17048 = vst [vmem:[#allocation56_spill] sm:$0xff] %v13088_v58 }
 0x713   : > { %v3898_v45 = vmax.f32 %v3770_v4, 0.0  ;;  %17049 = vst [vmem:[#allocation142_spill] sm:$0xff] %v13096_v61 }
 0x714   : > { %v3603_v24 = vpop.f32.mrf.mxu2  ;;  %3518 = vmatmul.bf16.gmra.mxu1 %v9119_v7  ;;  %v3273_v7 = vadd.f32 %v12290_v30, %v12310_v37  ;;  %v10492_v30 = vld [vmem:[%s16811_s4 + $0x404] sm:$0xf]  ;;  %v8956_v37 = vld [vmem:[%s16811_s4 + $0x418] sm:$0xf0] }
 0x715   : > { %v3962_v55 = vpack.c.bf16 %v3898_v45, %v3898_v45  ;;  %v3604_v0 = vadd.f32 %v3603_v24, %v12279_v40  ;;  %3811 = vmatmul.bf16.gmra.mxu3 %v8911_v35  ;;  %v8930_v40 = vld [vmem:[%s16811_s4 + $0x3d0] sm:$0xf]  ;;  %v9140_v45 = vld [vmem:[%s16811_s4 + $0x590] sm:$0xf0]  ;;  %v8959_v20 = vor.u32 %v10492_v30, %v8956_v37 }
 0x716   : > { %v8931_v51 = vor.u32 %v10489_v57, %v8930_v40  ;;  %v9143_v44 = vor.u32 %v10539_v34, %v9140_v45  ;;  %v3442_v40 = vadd.f32 %v12293_v54, %v3273_v7  ;;  %v9162_v54 = vld [vmem:[%s16811_s4 + $0x5a8] sm:$0xf] }
 0x717   : > { %v4090_v12 = vunpack.c.l.b16 %v3962_v55  ;;  %v10501_v7 = vld [vmem:[%s16811_s4 + $0x444] sm:$0xf0] }
 0x718   : > { %v3772_v15 = vpop.f32.mrf.mxu3 }
 0x719   : > { %v3773_v13 = vadd.f32 %v3772_v15, %v3604_v0  ;;  %v13073_v31 = vpack.c.b16 %v4090_v12, %v4089_v59  ;;  %v8954_v15 = vld [vmem:[%s16811_s4 + $0x400] sm:$0xf]  ;;  %v13115_v2 = vpop.f32.mrf.mxu0  ;;  %v13118_v57 = vpop.f32.mrf.mxu1 }
 0x71a   : > { %17051 = vst [vmem:[#allocation144_spill] sm:$0xff] %v13115_v2 }
 0x71b   : > { %17046 = vst [vmem:[#allocation141_spill] sm:$0xff] %v13073_v31  ;;  %v3899_v27 = vmax.f32 %v3773_v13, 0.0 }
 0x71c   : > { %v3605_v16 = vpop.f32.mrf.mxu2  ;;  %17052 = vst [vmem:[#allocation145_spill] sm:$0xff] %v13118_v57 }
 0x71d   : > { %v3606_v56 = vadd.f32 %v3605_v16, %v3437_v23  ;;  %v3963_v4 = vpack.c.bf16 %v3899_v27, %v3899_v27  ;;  %v10548_v27 = vld [vmem:[%s16811_s4 + $0x5bc] sm:$0xf0] }
 0x71f   : > { %v4091_v36 = vunpack.c.l.b16 %v3963_v4 }
 0x720   : > { %v3774_v3 = vpop.f32.mrf.mxu3  ;;  %3354 = vmatmul.bf16.gmra.mxu0 %v9139_v19  ;;  %v9167_v19 = vor.u32 %v10545_v48, %v9164_v41  ;;  %v17059_v48 = vld [vmem:[#allocation59_spill] sm:$0xff] }
 0x721   : > { %v3775_v8 = vadd.f32 %v3774_v3, %v3606_v56  ;;  %3647 = vmatmul.bf16.gmra.mxu2 %v8931_v51  ;;  %v13138_v4 = vpop.f32.mrf.mxu0 }
 0x722   : > { %17053 = vst [vmem:[#allocation146_spill] sm:$0xff] %v13138_v4 }
 0x723   : > { %v3900_v35 = vmax.f32 %v3775_v8, 0.0  ;;  %v9163_v8 = vor.u32 %v10548_v27, %v9162_v54 }
 0x724   : > { %v3608_v43 = vpop.f32.mrf.mxu2  ;;  %3523 = vmatmul.bf16.gmra.mxu1 %v9143_v44  ;;  %v17055_v44 = vld [vmem:[#allocation58_spill] sm:$0xff] }
 0x725   : > { %v3964_v33 = vpack.c.bf16 %v3900_v35, %v3900_v35  ;;  %v3609_v24 = vadd.f32 %v3608_v43, %v12301_v47  ;;  %3816 = vmatmul.bf16.gmra.mxu3 %v8935_v11  ;;  %v10495_v47 = vld [vmem:[%s16811_s4 + $0x414] sm:$0xf0]  ;;  %v13140_v43 = vpop.f32.mrf.mxu1 }
 0x726   : > { %v8955_v16 = vor.u32 %v10495_v47, %v8954_v15  ;;  %17054 = vst [vmem:[#allocation147_spill] sm:$0xff] %v13140_v43  ;;  %v17057_v47 = vld [vmem:[#allocation57_spill] sm:$0xff] }
 0x727   : > { %v4092_v55 = vunpack.c.l.b16 %v3964_v33 }
 0x728   : > { %v3777_v0 = vpop.f32.mrf.mxu3 }
 0x729   : > { %v3778_v59 = vadd.f32 %v3777_v0, %v3609_v24  ;;  %v13107_v12 = vpack.c.b16 %v4092_v55, %v4091_v36  ;;  %v3278_v24 = vadd.f32 %v12319_v6, %v12332_v39  ;;  %v8978_v0 = vld [vmem:[%s16811_s4 + $0x430] sm:$0xf]  ;;  %v10498_v6 = vld [vmem:[%s16811_s4 + $0x434] sm:$0xf]  ;;  %v8980_v39 = vld [vmem:[%s16811_s4 + $0x448] sm:$0xf0] }
 0x72b   : > { %17050 = vst [vmem:[#allocation143_spill] sm:$0xff] %v13107_v12  ;;  %v3901_v29 = vmax.f32 %v3778_v59, 0.0 }
 0x72c   : > { %v3610_v13 = vpop.f32.mrf.mxu2 }
 0x72d   : > { %v3611_v23 = vadd.f32 %v3610_v13, %v3442_v40  ;;  %v3965_v56 = vpack.c.bf16 %v3901_v29, %v3901_v29  ;;  %v3447_v13 = vadd.f32 %v17057_v47, %v3278_v24  ;;  %v8979_v40 = vor.u32 %v10501_v7, %v8978_v0  ;;  %v10504_v0 = vld [vmem:[%s16811_s4 + $0x464] sm:$0xf]  ;;  %v9004_v7 = vld [vmem:[%s16811_s4 + $0x478] sm:$0xf0] }
 0x72f   : > { %v4093_v34 = vunpack.c.l.b16 %v3965_v56 }
 0x730   : > { %v3779_v51 = vpop.f32.mrf.mxu3  ;;  %3359 = vmatmul.bf16.gmra.mxu0 %v9163_v8  ;;  %v17058_v8 = vld [vmem:[#allocation60_spill] sm:$0xff] }
 0x731   : > { %v3780_v25 = vadd.f32 %v3779_v51, %v3611_v23  ;;  %3652 = vmatmul.bf16.gmra.mxu2 %v8955_v16  ;;  %v8983_v23 = vor.u32 %v10498_v6, %v8980_v39  ;;  %v10554_v6 = vld [vmem:[%s16811_s4 + $0x5ec] sm:$0xf0] }
 0x733   : > { %v3902_v3 = vmax.f32 %v3780_v25, 0.0 }
 0x734   : > { %v3613_v11 = vpop.f32.mrf.mxu2  ;;  %3528 = vmatmul.bf16.gmra.mxu1 %v9167_v19  ;;  %v9002_v19 = vld [vmem:[%s16811_s4 + $0x460] sm:$0xf] }
 0x735   : > { %v3966_v35 = vpack.c.bf16 %v3902_v3, %v3902_v3  ;;  %3821 = vmatmul.bf16.gmra.mxu3 %v8959_v20  ;;  %v3614_v36 = vadd.f32 %v3613_v11, %v17055_v44  ;;  %v3283_v11 = vadd.f32 %v17058_v8, %v12354_v62  ;;  %v13176_v44 = vpop.f32.mrf.mxu1 }
 0x737   : > { %v4094_v45 = vunpack.c.l.b16 %v3966_v35  ;;  %v3452_v62 = vadd.f32 %v12352_v26, %v3283_v11  ;;  %v9186_v26 = vld [vmem:[%s16811_s4 + $0x5d8] sm:$0xf]  ;;  %v3288_v11 = vadd.f32 %v13002_v28, %v12372_v38 }
 0x738   : > { %v3782_v33 = vpop.f32.mrf.mxu3 }
 0x739   : > { %v13145_v55 = vpack.c.b16 %v4094_v45, %v4093_v34  ;;  %v3783_v59 = vadd.f32 %v3782_v33, %v3614_v36  ;;  %v10507_v34 = vld [vmem:[%s16811_s4 + $0x474] sm:$0xf0]  ;;  %v13171_v45 = vpop.f32.mrf.mxu0 }
 0x73a   : > { %v9003_v36 = vor.u32 %v10507_v34, %v9002_v19  ;;  %v9026_v19 = vld [vmem:[%s16811_s4 + $0x490] sm:$0xf]  ;;  %v10513_v34 = vld [vmem:[%s16811_s4 + $0x4a4] sm:$0xf0] }
 0x73b   : > { %17056 = vst [vmem:[#allocation58_spill] sm:$0xff] %v13145_v55  ;;  %v3903_v16 = vmax.f32 %v3783_v59, 0.0 }
 0x73c   : > { %v3615_v15 = vpop.f32.mrf.mxu2 }
 0x73d   : > { %v3616_v30 = vadd.f32 %v3615_v15, %v3447_v13  ;;  %v3967_v51 = vpack.c.bf16 %v3903_v16, %v3903_v16 }
 0x73f   : > { %v4095_v27 = vunpack.c.l.b16 %v3967_v51 }
 0x740   : > { %v3784_v37 = vpop.f32.mrf.mxu3 }
 0x741   : > { %v3785_v29 = vadd.f32 %v3784_v37, %v3616_v30  ;;  %3657 = vmatmul.bf16.gmra.mxu2 %v8979_v40  ;;  %v9007_v40 = vor.u32 %v10504_v0, %v9004_v7  ;;  %v9187_v30 = vor.u32 %v10554_v6, %v9186_v26  ;;  %v13198_v51 = vpop.f32.mrf.mxu0  ;;  %v9028_v0 = vld [vmem:[%s16811_s4 + $0x4a8] sm:$0xf0] }
 0x743   : > { %v3904_v25 = vmax.f32 %v3785_v29, 0.0  ;;  %v10551_v29 = vld [vmem:[%s16811_s4 + $0x5dc] sm:$0xf]  ;;  %3364 = vmatmul.bf16.gmra.mxu0 %v9187_v30 }
 0x744   : > { %v3618_v20 = vpop.f32.mrf.mxu2 }
 0x745   : > { %v3968_v54 = vpack.c.bf16 %v3904_v25, %v3904_v25  ;;  %3826 = vmatmul.bf16.gmra.mxu3 %v8983_v23  ;;  %v3619_v41 = vadd.f32 %v3618_v20, %v17059_v48  ;;  %v9188_v23 = vld [vmem:[%s16811_s4 + $0x5f0] sm:$0xf0]  ;;  %v4174_v25 = vpop.permute.xlu0 %4173 }
 0x747   : > { %v4096_v56 = vunpack.c.l.b16 %v3968_v54  ;;  %v9191_v54 = vor.u32 %v10551_v29, %v9188_v23 }
 0x748   : > { %v3787_v3 = vpop.f32.mrf.mxu3 }
 0x749   : > { %v13163_v35 = vpack.c.b16 %v4096_v56, %v4095_v27  ;;  %v3788_v33 = vadd.f32 %v3787_v3, %v3619_v41  ;;  %v13200_v27 = vpop.f32.mrf.mxu1  ;;  %3533 = vmatmul.bf16.gmra.mxu1 %v9191_v54  ;;  %v13238_v23 = vpop.f32.mrf.mxu0  ;;  %v1566_v54 = vld [vmem:[%s16812_s5 + $0x178] sm:$0xff] }
 0x74b   : > { %17060 = vst [vmem:[#allocation57_spill] sm:$0xff] %v13163_v35  ;;  %4191 = vrot.lane.b32.xlu2 %v13163_v35, %s10910_s30  ;;  %v3905_v59 = vmax.f32 %v3788_v33, 0.0 }
 0x74c   : > { %v3620_v24 = vpop.f32.mrf.mxu2 }
 0x74d   : > { %v3621_v15 = vadd.f32 %v3620_v24, %v3452_v62  ;;  %v3969_v39 = vpack.c.bf16 %v3905_v59, %v3905_v59  ;;  %v9027_v24 = vor.u32 %v10513_v34, %v9026_v19  ;;  %v17100_v62 = vld [vmem:[#allocation90_spill] sm:$0xff] }
 0x74f   : > { %v4097_v56 = vunpack.c.l.b16 %v3969_v39  ;;  %v4176_v39 = vpop.permute.xlu1 %4175 }
 0x750   : > { %v3789_v47 = vpop.f32.mrf.mxu3 }
 0x751   : > { %v3790_v13 = vadd.f32 %v3789_v47, %v3621_v15  ;;  %3662 = vmatmul.bf16.gmra.mxu2 %v9003_v36  ;;  %v10510_v36 = vld [vmem:[%s16811_s4 + $0x494] sm:$0xf]  ;;  %v4178_v47 = vpop.permute.xlu2 %4177  ;;  %v13266_v19 = vpop.f32.mrf.mxu1 }
 0x753   : > { %v3906_v16 = vmax.f32 %v3790_v13, 0.0  ;;  %4171 = vrot.lane.b32.xlu2 %v12831_v5, %s10910_s30 }
 0x754   : > { %v3623_v37 = vpop.f32.mrf.mxu2 }
 0x755   : > { %v3970_v20 = vpack.c.bf16 %v3906_v16, %v3906_v16  ;;  %3831 = vmatmul.bf16.gmra.mxu3 %v9007_v40  ;;  %v3624_v48 = vadd.f32 %v3623_v37, %v12363_v1  ;;  %v3457_v1 = vadd.f32 %v13005_v17, %v3288_v11  ;;  %v9031_v17 = vor.u32 %v10510_v36, %v9028_v0  ;;  %v10516_v11 = vld [vmem:[%s16811_s4 + $0x4c4] sm:$0xf]  ;;  %v1580_v0 = vld [vmem:[%s16812_s5 + $0x1e8] sm:$0xff] }
 0x757   : > { %v4098_v3 = vunpack.c.l.b16 %v3970_v20 }
 0x758   : > { %v3792_v8 = vpop.f32.mrf.mxu3 }
 0x759   : > { %v13205_v41 = vpack.c.b16 %v4098_v3, %v4097_v56  ;;  %v3793_v33 = vadd.f32 %v3792_v8, %v3624_v48  ;;  %v9050_v56 = vld [vmem:[%s16811_s4 + $0x4c0] sm:$0xf]  ;;  %v10519_v3 = vld [vmem:[%s16811_s4 + $0x4d4] sm:$0xf0]  ;;  %v9052_v48 = vld [vmem:[%s16811_s4 + $0x4d8] sm:$0xf0]  ;;  %v13286_v36 = vpop.f32.mrf.mxu1 }
 0x75b   : > { %17061 = vst [vmem:[#allocation60_spill] sm:$0xff] %v13205_v41  ;;  %4193 = vrot.lane.b32.xlu0 %v13205_v41, %s10910_s30  ;;  %4185 = vrot.lane.b32.xlu2 %v13073_v31, %s10910_s30  ;;  %v3907_v7 = vmax.f32 %v3793_v33, 0.0  ;;  %v1563_v33 = vld [vmem:[%s16812_s5 + $0x160] sm:$0xff] }
 0x75c   : > { %v3625_v38 = vpop.f32.mrf.mxu2 }
 0x75d   : > { %v4180_v28 = vpop.permute.xlu0 %4179  ;;  %v3626_v59 = vadd.f32 %v3625_v38, %v3457_v1  ;;  %v3971_v40 = vpack.c.bf16 %v3907_v7, %v3907_v7  ;;  %v9055_v38 = vor.u32 %v10516_v11, %v9052_v48  ;;  %v13274_v1 = vpop.f32.mrf.mxu0  ;;  %v1581_v7 = vld [vmem:[%s16812_s5 + $0x1f0] sm:$0xff]  ;;  %v1560_v48 = vld [vmem:[%s16812_s5 + $0x148] sm:$0xff] }
 0x75e   : > { %10001 = vmatpush.bf16.msk.msra.mxu0 %vm11131_vm10, %v4180_v28  ;;  %v1565_v11 = vld [vmem:[%s16812_s5 + $0x170] sm:$0xff] }
 0x75f   : > { %v4099_v30 = vunpack.c.l.b16 %v3971_v40  ;;  %v10522_v40 = vld [vmem:[%s16811_s4 + $0x4f4] sm:$0xf] }
 0x760   : > { %v3794_v15 = vpop.f32.mrf.mxu3 }
 0x761   : > { %v3795_v13 = vadd.f32 %v3794_v15, %v3626_v59  ;;  %3667 = vmatmul.bf16.gmra.mxu2 %v9027_v24  ;;  %v9074_v59 = vld [vmem:[%s16811_s4 + $0x4f0] sm:$0xf]  ;;  %v10525_v15 = vld [vmem:[%s16811_s4 + $0x504] sm:$0xf0] }
 0x762   : > { %10003 = vmatpush.bf16.msk.msra.mxu0 %vm11131_vm10, %v4178_v47 }
 0x763   : > { %v3908_v26 = vmax.f32 %v3795_v13, 0.0  ;;  %4187 = vrot.lane.b32.xlu0 %v13107_v12, %s10910_s30  ;;  %4165 = vrot.lane.b32.xlu2 %v12745_v21, %s10910_s30  ;;  %v10534_v21 = vld [vmem:[%s16811_s4 + $0x554] sm:$0xf] }
 0x764   : > { %v13232_v6 = vpop.f32.mrf.mxu2 }
 0x765   : > { %17063 = vst [vmem:[#allocation59_spill] sm:$0xff] %v13232_v6  ;;  %v3972_v16 = vpack.c.bf16 %v3908_v26, %v3908_v26  ;;  %3836 = vmatmul.bf16.gmra.mxu3 %v9031_v17  ;;  %v13305_v13 = vpop.f32.mrf.mxu0  ;;  %v9075_v17 = vor.u32 %v10525_v15, %v9074_v59  ;;  %v9076_v26 = vld [vmem:[%s16811_s4 + $0x508] sm:$0xf0]  ;;  %v1567_v6 = vld [vmem:[%s16812_s5 + $0x180] sm:$0xff] }
 0x766   : > { %10005 = vmatpush.bf16.msk.msra.mxu0 %vm11131_vm10, %v4176_v39 }
 0x767   : > { %v4100_v37 = vunpack.c.l.b16 %v3972_v16  ;;  %v1577_v16 = vld [vmem:[%s16812_s5 + $0x1d0] sm:$0xff] }
 0x768   : > { %v13236_v29 = vpop.f32.mrf.mxu3 }
 0x769   : > { %17064 = vst [vmem:[#allocation148_spill] sm:$0xff] %v13236_v29  ;;  %v13240_v20 = vpack.c.b16 %v4100_v37, %v4099_v30  ;;  %v1564_v30 = vld [vmem:[%s16812_s5 + $0x168] sm:$0xff]  ;;  %v9079_v37 = vor.u32 %v10522_v40, %v9076_v26  ;;  %v9100_v40 = vld [vmem:[%s16811_s4 + $0x538] sm:$0xf0] }
 0x76a   : > { %10007 = vmatpush.bf16.msk.msra.mxu0 %vm11131_vm10, %v4174_v25  ;;  %v9051_v25 = vor.u32 %v10519_v3, %v9050_v56 }
 0x76b   : > { %17065 = vst [vmem:[#allocation149_spill] sm:$0xff] %v13240_v20  ;;  %6306 = vmatpush.bf16.msra.mxu3 %v13240_v20  ;;  %4195 = vrot.lane.b32.xlu1 %v13240_v20, %s10910_s30  ;;  %v1573_v20 = vld [vmem:[%s16812_s5 + $0x1b0] sm:$0xff] }
 0x76c   : > { %4167 = vrot.lane.b32.xlu0 %v12773_v46, %s10910_s30  ;;  %1820 = vperm.xlu2 %10833, %v1566_v54   ;;  %v13258_v8 = vpop.f32.mrf.mxu2  ;;  %v13322_v54 = vpop.f32.mrf.mxu1 }
 0x76d   : > { %17066 = vst [vmem:[#allocation150_spill] sm:$0xff] %v13258_v8  ;;  %v13329_v3 = vpop.f32.mrf.mxu0 }
 0x76f   : > { %6307 = vmatpush.bf16.msra.mxu3 %v13205_v41  ;;  %v1559_v41 = vld [vmem:[%s16812_s5 + $0x140] sm:$0xff] }
 0x770   : > { %v13269_v34 = vpop.f32.mrf.mxu3 }
 0x771   : > { %17067 = vst [vmem:[#allocation151_spill] sm:$0xff] %v13269_v34  ;;  %3672 = vmatmul.bf16.gmra.mxu2 %v9051_v25 }
 0x773   : > { %4189 = vrot.lane.b32.xlu1 %v13145_v55, %s10910_s30  ;;  %6308 = vmatpush.bf16.msra.mxu3 %v13163_v35  ;;  %v9148_v35 = vld [vmem:[%s16811_s4 + $0x598] sm:$0xf0] }
 0x774   : > { %1805 = vperm.xlu2 %10833, %v1563_v33   ;;  %4181 = vrot.lane.b32.xlu0 %v12993_v22, %s10910_s30  ;;  %v13281_v28 = vpop.f32.mrf.mxu2  ;;  %v1561_v33 = vld [vmem:[%s16812_s5 + $0x150] sm:$0xff]  ;;  %v13351_v59 = vpop.f32.mrf.mxu1 }
 0x775   : > { %17068 = vst [vmem:[#allocation152_spill] sm:$0xff] %v13281_v28  ;;  %3841 = vmatmul.bf16.gmra.mxu3 %v9055_v38  ;;  %v9098_v38 = vld [vmem:[%s16811_s4 + $0x520] sm:$0xf] }
 0x777   : > { %6309 = vmatpush.bf16.msra.mxu3 %v13145_v55  ;;  %v1562_v55 = vld [vmem:[%s16812_s5 + $0x158] sm:$0xff] }
 0x778   : > { %v13284_v24 = vpop.f32.mrf.mxu3 }
 0x779   : > { %17069 = vst [vmem:[#allocation153_spill] sm:$0xff] %v13284_v24 }
 0x77b   : > { %4169 = vrot.lane.b32.xlu1 %v12801_v10, %s10910_s30  ;;  %6310 = vmatpush.bf16.msra.mxu3 %v13107_v12  ;;  %v9124_v10 = vld [vmem:[%s16811_s4 + $0x568] sm:$0xf0] }
 0x77c   : > { %1890 = vperm.xlu2 %10833, %v1580_v0   ;;  %1895 = vperm.xlu0 %10834, %v1581_v7   ;;  %v13303_v47 = vpop.f32.mrf.mxu2  ;;  %v10531_v0 = vld [vmem:[%s16811_s4 + $0x534] sm:$0xf0] }
 0x77d   : > { %17070 = vst [vmem:[#allocation154_spill] sm:$0xff] %v13303_v47  ;;  %v9099_v15 = vor.u32 %v10531_v0, %v9098_v38  ;;  %v13374_v38 = vpop.f32.mrf.mxu1 }
 0x77f   : > { %6311 = vmatpush.bf16.msra.mxu3 %v13073_v31 }
 0x780   : > { %v13314_v39 = vpop.f32.mrf.mxu3 }
 0x781   : > { %17071 = vst [vmem:[#allocation155_spill] sm:$0xff] %v13314_v39  ;;  %3677 = vmatmul.bf16.gmra.mxu2 %v9075_v17  ;;  %v10528_v17 = vld [vmem:[%s16811_s4 + $0x524] sm:$0xf] }
 0x783   : > { %4183 = vrot.lane.b32.xlu1 %v13035_v63, %s10910_s30  ;;  %6312 = vmatpush.bf16.msra.mxu3 %v13035_v63  ;;  %v1574_v63 = vld [vmem:[%s16812_s5 + $0x1b8] sm:$0xff] }
 0x784   : > { %1875 = vperm.xlu2 %10833, %v1577_v16   ;;  %1810 = vperm.xlu0 %10834, %v1564_v30   ;;  %v13327_v56 = vpop.f32.mrf.mxu2  ;;  %v1582_v16 = vld [vmem:[%s16812_s5 + $0x1f8] sm:$0xff]  ;;  %v13364_v30 = vpop.f32.mrf.mxu0 }
 0x785   : > { %17072 = vst [vmem:[#allocation156_spill] sm:$0xff] %v13327_v56  ;;  %3846 = vmatmul.bf16.gmra.mxu3 %v9079_v37  ;;  %v1557_v37 = vld [vmem:[%s16812_s5 + $0x130] sm:$0xff] }
 0x786   : > { %v10546_v56 = vld [vmem:[%s16811_s4 + $0x5b4] sm:$0xf] }
 0x787   : > { %6313 = vmatpush.bf16.msra.mxu3 %v12993_v22 }
 0x788   : > { %v13332_v25 = vpop.f32.mrf.mxu3 }
 0x789   : > { %17073 = vst [vmem:[#allocation157_spill] sm:$0xff] %v13332_v25 }
 0x78b   : > { %1815 = vperm.xlu1 %10835, %v1565_v11   ;;  %v1578_v11 = vld [vmem:[%s16812_s5 + $0x1d8] sm:$0xff] }
 0x78c   : > { %1790 = vperm.xlu2 %10833, %v1560_v48   ;;  %1795 = vperm.xlu0 %10834, %v1561_v33   ;;  %v13349_v7 = vpop.f32.mrf.mxu2  ;;  %v9103_v48 = vor.u32 %v10528_v17, %v9100_v40  ;;  %v1575_v17 = vld [vmem:[%s16812_s5 + $0x1c0] sm:$0xff]  ;;  %v9122_v40 = vld [vmem:[%s16811_s4 + $0x550] sm:$0xf] }
 0x78d   : > { %17074 = vst [vmem:[#allocation158_spill] sm:$0xff] %v13349_v7  ;;  %v9172_v7 = vld [vmem:[%s16811_s4 + $0x5c8] sm:$0xf0] }
 0x790   : > { %v13359_v26 = vpop.f32.mrf.mxu3 }
 0x791   : > { %17075 = vst [vmem:[#allocation159_spill] sm:$0xff] %v13359_v26  ;;  %3682 = vmatmul.bf16.gmra.mxu2 %v9099_v15  ;;  %v1579_v15 = vld [vmem:[%s16812_s5 + $0x1e0] sm:$0xff] }
 0x793   : > { %1900 = vperm.xlu1 %10835, %v1582_v16   ;;  %v10537_v16 = vld [vmem:[%s16811_s4 + $0x564] sm:$0xf0] }
 0x794   : > { %1775 = vperm.xlu2 %10833, %v1557_v37   ;;  %1880 = vperm.xlu0 %10834, %v1578_v11   ;;  %v13372_v33 = vpop.f32.mrf.mxu2  ;;  %v13393_v37 = vpop.f32.mrf.mxu0 }
 0x795   : > { %3851 = vmatmul.bf16.gmra.mxu3 %v9103_v48  ;;  %v9123_v48 = vor.u32 %v10537_v16, %v9122_v40  ;;  %v9127_v40 = vor.u32 %v10534_v21, %v9124_v10  ;;  %v1554_v21 = vld [vmem:[%s16812_s5 + $0x118] sm:$0xff]  ;;  %v1555_v10 = vld [vmem:[%s16812_s5 + $0x120] sm:$0xff] }
 0x798   : > { %v13376_v0 = vpop.f32.mrf.mxu3 }
 0x799   : > { %17076 = vst [vmem:[#allocation160_spill] sm:$0xff] %v13376_v0 }
 0x79b   : > { %1885 = vperm.xlu1 %10835, %v1579_v15   ;;  %v13408_v15 = vpop.f32.mrf.mxu1 }
 0x79c   : > { %1860 = vperm.xlu2 %10833, %v1574_v63   ;;  %1865 = vperm.xlu0 %10834, %v1575_v17   ;;  %v13395_v11 = vpop.f32.mrf.mxu2  ;;  %v1571_v63 = vld [vmem:[%s16812_s5 + $0x1a0] sm:$0xff]  ;;  %v1558_v17 = vld [vmem:[%s16812_s5 + $0x138] sm:$0xff]  ;;  %v13418_v46 = vpop.f32.mrf.mxu0 }
 0x7a0   : > { %v13403_v22 = vpop.f32.mrf.mxu3 }
 0x7a1   : > { %17077 = vst [vmem:[#allocation161_spill] sm:$0xff] %v13403_v22  ;;  %3687 = vmatmul.bf16.gmra.mxu2 %v9123_v48 }
 0x7a3   : > { %1800 = vperm.xlu1 %10835, %v1562_v55   ;;  %v9146_v55 = vld [vmem:[%s16811_s4 + $0x580] sm:$0xf] }
 0x7a4   : > { %1845 = vperm.xlu2 %10833, %v1571_v63   ;;  %1780 = vperm.xlu0 %10834, %v1558_v17   ;;  %v13416_v16 = vpop.f32.mrf.mxu2  ;;  %v10543_v63 = vld [vmem:[%s16811_s4 + $0x594] sm:$0xf0]  ;;  %v13439_v17 = vpop.f32.mrf.mxu1 }
 0x7a5   : > { %3856 = vmatmul.bf16.gmra.mxu3 %v9127_v40  ;;  %v13420_v31 = vpop.permute.xlu2 %4191  ;;  %v9147_v5 = vor.u32 %v10543_v63, %v9146_v55  ;;  %v13451_v9 = vpop.f32.mrf.mxu0  ;;  %v9151_v55 = vor.u32 %v10540_v42, %v9148_v35  ;;  %v1568_v42 = vld [vmem:[%s16812_s5 + $0x188] sm:$0xff]  ;;  %v1569_v35 = vld [vmem:[%s16812_s5 + $0x190] sm:$0xff] }
 0x7a8   : > { %v13422_v48 = vpop.f32.mrf.mxu3 }
 0x7ab   : > { %1785 = vperm.xlu1 %10835, %v1559_v41  }
 0x7ac   : > { %1760 = vperm.xlu2 %10833, %v1554_v21   ;;  %1765 = vperm.xlu0 %10834, %v1555_v10   ;;  %v13441_v40 = vpop.f32.mrf.mxu2  ;;  %v1576_v21 = vld [vmem:[%s16812_s5 + $0x1c8] sm:$0xff]  ;;  %v13466_v52 = vpop.f32.mrf.mxu1 }
 0x7ad   : > { %v4172_v12 = vpop.permute.xlu2 %4171  ;;  %v1572_v10 = vld [vmem:[%s16812_s5 + $0x1a8] sm:$0xff]  ;;  %v13475_v25 = vpop.f32.mrf.mxu0 }
 0x7ae   : > { %10009 = vmatpush.bf16.msk.msra.mxu0 %vm11131_vm10, %v4172_v12  ;;  %v1551_v12 = vld [vmem:[%s16812_s5 + $0x100] sm:$0xff]  ;;  %17078 = vst [vmem:[#allocation162_spill] sm:$0xff] %v13475_v25 }
 0x7b0   : > { %v13453_v41 = vpop.f32.mrf.mxu3 }
 0x7b1   : > { %3692 = vmatmul.bf16.gmra.mxu2 %v9147_v5 }
 0x7b3   : > { %1870 = vperm.xlu1 %10835, %v1576_v21   ;;  %v9170_v21 = vld [vmem:[%s16811_s4 + $0x5b0] sm:$0xf] }
 0x7b4   : > { %1745 = vperm.xlu2 %10833, %v1551_v12   ;;  %1850 = vperm.xlu0 %10834, %v1572_v10   ;;  %v13464_v63 = vpop.f32.mrf.mxu2  ;;  %v10549_v12 = vld [vmem:[%s16811_s4 + $0x5c4] sm:$0xf0]  ;;  %v13499_v57 = vpop.f32.mrf.mxu1 }
 0x7b5   : > { %3861 = vmatmul.bf16.gmra.mxu3 %v9151_v55  ;;  %v13468_v60 = vpop.permute.xlu2 %4185  ;;  %v9171_v26 = vor.u32 %v10549_v12, %v9170_v21  ;;  %17079 = vst [vmem:[#allocation163_spill] sm:$0xff] %v13499_v57  ;;  %v13509_v21 = vpop.f32.mrf.mxu0 }
 0x7b6   : > { %17080 = vst [vmem:[#allocation164_spill] sm:$0xff] %v13509_v21  ;;  %v9196_v21 = vld [vmem:[%s16811_s4 + $0x5f8] sm:$0xf0] }
 0x7b8   : > { %v13470_v5 = vpop.f32.mrf.mxu3 }
 0x7bb   : > { %1855 = vperm.xlu1 %10835, %v1573_v20   ;;  %v1556_v20 = vld [vmem:[%s16812_s5 + $0x128] sm:$0xff] }
 0x7bc   : > { %1830 = vperm.xlu2 %10833, %v1568_v42   ;;  %1835 = vperm.xlu0 %10834, %v1569_v35   ;;  %v13489_v10 = vpop.f32.mrf.mxu2  ;;  %v1552_v42 = vld [vmem:[%s16812_s5 + $0x108] sm:$0xff]  ;;  %v9175_v35 = vor.u32 %v10546_v56, %v9172_v7  ;;  %v13520_v39 = vpop.f32.mrf.mxu1  ;;  %v9194_v56 = vld [vmem:[%s16811_s4 + $0x5e0] sm:$0xf]  ;;  %v10555_v7 = vld [vmem:[%s16811_s4 + $0x5f4] sm:$0xf0] }
 0x7bd   : > { %v13491_v55 = vpop.permute.xlu2 %4165  ;;  %17081 = vst [vmem:[#allocation165_spill] sm:$0xff] %v13520_v39  ;;  %v9195_v57 = vor.u32 %v10555_v7, %v9194_v56  ;;  %v10552_v39 = vld [vmem:[%s16811_s4 + $0x5e4] sm:$0xf] }
 0x7be   : > { %v9199_v28 = vor.u32 %v10552_v39, %v9196_v21 }
 0x7c0   : > { %v13501_v43 = vpop.f32.mrf.mxu3 }
 0x7c1   : > { %3697 = vmatmul.bf16.gmra.mxu2 %v9171_v26  ;;  %v1553_v26 = vld [vmem:[%s16812_s5 + $0x110] sm:$0xff] }
 0x7c3   : > { %1770 = vperm.xlu1 %10835, %v1556_v20  }
 0x7c4   : > { %1750 = vperm.xlu0 %10834, %v1552_v42   ;;  %v13511_v12 = vpop.f32.mrf.mxu2  ;;  %v13530_v42 = vpop.f32.mrf.mxu0 }
 0x7c5   : > { %3866 = vmatmul.bf16.gmra.mxu3 %v9175_v35  ;;  %v13543_v29 = vpop.f32.mrf.mxu1 }
 0x7c6   : > { %v13513_v2 = vpop.permute.xlu2 %1820 }
 0x7c8   : > { %v13515_v4 = vpop.f32.mrf.mxu3 }
 0x7cb   : > { %1755 = vperm.xlu1 %10835, %v1553_v26   ;;  %v1570_v26 = vld [vmem:[%s16812_s5 + $0x198] sm:$0xff] }
 0x7cc   : > { %v13528_v20 = vpop.f32.mrf.mxu2  ;;  %v13549_v32 = vpop.f32.mrf.mxu0 }
 0x7cd   : > { %v4194_v35 = vpop.permute.xlu0 %4193  ;;  %17083 = vst [vmem:[#allocation167_spill] sm:$0xff] %v13549_v32  ;;  %v13558_v39 = vpop.f32.mrf.mxu1 }
 0x7ce   : > { %v1806_v24 = vpop.permute.xlu2 %1805  ;;  %17084 = vst [vmem:[#allocation168_spill] sm:$0xff] %v13558_v39 }
 0x7d0   : > { %v13538_v25 = vpop.f32.mrf.mxu3 }
 0x7d1   : > { %3702 = vmatmul.bf16.gmra.mxu2 %v9195_v57 }
 0x7d3   : > { %1840 = vperm.xlu1 %10835, %v1570_v26  }
 0x7d4   : > { %v13545_v56 = vpop.f32.mrf.mxu2  ;;  %v13566_v32 = vpop.f32.mrf.mxu0 }
 0x7d5   : > { %3871 = vmatmul.bf16.gmra.mxu3 %v9199_v28  ;;  %v4188_v7 = vpop.permute.xlu0 %4187  ;;  %v13577_v39 = vpop.f32.mrf.mxu1 }
 0x7d6   : > { %v13547_v47 = vpop.permute.xlu2 %1890 }
 0x7d7   : > { %17082 = vst [vmem:[#allocation166_spill] sm:$0xff] %v13547_v47 }
 0x7d8   : > { %v13551_v34 = vpop.f32.mrf.mxu3 }
 0x7db   : > { %1825 = vperm.xlu1 %10835, %v1567_v6  }
 0x7dc   : > { %v13556_v57 = vpop.f32.mrf.mxu2 }
 0x7dd   : > { %v4196_v21 = vpop.permute.xlu1 %4195 }
 0x7de   : > { %v4168_v26 = vpop.permute.xlu0 %4167  ;;  %v13560_v61 = vpop.permute.xlu2 %1875  ;;  %10017 = vmatpush.bf16.msk.msra.mxu1 %vm11131_vm10, %v4196_v21  ;;  %v17086_v21 = vld [vmem:[#allocation85_spill] sm:$0xff] }
 0x7df   : > { %v2983_v58 = vadd.f32 %v17086_v21, %v1806_v24 }
 0x7e0   : > { %v13564_v28 = vpop.f32.mrf.mxu3 }
 0x7e2   : > { %10019 = vmatpush.bf16.msk.msra.mxu1 %vm11131_vm10, %v4194_v35  ;;  %v13584_v35 = vpop.f32.mrf.mxu0 }
 0x7e3   : > { %17088 = vst [vmem:[#allocation170_spill] sm:$0xff] %v13584_v35 }
 0x7e4   : > { %v13570_v14 = vpop.f32.mrf.mxu2 }
 0x7e5   : > { %17085 = vst [vmem:[#allocation169_spill] sm:$0xff] %v13570_v14  ;;  %v4190_v6 = vpop.permute.xlu1 %4189  ;;  %v17089_v14 = vld [vmem:[#allocation86_spill] sm:$0xff] }
 0x7e6   : > { %v4182_v8 = vpop.permute.xlu0 %4181  ;;  %v13572_v18 = vpop.permute.xlu2 %1790  ;;  %10021 = vmatpush.bf16.msk.msra.mxu1 %vm11131_vm10, %v13420_v31  ;;  %v3152_v53 = vadd.f32 %v17089_v14, %v2983_v58  ;;  %v10562_v14 = vld [vmem:[%s16813_s6 + $0x2c] sm:$0xf0] }
 0x7e8   : > { %v13580_v50 = vpop.f32.mrf.mxu3  ;;  %v3321_v31 = vadd.f32 %v13364_v30, %v3152_v53 }
 0x7e9   : > { %17087 = vst [vmem:[#allocation85_spill] sm:$0xff] %v13580_v50 }
 0x7ea   : > { %10023 = vmatpush.bf16.msk.msra.mxu1 %vm11131_vm10, %v4190_v6  ;;  %v13600_v6 = vpop.f32.mrf.mxu1  ;;  %v3490_v53 = vadd.f32 %v13374_v38, %v3321_v31  ;;  %v13616_v30 = vpop.f32.mrf.mxu0  ;;  %v9236_v38 = vld [vmem:[%s16813_s6 + $0x30] sm:$0xf0]  ;;  %v17095_v31 = vld [vmem:[#allocation87_spill] sm:$0xff] }
 0x7eb   : > { %17093 = vst [vmem:[#allocation173_spill] sm:$0xff] %v13600_v6 }
 0x7ec   : > { %v13587_v49 = vpop.f32.mrf.mxu2 }
 0x7ed   : > { %17090 = vst [vmem:[#allocation86_spill] sm:$0xff] %v13587_v49  ;;  %v4170_v22 = vpop.permute.xlu1 %4169  ;;  %v17096_v49 = vld [vmem:[#allocation88_spill] sm:$0xff] }
 0x7ee   : > { %v13589_v0 = vpop.permute.xlu0 %1895  ;;  %v13591_v47 = vpop.permute.xlu2 %1775  ;;  %10011 = vmatpush.bf16.msk.msra.mxu0 %vm11131_vm10, %v4170_v22  ;;  %10025 = vmatpush.bf16.msk.msra.mxu1 %vm11131_vm10, %v4188_v7  ;;  %v9234_v22 = vld [vmem:[%s16813_s6] sm:$0xf] }
 0x7ef   : > { %17091 = vst [vmem:[#allocation171_spill] sm:$0xff] %v13589_v0 }
 0x7f0   : > { %v13598_v24 = vpop.f32.mrf.mxu3 }
 0x7f1   : > { %17092 = vst [vmem:[#allocation172_spill] sm:$0xff] %v13598_v24 }
 0x7f2   : > { %10013 = vmatpush.bf16.msk.msra.mxu0 %vm11131_vm10, %v4168_v26  ;;  %10027 = vmatpush.bf16.msk.msra.mxu1 %vm11131_vm10, %v13468_v60  ;;  %v9235_v26 = vor.u32 %v10562_v14, %v9234_v22  ;;  %v10556_v60 = vld [vmem:[%s16813_s6 + $0x4] sm:$0xf]  ;;  %v3659_v14 = vadd.f32 %v13511_v12, %v3490_v53  ;;  %v17098_v53 = vld [vmem:[#allocation89_spill] sm:$0xff] }
 0x7f4   : > { %v13614_v58 = vpop.f32.mrf.mxu2  ;;  %v3828_v35 = vadd.f32 %v13515_v4, %v3659_v14  ;;  %v17102_v4 = vld [vmem:[#allocation102_spill] sm:$0xff] }
 0x7f5   : > { %v4184_v7 = vpop.permute.xlu1 %4183 }
 0x7f6   : > { %v1811_v21 = vpop.permute.xlu0 %1810  ;;  %v13618_v24 = vpop.permute.xlu2 %1860  ;;  %10015 = vmatpush.bf16.msk.msra.mxu0 %vm11131_vm10, %v13491_v55  ;;  %10029 = vmatpush.bf16.msk.msra.mxu1 %vm11131_vm10, %v4184_v7  ;;  %v9239_v55 = vor.u32 %v10556_v60, %v9236_v38  ;;  %v17099_v38 = vld [vmem:[#allocation101_spill] sm:$0xff] }
 0x7f7   : > { %17094 = vst [vmem:[#allocation174_spill] sm:$0xff] %v13618_v24  ;;  %v2985_v22 = vadd.f32 %v17095_v31, %v1811_v21  ;;  %v13638_v7 = vpop.f32.mrf.mxu1  ;;  %v13646_v60 = vpop.f32.mrf.mxu0 }
 0x7f8   : > { %v13633_v50 = vpop.f32.mrf.mxu3 }
 0x7f9   : > { %v3154_v6 = vadd.f32 %v17096_v49, %v2985_v22  ;;  %5869 = vmatmul.bf16.vlgmr.msra.gmra.mxu0 %v9235_v26 }
 0x7fa   : > { %10031 = vmatpush.bf16.msk.msra.mxu1 %vm11131_vm10, %v4182_v8 }
 0x7fb   : > { %v3323_v24 = vadd.f32 %v13393_v37, %v3154_v6 }
 0x7fc   : > { %v13641_v0 = vpop.f32.mrf.mxu2 }
 0x7fd   : > { %17097 = vst [vmem:[#allocation87_spill] sm:$0xff] %v13641_v0  ;;  %v3492_v21 = vadd.f32 %v13408_v15, %v3323_v24  ;;  %v1816_v12 = vpop.permute.xlu1 %1815  ;;  %5958 = vmatmul.bf16.vlgmr.msra.gmra.mxu1 %v9239_v55  ;;  %v3921_v0 = vmax.f32 %v3828_v35, 0.0  ;;  %v9282_v55 = vld [vmem:[%s16813_s6 + $0x60] sm:$0xf] }
 0x7fe   : > { %v2988_v31 = vadd.f32 %v17098_v53, %v1816_v12  ;;  %v1796_v49 = vpop.permute.xlu0 %1795  ;;  %v1846_v26 = vpop.permute.xlu2 %1845 }
 0x7ff   : > { %v3661_v8 = vadd.f32 %v13528_v20, %v3492_v21  ;;  %v3003_v22 = vadd.f32 %v17099_v38, %v1846_v26  ;;  %v10574_v20 = vld [vmem:[%s16813_s6 + $0x8c] sm:$0xf0]  ;;  %v3985_v53 = vpack.c.bf16 %v3921_v0, %v3921_v0  ;;  %v9284_v0 = vld [vmem:[%s16813_s6 + $0x90] sm:$0xf0] }
 0x800   : > { %v3157_v37 = vadd.f32 %v17100_v62, %v2988_v31  ;;  %v13651_v6 = vpop.f32.mrf.mxu3  ;;  %v13664_v31 = vpop.f32.mrf.mxu1  ;;  %v9283_v26 = vor.u32 %v10574_v20, %v9282_v55  ;;  %v17104_v20 = vld [vmem:[#allocation82_spill] sm:$0xff] }
 0x801   : > { %17101 = vst [vmem:[#allocation88_spill] sm:$0xff] %v13651_v6  ;;  %v3172_v14 = vadd.f32 %v17102_v4, %v3003_v22  ;;  %v3830_v15 = vadd.f32 %v13538_v25, %v3661_v8  ;;  %v17103_v22 = vld [vmem:[#allocation81_spill] sm:$0xff] }
 0x802   : > { %v3326_v24 = vadd.f32 %v13418_v46, %v3157_v37  ;;  %v2978_v37 = vadd.f32 %v17103_v22, %v1796_v49 }
 0x803   : > { %v3341_v21 = vadd.f32 %v13566_v32, %v3172_v14  ;;  %v3922_v62 = vmax.f32 %v3830_v15, 0.0  ;;  %v10568_v32 = vld [vmem:[%s16813_s6 + $0x64] sm:$0xf]  ;;  %v4113_v14 = vunpack.c.l.b16 %v3985_v53 }
 0x804   : > { %v3495_v12 = vadd.f32 %v13439_v17, %v3326_v24  ;;  %v3678_v35 = vpop.f32.mrf.mxu2  ;;  %v9287_v49 = vor.u32 %v10568_v32, %v9284_v0  ;;  %v17108_v32 = vld [vmem:[#allocation110_spill] sm:$0xff] }
 0x805   : > { %v3510_v25 = vadd.f32 %v13577_v39, %v3341_v21  ;;  %v13667_v46 = vpop.permute.xlu1 %1900  ;;  %v3986_v8 = vpack.c.bf16 %v3922_v62, %v3922_v62  ;;  %v3147_v21 = vadd.f32 %v17104_v20, %v2978_v37 }
 0x806   : > { %v3664_v38 = vadd.f32 %v13545_v56, %v3495_v12  ;;  %v13671_v4 = vpop.permute.xlu0 %1880  ;;  %v3350_v56 = vpop.f32.mrf.mxu0 }
 0x807   : > { %v3679_v17 = vadd.f32 %v3678_v35, %v3510_v25  ;;  %v4114_v15 = vunpack.c.l.b16 %v3986_v8  ;;  %v3316_v25 = vadd.f32 %v13305_v13, %v3147_v21 }
 0x808   : > { %v3847_v39 = vpop.f32.mrf.mxu3  ;;  %v13680_v24 = vadd.f32 %v13551_v34, %v3664_v38  ;;  %v17106_v34 = vld [vmem:[#allocation79_spill] sm:$0xff]  ;;  %v17107_v38 = vld [vmem:[#allocation109_spill] sm:$0xff] }
 0x809   : > { %v13682_v55 = vadd.f32 %v3847_v39, %v3679_v17  ;;  %5874 = vmatmul.bf16.gmra.mxu0 %v9283_v26  ;;  %v13685_v62 = vpack.c.b16 %v4114_v15, %v4113_v14  ;;  %v2975_v53 = vadd.f32 %v17106_v34, %v13572_v18  ;;  %v3519_v26 = vpop.f32.mrf.mxu1  ;;  %v17109_v17 = vld [vmem:[#allocation80_spill] sm:$0xff]  ;;  %v3485_v14 = vadd.f32 %v13322_v54, %v3316_v25  ;;  %v9330_v15 = vld [vmem:[%s16813_s6 + $0xc0] sm:$0xf]  ;;  %v10586_v18 = vld [vmem:[%s16813_s6 + $0xec] sm:$0xf0] }
 0x80a   : > { %v9331_v34 = vor.u32 %v10586_v18, %v9330_v15  ;;  %v17110_v25 = vld [vmem:[#allocation83_spill] sm:$0xff] }
 0x80b   : > { %17105 = vst [vmem:[#allocation89_spill] sm:$0xff] %v13685_v62  ;;  %4209 = vrot.lane.b32.xlu2 %v13685_v62, %s10910_s30  ;;  %v3144_v39 = vadd.f32 %v17109_v17, %v2975_v53  ;;  %v3654_v54 = vadd.f32 %v13464_v63, %v3485_v14 }
 0x80c   : > { %v13689_v12 = vpop.f32.mrf.mxu2 }
 0x80d   : > { %v13691_v35 = vpop.permute.xlu1 %1885  ;;  %5963 = vmatmul.bf16.gmra.mxu1 %v9287_v49  ;;  %v3313_v53 = vadd.f32 %v13274_v1, %v3144_v39  ;;  %v17112_v1 = vld [vmem:[#allocation91_spill] sm:$0xff]  ;;  %v3823_v18 = vadd.f32 %v13470_v5, %v3654_v54  ;;  %v17115_v5 = vld [vmem:[#allocation78_spill] sm:$0xff] }
 0x80e   : > { %v1866_v8 = vpop.permute.xlu0 %1865  ;;  %v13708_v13 = vpop.f32.mrf.mxu0  ;;  %v2990_v63 = vadd.f32 %v17112_v1, %v13513_v2 }
 0x80f   : > { %v3013_v22 = vadd.f32 %v17107_v38, %v1866_v8  ;;  %v3482_v14 = vadd.f32 %v13286_v36, %v3313_v53 }
 0x810   : > { %v13697_v37 = vpop.f32.mrf.mxu3 }
 0x811   : > { %v3182_v0 = vadd.f32 %v17108_v32, %v3013_v22  ;;  %v10580_v32 = vld [vmem:[%s16813_s6 + $0xc4] sm:$0xf]  ;;  %v3651_v2 = vadd.f32 %v13441_v40, %v3482_v14  ;;  %v9378_v40 = vld [vmem:[%s16813_s6 + $0x120] sm:$0xf] }
 0x813   : > { %v3351_v49 = vadd.f32 %v3350_v56, %v3182_v0  ;;  %v9332_v56 = vld [vmem:[%s16813_s6 + $0xf0] sm:$0xf0]  ;;  %v17111_v0 = vld [vmem:[#allocation84_spill] sm:$0xff]  ;;  %v3820_v1 = vadd.f32 %v13453_v41, %v3651_v2 }
 0x814   : > { %v13710_v20 = vpop.f32.mrf.mxu2  ;;  %v9335_v39 = vor.u32 %v10580_v32, %v9332_v56  ;;  %v17114_v32 = vld [vmem:[#allocation77_spill] sm:$0xff] }
 0x815   : > { %v1801_v21 = vpop.permute.xlu1 %1800  ;;  %v3520_v8 = vadd.f32 %v3519_v26, %v3351_v49  ;;  %v13724_v26 = vpop.f32.mrf.mxu1 }
 0x816   : > { %v2980_v38 = vadd.f32 %v17110_v25, %v1801_v21  ;;  %v1781_v22 = vpop.permute.xlu0 %1780  ;;  %v13734_v25 = vpop.f32.mrf.mxu0 }
 0x818   : > { %v3149_v17 = vadd.f32 %v17111_v0, %v2980_v38  ;;  %v13722_v62 = vpop.f32.mrf.mxu3  ;;  %v17113_v38 = vld [vmem:[#allocation92_spill] sm:$0xff] }
 0x819   : > { %5879 = vmatmul.bf16.gmra.mxu0 %v9331_v34  ;;  %v3159_v0 = vadd.f32 %v17113_v38, %v2990_v63 }
 0x81a   : > { %v3318_v15 = vadd.f32 %v13329_v3, %v3149_v17  ;;  %v3919_v3 = vmax.f32 %v3823_v18, 0.0 }
 0x81b   : > { %v3328_v17 = vadd.f32 %v13451_v9, %v3159_v0 }
 0x81c   : > { %v3487_v49 = vadd.f32 %v13351_v59, %v3318_v15  ;;  %v13732_v21 = vpop.f32.mrf.mxu2 }
 0x81d   : > { %v1786_v6 = vpop.permute.xlu1 %1785  ;;  %5968 = vmatmul.bf16.gmra.mxu1 %v9335_v39  ;;  %v3983_v39 = vpack.c.bf16 %v3919_v3, %v3919_v3  ;;  %v13755_v14 = vpop.f32.mrf.mxu1  ;;  %v3497_v41 = vadd.f32 %v13466_v52, %v3328_v17 }
 0x81e   : > { %v3656_v34 = vadd.f32 %v13489_v10, %v3487_v49  ;;  %v2973_v36 = vadd.f32 %v17114_v32, %v1786_v6  ;;  %v13740_v53 = vpop.permute.xlu0 %1765  ;;  %v10598_v10 = vld [vmem:[%s16813_s6 + $0x14c] sm:$0xf0]  ;;  %v10592_v32 = vld [vmem:[%s16813_s6 + $0x124] sm:$0xf]  ;;  %v13768_v3 = vpop.f32.mrf.mxu0 }
 0x81f   : > { %v9379_v49 = vor.u32 %v10598_v10, %v9378_v40  ;;  %v4111_v2 = vunpack.c.l.b16 %v3983_v39  ;;  %v3666_v52 = vadd.f32 %v13556_v57, %v3497_v41  ;;  %v17116_v40 = vld [vmem:[#allocation113_spill] sm:$0xff]  ;;  %v17118_v39 = vld [vmem:[#allocation75_spill] sm:$0xff] }
 0x820   : > { %v3142_v54 = vadd.f32 %v17115_v5, %v2973_v36  ;;  %v13743_v59 = vpop.f32.mrf.mxu3  ;;  %v3825_v56 = vadd.f32 %v13501_v43, %v3656_v34  ;;  %v3918_v36 = vmax.f32 %v3820_v1, 0.0  ;;  %v3018_v10 = vadd.f32 %v17116_v40, %v13560_v61  ;;  %v17117_v57 = vld [vmem:[#allocation73_spill] sm:$0xff] }
 0x821   : > { %v3835_v17 = vadd.f32 %v13564_v28, %v3666_v52 }
 0x822   : > { %v3311_v63 = vadd.f32 %v13238_v23, %v3142_v54  ;;  %v3920_v6 = vmax.f32 %v3825_v56, 0.0  ;;  %v3982_v1 = vpack.c.bf16 %v3918_v36, %v3918_v36 }
 0x824   : > { %v3480_v43 = vadd.f32 %v13266_v19, %v3311_v63  ;;  %v3688_v15 = vpop.f32.mrf.mxu2  ;;  %v3984_v9 = vpack.c.bf16 %v3920_v6, %v3920_v6  ;;  %v9380_v19 = vld [vmem:[%s16813_s6 + $0x150] sm:$0xf0]  ;;  %v2968_v6 = vadd.f32 %v17117_v57, %v13591_v47  ;;  %v4110_v61 = vunpack.c.l.b16 %v3982_v1  ;;  %v17121_v47 = vld [vmem:[#allocation74_spill] sm:$0xff] }
 0x825   : > { %v3689_v18 = vadd.f32 %v3688_v15, %v3520_v8  ;;  %v13759_v23 = vpop.permute.xlu1 %1870  ;;  %v9383_v56 = vor.u32 %v10592_v32, %v9380_v19  ;;  %v13787_v41 = vpop.f32.mrf.mxu1  ;;  %v17120_v32 = vld [vmem:[#allocation114_spill] sm:$0xff] }
 0x826   : > { %v3649_v38 = vadd.f32 %v13416_v16, %v3480_v43  ;;  %v1851_v0 = vpop.permute.xlu0 %1850  ;;  %v4112_v34 = vunpack.c.l.b16 %v3984_v9  ;;  %v2970_v43 = vadd.f32 %v17118_v39, %v1781_v22  ;;  %v3923_v9 = vmax.f32 %v13680_v24, 0.0  ;;  %v17122_v22 = vld [vmem:[#allocation97_spill] sm:$0xff]  ;;  %v17125_v39 = vld [vmem:[#allocation115_spill] sm:$0xff] }
 0x827   : > { %v3187_v19 = vadd.f32 %v17120_v32, %v3018_v10  ;;  %v3137_v36 = vadd.f32 %v17121_v47, %v2968_v6  ;;  %v3020_v1 = vadd.f32 %v17125_v39, %v13671_v4  ;;  %v17126_v10 = vld [vmem:[#allocation98_spill] sm:$0xff] }
 0x828   : > { %v3857_v8 = vpop.f32.mrf.mxu3  ;;  %v13771_v5 = vpack.c.b16 %v4112_v34, %v4111_v2  ;;  %v3818_v16 = vadd.f32 %v13422_v48, %v3649_v38 }
 0x829   : > { %v13774_v54 = vadd.f32 %v3857_v8, %v3689_v18  ;;  %5884 = vmatmul.bf16.gmra.mxu0 %v9379_v49  ;;  %v3924_v18 = vmax.f32 %v3835_v17, 0.0  ;;  %v17119_v49 = vld [vmem:[#allocation105_spill] sm:$0xff]  ;;  %v17123_v8 = vld [vmem:[#allocation76_spill] sm:$0xff]  ;;  %v13799_v17 = vpop.f32.mrf.mxu0  ;;  %v3306_v4 = vadd.f32 %v13171_v45, %v3137_v36 }
 0x82a   : > { %4207 = vrot.lane.b32.xlu1 %v13771_v5, %s10910_s30  ;;  %v3917_v63 = vmax.f32 %v3818_v16, 0.0  ;;  %v3139_v16 = vadd.f32 %v17123_v8, %v2970_v43  ;;  %v9426_v43 = vld [vmem:[%s16813_s6 + $0x180] sm:$0xf] }
 0x82c   : > { %v13784_v48 = vpop.f32.mrf.mxu2  ;;  %v3981_v15 = vpack.c.bf16 %v3917_v63, %v3917_v63  ;;  %v17124_v63 = vld [vmem:[#allocation106_spill] sm:$0xff] }
 0x82d   : > { %v1856_v28 = vpop.permute.xlu1 %1855  ;;  %5973 = vmatmul.bf16.gmra.mxu1 %v9383_v56  ;;  %v3987_v56 = vpack.c.bf16 %v3923_v9, %v3923_v9  ;;  %v10610_v9 = vld [vmem:[%s16813_s6 + $0x1ac] sm:$0xf0] }
 0x82e   : > { %v3008_v38 = vadd.f32 %v17119_v49, %v1856_v28  ;;  %v1836_v2 = vpop.permute.xlu0 %1835  ;;  %v4109_v34 = vunpack.c.l.b16 %v3981_v15  ;;  %v13803_v15 = vpop.permute.xlu2 %1760  ;;  %v3988_v28 = vpack.c.bf16 %v3924_v18, %v3924_v18  ;;  %v3308_v18 = vadd.f32 %v13198_v51, %v3139_v16  ;;  %v10604_v51 = vld [vmem:[%s16813_s6 + $0x184] sm:$0xf]  ;;  %v17129_v16 = vld [vmem:[#allocation104_spill] sm:$0xff] }
 0x82f   : > { %v2998_v52 = vadd.f32 %v17122_v22, %v1836_v2  ;;  %v3356_v2 = vadd.f32 %v13734_v25, %v3187_v19  ;;  %v4115_v47 = vunpack.c.l.b16 %v3987_v56  ;;  %v17128_v22 = vld [vmem:[#allocation116_spill] sm:$0xff]  ;;  %v13832_v25 = vpop.f32.mrf.mxu1 }
 0x830   : > { %v3177_v24 = vadd.f32 %v17124_v63, %v3008_v38  ;;  %v13795_v40 = vpop.f32.mrf.mxu3  ;;  %v13797_v57 = vpack.c.b16 %v4110_v61, %v4109_v34  ;;  %v4116_v45 = vunpack.c.l.b16 %v3988_v28  ;;  %v3477_v36 = vadd.f32 %v13200_v27, %v3308_v18 }
 0x831   : > { %v3167_v6 = vadd.f32 %v17126_v10, %v2998_v52  ;;  %v3189_v52 = vadd.f32 %v17128_v22, %v3020_v1  ;;  %v3525_v19 = vadd.f32 %v13755_v14, %v3356_v2  ;;  %v3362_v27 = vpop.f32.mrf.mxu0  ;;  %v17130_v14 = vld [vmem:[#allocation117_spill] sm:$0xff]  ;;  %v17132_v2 = vld [vmem:[#allocation63_spill] sm:$0xff] }
 0x832   : > { %v3346_v49 = vadd.f32 %v13616_v30, %v3177_v24  ;;  %4205 = vrot.lane.b32.xlu0 %v13797_v57, %s10910_s30  ;;  %v17127_v30 = vld [vmem:[#allocation103_spill] sm:$0xff]  ;;  %v9427_v24 = vor.u32 %v10610_v9, %v9426_v43  ;;  %v13842_v1 = vpack.c.b16 %v4116_v45, %v4115_v47  ;;  %v17139_v45 = vld [vmem:[#allocation61_spill] sm:$0xff] }
 0x833   : > { %v3336_v38 = vadd.f32 %v13530_v42, %v3167_v6  ;;  %v3005_v34 = vadd.f32 %v17127_v30, %v1851_v0  ;;  %v3475_v0 = vadd.f32 %v13176_v44, %v3306_v4  ;;  %v3358_v44 = vadd.f32 %v13768_v3, %v3189_v52  ;;  %v17131_v4 = vld [vmem:[#allocation170_spill] sm:$0xff]  ;;  %v17135_v22 = vld [vmem:[#allocation171_spill] sm:$0xff] }
 0x834   : > { %v3515_v61 = vadd.f32 %v13638_v7, %v3346_v49  ;;  %v3693_v32 = vpop.f32.mrf.mxu2  ;;  %v9428_v7 = vld [vmem:[%s16813_s6 + $0x1b0] sm:$0xf0]  ;;  %v17133_v3 = vld [vmem:[#allocation166_spill] sm:$0xff] }
 0x835   : > { %v3505_v8 = vadd.f32 %v13543_v29, %v3336_v38  ;;  %v13823_v63 = vpop.permute.xlu1 %1770  ;;  %v3694_v6 = vadd.f32 %v3693_v32, %v3525_v19  ;;  %v3644_v9 = vadd.f32 %v13372_v33, %v3475_v0  ;;  %v3527_v32 = vadd.f32 %v13787_v41, %v3358_v44  ;;  %v17145_v44 = vld [vmem:[#allocation120_spill] sm:$0xff] }
 0x836   : > { %v3684_v42 = vadd.f32 %v13710_v20, %v3515_v61  ;;  %v3174_v20 = vadd.f32 %v17129_v16, %v3005_v34  ;;  %v1751_v28 = vpop.permute.xlu0 %1750  ;;  %v1746_v49 = vpop.permute.xlu2 %1745  ;;  %v17134_v34 = vld [vmem:[#allocation119_spill] sm:$0xff] }
 0x837   : > { %v3674_v29 = vadd.f32 %v13614_v58, %v3505_v8  ;;  %v9431_v58 = vor.u32 %v10604_v51, %v9428_v7  ;;  %v2955_v18 = vadd.f32 %v17132_v2, %v1751_v28  ;;  %v3025_v61 = vadd.f32 %v17134_v34, %v17133_v3  ;;  %v17137_v8 = vld [vmem:[#allocation174_spill] sm:$0xff] }
 0x838   : > { %v13840_v56 = vadd.f32 %v13722_v62, %v3684_v42  ;;  %v3862_v39 = vpop.f32.mrf.mxu3  ;;  %v3023_v62 = vadd.f32 %v17130_v14, %v13691_v35  ;;  %v3343_v38 = vadd.f32 %v17131_v4, %v3174_v20  ;;  %v17136_v35 = vld [vmem:[#allocation121_spill] sm:$0xff]  ;;  %v17140_v42 = vld [vmem:[#allocation118_spill] sm:$0xff]  ;;  %v3531_v14 = vpop.f32.mrf.mxu1 }
 0x839   : > { %v13845_v10 = vadd.f32 %v13633_v50, %v3674_v29  ;;  %5889 = vmatmul.bf16.gmra.mxu0 %v9427_v24  ;;  %v3863_v43 = vadd.f32 %v3862_v39, %v3694_v6  ;;  %v3646_v50 = vadd.f32 %v13395_v11, %v3477_v36  ;;  %v3028_v52 = vadd.f32 %v17136_v35, %v17135_v22  ;;  %v17138_v24 = vld [vmem:[#allocation107_spill] sm:$0xff]  ;;  %v17141_v29 = vld [vmem:[#allocation160_spill] sm:$0xff]  ;;  %v17142_v36 = vld [vmem:[#allocation161_spill] sm:$0xff] }
 0x83a   : > { %4211 = vrot.lane.b32.xlu0 %v13842_v1, %s10910_s30  ;;  %v3010_v33 = vadd.f32 %v17138_v24, %v17137_v8  ;;  %v2953_v11 = vadd.f32 %v17139_v45, %v1746_v49  ;;  %v3192_v51 = vadd.f32 %v17140_v42, %v3023_v62  ;;  %v3813_v19 = vadd.f32 %v17141_v29, %v3644_v9  ;;  %v17143_v20 = vld [vmem:[#allocation173_spill] sm:$0xff]  ;;  %v17144_v39 = vld [vmem:[#allocation64_spill] sm:$0xff]  ;;  %v17146_v2 = vld [vmem:[#allocation122_spill] sm:$0xff] }
 0x83b   : > { %v3935_v7 = vmax.f32 %v3863_v43, 0.0  ;;  %v3815_v16 = vadd.f32 %v17142_v36, %v3646_v50  ;;  %v3512_v41 = vadd.f32 %v17143_v20, %v3343_v38  ;;  %v3124_v6 = vadd.f32 %v17144_v39, %v2955_v18  ;;  %v17147_v49 = vld [vmem:[#allocation108_spill] sm:$0xff]  ;;  %v17148_v62 = vld [vmem:[#allocation67_spill] sm:$0xff]  ;;  %v10622_v38 = vld [vmem:[%s16813_s6 + $0x20c] sm:$0xf0]  ;;  %v3365_v18 = vpop.f32.mrf.mxu0 }
 0x83c   : > { %v3695_v30 = vpop.f32.mrf.mxu2  ;;  %v3197_v3 = vadd.f32 %v17146_v2, %v3028_v52  ;;  %v3179_v34 = vadd.f32 %v17147_v49, %v3010_v33  ;;  %v2960_v43 = vadd.f32 %v17148_v62, %v13803_v15  ;;  %v9474_v50 = vld [vmem:[%s16813_s6 + $0x1e0] sm:$0xf]  ;;  %v3361_v22 = vadd.f32 %v13799_v17, %v3192_v51  ;;  %v17150_v52 = vld [vmem:[#allocation137_spill] sm:$0xff]  ;;  %v17152_v39 = vld [vmem:[#allocation68_spill] sm:$0xff] }
 0x83d   : > { %v1756_v47 = vpop.permute.xlu1 %1755  ;;  %5978 = vmatmul.bf16.gmra.mxu1 %v9431_v58  ;;  %v3696_v0 = vadd.f32 %v3695_v30, %v3527_v32  ;;  %v3194_v58 = vadd.f32 %v17145_v44, %v3025_v61  ;;  %v17149_v30 = vld [vmem:[#allocation62_spill] sm:$0xff]  ;;  %v3999_v61 = vpack.c.bf16 %v3935_v7, %v3935_v7  ;;  %v3681_v35 = vadd.f32 %v13689_v12, %v3512_v41  ;;  %v10616_v12 = vld [vmem:[%s16813_s6 + $0x1e4] sm:$0xf] }
 0x83e   : > { %v3122_v9 = vadd.f32 %v17149_v30, %v2953_v11  ;;  %v3293_v8 = vadd.f32 %v17150_v52, %v3124_v6  ;;  %v3915_v24 = vmax.f32 %v3813_v19, 0.0  ;;  %v3916_v33 = vmax.f32 %v3815_v16, 0.0  ;;  %v17151_v11 = vld [vmem:[#allocation65_spill] sm:$0xff]  ;;  %v17153_v17 = vld [vmem:[#allocation134_spill] sm:$0xff] }
 0x83f   : > { %v3363_v45 = vadd.f32 %v3362_v27, %v3194_v58  ;;  %v2958_v42 = vadd.f32 %v17151_v11, %v1756_v47  ;;  %v9475_v36 = vor.u32 %v10622_v38, %v9474_v50  ;;  %v3366_v20 = vadd.f32 %v3365_v18, %v3197_v3  ;;  %v9476_v27 = vld [vmem:[%s16813_s6 + $0x210] sm:$0xf0]  ;;  %v17154_v47 = vld [vmem:[#allocation123_spill] sm:$0xff]  ;;  %v17155_v44 = vld [vmem:[#allocation138_spill] sm:$0xff] }
 0x840   : > { %v3864_v28 = vpop.f32.mrf.mxu3  ;;  %v3348_v7 = vadd.f32 %v13646_v60, %v3179_v34  ;;  %v3291_v51 = vadd.f32 %v17153_v17, %v3122_v9  ;;  %v3030_v19 = vadd.f32 %v17154_v47, %v13667_v46  ;;  %v4127_v16 = vunpack.c.l.b16 %v3999_v61  ;;  %v3534_v49 = vpop.f32.mrf.mxu1  ;;  %v17156_v34 = vld [vmem:[#allocation66_spill] sm:$0xff]  ;;  %v17157_v46 = vld [vmem:[#allocation56_spill] sm:$0xff]  ;;  %v17158_v38 = vld [vmem:[#allocation135_spill] sm:$0xff] }
 0x841   : > { %v3865_v4 = vadd.f32 %v3864_v28, %v3696_v0  ;;  %v3129_v28 = vadd.f32 %v17152_v39, %v2960_v43  ;;  %v3530_v6 = vadd.f32 %v13832_v25, %v3361_v22  ;;  %v3850_v60 = vadd.f32 %v13697_v37, %v3681_v35  ;;  %v17159_v61 = vld [vmem:[#allocation124_spill] sm:$0xff]  ;;  %v17160_v22 = vld [vmem:[#allocation111_spill] sm:$0xff]  ;;  %v17163_v17 = vld [vmem:[#allocation142_spill] sm:$0xff] }
 0x842   : > { %v3462_v58 = vadd.f32 %v17155_v44, %v3293_v8  ;;  %v3979_v2 = vpack.c.bf16 %v3915_v24, %v3915_v24  ;;  %v3980_v3 = vpack.c.bf16 %v3916_v33, %v3916_v33  ;;  %v3127_v62 = vadd.f32 %v17156_v34, %v2958_v42  ;;  %v17161_v33 = vld [vmem:[#allocation150_spill] sm:$0xff] }
 0x843   : > { %v3936_v32 = vmax.f32 %v3865_v4, 0.0  ;;  %v9479_v9 = vor.u32 %v10616_v12, %v9476_v27  ;;  %v3298_v50 = vadd.f32 %v17157_v46, %v3129_v28  ;;  %v3460_v18 = vadd.f32 %v17158_v38, %v3291_v51  ;;  %v3367_v24 = vpop.f32.mrf.mxu0  ;;  %v17164_v12 = vld [vmem:[#allocation59_spill] sm:$0xff] }
 0x844   : > { %v3698_v15 = vpop.f32.mrf.mxu2  ;;  %v3532_v25 = vadd.f32 %v3531_v14, %v3363_v45  ;;  %v3199_v37 = vadd.f32 %v17159_v61, %v3030_v19  ;;  %v3015_v35 = vadd.f32 %v17160_v22, %v13759_v23  ;;  %v13911_v8 = vadd.f32 %v3534_v49, %v3366_v20  ;;  %v17162_v45 = vld [vmem:[#allocation139_spill] sm:$0xff]  ;;  %v17169_v49 = vld [vmem:[#allocation140_spill] sm:$0xff]  ;;  %v10634_v22 = vld [vmem:[%s16813_s6 + $0x26c] sm:$0xf0] }
 0x845   : > { %v4000_v0 = vpack.c.bf16 %v3936_v32, %v3936_v32  ;;  %v13885_v29 = vpop.permute.xlu1 %1840  ;;  %v3699_v30 = vadd.f32 %v3698_v15, %v3530_v6  ;;  %v1831_v32 = vpop.permute.xlu2 %1830  ;;  %v3929_v15 = vmax.f32 %v13682_v55, 0.0  ;;  %v3631_v11 = vadd.f32 %v17161_v33, %v3462_v58  ;;  %v17165_v27 = vld [vmem:[#allocation95_spill] sm:$0xff]  ;;  %v17166_v55 = vld [vmem:[#allocation93_spill] sm:$0xff] }
 0x846   : > { %v3517_v14 = vadd.f32 %v13664_v31, %v3348_v7  ;;  %v4107_v23 = vunpack.c.l.b16 %v3979_v2  ;;  %v4108_v28 = vunpack.c.l.b16 %v3980_v3  ;;  %v3467_v51 = vadd.f32 %v17163_v17, %v3298_v50  ;;  %v17168_v58 = vld [vmem:[#allocation151_spill] sm:$0xff]  ;;  %v17171_v50 = vld [vmem:[#allocation154_spill] sm:$0xff]  ;;  %v9524_v17 = vld [vmem:[%s16813_s6 + $0x270] sm:$0xf0] }
 0x847   : > { %v4128_v41 = vunpack.c.l.b16 %v4000_v0  ;;  %v3930_v0 = vmax.f32 %v3850_v60, 0.0  ;;  %v3629_v20 = vadd.f32 %v17164_v12, %v3460_v18  ;;  %v2995_v47 = vadd.f32 %v17165_v27, %v1831_v32  ;;  %v17172_v18 = vld [vmem:[#allocation148_spill] sm:$0xff] }
 0x848   : > { %v3867_v4 = vpop.f32.mrf.mxu3  ;;  %v3993_v7 = vpack.c.bf16 %v3929_v15, %v3929_v15  ;;  %v3686_v44 = vadd.f32 %v13732_v21, %v3517_v14  ;;  %v13928_v46 = vpack.c.b16 %v4108_v28, %v4107_v23  ;;  %v3636_v38 = vadd.f32 %v17171_v50, %v3467_v51  ;;  %v9522_v21 = vld [vmem:[%s16813_s6 + $0x240] sm:$0xf]  ;;  %v17177_v51 = vld [vmem:[#allocation164_spill] sm:$0xff]  ;;  %v17183_v50 = vld [vmem:[#allocation165_spill] sm:$0xff] }
 0x849   : > { %v13902_v43 = vpack.c.b16 %v4128_v41, %v4127_v16  ;;  %5894 = vmatmul.bf16.gmra.mxu0 %v9475_v36  ;;  %v3868_v52 = vadd.f32 %v3867_v4, %v3699_v30  ;;  %v3296_v36 = vadd.f32 %v17162_v45, %v3127_v62  ;;  %v13921_v16 = vadd.f32 %v3367_v24, %v3199_v37  ;;  %v17167_v41 = vld [vmem:[#allocation112_spill] sm:$0xff]  ;;  %v17170_v62 = vld [vmem:[#allocation94_spill] sm:$0xff] }
 0x84a   : > { %v3184_v6 = vadd.f32 %v17167_v41, %v3015_v35  ;;  %v3800_v4 = vadd.f32 %v17168_v58, %v3631_v11  ;;  %v3994_v3 = vpack.c.bf16 %v3930_v0, %v3930_v0  ;;  %v3798_v61 = vadd.f32 %v17172_v18, %v3629_v20  ;;  %v17173_v37 = vld [vmem:[#allocation96_spill] sm:$0xff]  ;;  %v17178_v20 = vld [vmem:[#allocation69_spill] sm:$0xff] }
 0x84b   : > { %4223 = vrot.lane.b32.xlu2 %v13902_v43, %s10910_s30  ;;  %v3937_v60 = vmax.f32 %v3868_v52, 0.0  ;;  %v3465_v34 = vadd.f32 %v17169_v49, %v3296_v36  ;;  %v3855_v32 = vadd.f32 %v13743_v59, %v3686_v44  ;;  %v17174_v52 = vld [vmem:[#allocation71_spill] sm:$0xff]  ;;  %v4121_v11 = vunpack.c.l.b16 %v3993_v7  ;;  %v17175_v45 = vld [vmem:[#allocation152_spill] sm:$0xff] }
 0x84c   : > { %v3700_v42 = vpop.f32.mrf.mxu2  ;;  %v3353_v35 = vadd.f32 %v13708_v13, %v3184_v6  ;;  %v2965_v15 = vadd.f32 %v17174_v52, %v13823_v63  ;;  %v3931_v0 = vmax.f32 %v13840_v56, 0.0  ;;  %v3910_v14 = vmax.f32 %v3800_v4, 0.0  ;;  %v10628_v63 = vld [vmem:[%s16813_s6 + $0x244] sm:$0xf] }
 0x84d   : > { %v1826_v39 = vpop.permute.xlu1 %1825  ;;  %5983 = vmatmul.bf16.gmra.mxu1 %v9479_v9  ;;  %v3701_v31 = vadd.f32 %v3700_v42, %v3532_v25  ;;  %v3164_v25 = vadd.f32 %v17173_v37, %v2995_v47  ;;  %v4001_v24 = vpack.c.bf16 %v3937_v60, %v3937_v60  ;;  %v4122_v42 = vunpack.c.l.b16 %v3994_v3  ;;  %v17181_v49 = vld [vmem:[#allocation163_spill] sm:$0xff]  ;;  %v17184_v37 = vld [vmem:[#allocation70_spill] sm:$0xff] }
 0x84e   : > { %v2993_v19 = vadd.f32 %v17166_v55, %v1826_v39  ;;  %v3634_v36 = vadd.f32 %v17175_v45, %v3465_v34  ;;  %v17176_v39 = vld [vmem:[#allocation162_spill] sm:$0xff]  ;;  %v9523_v13 = vor.u32 %v10634_v22, %v9522_v21  ;;  %v2963_v56 = vadd.f32 %v17178_v20, %v13740_v53 }
 0x84f   : > { %v3333_v12 = vadd.f32 %v17177_v51, %v3164_v25  ;;  %v3932_v27 = vmax.f32 %v3855_v32, 0.0  ;;  %v3909_v47 = vmax.f32 %v3798_v61, 0.0  ;;  %v3522_v55 = vadd.f32 %v13724_v26, %v3353_v35  ;;  %v17182_v26 = vld [vmem:[#allocation155_spill] sm:$0xff] }
 0x850   : > { %v3869_v2 = vpop.f32.mrf.mxu3  ;;  %v3162_v30 = vadd.f32 %v17170_v62, %v2993_v19  ;;  %v17179_v19 = vld [vmem:[#allocation72_spill] sm:$0xff]  ;;  %v4129_v6 = vunpack.c.l.b16 %v4001_v24  ;;  %v13959_v7 = vpack.c.b16 %v4122_v42, %v4121_v11  ;;  %v9527_v44 = vor.u32 %v10628_v63, %v9524_v17  ;;  %v17187_v11 = vld [vmem:[#allocation169_spill] sm:$0xff]  ;;  %v17190_v17 = vld [vmem:[#allocation147_spill] sm:$0xff] }
 0x851   : > { %v3870_v9 = vadd.f32 %v3869_v2, %v3701_v31  ;;  %v3134_v41 = vadd.f32 %v17179_v19, %v2965_v15  ;;  %v3995_v58 = vpack.c.bf16 %v3931_v0, %v3931_v0  ;;  %v3974_v4 = vpack.c.bf16 %v3910_v14, %v3910_v14  ;;  %v17180_v2 = vld [vmem:[#allocation153_spill] sm:$0xff]  ;;  %v17188_v14 = vld [vmem:[#allocation86_spill] sm:$0xff] }
 0x852   : > { %v3331_v23 = vadd.f32 %v17176_v39, %v3162_v30  ;;  %v3803_v3 = vadd.f32 %v17180_v2, %v3634_v36  ;;  %v3805_v30 = vadd.f32 %v17182_v26, %v3636_v38  ;;  %v3502_v18 = vadd.f32 %v17183_v50, %v3333_v12  ;;  %v17186_v38 = vld [vmem:[#allocation99_spill] sm:$0xff]  ;;  %v17191_v12 = vld [vmem:[#allocation100_spill] sm:$0xff] }
 0x853   : > { %v3938_v33 = vmax.f32 %v3870_v9, 0.0  ;;  %4203 = vrot.lane.b32.xlu2 %v13928_v46, %s10910_s30  ;;  %v3536_v9 = vpop.f32.mrf.mxu1  ;;  %v3996_v61 = vpack.c.bf16 %v3932_v27, %v3932_v27  ;;  %v3132_v25 = vadd.f32 %v17184_v37, %v2963_v56  ;;  %v3973_v21 = vpack.c.bf16 %v3909_v47, %v3909_v47  ;;  %v17192_v27 = vld [vmem:[#allocation85_spill] sm:$0xff]  ;;  %v17196_v26 = vld [vmem:[#allocation167_spill] sm:$0xff] }
 0x854   : > { %v3703_v59 = vpop.f32.mrf.mxu2  ;;  %v3500_v34 = vadd.f32 %v17181_v49, %v3331_v23  ;;  %v3691_v22 = vadd.f32 %v13784_v48, %v3522_v55  ;;  %v3000_v52 = vadd.f32 %v17186_v38, %v13885_v29  ;;  %v4123_v24 = vunpack.c.l.b16 %v3995_v58  ;;  %v17189_v23 = vld [vmem:[#allocation144_spill] sm:$0xff]  ;;  %v17194_v58 = vld [vmem:[#allocation145_spill] sm:$0xff] }
 0x855   : > { %v4002_v28 = vpack.c.bf16 %v3938_v33, %v3938_v33  ;;  %v3704_v53 = vadd.f32 %v3703_v59, %v13911_v8  ;;  %v17185_v8 = vld [vmem:[#allocation146_spill] sm:$0xff]  ;;  %v3537_v33 = vadd.f32 %v3536_v9, %v13921_v16  ;;  %v4102_v42 = vunpack.c.l.b16 %v3974_v4 }
 0x856   : > { %v3303_v35 = vadd.f32 %v17185_v8, %v3134_v41  ;;  %v3669_v59 = vadd.f32 %v17187_v11, %v3500_v34  ;;  %v3911_v0 = vmax.f32 %v3803_v3, 0.0  ;;  %v3671_v45 = vadd.f32 %v17188_v14, %v3502_v18  ;;  %v17195_v34 = vld [vmem:[#allocation158_spill] sm:$0xff]  ;;  %v17199_v11 = vld [vmem:[#allocation168_spill] sm:$0xff] }
 0x857   : > { %v4130_v60 = vunpack.c.l.b16 %v4002_v28  ;;  %v4124_v36 = vunpack.c.l.b16 %v3996_v61  ;;  %v3912_v39 = vmax.f32 %v3805_v30, 0.0  ;;  %v3301_v48 = vadd.f32 %v17189_v23, %v3132_v25  ;;  %v10640_v25 = vld [vmem:[%s16813_s6 + $0x2a4] sm:$0xf] }
 0x858   : > { %v3872_v31 = vpop.f32.mrf.mxu3  ;;  %v4101_v63 = vunpack.c.l.b16 %v3973_v21  ;;  %v3860_v29 = vadd.f32 %v13795_v40, %v3691_v22  ;;  %v3472_v51 = vadd.f32 %v17190_v17, %v3303_v35  ;;  %v3169_v16 = vadd.f32 %v17191_v12, %v3000_v52  ;;  %v10646_v40 = vld [vmem:[%s16813_s6 + $0x2cc] sm:$0xf0]  ;;  %v17197_v22 = vld [vmem:[#allocation156_spill] sm:$0xff] }
 0x859   : > { %v13963_v62 = vpack.c.b16 %v4130_v60, %v4129_v6  ;;  %5899 = vmatmul.bf16.gmra.mxu0 %v9523_v13  ;;  %v3873_v32 = vadd.f32 %v3872_v31, %v3704_v53  ;;  %v13984_v56 = vpack.c.b16 %v4124_v36, %v4123_v24  ;;  %v3838_v47 = vadd.f32 %v17192_v27, %v3669_v59  ;;  %v17193_v6 = vld [vmem:[#allocation172_spill] sm:$0xff]  ;;  %v9570_v31 = vld [vmem:[%s16813_s6 + $0x2a0] sm:$0xf]  ;;  %v17200_v36 = vld [vmem:[#allocation157_spill] sm:$0xff] }
 0x85a   : > { %v13987_v19 = vpack.c.b16 %v4102_v42, %v4101_v63  ;;  %v3975_v41 = vpack.c.bf16 %v3911_v0, %v3911_v0  ;;  %v3840_v60 = vadd.f32 %v17193_v6, %v3671_v45  ;;  %v3470_v4 = vadd.f32 %v17194_v58, %v3301_v48  ;;  %v17198_v24 = vld [vmem:[#allocation159_spill] sm:$0xff]  ;;  %v17201_v48 = vld [vmem:[#allocation149_spill] sm:$0xff]  ;;  %v17203_v27 = vld [vmem:[#allocation88_spill] sm:$0xff] }
 0x85b   : > { %4225 = vrot.lane.b32.xlu0 %v13963_v62, %s10910_s30  ;;  %4217 = vrot.lane.b32.xlu2 %v13959_v7, %s10910_s30  ;;  %v3939_v28 = vmax.f32 %v3873_v32, 0.0  ;;  %v3934_v49 = vmax.f32 %v3860_v29, 0.0  ;;  %v3641_v53 = vadd.f32 %v17195_v34, %v3472_v51  ;;  %v3338_v30 = vadd.f32 %v17196_v26, %v3169_v16  ;;  %v9572_v32 = vld [vmem:[%s16813_s6 + $0x2d0] sm:$0xf0]  ;;  %v9618_v6 = vld [vmem:[%s16813_s6 + $0x300] sm:$0xf] }
 0x85c   : > { %v3705_v15 = vpop.f32.mrf.mxu2  ;;  %v9571_v50 = vor.u32 %v10646_v40, %v9570_v31  ;;  %v4103_v18 = vunpack.c.l.b16 %v3975_v41  ;;  %v3925_v61 = vmax.f32 %v3838_v47, 0.0  ;;  %v3926_v21 = vmax.f32 %v3840_v60, 0.0  ;;  %v10658_v60 = vld [vmem:[%s16813_s6 + $0x32c] sm:$0xf0]  ;;  %v17204_v40 = vld [vmem:[#allocation130_spill] sm:$0xff] }
 0x85d   : > { %5988 = vmatmul.bf16.gmra.mxu1 %v9527_v44  ;;  %v3706_v13 = vadd.f32 %v3705_v15, %v3537_v33  ;;  %v3976_v44 = vpack.c.bf16 %v3912_v39, %v3912_v39  ;;  %v4003_v2 = vpack.c.bf16 %v3939_v28, %v3939_v28  ;;  %v3639_v8 = vadd.f32 %v17197_v22, %v3470_v4 }
 0x85e   : > { %v3933_v35 = vmax.f32 %v13774_v54, 0.0  ;;  %v3998_v15 = vpack.c.bf16 %v3934_v49, %v3934_v49  ;;  %v3810_v33 = vadd.f32 %v17198_v24, %v3641_v53  ;;  %v3507_v59 = vadd.f32 %v17199_v11, %v3338_v30  ;;  %v9620_v49 = vld [vmem:[%s16813_s6 + $0x330] sm:$0xf0] }
 0x85f   : > { %v4104_v37 = vunpack.c.l.b16 %v3976_v44  ;;  %v4131_v38 = vunpack.c.l.b16 %v4003_v2  ;;  %v9575_v14 = vor.u32 %v10640_v25, %v9572_v32  ;;  %v3989_v45 = vpack.c.bf16 %v3925_v61, %v3925_v61  ;;  %v9668_v11 = vld [vmem:[%s16813_s6 + $0x390] sm:$0xf0] }
 0x860   : > { %v3874_v20 = vpop.f32.mrf.mxu3  ;;  %v3808_v39 = vadd.f32 %v17200_v36, %v3639_v8  ;;  %v3997_v23 = vpack.c.bf16 %v3933_v35, %v3933_v35  ;;  %v3990_v54 = vpack.c.bf16 %v3926_v21, %v3926_v21  ;;  %v4126_v28 = vunpack.c.l.b16 %v3998_v15  ;;  %v9666_v8 = vld [vmem:[%s16813_s6 + $0x360] sm:$0xf]  ;;  %v10670_v35 = vld [vmem:[%s16813_s6 + $0x38c] sm:$0xf0]  ;;  %v17210_v36 = vld [vmem:[#allocation128_spill] sm:$0xff] }
 0x861   : > { %v3875_v55 = vadd.f32 %v3874_v20, %v3706_v13  ;;  %v14015_v0 = vpack.c.b16 %v4104_v37, %v4103_v18  ;;  %v17202_v13 = vld [vmem:[#allocation87_spill] sm:$0xff]  ;;  %v4117_v29 = vunpack.c.l.b16 %v3989_v45  ;;  %v3914_v17 = vmax.f32 %v3810_v33, 0.0  ;;  %v17206_v37 = vld [vmem:[#allocation129_spill] sm:$0xff]  ;;  %v17209_v45 = vld [vmem:[#allocation132_spill] sm:$0xff] }
 0x862   : > { %v3676_v63 = vadd.f32 %v17202_v13, %v3507_v59  ;;  %v4125_v51 = vunpack.c.l.b16 %v3997_v23  ;;  %v4118_v12 = vunpack.c.l.b16 %v3990_v54  ;;  %v3913_v16 = vmax.f32 %v3808_v39, 0.0  ;;  %v17205_v18 = vld [vmem:[#allocation131_spill] sm:$0xff]  ;;  %v17212_v13 = vld [vmem:[#allocation60_spill] sm:$0xff] }
 0x863   : > { %v3940_v3 = vmax.f32 %v3875_v55, 0.0  ;;  %4219 = vrot.lane.b32.xlu0 %v13984_v56, %s10910_s30  ;;  %4197 = vrot.lane.b32.xlu2 %v13987_v19, %s10910_s30  ;;  %v3978_v41 = vpack.c.bf16 %v3914_v17, %v3914_v17  ;;  %v9619_v44 = vor.u32 %v10658_v60, %v9618_v6  ;;  %v3927_v53 = vmax.f32 %v13845_v10, 0.0  ;;  %v10664_v33 = vld [vmem:[%s16813_s6 + $0x364] sm:$0xf] }
 0x864   : > { %v14025_v20 = vpack.c.b16 %v4126_v28, %v4125_v51  ;;  %v3845_v47 = vadd.f32 %v17203_v27, %v3676_v63  ;;  %v14028_v55 = vpack.c.b16 %v4118_v12, %v4117_v29  ;;  %v3977_v31 = vpack.c.bf16 %v3913_v16, %v3913_v16  ;;  %v17211_v39 = vld [vmem:[#allocation143_spill] sm:$0xff]  ;;  %v10682_v28 = vld [vmem:[%s16813_s6 + $0x3ec] sm:$0xf0]  ;;  %v9716_v51 = vld [vmem:[%s16813_s6 + $0x3f0] sm:$0xf0] }
 0x865   : > { %v4004_v9 = vpack.c.bf16 %v3940_v3, %v3940_v3  ;;  %v4106_v58 = vunpack.c.l.b16 %v3978_v41  ;;  %v10652_v3 = vld [vmem:[%s16813_s6 + $0x304] sm:$0xf]  ;;  %v3991_v61 = vpack.c.bf16 %v3927_v53, %v3927_v53  ;;  %v9667_v15 = vor.u32 %v10670_v35, %v9666_v8  ;;  %v17213_v27 = vld [vmem:[#allocation141_spill] sm:$0xff]  ;;  %v4210_v41 = vpop.permute.xlu2 %4209  ;;  %v9810_v35 = vld [vmem:[%s16813_s6 + $0x480] sm:$0xf] }
 0x866   : > { %v3928_v4 = vmax.f32 %v3845_v47, 0.0  ;;  %v4105_v34 = vunpack.c.l.b16 %v3977_v31  ;;  %v9623_v30 = vor.u32 %v10652_v3, %v9620_v49  ;;  %v9671_v59 = vor.u32 %v10664_v33, %v9668_v11  ;;  %v10676_v17 = vld [vmem:[%s16813_s6 + $0x3c4] sm:$0xf]  ;;  %v17214_v47 = vld [vmem:[#allocation126_spill] sm:$0xff]  ;;  %v9762_v31 = vld [vmem:[%s16813_s6 + $0x420] sm:$0xf] }
 0x867   : > { %v4132_v52 = vunpack.c.l.b16 %v4004_v9  ;;  %v4119_v32 = vunpack.c.l.b16 %v3991_v61  ;;  %v9719_v12 = vor.u32 %v10676_v17, %v9716_v51  ;;  %v9764_v53 = vld [vmem:[%s16813_s6 + $0x450] sm:$0xf0] }
 0x868   : > { %v14051_v26 = vpack.c.b16 %v4106_v58, %v4105_v34  ;;  %v3992_v9 = vpack.c.bf16 %v3928_v4, %v3928_v4  ;;  %v10688_v34 = vld [vmem:[%s16813_s6 + $0x424] sm:$0xf]  ;;  %v17219_v33 = vld [vmem:[#allocation125_spill] sm:$0xff] }
 0x869   : > { %v14013_v42 = vpack.c.b16 %v4132_v52, %v4131_v38  ;;  %5904 = vmatmul.bf16.gmra.mxu0 %v9571_v50  ;;  %v17207_v38 = vld [vmem:[#allocation57_spill] sm:$0xff] }
 0x86a   : > { %v4120_v25 = vunpack.c.l.b16 %v3992_v9  ;;  %v17208_v52 = vld [vmem:[#allocation89_spill] sm:$0xff] }
 0x86b   : > { %4227 = vrot.lane.b32.xlu1 %v14013_v42, %s10910_s30  ;;  %4199 = vrot.lane.b32.xlu0 %v14015_v0, %s10910_s30  ;;  %v4739_v51 = vld [vmem:[%s16814_s7 + $0xf0] sm:$0xff] }
 0x86c   : > { %4355 = vrot.lane.b32.xlu2 %v17201_v48, %s10911_s19  ;;  %v14063_v21 = vpack.c.b16 %v4120_v25, %v4119_v32  ;;  %v9714_v48 = vld [vmem:[%s16813_s6 + $0x3c0] sm:$0xf] }
 0x86d   : > { %5993 = vmatmul.bf16.gmra.mxu1 %v9575_v14  ;;  %v9715_v63 = vor.u32 %v10682_v28, %v9714_v48  ;;  %v9812_v48 = vld [vmem:[%s16813_s6 + $0x4b0] sm:$0xf0] }
 0x873   : > { %4221 = vrot.lane.b32.xlu1 %v14025_v20, %s10910_s30  ;;  %4213 = vrot.lane.b32.xlu0 %v14028_v55, %s10910_s30 }
 0x874   : > { %4335 = vrot.lane.b32.xlu2 %v17204_v40, %s10911_s19  ;;  %v10694_v40 = vld [vmem:[%s16813_s6 + $0x44c] sm:$0xf0] }
 0x875   : > { %v9763_v3 = vor.u32 %v10694_v40, %v9762_v31 }
 0x876   : > { %v14042_v2 = vpop.f32.mrf.mxu0 }
 0x879   : > { %5909 = vmatmul.bf16.gmra.mxu0 %v9619_v44  ;;  %v17215_v44 = vld [vmem:[#allocation58_spill] sm:$0xff] }
 0x87a   : > { %v14053_v50 = vpop.f32.mrf.mxu1 }
 0x87b   : > { %4201 = vrot.lane.b32.xlu1 %v14051_v26, %s10910_s30  ;;  %4337 = vrot.lane.b32.xlu0 %v17205_v18, %s10911_s19  ;;  %v17216_v18 = vld [vmem:[#allocation133_spill] sm:$0xff] }
 0x87c   : > { %4333 = vrot.lane.b32.xlu2 %v17206_v37, %s10911_s19 }
 0x87d   : > { %5998 = vmatmul.bf16.gmra.mxu1 %v9623_v30  ;;  %v9767_v30 = vor.u32 %v10688_v34, %v9764_v53  ;;  %v4723_v53 = vld [vmem:[%s16814_s7 + $0x70] sm:$0xff] }
 0x87e   : > { %v14061_v10 = vpop.f32.mrf.mxu0 }
 0x882   : > { %v14065_v22 = vpop.f32.mrf.mxu1 }
 0x883   : > { %4215 = vrot.lane.b32.xlu1 %v14063_v21, %s10910_s30  ;;  %4351 = vrot.lane.b32.xlu0 %v17207_v38, %s10911_s19  ;;  %v10706_v38 = vld [vmem:[%s16813_s6 + $0x4ac] sm:$0xf0] }
 0x884   : > { %4369 = vrot.lane.b32.xlu2 %v17208_v52, %s10911_s19 }
 0x886   : > { %v14079_v24 = vpop.f32.mrf.mxu0 }
 0x889   : > { %5914 = vmatmul.bf16.gmra.mxu0 %v9667_v15  ;;  %v17218_v15 = vld [vmem:[#allocation127_spill] sm:$0xff] }
 0x88a   : > { %v14087_v14 = vpop.f32.mrf.mxu1 }
 0x88b   : > { %4339 = vrot.lane.b32.xlu1 %v17209_v45, %s10911_s19  ;;  %4331 = vrot.lane.b32.xlu0 %v17210_v36, %s10911_s19  ;;  %v9811_v45 = vor.u32 %v10706_v38, %v9810_v35 }
 0x88c   : > { %4347 = vrot.lane.b32.xlu2 %v17211_v39, %s10911_s19  ;;  %v10700_v39 = vld [vmem:[%s16813_s6 + $0x484] sm:$0xf] }
 0x88d   : > { %6003 = vmatmul.bf16.gmra.mxu1 %v9671_v59  ;;  %v9815_v28 = vor.u32 %v10700_v39, %v9812_v48  ;;  %v10730_v39 = vld [vmem:[%s16813_s6 + $0x56c] sm:$0xf0] }
 0x88e   : > { %v14095_v23 = vpop.f32.mrf.mxu0 }
 0x892   : > { %v14097_v54 = vpop.f32.mrf.mxu1 }
 0x893   : > { %4353 = vrot.lane.b32.xlu1 %v17212_v13, %s10911_s19  ;;  %4367 = vrot.lane.b32.xlu0 %v13771_v5, %s10911_s19 }
 0x894   : > { %4383 = vrot.lane.b32.xlu2 %v13902_v43, %s10911_s19 }
 0x896   : > { %v14111_v29 = vpop.f32.mrf.mxu0 }
 0x899   : > { %5919 = vmatmul.bf16.gmra.mxu0 %v9715_v63 }
 0x89a   : > { %v14119_v16 = vpop.f32.mrf.mxu1 }
 0x89b   : > { %4371 = vrot.lane.b32.xlu1 %v13842_v1, %s10911_s19  ;;  %4345 = vrot.lane.b32.xlu0 %v17213_v27, %s10911_s19  ;;  %v9858_v27 = vld [vmem:[%s16813_s6 + $0x4e0] sm:$0xf] }
 0x89c   : > { %4327 = vrot.lane.b32.xlu2 %v17214_v47, %s10911_s19  ;;  %v4208_v11 = vpop.permute.xlu1 %4207  ;;  %v10718_v47 = vld [vmem:[%s16813_s6 + $0x50c] sm:$0xf0] }
 0x89d   : > { %6008 = vmatmul.bf16.gmra.mxu1 %v9719_v12  ;;  %v9859_v31 = vor.u32 %v10718_v47, %v9858_v27  ;;  %v10724_v47 = vld [vmem:[%s16813_s6 + $0x544] sm:$0xf] }
 0x89e   : > { %v14127_v6 = vpop.f32.mrf.mxu0 }
 0x8a2   : > { %v14129_v60 = vpop.f32.mrf.mxu1 }
 0x8a3   : > { %4349 = vrot.lane.b32.xlu1 %v17215_v44, %s10911_s19  ;;  %4381 = vrot.lane.b32.xlu0 %v14025_v20, %s10911_s19 }
 0x8a4   : > { %4363 = vrot.lane.b32.xlu2 %v13928_v46, %s10911_s19  ;;  %v4206_v58 = vpop.permute.xlu0 %4205 }
 0x8a5   : > { %v14143_v4 = vpop.permute.xlu2 %4223 }
 0x8a6   : > { %v14145_v49 = vpop.f32.mrf.mxu0 }
 0x8a9   : > { %5924 = vmatmul.bf16.gmra.mxu0 %v9763_v3  ;;  %v9860_v3 = vld [vmem:[%s16813_s6 + $0x510] sm:$0xf0] }
 0x8aa   : > { %v14153_v9 = vpop.f32.mrf.mxu1 }
 0x8ab   : > { %4385 = vrot.lane.b32.xlu1 %v13963_v62, %s10911_s19  ;;  %4387 = vrot.lane.b32.xlu0 %v14013_v42, %s10911_s19 }
 0x8ac   : > { %4341 = vrot.lane.b32.xlu2 %v17216_v18, %s10911_s19  ;;  %v4212_v61 = vpop.permute.xlu0 %4211 }
 0x8ad   : > { %6013 = vmatmul.bf16.gmra.mxu1 %v9767_v30  ;;  %10033 = vmatpush.bf16.msk.msrb.mxu0 %vm11131_vm10, %v4212_v61  ;;  %v4204_v25 = vpop.permute.xlu2 %4203  ;;  %v4722_v30 = vld [vmem:[%s16814_s7 + $0x68] sm:$0xff] }
 0x8ae   : > { %v14163_v32 = vpop.f32.mrf.mxu0 }
 0x8b1   : > { %10035 = vmatpush.bf16.msk.msrb.mxu0 %vm11131_vm10, %v4210_v41  ;;  %v17220_v41 = vld [vmem:[#allocation136_spill] sm:$0xff] }
 0x8b2   : > { %v14167_v8 = vpop.f32.mrf.mxu1 }
 0x8b3   : > { %4329 = vrot.lane.b32.xlu1 %v17218_v15, %s10911_s19  ;;  %4325 = vrot.lane.b32.xlu0 %v17219_v33, %s10911_s19  ;;  %v4740_v15 = vld [vmem:[%s16814_s7 + $0xf8] sm:$0xff]  ;;  %v4719_v33 = vld [vmem:[%s16814_s7 + $0x50] sm:$0xff] }
 0x8b4   : > { %4359 = vrot.lane.b32.xlu2 %v14015_v0, %s10911_s19 }
 0x8b5   : > { %10037 = vmatpush.bf16.msk.msrb.mxu0 %vm11131_vm10, %v4208_v11  ;;  %v14183_v59 = vpop.permute.xlu2 %4217 }
 0x8b6   : > { %v14185_v36 = vpop.f32.mrf.mxu0 }
 0x8b9   : > { %5929 = vmatmul.bf16.gmra.mxu0 %v9811_v45  ;;  %v9906_v45 = vld [vmem:[%s16813_s6 + $0x540] sm:$0xf] }
 0x8ba   : > { %10039 = vmatpush.bf16.msk.msrb.mxu0 %vm11131_vm10, %v4206_v58  ;;  %v14195_v13 = vpop.f32.mrf.mxu1  ;;  %v10712_v58 = vld [vmem:[%s16813_s6 + $0x4e4] sm:$0xf] }
 0x8bb   : > { %4365 = vrot.lane.b32.xlu1 %v13797_v57, %s10911_s19  ;;  %4361 = vrot.lane.b32.xlu0 %v14051_v26, %s10911_s19  ;;  %v9863_v18 = vor.u32 %v10712_v58, %v9860_v3  ;;  %v10564_v58 = vld [vmem:[%s16813_s6 + $0x3c] sm:$0xf0]  ;;  %v4736_v3 = vld [vmem:[%s16814_s7 + $0xd8] sm:$0xff] }
 0x8bc   : > { %4373 = vrot.lane.b32.xlu2 %v14028_v55, %s10911_s19 }
 0x8bd   : > { %6018 = vmatmul.bf16.gmra.mxu1 %v9815_v28  ;;  %v14203_v63 = vpop.permute.xlu2 %4197  ;;  %v9907_v28 = vor.u32 %v10730_v39, %v9906_v45 }
 0x8be   : > { %10041 = vmatpush.bf16.msk.msrb.mxu0 %vm11131_vm10, %v4204_v25  ;;  %v14207_v17 = vpop.f32.mrf.mxu0 }
 0x8c2   : > { %v14212_v12 = vpop.f32.mrf.mxu1 }
 0x8c3   : > { %4343 = vrot.lane.b32.xlu1 %v17220_v41, %s10911_s19  ;;  %4375 = vrot.lane.b32.xlu0 %v14063_v21, %s10911_s19  ;;  %v9908_v41 = vld [vmem:[%s16813_s6 + $0x570] sm:$0xf0] }
 0x8c4   : > { %4893 = vperm.xlu2 %10833, %v4739_v51  }
 0x8c6   : > { %v4356_v40 = vpop.permute.xlu2 %4355  ;;  %v14224_v44 = vpop.f32.mrf.mxu0 }
 0x8c7   : > { %v4435_v34 = vsel %vm556_vm8, %v4356_v40, 0  ;;  %v9250_v40 = vld [vmem:[%s16813_s6 + $0x10] sm:$0xf] }
 0x8c8   : > { %6662 = vmatpush.bf16.msrb.mxu3 %v4435_v34  ;;  %v9911_v34 = vor.u32 %v10724_v47, %v9908_v41  ;;  %v4724_v41 = vld [vmem:[%s16814_s7 + $0x78] sm:$0xff] }
 0x8c9   : > { %5934 = vmatmul.bf16.gmra.mxu0 %v9859_v31  ;;  %v4737_v31 = vld [vmem:[%s16814_s7 + $0xe0] sm:$0xff] }
 0x8ca   : > { %v14239_v61 = vpop.f32.mrf.mxu1 }
 0x8cb   : > { %4379 = vrot.lane.b32.xlu1 %v13984_v56, %s10911_s19  ;;  %4813 = vperm.xlu0 %10834, %v4723_v53   ;;  %v9251_v53 = vor.u32 %v10564_v58, %v9250_v40  ;;  %v4733_v40 = vld [vmem:[%s16814_s7 + $0xc0] sm:$0xff] }
 0x8cc   : > { %4808 = vperm.xlu2 %10833, %v4722_v30  }
 0x8cd   : > { %6023 = vmatmul.bf16.gmra.mxu1 %v9863_v18  ;;  %v4226_v25 = vpop.permute.xlu0 %4225  ;;  %v10558_v18 = vld [vmem:[%s16813_s6 + $0x14] sm:$0xf]  ;;  %6225 = vmatmul.bf16.vlgmr.msra.gmra.mxu2 %v9251_v53 }
 0x8ce   : > { %v14243_v35 = vpop.permute.xlu2 %4335  ;;  %v14245_v38 = vpop.f32.mrf.mxu0 }
 0x8d2   : > { %v14253_v11 = vpop.f32.mrf.mxu1 }
 0x8d3   : > { %4377 = vrot.lane.b32.xlu1 %v13959_v7, %s10911_s19  ;;  %4898 = vperm.xlu0 %10834, %v4740_v15   ;;  %v9252_v15 = vld [vmem:[%s16813_s6 + $0x40] sm:$0xf0] }
 0x8d4   : > { %4793 = vperm.xlu2 %10833, %v4719_v33   ;;  %v9255_v33 = vor.u32 %v10558_v18, %v9252_v15 }
 0x8d5   : > { %v14263_v48 = vpop.permute.xlu0 %4219 }
 0x8d6   : > { %v14265_v51 = vpop.permute.xlu2 %4333  ;;  %v14267_v27 = vpop.f32.mrf.mxu0  ;;  %6314 = vmatmul.bf16.vlgmr.msra.gmra.mxu3 %v9255_v33 }
 0x8d9   : > { %5939 = vmatmul.bf16.gmra.mxu0 %v9907_v28 }
 0x8da   : > { %v14287_v30 = vpop.f32.mrf.mxu1 }
 0x8db   : > { %17221 = vst [vmem:[#allocation101_spill] sm:$0xff] %v14287_v30  ;;  %4357 = vrot.lane.b32.xlu1 %v13987_v19, %s10911_s19  ;;  %4883 = vperm.xlu0 %10834, %v4737_v31   ;;  %v4720_v31 = vld [vmem:[%s16814_s7 + $0x58] sm:$0xff]  ;;  %v10570_v30 = vld [vmem:[%s16813_s6 + $0x74] sm:$0xf] }
 0x8dc   : > { %4878 = vperm.xlu2 %10833, %v4736_v3   ;;  %v9954_v3 = vld [vmem:[%s16813_s6 + $0x5a0] sm:$0xf] }
 0x8dd   : > { %v4228_v45 = vpop.permute.xlu1 %4227  ;;  %6028 = vmatmul.bf16.gmra.mxu1 %v9911_v34  ;;  %v4200_v39 = vpop.permute.xlu0 %4199  ;;  %v10742_v34 = vld [vmem:[%s16813_s6 + $0x5cc] sm:$0xf0] }
 0x8de   : > { %v14297_v28 = vpop.permute.xlu2 %4369  ;;  %v14299_v47 = vpop.f32.mrf.mxu0  ;;  %10049 = vmatpush.bf16.msk.msrb.mxu1 %vm11131_vm10, %v4228_v45  ;;  %v9955_v15 = vor.u32 %v10742_v34, %v9954_v3  ;;  %v4716_v3 = vld [vmem:[%s16814_s7 + $0x38] sm:$0xff] }
 0x8df   : > { %17222 = vst [vmem:[#allocation90_spill] sm:$0xff] %v14299_v47 }
 0x8e2   : > { %v14312_v58 = vpop.f32.mrf.mxu1  ;;  %10051 = vmatpush.bf16.msk.msrb.mxu1 %vm11131_vm10, %v4226_v25  ;;  %v10736_v25 = vld [vmem:[%s16813_s6 + $0x5a4] sm:$0xf] }
 0x8e3   : > { %17223 = vst [vmem:[#allocation102_spill] sm:$0xff] %v14312_v58  ;;  %4818 = vperm.xlu1 %10835, %v4724_v41   ;;  %4798 = vperm.xlu0 %10834, %v4720_v31   ;;  %v9956_v41 = vld [vmem:[%s16813_s6 + $0x5d0] sm:$0xf0]  ;;  %v4721_v31 = vld [vmem:[%s16814_s7 + $0x60] sm:$0xff] }
 0x8e4   : > { %4863 = vperm.xlu2 %10833, %v4733_v40   ;;  %v4717_v40 = vld [vmem:[%s16814_s7 + $0x40] sm:$0xff]  ;;  %v9959_v34 = vor.u32 %v10736_v25, %v9956_v41 }
 0x8e5   : > { %v4222_v53 = vpop.permute.xlu1 %4221  ;;  %v4214_v18 = vpop.permute.xlu0 %4213 }
 0x8e6   : > { %v14322_v33 = vpop.permute.xlu2 %4347  ;;  %v14324_v45 = vpop.f32.mrf.mxu0  ;;  %10053 = vmatpush.bf16.msk.msrb.mxu1 %vm11131_vm10, %v14143_v4  ;;  %v9298_v4 = vld [vmem:[%s16813_s6 + $0x70] sm:$0xf] }
 0x8e7   : > { %17224 = vst [vmem:[#allocation81_spill] sm:$0xff] %v14324_v45  ;;  %v10576_v45 = vld [vmem:[%s16813_s6 + $0x9c] sm:$0xf0] }
 0x8e8   : > { %v9299_v47 = vor.u32 %v10576_v45, %v9298_v4  ;;  %v10563_v4 = vld [vmem:[%s16813_s6 + $0x34] sm:$0xf0] }
 0x8e9   : > { %5944 = vmatmul.bf16.gmra.mxu0 %v9955_v15  ;;  %v9300_v15 = vld [vmem:[%s16813_s6 + $0xa0] sm:$0xf0] }
 0x8ea   : > { %v14350_v58 = vpop.f32.mrf.mxu1  ;;  %10055 = vmatpush.bf16.msk.msrb.mxu1 %vm11131_vm10, %v4222_v53  ;;  %v9303_v25 = vor.u32 %v10570_v30, %v9300_v15  ;;  %6230 = vmatmul.bf16.gmra.mxu2 %v9299_v47  ;;  %v4738_v30 = vld [vmem:[%s16814_s7 + $0xe8] sm:$0xff] }
 0x8eb   : > { %17225 = vst [vmem:[#allocation82_spill] sm:$0xff] %v14350_v58  ;;  %4803 = vperm.xlu1 %10835, %v4721_v31   ;;  %4783 = vperm.xlu0 %10834, %v4717_v40   ;;  %v4734_v47 = vld [vmem:[%s16814_s7 + $0xc8] sm:$0xff]  ;;  %v4713_v31 = vld [vmem:[%s16814_s7 + $0x20] sm:$0xff] }
 0x8ec   : > { %4778 = vperm.xlu2 %10833, %v4716_v3   ;;  %6319 = vmatmul.bf16.gmra.mxu3 %v9303_v25 }
 0x8ed   : > { %v4202_v41 = vpop.permute.xlu1 %4201  ;;  %6033 = vmatmul.bf16.gmra.mxu1 %v9959_v34  ;;  %v14360_v58 = vpop.permute.xlu0 %4337 }
 0x8ee   : > { %v14362_v53 = vpop.permute.xlu2 %4383  ;;  %v14364_v45 = vpop.f32.mrf.mxu0  ;;  %10043 = vmatpush.bf16.msk.msrb.mxu0 %vm11131_vm10, %v4202_v41  ;;  %10057 = vmatpush.bf16.msk.msrb.mxu1 %vm11131_vm10, %v14263_v48  ;;  %v9242_v48 = vld [vmem:[%s16813_s6 + $0x8] sm:$0xf]  ;;  %v9244_v41 = vld [vmem:[%s16813_s6 + $0x38] sm:$0xf0] }
 0x8ef   : > { %v9243_v15 = vor.u32 %v10563_v4, %v9242_v48  ;;  %v10588_v4 = vld [vmem:[%s16813_s6 + $0xfc] sm:$0xf0] }
 0x8f2   : > { %v14380_v40 = vpop.f32.mrf.mxu1  ;;  %10045 = vmatpush.bf16.msk.msrb.mxu0 %vm11131_vm10, %v4200_v39  ;;  %10059 = vmatpush.bf16.msk.msrb.mxu1 %vm11131_vm10, %v14183_v59  ;;  %v10557_v59 = vld [vmem:[%s16813_s6 + $0xc] sm:$0xf] }
 0x8f3   : > { %17226 = vst [vmem:[#allocation79_spill] sm:$0xff] %v14380_v40  ;;  %4888 = vperm.xlu1 %10835, %v4738_v30   ;;  %4868 = vperm.xlu0 %10834, %v4734_v47   ;;  %v4735_v30 = vld [vmem:[%s16814_s7 + $0xd0] sm:$0xff]  ;;  %v9247_v48 = vor.u32 %v10557_v59, %v9244_v41 }
 0x8f4   : > { %4763 = vperm.xlu2 %10833, %v4713_v31   ;;  %v9346_v47 = vld [vmem:[%s16813_s6 + $0xd0] sm:$0xf] }
 0x8f5   : > { %v4216_v3 = vpop.permute.xlu1 %4215  ;;  %v14393_v34 = vpop.permute.xlu0 %4351 }
 0x8f6   : > { %v14395_v39 = vpop.permute.xlu2 %4327  ;;  %v14397_v25 = vpop.f32.mrf.mxu0  ;;  %10047 = vmatpush.bf16.msk.msrb.mxu0 %vm11131_vm10, %v14203_v63  ;;  %10061 = vmatpush.bf16.msk.msrb.mxu1 %vm11131_vm10, %v4216_v3  ;;  %v4731_v63 = vld [vmem:[%s16814_s7 + $0xb0] sm:$0xff] }
 0x8f7   : > { %17227 = vst [vmem:[#allocation109_spill] sm:$0xff] %v14397_v25  ;;  %v10582_v3 = vld [vmem:[%s16813_s6 + $0xd4] sm:$0xf]  ;;  %v9347_v25 = vor.u32 %v10588_v4, %v9346_v47 }
 0x8f9   : > { %6047 = vmatmul.bf16.vlgmr.msrb.gmra.mxu0 %v9243_v15  ;;  %v9348_v15 = vld [vmem:[%s16813_s6 + $0x100] sm:$0xf0] }
 0x8fa   : > { %6395 = vmatpush.bf16.msra.mxu0 %v13842_v1  ;;  %v4730_v1 = vld [vmem:[%s16814_s7 + $0xa8] sm:$0xff]  ;;  %v14423_v31 = vpop.f32.mrf.mxu1  ;;  %10063 = vmatpush.bf16.msk.msrb.mxu1 %vm11131_vm10, %v4214_v18 }
 0x8fb   : > { %17228 = vst [vmem:[#allocation110_spill] sm:$0xff] %v14423_v31  ;;  %4873 = vperm.xlu1 %10835, %v4735_v30   ;;  %4853 = vperm.xlu0 %10834, %v4731_v63   ;;  %v9351_v31 = vor.u32 %v10582_v3, %v9348_v15  ;;  %v10575_v63 = vld [vmem:[%s16813_s6 + $0x94] sm:$0xf0]  ;;  %v4715_v15 = vld [vmem:[%s16814_s7 + $0x30] sm:$0xff] }
 0x8fc   : > { %4848 = vperm.xlu2 %10833, %v4730_v1   ;;  %6235 = vmatmul.bf16.gmra.mxu2 %v9347_v25  ;;  %v4727_v25 = vld [vmem:[%s16814_s7 + $0x90] sm:$0xff]  ;;  %v4408_v1 = vsel %vm556_vm8, %v14360_v58, 0  ;;  %v10569_v58 = vld [vmem:[%s16813_s6 + $0x6c] sm:$0xf] }
 0x8fd   : > { %v4340_v18 = vpop.permute.xlu1 %4339  ;;  %v14438_v59 = vpop.permute.xlu0 %4331  ;;  %6136 = vmatmul.bf16.vlgmr.msrb.gmra.mxu1 %v9247_v48  ;;  %6324 = vmatmul.bf16.gmra.mxu3 %v9351_v31 }
 0x8fe   : > { %6396 = vmatpush.bf16.msra.mxu0 %v17208_v52  ;;  %6484 = vmatpush.bf16.msra.mxu1 %v14013_v42  ;;  %v4411_v41 = vsel %vm556_vm8, %v4340_v18, 0  ;;  %v14441_v37 = vpop.permute.xlu2 %4363  ;;  %v14443_v40 = vpop.f32.mrf.mxu0  ;;  %v4718_v52 = vld [vmem:[%s16814_s7 + $0x48] sm:$0xff]  ;;  %v4711_v18 = vld [vmem:[%s16814_s7 + $0x10] sm:$0xff] }
 0x8ff   : > { %17229 = vst [vmem:[#allocation80_spill] sm:$0xff] %v14443_v40  ;;  %6573 = vmatpush.bf16.msrb.mxu2 %v4411_v41  ;;  %v4714_v42 = vld [vmem:[%s16814_s7 + $0x28] sm:$0xff] }
 0x900   : > { %v4710_v41 = vld [vmem:[%s16814_s7 + $0x8] sm:$0xff] }
 0x902   : > { %6397 = vmatpush.bf16.msra.mxu0 %v13771_v5  ;;  %6485 = vmatpush.bf16.msra.mxu1 %v13963_v62  ;;  %v14456_v30 = vpop.f32.mrf.mxu1  ;;  %v9290_v5 = vld [vmem:[%s16813_s6 + $0x68] sm:$0xf] }
 0x903   : > { %17230 = vst [vmem:[#allocation83_spill] sm:$0xff] %v14456_v30  ;;  %4788 = vperm.xlu1 %10835, %v4718_v52   ;;  %4768 = vperm.xlu0 %10834, %v4714_v42   ;;  %v9291_v3 = vor.u32 %v10575_v63, %v9290_v5  ;;  %v10600_v42 = vld [vmem:[%s16813_s6 + $0x15c] sm:$0xf0] }
 0x904   : > { %4833 = vperm.xlu2 %10833, %v4727_v25   ;;  %6574 = vmatpush.bf16.msrb.mxu2 %v4408_v1  ;;  %v9396_v25 = vld [vmem:[%s16813_s6 + $0x160] sm:$0xf0]  ;;  %v4402_v1 = vsel %vm556_vm8, %v14265_v51, 0  ;;  %v4399_v51 = vsel %vm556_vm8, %v14438_v59, 0  ;;  %v9338_v59 = vld [vmem:[%s16813_s6 + $0xc8] sm:$0xf] }
 0x905   : > { %v4354_v62 = vpop.permute.xlu1 %4353  ;;  %v14468_v47 = vpop.permute.xlu0 %4367 }
 0x906   : > { %6398 = vmatpush.bf16.msra.mxu0 %v13797_v57  ;;  %6486 = vmatpush.bf16.msra.mxu1 %v13902_v43  ;;  %v4432_v31 = vsel %vm556_vm8, %v4354_v62, 0  ;;  %v14471_v48 = vpop.permute.xlu2 %4341  ;;  %v14473_v4 = vpop.f32.mrf.mxu0  ;;  %v9292_v57 = vld [vmem:[%s16813_s6 + $0x98] sm:$0xf0]  ;;  %v4405_v43 = vsel %vm556_vm8, %v14243_v35, 0  ;;  %v9394_v35 = vld [vmem:[%s16813_s6 + $0x130] sm:$0xf] }
 0x907   : > { %17231 = vst [vmem:[#allocation84_spill] sm:$0xff] %v14473_v4  ;;  %6663 = vmatpush.bf16.msrb.mxu3 %v4432_v31  ;;  %v9295_v52 = vor.u32 %v10569_v58, %v9292_v57  ;;  %v9395_v5 = vor.u32 %v10600_v42, %v9394_v35  ;;  %v4429_v62 = vsel %vm556_vm8, %v14393_v34, 0  ;;  %v10581_v42 = vld [vmem:[%s16813_s6 + $0xcc] sm:$0xf] }
 0x908   : > { %6575 = vmatpush.bf16.msrb.mxu2 %v4405_v43 }
 0x909   : > { %6052 = vmatmul.bf16.gmra.mxu0 %v9291_v3 }
 0x90a   : > { %6399 = vmatpush.bf16.msra.mxu0 %v13928_v46  ;;  %6487 = vmatpush.bf16.msra.mxu1 %v14025_v20  ;;  %v14497_v46 = vpop.f32.mrf.mxu1  ;;  %v10594_v20 = vld [vmem:[%s16813_s6 + $0x134] sm:$0xf] }
 0x90b   : > { %17232 = vst [vmem:[#allocation91_spill] sm:$0xff] %v14497_v46  ;;  %4773 = vperm.xlu1 %10835, %v4715_v15   ;;  %4753 = vperm.xlu0 %10834, %v4711_v18   ;;  %v9399_v63 = vor.u32 %v10594_v20, %v9396_v25  ;;  %v4729_v20 = vld [vmem:[%s16814_s7 + $0xa0] sm:$0xff] }
 0x90c   : > { %4748 = vperm.xlu2 %10833, %v4710_v41   ;;  %6576 = vmatpush.bf16.msrb.mxu2 %v4402_v1  ;;  %v4725_v25 = vld [vmem:[%s16814_s7 + $0x80] sm:$0xff] }
 0x90d   : > { %v4372_v31 = vpop.permute.xlu1 %4371  ;;  %v4346_v3 = vpop.permute.xlu0 %4345  ;;  %6664 = vmatpush.bf16.msrb.mxu3 %v4429_v62  ;;  %6141 = vmatmul.bf16.gmra.mxu1 %v9295_v52  ;;  %v10606_v62 = vld [vmem:[%s16813_s6 + $0x194] sm:$0xf] }
 0x90e   : > { %6400 = vmatpush.bf16.msra.mxu0 %v14051_v26  ;;  %6488 = vmatpush.bf16.msra.mxu1 %v13984_v56  ;;  %v14514_v58 = vpop.permute.xlu2 %4359  ;;  %v14516_v57 = vpop.f32.mrf.mxu0  ;;  %v4732_v56 = vld [vmem:[%s16814_s7 + $0xb8] sm:$0xff]  ;;  %v4459_v43 = vsel %vm556_vm8, %v4372_v31, 0  ;;  %v4423_v31 = vsel %vm556_vm8, %v14322_v33, 0  ;;  %v4420_v33 = vsel %vm556_vm8, %v4346_v3, 0 }
 0x90f   : > { %17233 = vst [vmem:[#allocation92_spill] sm:$0xff] %v14516_v57  ;;  %6240 = vmatmul.bf16.gmra.mxu2 %v9395_v5  ;;  %6329 = vmatmul.bf16.gmra.mxu3 %v9399_v63  ;;  %v4728_v26 = vld [vmem:[%s16814_s7 + $0x98] sm:$0xff]  ;;  %v9442_v5 = vld [vmem:[%s16813_s6 + $0x190] sm:$0xf]  ;;  %v10612_v63 = vld [vmem:[%s16813_s6 + $0x1bc] sm:$0xf0] }
 0x910   : > { %6577 = vmatpush.bf16.msrb.mxu2 %v4399_v51  ;;  %v9443_v51 = vor.u32 %v10612_v63, %v9442_v5  ;;  %v10599_v3 = vld [vmem:[%s16813_s6 + $0x154] sm:$0xf0] }
 0x912   : > { %6401 = vmatpush.bf16.msra.mxu0 %v14015_v0  ;;  %6489 = vmatpush.bf16.msra.mxu1 %v13959_v7  ;;  %v14528_v34 = vpop.f32.mrf.mxu1  ;;  %v10587_v0 = vld [vmem:[%s16813_s6 + $0xf4] sm:$0xf0] }
 0x913   : > { %17234 = vst [vmem:[#allocation77_spill] sm:$0xff] %v14528_v34  ;;  %4858 = vperm.xlu1 %10835, %v4732_v56   ;;  %4838 = vperm.xlu0 %10834, %v4728_v26   ;;  %v9339_v52 = vor.u32 %v10587_v0, %v9338_v59  ;;  %v4453_v56 = vsel %vm556_vm8, %v14468_v47, 0  ;;  %v4712_v47 = vld [vmem:[%s16814_s7 + $0x18] sm:$0xff] }
 0x915   : > { %v4350_v7 = vpop.permute.xlu1 %4349  ;;  %v14539_v15 = vpop.permute.xlu0 %4381 }
 0x916   : > { %6402 = vmatpush.bf16.msra.mxu0 %v13987_v19  ;;  %6490 = vmatpush.bf16.msra.mxu1 %v14063_v21  ;;  %v4426_v18 = vsel %vm556_vm8, %v4350_v7, 0  ;;  %v14542_v41 = vpop.permute.xlu2 %4373  ;;  %v14544_v35 = vpop.f32.mrf.mxu0  ;;  %v9340_v19 = vld [vmem:[%s16813_s6 + $0xf8] sm:$0xf0]  ;;  %v4456_v21 = vsel %vm556_vm8, %v14297_v28, 0 }
 0x917   : > { %17235 = vst [vmem:[#allocation78_spill] sm:$0xff] %v14544_v35  ;;  %6665 = vmatpush.bf16.msrb.mxu3 %v4426_v18  ;;  %v9343_v1 = vor.u32 %v10581_v42, %v9340_v19  ;;  %v9386_v19 = vld [vmem:[%s16813_s6 + $0x128] sm:$0xf] }
 0x919   : > { %6057 = vmatmul.bf16.gmra.mxu0 %v9339_v52 }
 0x91a   : > { %6751 = vmatpush.bf16.msrb.mxu0 %v4459_v43  ;;  %6491 = vmatpush.bf16.msra.mxu1 %v14028_v55  ;;  %v14567_v28 = vpop.f32.mrf.mxu1  ;;  %v9444_v55 = vld [vmem:[%s16813_s6 + $0x1c0] sm:$0xf0] }
 0x91b   : > { %17236 = vst [vmem:[#allocation113_spill] sm:$0xff] %v14567_v28  ;;  %4843 = vperm.xlu1 %10835, %v4729_v20   ;;  %4823 = vperm.xlu0 %10834, %v4725_v25   ;;  %v9447_v0 = vor.u32 %v10606_v62, %v9444_v55  ;;  %v4477_v25 = vsel %vm556_vm8, %v14362_v53, 0  ;;  %v9387_v62 = vor.u32 %v10599_v3, %v9386_v19  ;;  %v10593_v55 = vld [vmem:[%s16813_s6 + $0x12c] sm:$0xf]  ;;  %v4709_v53 = vld [vmem:[%s16814_s7] sm:$0xff] }
 0x91c   : > { %6666 = vmatpush.bf16.msrb.mxu3 %v4423_v31  ;;  %v9388_v31 = vld [vmem:[%s16813_s6 + $0x158] sm:$0xf0] }
 0x91d   : > { %v4386_v26 = vpop.permute.xlu1 %4385  ;;  %v4388_v59 = vpop.permute.xlu0 %4387  ;;  %6146 = vmatmul.bf16.gmra.mxu1 %v9343_v1 }
 0x91e   : > { %6752 = vmatpush.bf16.msrb.mxu0 %v4456_v21  ;;  %v4483_v43 = vsel %vm556_vm8, %v4388_v59, 0  ;;  %v14580_v7 = vpop.permute.xlu2 %4893  ;;  %v14582_v18 = vpop.f32.mrf.mxu0  ;;  %v4480_v52 = vsel %vm556_vm8, %v4386_v26, 0  ;;  %v9391_v59 = vor.u32 %v10593_v55, %v9388_v31  ;;  %v4447_v55 = vsel %vm556_vm8, %v14441_v37, 0 }
 0x91f   : > { %6840 = vmatpush.bf16.msrb.mxu1 %v4483_v43  ;;  %6245 = vmatmul.bf16.gmra.mxu2 %v9443_v51  ;;  %v4393_v51 = vsel %vm556_vm8, %v14395_v39, 0  ;;  %v10618_v43 = vld [vmem:[%s16813_s6 + $0x1f4] sm:$0xf]  ;;  %v9492_v39 = vld [vmem:[%s16813_s6 + $0x220] sm:$0xf0] }
 0x920   : > { %6667 = vmatpush.bf16.msrb.mxu3 %v4420_v33  ;;  %v4474_v33 = vsel %vm556_vm8, %v14539_v15, 0  ;;  %v9495_v3 = vor.u32 %v10618_v43, %v9492_v39  ;;  %v4726_v15 = vld [vmem:[%s16814_s7 + $0x88] sm:$0xff] }
 0x921   : > { %6334 = vmatmul.bf16.gmra.mxu3 %v9447_v0  ;;  %v10624_v0 = vld [vmem:[%s16813_s6 + $0x21c] sm:$0xf0] }
 0x922   : > { %6753 = vmatpush.bf16.msrb.mxu0 %v4453_v56  ;;  %v14589_v42 = vpop.f32.mrf.mxu1  ;;  %v9490_v56 = vld [vmem:[%s16813_s6 + $0x1f0] sm:$0xf] }
 0x923   : > { %4758 = vperm.xlu1 %10835, %v4712_v47   ;;  %6841 = vmatpush.bf16.msrb.mxu1 %v4480_v52  ;;  %v9491_v47 = vor.u32 %v10624_v0, %v9490_v56 }
 0x925   : > { %v4330_v21 = vpop.permute.xlu1 %4329  ;;  %v4326_v20 = vpop.permute.xlu0 %4325 }
 0x926   : > { %v4396_v5 = vsel %vm556_vm8, %v4330_v21, 0  ;;  %v14600_v63 = vpop.permute.xlu2 %4808  ;;  %v14602_v1 = vpop.f32.mrf.mxu0  ;;  %v4390_v21 = vsel %vm556_vm8, %v4326_v20, 0  ;;  %v9434_v20 = vld [vmem:[%s16813_s6 + $0x188] sm:$0xf] }
 0x927   : > { %6578 = vmatpush.bf16.msrb.mxu2 %v4396_v5  ;;  %6842 = vmatpush.bf16.msrb.mxu1 %v4477_v25 }
 0x929   : > { %6062 = vmatmul.bf16.gmra.mxu0 %v9387_v62 }
 0x92a   : > { %v14618_v26 = vpop.f32.mrf.mxu1 }
 0x92b   : > { %4743 = vperm.xlu1 %10835, %v4709_v53   ;;  %6579 = vmatpush.bf16.msrb.mxu2 %v4393_v51  ;;  %v10611_v53 = vld [vmem:[%s16813_s6 + $0x1b4] sm:$0xf0] }
 0x92c   : > { %6843 = vmatpush.bf16.msrb.mxu1 %v4474_v33  ;;  %v9435_v39 = vor.u32 %v10611_v53, %v9434_v20  ;;  %v10605_v33 = vld [vmem:[%s16813_s6 + $0x18c] sm:$0xf] }
 0x92d   : > { %v4366_v52 = vpop.permute.xlu1 %4365  ;;  %v4362_v19 = vpop.permute.xlu0 %4361  ;;  %6151 = vmatmul.bf16.gmra.mxu1 %v9391_v59 }
 0x92e   : > { %v4450_v25 = vsel %vm556_vm8, %v4366_v52, 0  ;;  %v14633_v5 = vpop.permute.xlu2 %4793  ;;  %v14635_v62 = vpop.f32.mrf.mxu0  ;;  %v4444_v59 = vsel %vm556_vm8, %v4362_v19, 0  ;;  %v9538_v52 = vld [vmem:[%s16813_s6 + $0x250] sm:$0xf]  ;;  %v4414_v19 = vsel %vm556_vm8, %v14471_v48, 0 }
 0x92f   : > { %17237 = vst [vmem:[#allocation73_spill] sm:$0xff] %v14635_v62  ;;  %6580 = vmatpush.bf16.msrb.mxu2 %v4390_v21  ;;  %6754 = vmatpush.bf16.msrb.mxu0 %v4450_v25  ;;  %v9540_v48 = vld [vmem:[%s16813_s6 + $0x280] sm:$0xf0] }
 0x930   : > { %6250 = vmatmul.bf16.gmra.mxu2 %v9491_v47  ;;  %v9436_v47 = vld [vmem:[%s16813_s6 + $0x1b8] sm:$0xf0] }
 0x931   : > { %6339 = vmatmul.bf16.gmra.mxu3 %v9495_v3  ;;  %v4441_v3 = vsel %vm556_vm8, %v14514_v58, 0  ;;  %v9439_v25 = vor.u32 %v10605_v33, %v9436_v47 }
 0x932   : > { %v14642_v31 = vpop.f32.mrf.mxu1 }
 0x933   : > { %17238 = vst [vmem:[#allocation75_spill] sm:$0xff] %v14642_v31  ;;  %4828 = vperm.xlu1 %10835, %v4726_v15   ;;  %6755 = vmatpush.bf16.msrb.mxu0 %v4447_v55  ;;  %v10636_v15 = vld [vmem:[%s16813_s6 + $0x27c] sm:$0xf0]  ;;  %v10630_v55 = vld [vmem:[%s16813_s6 + $0x254] sm:$0xf] }
 0x934   : > { %v9539_v20 = vor.u32 %v10636_v15, %v9538_v52  ;;  %v9482_v52 = vld [vmem:[%s16813_s6 + $0x1e8] sm:$0xf] }
 0x935   : > { %v4344_v51 = vpop.permute.xlu1 %4343  ;;  %v4376_v56 = vpop.permute.xlu0 %4375 }
 0x936   : > { %v4417_v0 = vsel %vm556_vm8, %v4344_v51, 0  ;;  %v14652_v43 = vpop.permute.xlu2 %4878  ;;  %v5930_v37 = vpop.f32.mrf.mxu0  ;;  %v9543_v51 = vor.u32 %v10630_v55, %v9540_v48 }
 0x937   : > { %6668 = vmatpush.bf16.msrb.mxu3 %v4417_v0  ;;  %6756 = vmatpush.bf16.msrb.mxu0 %v4444_v59 }
 0x939   : > { %6067 = vmatmul.bf16.gmra.mxu0 %v9435_v39 }
 0x93a   : > { %v6019_v21 = vpop.f32.mrf.mxu1 }
 0x93b   : > { %6669 = vmatpush.bf16.msrb.mxu3 %v4414_v19  ;;  %6757 = vmatpush.bf16.msrb.mxu0 %v4441_v3  ;;  %v10623_v3 = vld [vmem:[%s16813_s6 + $0x214] sm:$0xf0] }
 0x93d   : > { %v4380_v53 = vpop.permute.xlu1 %4379  ;;  %v14676_v58 = vpop.permute.xlu0 %4813  ;;  %6156 = vmatmul.bf16.gmra.mxu1 %v9439_v25 }
 0x93e   : > { %v4471_v59 = vsel %vm556_vm8, %v4380_v53, 0  ;;  %v4864_v0 = vpop.permute.xlu2 %4863  ;;  %v14679_v39 = vpop.f32.mrf.mxu0  ;;  %v9484_v53 = vld [vmem:[%s16813_s6 + $0x218] sm:$0xf0] }
 0x93f   : > { %v5931_v33 = vadd.f32 %v5930_v37, %v4864_v0  ;;  %6844 = vmatpush.bf16.msrb.mxu1 %v4471_v59  ;;  %v4465_v59 = vsel %vm556_vm8, %v4376_v56, 0 }
 0x940   : > { %6255 = vmatmul.bf16.gmra.mxu2 %v9539_v20  ;;  %v10617_v20 = vld [vmem:[%s16813_s6 + $0x1ec] sm:$0xf] }
 0x941   : > { %6344 = vmatmul.bf16.gmra.mxu3 %v9543_v51  ;;  %v14681_v47 = vadd.f32 %v6019_v21, %v5931_v33  ;;  %v9483_v21 = vor.u32 %v10623_v3, %v9482_v52  ;;  %v9586_v51 = vld [vmem:[%s16813_s6 + $0x2b0] sm:$0xf]  ;;  %v9487_v33 = vor.u32 %v10617_v20, %v9484_v53  ;;  %v10648_v52 = vld [vmem:[%s16813_s6 + $0x2dc] sm:$0xf0]  ;;  %v10642_v3 = vld [vmem:[%s16813_s6 + $0x2b4] sm:$0xf] }
 0x942   : > { %v14683_v19 = vpop.f32.mrf.mxu1  ;;  %v4462_v20 = vsel %vm556_vm8, %v14542_v41, 0  ;;  %v10635_v41 = vld [vmem:[%s16813_s6 + $0x274] sm:$0xf0] }
 0x943   : > { %17239 = vst [vmem:[#allocation105_spill] sm:$0xff] %v14681_v47 }
 0x945   : > { %v4378_v25 = vpop.permute.xlu1 %4377  ;;  %v14691_v15 = vpop.permute.xlu0 %4898 }
 0x946   : > { %v4468_v37 = vsel %vm556_vm8, %v4378_v25, 0  ;;  %v14694_v55 = vpop.permute.xlu2 %4778  ;;  %v14696_v48 = vpop.f32.mrf.mxu0  ;;  %v9588_v25 = vld [vmem:[%s16813_s6 + $0x2e0] sm:$0xf0] }
 0x947   : > { %6845 = vmatpush.bf16.msrb.mxu1 %v4468_v37  ;;  %v9587_v37 = vor.u32 %v10648_v52, %v9586_v51  ;;  %v9530_v52 = vld [vmem:[%s16813_s6 + $0x248] sm:$0xf] }
 0x949   : > { %6072 = vmatmul.bf16.gmra.mxu0 %v9483_v21  ;;  %v9591_v21 = vor.u32 %v10642_v3, %v9588_v25 }
 0x94a   : > { %v14708_v0 = vpop.f32.mrf.mxu1 }
 0x94b   : > { %6846 = vmatpush.bf16.msrb.mxu1 %v4465_v59 }
 0x94d   : > { %v4358_v47 = vpop.permute.xlu1 %4357  ;;  %v4884_v56 = vpop.permute.xlu0 %4883  ;;  %6161 = vmatmul.bf16.gmra.mxu1 %v9487_v33 }
 0x94e   : > { %v4438_v53 = vsel %vm556_vm8, %v4358_v47, 0  ;;  %v14722_v31 = vpop.permute.xlu2 %4763  ;;  %v5937_v59 = vpop.f32.mrf.mxu0 }
 0x94f   : > { %6758 = vmatpush.bf16.msrb.mxu0 %v4438_v53  ;;  %6847 = vmatpush.bf16.msrb.mxu1 %v4462_v20  ;;  %v5938_v62 = vadd.f32 %v5937_v59, %v14652_v43  ;;  %v9634_v53 = vld [vmem:[%s16813_s6 + $0x310] sm:$0xf] }
 0x950   : > { %6260 = vmatmul.bf16.gmra.mxu2 %v9587_v37  ;;  %v9531_v37 = vor.u32 %v10635_v41, %v9530_v52  ;;  %v10654_v41 = vld [vmem:[%s16813_s6 + $0x314] sm:$0xf] }
 0x951   : > { %6349 = vmatmul.bf16.gmra.mxu3 %v9591_v21 }
 0x952   : > { %v6026_v28 = vpop.f32.mrf.mxu1 }
 0x953   : > { %v14725_v51 = vadd.f32 %v6026_v28, %v5938_v62  ;;  %v10629_v28 = vld [vmem:[%s16813_s6 + $0x24c] sm:$0xf]  ;;  %v9532_v62 = vld [vmem:[%s16813_s6 + $0x278] sm:$0xf0] }
 0x954   : > { %v9535_v59 = vor.u32 %v10629_v28, %v9532_v62  ;;  %v9578_v62 = vld [vmem:[%s16813_s6 + $0x2a8] sm:$0xf] }
 0x955   : > { %17240 = vst [vmem:[#allocation114_spill] sm:$0xff] %v14725_v51  ;;  %v14733_v47 = vpop.permute.xlu1 %4818  ;;  %v14735_v33 = vpop.permute.xlu0 %4798 }
 0x956   : > { %v4849_v3 = vpop.permute.xlu2 %4848  ;;  %v5940_v25 = vpop.f32.mrf.mxu0 }
 0x957   : > { %v5923_v43 = vadd.f32 %v14582_v18, %v4849_v3  ;;  %v5941_v21 = vadd.f32 %v5940_v25, %v4884_v56  ;;  %v10660_v18 = vld [vmem:[%s16813_s6 + $0x33c] sm:$0xf0] }
 0x958   : > { %v9635_v3 = vor.u32 %v10660_v18, %v9634_v53  ;;  %v10647_v53 = vld [vmem:[%s16813_s6 + $0x2d4] sm:$0xf0] }
 0x959   : > { %v14745_v20 = vadd.f32 %v14589_v42, %v5923_v43  ;;  %6077 = vmatmul.bf16.gmra.mxu0 %v9531_v37  ;;  %v9636_v42 = vld [vmem:[%s16813_s6 + $0x340] sm:$0xf0] }
 0x95a   : > { %v6029_v56 = vpop.f32.mrf.mxu1  ;;  %v9639_v51 = vor.u32 %v10654_v41, %v9636_v42 }
 0x95b   : > { %17241 = vst [vmem:[#allocation74_spill] sm:$0xff] %v14745_v20  ;;  %v14753_v52 = vadd.f32 %v6029_v56, %v5941_v21  ;;  %v14765_v20 = vpop.f32.mrf.mxu2  ;;  %v14767_v21 = vpop.f32.mrf.mxu3 }
 0x95d   : > { %17242 = vst [vmem:[#allocation97_spill] sm:$0xff] %v14753_v52  ;;  %v14761_v25 = vpop.permute.xlu1 %4803  ;;  %v14763_v43 = vpop.permute.xlu0 %4783  ;;  %6166 = vmatmul.bf16.gmra.mxu1 %v9535_v59  ;;  %v9579_v52 = vor.u32 %v10647_v53, %v9578_v62  ;;  %v9682_v62 = vld [vmem:[%s16813_s6 + $0x370] sm:$0xf]  ;;  %v10672_v53 = vld [vmem:[%s16813_s6 + $0x39c] sm:$0xf0] }
 0x95e   : > { %v5942_v37 = vpop.f32.mrf.mxu0 }
 0x960   : > { %6265 = vmatmul.bf16.gmra.mxu2 %v9635_v3  ;;  %v9580_v3 = vld [vmem:[%s16813_s6 + $0x2d8] sm:$0xf0] }
 0x961   : > { %6354 = vmatmul.bf16.gmra.mxu3 %v9639_v51  ;;  %v10641_v51 = vld [vmem:[%s16813_s6 + $0x2ac] sm:$0xf] }
 0x962   : > { %v6031_v28 = vpop.f32.mrf.mxu1 }
 0x963   : > { %v14782_v35 = vpop.f32.mrf.mxu2 }
 0x965   : > { %v4889_v18 = vpop.permute.xlu1 %4888  ;;  %v4869_v56 = vpop.permute.xlu0 %4868 }
 0x966   : > { %v5943_v41 = vadd.f32 %v5942_v37, %v4889_v18  ;;  %v5933_v59 = vadd.f32 %v14679_v39, %v4869_v56  ;;  %v5945_v42 = vpop.f32.mrf.mxu0  ;;  %v14789_v37 = vpop.f32.mrf.mxu3  ;;  %v9583_v56 = vor.u32 %v10641_v51, %v9580_v3 }
 0x967   : > { %v5946_v39 = vadd.f32 %v5945_v42, %v14580_v7  ;;  %v9684_v7 = vld [vmem:[%s16813_s6 + $0x3a0] sm:$0xf0]  ;;  %v14808_v3 = vpop.permute.xlu2 %4833 }
 0x968   : > { %v14784_v34 = vadd.f32 %v6031_v28, %v5943_v41  ;;  %v14787_v57 = vadd.f32 %v14683_v19, %v5933_v59  ;;  %v10666_v19 = vld [vmem:[%s16813_s6 + $0x374] sm:$0xf]  ;;  %v9683_v41 = vor.u32 %v10672_v53, %v9682_v62  ;;  %17246 = vst [vmem:[#allocation98_spill] sm:$0xff] %v14808_v3 }
 0x969   : > { %6082 = vmatmul.bf16.gmra.mxu0 %v9579_v52 }
 0x96a   : > { %17243 = vst [vmem:[#allocation76_spill] sm:$0xff] %v14784_v34  ;;  %v6034_v18 = vpop.f32.mrf.mxu1  ;;  %v9687_v34 = vor.u32 %v10666_v19, %v9684_v7 }
 0x96b   : > { %17244 = vst [vmem:[#allocation106_spill] sm:$0xff] %v14787_v57  ;;  %v14798_v28 = vadd.f32 %v6034_v18, %v5946_v39 }
 0x96d   : > { %17245 = vst [vmem:[#allocation115_spill] sm:$0xff] %v14798_v28  ;;  %v4874_v59 = vpop.permute.xlu1 %4873  ;;  %v4854_v42 = vpop.permute.xlu0 %4853  ;;  %6171 = vmatmul.bf16.gmra.mxu1 %v9583_v56  ;;  %v9626_v56 = vld [vmem:[%s16813_s6 + $0x308] sm:$0xf] }
 0x96e   : > { %v5936_v57 = vadd.f32 %v14696_v48, %v4874_v59  ;;  %v5926_v52 = vadd.f32 %v14602_v1, %v4854_v42  ;;  %v5947_v51 = vpop.f32.mrf.mxu0  ;;  %v14811_v18 = vpop.f32.mrf.mxu2 }
 0x96f   : > { %v5948_v39 = vadd.f32 %v5947_v51, %v14691_v15  ;;  %v14813_v28 = vpop.f32.mrf.mxu3  ;;  %v10659_v15 = vld [vmem:[%s16813_s6 + $0x334] sm:$0xf0]  ;;  %v4749_v59 = vpop.permute.xlu2 %4748 }
 0x970   : > { %6270 = vmatmul.bf16.gmra.mxu2 %v9683_v41  ;;  %v14816_v62 = vadd.f32 %v14618_v26, %v5926_v52  ;;  %v14819_v53 = vadd.f32 %v14708_v0, %v5936_v57  ;;  %v9627_v26 = vor.u32 %v10659_v15, %v9626_v56  ;;  %v10653_v57 = vld [vmem:[%s16813_s6 + $0x30c] sm:$0xf]  ;;  %v9730_v52 = vld [vmem:[%s16813_s6 + $0x3d0] sm:$0xf]  ;;  %v10678_v56 = vld [vmem:[%s16813_s6 + $0x3d4] sm:$0xf] }
 0x971   : > { %6359 = vmatmul.bf16.gmra.mxu3 %v9687_v34  ;;  %v9628_v34 = vld [vmem:[%s16813_s6 + $0x338] sm:$0xf0]  ;;  %v9732_v15 = vld [vmem:[%s16813_s6 + $0x400] sm:$0xf0] }
 0x972   : > { %17247 = vst [vmem:[#allocation103_spill] sm:$0xff] %v14816_v62  ;;  %v6036_v48 = vpop.f32.mrf.mxu1  ;;  %v9631_v51 = vor.u32 %v10653_v57, %v9628_v34 }
 0x973   : > { %17248 = vst [vmem:[#allocation116_spill] sm:$0xff] %v14819_v53  ;;  %v14821_v1 = vadd.f32 %v6036_v48, %v5948_v39  ;;  %v10684_v39 = vld [vmem:[%s16813_s6 + $0x3fc] sm:$0xf0] }
 0x974   : > { %v9731_v53 = vor.u32 %v10684_v39, %v9730_v52 }
 0x975   : > { %17249 = vst [vmem:[#allocation104_spill] sm:$0xff] %v14821_v1  ;;  %v14829_v19 = vpop.permute.xlu1 %4788  ;;  %v14833_v41 = vpop.permute.xlu0 %4768  ;;  %v5873_v1 = vadd.f32 %v14061_v10, %v4749_v59  ;;  %v9674_v10 = vld [vmem:[%s16813_s6 + $0x368] sm:$0xf]  ;;  %v10671_v59 = vld [vmem:[%s16813_s6 + $0x394] sm:$0xf0] }
 0x976   : > { %v14831_v7 = vpop.f32.mrf.mxu0  ;;  %v14841_v0 = vpop.f32.mrf.mxu2 }
 0x977   : > { %v14843_v42 = vpop.f32.mrf.mxu3  ;;  %v5962_v34 = vadd.f32 %v14065_v22, %v5873_v1 }
 0x979   : > { %6087 = vmatmul.bf16.gmra.mxu0 %v9627_v26  ;;  %v9735_v26 = vor.u32 %v10678_v56, %v9732_v15  ;;  %v10665_v56 = vld [vmem:[%s16813_s6 + $0x36c] sm:$0xf]  ;;  %v9676_v15 = vld [vmem:[%s16813_s6 + $0x398] sm:$0xf0] }
 0x97a   : > { %v14851_v48 = vpop.f32.mrf.mxu1 }
 0x97d   : > { %v14860_v62 = vpop.permute.xlu1 %4773  ;;  %6176 = vmatmul.bf16.gmra.mxu1 %v9631_v51  ;;  %v4754_v4 = vpop.permute.xlu0 %4753  ;;  %v9675_v51 = vor.u32 %v10671_v59, %v9674_v10 }
 0x97e   : > { %v6050_v57 = vpop.f32.mrf.mxu0  ;;  %v5876_v52 = vadd.f32 %v14079_v24, %v4754_v4  ;;  %v10696_v4 = vld [vmem:[%s16813_s6 + $0x45c] sm:$0xf0] }
 0x97f   : > { %v14863_v46 = vpop.f32.mrf.mxu2  ;;  %v6051_v30 = vadd.f32 %v6050_v57, %v5962_v34  ;;  %v9679_v34 = vor.u32 %v10665_v56, %v9676_v15 }
 0x980   : > { %6275 = vmatmul.bf16.gmra.mxu2 %v9731_v53  ;;  %v14865_v3 = vpop.f32.mrf.mxu3 }
 0x981   : > { %6364 = vmatmul.bf16.gmra.mxu3 %v9735_v26  ;;  %v5965_v26 = vadd.f32 %v14087_v14, %v5876_v52  ;;  %v10690_v14 = vld [vmem:[%s16813_s6 + $0x434] sm:$0xf] }
 0x982   : > { %v6139_v40 = vpop.f32.mrf.mxu1 }
 0x983   : > { %v6140_v22 = vadd.f32 %v6139_v40, %v6051_v30  ;;  %v9778_v30 = vld [vmem:[%s16813_s6 + $0x430] sm:$0xf] }
 0x984   : > { %v9779_v52 = vor.u32 %v10696_v4, %v9778_v30  ;;  %v9722_v30 = vld [vmem:[%s16813_s6 + $0x3c8] sm:$0xf]  ;;  %v5881_v4 = vadd.f32 %v14111_v29, %v14722_v31  ;;  %v9826_v29 = vld [vmem:[%s16813_s6 + $0x490] sm:$0xf] }
 0x985   : > { %v14874_v53 = vpop.permute.xlu1 %4858  ;;  %v6229_v1 = vadd.f32 %v14782_v35, %v6140_v22 }
 0x986   : > { %17250 = vst [vmem:[#allocation117_spill] sm:$0xff] %v14874_v53  ;;  %v6053_v39 = vpop.f32.mrf.mxu0 }
 0x987   : > { %v14885_v57 = vadd.f32 %v14789_v37, %v6229_v1  ;;  %v14887_v24 = vpop.f32.mrf.mxu2  ;;  %v6054_v35 = vadd.f32 %v6053_v39, %v5965_v26  ;;  %v9780_v37 = vld [vmem:[%s16813_s6 + $0x460] sm:$0xf0] }
 0x988   : > { %v14889_v40 = vpop.f32.mrf.mxu3  ;;  %v9783_v1 = vor.u32 %v10690_v14, %v9780_v37  ;;  %v9724_v14 = vld [vmem:[%s16813_s6 + $0x3f8] sm:$0xf0] }
 0x989   : > { %17251 = vst [vmem:[#allocation170_spill] sm:$0xff] %v14885_v57  ;;  %6092 = vmatmul.bf16.gmra.mxu0 %v9675_v51 }
 0x98a   : > { %v6142_v10 = vpop.f32.mrf.mxu1 }
 0x98b   : > { %v6143_v59 = vadd.f32 %v6142_v10, %v6054_v35  ;;  %v10677_v10 = vld [vmem:[%s16813_s6 + $0x3cc] sm:$0xf] }
 0x98d   : > { %v14903_v22 = vpop.permute.xlu1 %4843  ;;  %v6232_v57 = vadd.f32 %v14811_v18, %v6143_v59  ;;  %6181 = vmatmul.bf16.gmra.mxu1 %v9679_v34  ;;  %v10683_v18 = vld [vmem:[%s16813_s6 + $0x3f4] sm:$0xf0]  ;;  %v5970_v59 = vadd.f32 %v14119_v16, %v5881_v4  ;;  %v9828_v16 = vld [vmem:[%s16813_s6 + $0x4c0] sm:$0xf0]  ;;  %v5883_v4 = vadd.f32 %v14127_v6, %v14833_v41 }
 0x98e   : > { %17252 = vst [vmem:[#allocation63_spill] sm:$0xff] %v14903_v22  ;;  %v6055_v39 = vpop.f32.mrf.mxu0  ;;  %v9723_v35 = vor.u32 %v10683_v18, %v9722_v30 }
 0x98f   : > { %v14907_v51 = vadd.f32 %v14813_v28, %v6232_v57  ;;  %v5972_v53 = vadd.f32 %v14129_v60, %v5883_v4  ;;  %v9770_v60 = vld [vmem:[%s16813_s6 + $0x428] sm:$0xf] }
 0x990   : > { %6280 = vmatmul.bf16.gmra.mxu2 %v9779_v52 }
 0x991   : > { %17253 = vst [vmem:[#allocation166_spill] sm:$0xff] %v14907_v51  ;;  %6369 = vmatmul.bf16.gmra.mxu3 %v9783_v1  ;;  %v9727_v1 = vor.u32 %v10677_v10, %v9724_v14 }
 0x992   : > { %v14909_v56 = vpop.f32.mrf.mxu2  ;;  %v14911_v15 = vpop.f32.mrf.mxu3 }
 0x993   : > { %v6144_v26 = vpop.f32.mrf.mxu1 }
 0x995   : > { %v4759_v28 = vpop.permute.xlu1 %4758 }
 0x996   : > { %v5878_v57 = vadd.f32 %v14095_v23, %v4759_v28  ;;  %v6058_v34 = vpop.f32.mrf.mxu0  ;;  %v10708_v23 = vld [vmem:[%s16813_s6 + $0x4bc] sm:$0xf0] }
 0x997   : > { %v6059_v52 = vadd.f32 %v6058_v34, %v5970_v59 }
 0x998   : > { %v5967_v37 = vadd.f32 %v14097_v54, %v5878_v57  ;;  %v10702_v54 = vld [vmem:[%s16813_s6 + $0x494] sm:$0xf] }
 0x999   : > { %6097 = vmatmul.bf16.gmra.mxu0 %v9723_v35  ;;  %v9827_v35 = vor.u32 %v10708_v23, %v9826_v29  ;;  %v9831_v10 = vor.u32 %v10702_v54, %v9828_v16 }
 0x99a   : > { %v6056_v31 = vadd.f32 %v6055_v39, %v5967_v37  ;;  %v14936_v30 = vpop.f32.mrf.mxu2  ;;  %v14938_v18 = vpop.f32.mrf.mxu3 }
 0x99b   : > { %v6147_v28 = vpop.f32.mrf.mxu1 }
 0x99c   : > { %v6145_v39 = vadd.f32 %v6144_v26, %v6056_v31  ;;  %v6148_v57 = vadd.f32 %v6147_v28, %v6059_v52  ;;  %v10689_v52 = vld [vmem:[%s16813_s6 + $0x42c] sm:$0xf] }
 0x99d   : > { %v4744_v34 = vpop.permute.xlu1 %4743  ;;  %6186 = vmatmul.bf16.gmra.mxu1 %v9727_v1  ;;  %v9772_v1 = vld [vmem:[%s16813_s6 + $0x458] sm:$0xf0] }
 0x99e   : > { %v6234_v14 = vadd.f32 %v14841_v0, %v6145_v39  ;;  %v6237_v37 = vadd.f32 %v14863_v46, %v6148_v57  ;;  %v5871_v59 = vadd.f32 %v14042_v2, %v4744_v34  ;;  %v6060_v51 = vpop.f32.mrf.mxu0  ;;  %v9775_v54 = vor.u32 %v10689_v52, %v9772_v1 }
 0x99f   : > { %v6061_v26 = vadd.f32 %v6060_v51, %v5972_v53  ;;  %v5893_v52 = vadd.f32 %v14207_v17, %v14829_v19  ;;  %v9866_v17 = vld [vmem:[%s16813_s6 + $0x4e8] sm:$0xf]  ;;  %v10719_v19 = vld [vmem:[%s16813_s6 + $0x514] sm:$0xf0] }
 0x9a0   : > { %v14953_v22 = vadd.f32 %v14843_v42, %v6234_v14  ;;  %v5960_v6 = vadd.f32 %v14053_v50, %v5871_v59  ;;  %v14957_v41 = vadd.f32 %v14865_v3, %v6237_v37  ;;  %6285 = vmatmul.bf16.gmra.mxu2 %v9827_v35  ;;  %v10695_v42 = vld [vmem:[%s16813_s6 + $0x454] sm:$0xf0]  ;;  %v5886_v50 = vadd.f32 %v14145_v49, %v14860_v62 }
 0x9a1   : > { %6374 = vmatmul.bf16.gmra.mxu3 %v9831_v10  ;;  %v9771_v51 = vor.u32 %v10695_v42, %v9770_v60 }
 0x9a2   : > { %v6049_v0 = vadd.f32 %v14831_v7, %v5960_v6  ;;  %v14960_v46 = vpop.f32.mrf.mxu2  ;;  %v5975_v49 = vadd.f32 %v14153_v9, %v5886_v50  ;;  %v10714_v9 = vld [vmem:[%s16813_s6 + $0x4f4] sm:$0xf]  ;;  %v10701_v50 = vld [vmem:[%s16813_s6 + $0x48c] sm:$0xf] }
 0x9a3   : > { %v6149_v2 = vpop.f32.mrf.mxu1 }
 0x9a4   : > { %v6150_v3 = vadd.f32 %v6149_v2, %v6061_v26  ;;  %v14970_v29 = vpop.f32.mrf.mxu3  ;;  %v6138_v7 = vadd.f32 %v14851_v48, %v6049_v0  ;;  %v5891_v26 = vadd.f32 %v14185_v36, %v14763_v43  ;;  %v9922_v36 = vld [vmem:[%s16813_s6 + $0x550] sm:$0xf]  ;;  %v10732_v43 = vld [vmem:[%s16813_s6 + $0x57c] sm:$0xf0] }
 0x9a6   : > { %v6239_v53 = vadd.f32 %v14887_v24, %v6150_v3  ;;  %v6227_v23 = vadd.f32 %v14765_v20, %v6138_v7  ;;  %v6063_v31 = vpop.f32.mrf.mxu0  ;;  %v9874_v20 = vld [vmem:[%s16813_s6 + $0x4f0] sm:$0xf]  ;;  %v10720_v24 = vld [vmem:[%s16813_s6 + $0x51c] sm:$0xf0]  ;;  %v9820_v3 = vld [vmem:[%s16813_s6 + $0x4b8] sm:$0xf0]  ;;  %v5980_v7 = vadd.f32 %v14195_v13, %v5891_v26 }
 0x9a7   : > { %v6064_v28 = vadd.f32 %v6063_v31, %v5975_v49  ;;  %v9875_v35 = vor.u32 %v10720_v24, %v9874_v20  ;;  %v10726_v13 = vld [vmem:[%s16813_s6 + $0x554] sm:$0xf]  ;;  %v9923_v20 = vor.u32 %v10732_v43, %v9922_v36 }
 0x9a8   : > { %v14983_v62 = vadd.f32 %v14889_v40, %v6239_v53  ;;  %v14986_v48 = vadd.f32 %v14767_v21, %v6227_v23  ;;  %v9876_v21 = vld [vmem:[%s16813_s6 + $0x520] sm:$0xf0]  ;;  %v5888_v40 = vadd.f32 %v14163_v32, %v14694_v55  ;;  %v9818_v32 = vld [vmem:[%s16813_s6 + $0x488] sm:$0xf]  ;;  %v10707_v55 = vld [vmem:[%s16813_s6 + $0x4b4] sm:$0xf0] }
 0x9a9   : > { %6102 = vmatmul.bf16.gmra.mxu0 %v9771_v51  ;;  %v9879_v34 = vor.u32 %v10714_v9, %v9876_v21  ;;  %v9819_v60 = vor.u32 %v10707_v55, %v9818_v32  ;;  %v9823_v51 = vor.u32 %v10701_v50, %v9820_v3 }
 0x9aa   : > { %v6248_v16 = vpop.f32.mrf.mxu2  ;;  %v5977_v37 = vadd.f32 %v14167_v8, %v5888_v40 }
 0x9ab   : > { %v6152_v4 = vpop.f32.mrf.mxu1 }
 0x9ac   : > { %v6153_v39 = vadd.f32 %v6152_v4, %v6064_v28  ;;  %v6337_v57 = vpop.f32.mrf.mxu3  ;;  %v5982_v4 = vadd.f32 %v14212_v12, %v5893_v52 }
 0x9ad   : > { %6191 = vmatmul.bf16.gmra.mxu1 %v9775_v54 }
 0x9ae   : > { %v6242_v10 = vadd.f32 %v14909_v56, %v6153_v39  ;;  %v6065_v14 = vpop.f32.mrf.mxu0  ;;  %v5896_v39 = vadd.f32 %v14224_v44, %v14633_v5  ;;  %v9970_v44 = vld [vmem:[%s16813_s6 + $0x5b0] sm:$0xf]  ;;  %v10744_v5 = vld [vmem:[%s16813_s6 + $0x5dc] sm:$0xf0] }
 0x9af   : > { %v6066_v6 = vadd.f32 %v6065_v14, %v5977_v37  ;;  %v10713_v14 = vld [vmem:[%s16813_s6 + $0x4ec] sm:$0xf]  ;;  %v9868_v37 = vld [vmem:[%s16813_s6 + $0x518] sm:$0xf0] }
 0x9b0   : > { %v15005_v59 = vadd.f32 %v14911_v15, %v6242_v10  ;;  %6290 = vmatmul.bf16.gmra.mxu2 %v9875_v35  ;;  %v9871_v32 = vor.u32 %v10713_v14, %v9868_v37  ;;  %v17256_v14 = vld [vmem:[#allocation102_spill] sm:$0xff] }
 0x9b1   : > { %6379 = vmatmul.bf16.gmra.mxu3 %v9879_v34  ;;  %v9867_v34 = vor.u32 %v10719_v19, %v9866_v17 }
 0x9b3   : > { %v6154_v0 = vpop.f32.mrf.mxu1  ;;  %v6251_v56 = vpop.f32.mrf.mxu2 }
 0x9b4   : > { %v6155_v8 = vadd.f32 %v6154_v0, %v6066_v6  ;;  %v6340_v2 = vpop.f32.mrf.mxu3  ;;  %v5985_v6 = vadd.f32 %v14239_v61, %v5896_v39  ;;  %v9972_v61 = vld [vmem:[%s16813_s6 + $0x5e0] sm:$0xf0]  ;;  %v9268_v39 = vld [vmem:[%s16813_s6 + $0x50] sm:$0xf0] }
 0x9b6   : > { %v6244_v15 = vadd.f32 %v14936_v30, %v6155_v8  ;;  %v6068_v42 = vpop.f32.mrf.mxu0  ;;  %v10738_v8 = vld [vmem:[%s16813_s6 + $0x5b4] sm:$0xf] }
 0x9b7   : > { %v6069_v30 = vadd.f32 %v6068_v42, %v5980_v7  ;;  %v9971_v42 = vor.u32 %v10744_v5, %v9970_v44  ;;  %v9975_v50 = vor.u32 %v10738_v8, %v9972_v61  ;;  %v9962_v8 = vld [vmem:[%s16813_s6 + $0x5a8] sm:$0xf] }
 0x9b8   : > { %v15024_v53 = vadd.f32 %v14938_v18, %v6244_v15  ;;  %v9924_v18 = vld [vmem:[%s16813_s6 + $0x580] sm:$0xf0] }
 0x9b9   : > { %6107 = vmatmul.bf16.gmra.mxu0 %v9819_v60  ;;  %v9927_v24 = vor.u32 %v10726_v13, %v9924_v18 }
 0x9bb   : > { %v6157_v23 = vpop.f32.mrf.mxu1  ;;  %v6253_v31 = vpop.f32.mrf.mxu2 }
 0x9bc   : > { %v6158_v1 = vadd.f32 %v6157_v23, %v6069_v30  ;;  %v6342_v49 = vpop.f32.mrf.mxu3  ;;  %v9914_v23 = vld [vmem:[%s16813_s6 + $0x548] sm:$0xf] }
 0x9bd   : > { %6196 = vmatmul.bf16.gmra.mxu1 %v9823_v51 }
 0x9be   : > { %v6247_v28 = vadd.f32 %v14960_v46, %v6158_v1  ;;  %v6070_v54 = vpop.f32.mrf.mxu0  ;;  %v10725_v1 = vld [vmem:[%s16813_s6 + $0x54c] sm:$0xf] }
 0x9bf   : > { %v6071_v21 = vadd.f32 %v6070_v54, %v5982_v4 }
 0x9c0   : > { %v15043_v9 = vadd.f32 %v14970_v29, %v6247_v28  ;;  %6295 = vmatmul.bf16.gmra.mxu2 %v9923_v20  ;;  %v9916_v20 = vld [vmem:[%s16813_s6 + $0x578] sm:$0xf0] }
 0x9c1   : > { %6384 = vmatmul.bf16.gmra.mxu3 %v9927_v24  ;;  %v17254_v24 = vld [vmem:[#allocation101_spill] sm:$0xff] }
 0x9c3   : > { %v6159_v40 = vpop.f32.mrf.mxu1  ;;  %v6256_v46 = vpop.f32.mrf.mxu2 }
 0x9c4   : > { %v6160_v12 = vadd.f32 %v6159_v40, %v6071_v21  ;;  %v15053_v35 = vpop.f32.mrf.mxu3  ;;  %v9919_v40 = vor.u32 %v10725_v1, %v9916_v20 }
 0x9c6   : > { %v6249_v29 = vadd.f32 %v6248_v16, %v6160_v12  ;;  %v6073_v10 = vpop.f32.mrf.mxu0 }
 0x9c7   : > { %v6074_v16 = vadd.f32 %v6073_v10, %v5985_v6 }
 0x9c8   : > { %v15062_v0 = vadd.f32 %v6337_v57, %v6249_v29  ;;  %v5898_v57 = vadd.f32 %v14245_v38, %v14735_v33  ;;  %v10731_v38 = vld [vmem:[%s16813_s6 + $0x574] sm:$0xf0] }
 0x9c9   : > { %6112 = vmatmul.bf16.gmra.mxu0 %v9867_v34  ;;  %v9915_v18 = vor.u32 %v10731_v38, %v9914_v23  ;;  %v10578_v38 = vld [vmem:[%s16813_s6 + $0xac] sm:$0xf0] }
 0x9ca   : > { %v5987_v36 = vadd.f32 %v14253_v11, %v5898_v57 }
 0x9cb   : > { %v6162_v55 = vpop.f32.mrf.mxu1  ;;  %v6258_v26 = vpop.f32.mrf.mxu2 }
 0x9cc   : > { %v6163_v15 = vadd.f32 %v6162_v55, %v6074_v16  ;;  %v6347_v60 = vpop.f32.mrf.mxu3  ;;  %v17257_v16 = vld [vmem:[#allocation81_spill] sm:$0xff] }
 0x9cd   : > { %6201 = vmatmul.bf16.gmra.mxu1 %v9871_v32  ;;  %v5906_v32 = vadd.f32 %v17257_v16, %v14676_v58 }
 0x9ce   : > { %v6252_v3 = vadd.f32 %v6251_v56, %v6163_v15  ;;  %v6075_v7 = vpop.f32.mrf.mxu0  ;;  %v5901_v56 = vadd.f32 %v14267_v27, %v14761_v25  ;;  %v9266_v27 = vld [vmem:[%s16813_s6 + $0x20] sm:$0xf]  ;;  %v10566_v25 = vld [vmem:[%s16813_s6 + $0x4c] sm:$0xf0] }
 0x9cf   : > { %v6076_v30 = vadd.f32 %v6075_v7, %v5987_v36  ;;  %v9267_v34 = vor.u32 %v10566_v25, %v9266_v27  ;;  %v15133_v7 = vpop.permute.xlu0 %4838  ;;  %v10737_v36 = vld [vmem:[%s16813_s6 + $0x5ac] sm:$0xf]  ;;  %v17259_v27 = vld [vmem:[#allocation79_spill] sm:$0xff] }
 0x9d0   : > { %v15079_v43 = vadd.f32 %v6340_v2, %v6252_v3  ;;  %6300 = vmatmul.bf16.gmra.mxu2 %v9971_v42  ;;  %v5990_v28 = vadd.f32 %v17254_v24, %v5901_v56  ;;  %v17258_v42 = vld [vmem:[#allocation82_spill] sm:$0xff]  ;;  %v5908_v56 = vadd.f32 %v14364_v45, %v14733_v47 }
 0x9d1   : > { %6389 = vmatmul.bf16.gmra.mxu3 %v9975_v50  ;;  %v5995_v50 = vadd.f32 %v17258_v42, %v5906_v32 }
 0x9d2   : > { %v5997_v45 = vadd.f32 %v17259_v27, %v5908_v56 }
 0x9d3   : > { %v6164_v51 = vpop.f32.mrf.mxu1  ;;  %v15087_v33 = vpop.f32.mrf.mxu2 }
 0x9d4   : > { %v6165_v11 = vadd.f32 %v6164_v51, %v6076_v30  ;;  %v15091_v2 = vpop.f32.mrf.mxu3  ;;  %v9964_v30 = vld [vmem:[%s16813_s6 + $0x5d8] sm:$0xf0] }
 0x9d6   : > { %v6254_v13 = vadd.f32 %v6253_v31, %v6165_v11  ;;  %v6078_v52 = vpop.f32.mrf.mxu0  ;;  %v17255_v31 = vld [vmem:[#allocation90_spill] sm:$0xff]  ;;  %v9967_v11 = vor.u32 %v10737_v36, %v9964_v30  ;;  %v17264_v36 = vld [vmem:[#allocation80_spill] sm:$0xff] }
 0x9d7   : > { %v5903_v4 = vadd.f32 %v17255_v31, %v14600_v63  ;;  %v6079_v21 = vadd.f32 %v6078_v52, %v5990_v28  ;;  %v9316_v52 = vld [vmem:[%s16813_s6 + $0xb0] sm:$0xf0] }
 0x9d8   : > { %v15100_v54 = vadd.f32 %v6342_v49, %v6254_v13  ;;  %v10560_v49 = vld [vmem:[%s16813_s6 + $0x24] sm:$0xf] }
 0x9d9   : > { %6117 = vmatmul.bf16.gmra.mxu0 %v9915_v18  ;;  %v9271_v10 = vor.u32 %v10560_v49, %v9268_v39  ;;  %v5992_v37 = vadd.f32 %v17256_v14, %v5903_v4  ;;  %v10565_v49 = vld [vmem:[%s16813_s6 + $0x44] sm:$0xf0] }
 0x9db   : > { %v6167_v17 = vpop.f32.mrf.mxu1  ;;  %v6263_v19 = vpop.f32.mrf.mxu2 }
 0x9dc   : > { %v6168_v12 = vadd.f32 %v6167_v17, %v6079_v21  ;;  %v6352_v29 = vpop.f32.mrf.mxu3  ;;  %v4824_v21 = vpop.permute.xlu0 %4823  ;;  %v9258_v17 = vld [vmem:[%s16813_s6 + $0x18] sm:$0xf] }
 0x9dd   : > { %6206 = vmatmul.bf16.gmra.mxu1 %v9919_v40  ;;  %v9259_v14 = vor.u32 %v10565_v49, %v9258_v17 }
 0x9de   : > { %v6257_v63 = vadd.f32 %v6256_v46, %v6168_v12  ;;  %v6080_v6 = vpop.f32.mrf.mxu0  ;;  %v10743_v46 = vld [vmem:[%s16813_s6 + $0x5d4] sm:$0xf0] }
 0x9df   : > { %v6081_v44 = vadd.f32 %v6080_v6, %v5992_v37  ;;  %v9963_v3 = vor.u32 %v10743_v46, %v9962_v8  ;;  %v9260_v6 = vld [vmem:[%s16813_s6 + $0x48] sm:$0xf0]  ;;  %v9362_v8 = vld [vmem:[%s16813_s6 + $0xe0] sm:$0xf] }
 0x9e0   : > { %v15118_v5 = vadd.f32 %v15053_v35, %v6257_v63  ;;  %6581 = vmatmul.bf16.vlgmr.msrb.gmra.mxu2 %v9267_v34  ;;  %v10559_v63 = vld [vmem:[%s16813_s6 + $0x1c] sm:$0xf] }
 0x9e1   : > { %6670 = vmatmul.bf16.vlgmr.msrb.gmra.mxu3 %v9271_v10 }
 0x9e3   : > { %v6169_v55 = vpop.f32.mrf.mxu1  ;;  %v15128_v61 = vpop.f32.mrf.mxu2 }
 0x9e4   : > { %v6170_v57 = vadd.f32 %v6169_v55, %v6081_v44  ;;  %v15130_v15 = vpop.f32.mrf.mxu3  ;;  %v17261_v44 = vld [vmem:[#allocation110_spill] sm:$0xff]  ;;  %v4829_v55 = vpop.permute.xlu1 %4828 }
 0x9e5   : > { %v5913_v30 = vadd.f32 %v17264_v36, %v4829_v55 }
 0x9e6   : > { %v6259_v35 = vadd.f32 %v6258_v26, %v6170_v57  ;;  %v6083_v58 = vpop.f32.mrf.mxu0  ;;  %v9314_v26 = vld [vmem:[%s16813_s6 + $0x80] sm:$0xf]  ;;  %v9263_v57 = vor.u32 %v10559_v63, %v9260_v6 }
 0x9e7   : > { %v6084_v51 = vadd.f32 %v6083_v58, %v5995_v50  ;;  %v9315_v24 = vor.u32 %v10578_v38, %v9314_v26  ;;  %v9364_v58 = vld [vmem:[%s16813_s6 + $0x110] sm:$0xf0]  ;;  %v9410_v6 = vld [vmem:[%s16813_s6 + $0x140] sm:$0xf] }
 0x9e8   : > { %v15141_v23 = vadd.f32 %v6347_v60, %v6259_v35  ;;  %v10572_v60 = vld [vmem:[%s16813_s6 + $0x84] sm:$0xf]  ;;  %v17262_v35 = vld [vmem:[#allocation17_spill] sm:$0xff] }
 0x9e9   : > { %6122 = vmatmul.bf16.gmra.mxu0 %v9963_v3  ;;  %v9319_v28 = vor.u32 %v10572_v60, %v9316_v52  ;;  %v17266_v52 = vld [vmem:[#allocation83_spill] sm:$0xff] }
 0x9eb   : > { %v6172_v13 = vpop.f32.mrf.mxu1  ;;  %v15151_v18 = vpop.f32.mrf.mxu2 }
 0x9ec   : > { %v6173_v1 = vadd.f32 %v6172_v13, %v6084_v51  ;;  %v15159_v20 = vpop.f32.mrf.mxu3  ;;  %v17265_v13 = vld [vmem:[#allocation19_spill] sm:$0xff] }
 0x9ed   : > { %6211 = vmatmul.bf16.gmra.mxu1 %v9967_v11 }
 0x9ee   : > { %v6262_v47 = vadd.f32 %v15087_v33, %v6173_v1  ;;  %v6085_v25 = vpop.f32.mrf.mxu0  ;;  %v17260_v33 = vld [vmem:[#allocation109_spill] sm:$0xff]  ;;  %v6002_v1 = vadd.f32 %v17266_v52, %v5913_v30 }
 0x9ef   : > { %v6086_v31 = vadd.f32 %v6085_v25, %v5997_v45  ;;  %v5911_v12 = vadd.f32 %v17260_v33, %v4824_v21  ;;  %v9306_v45 = vld [vmem:[%s16813_s6 + $0x78] sm:$0xf] }
 0x9f0   : > { %v15164_v4 = vadd.f32 %v15091_v2, %v6262_v47  ;;  %6586 = vmatmul.bf16.gmra.mxu2 %v9315_v24  ;;  %v17268_v25 = vld [vmem:[#allocation98_spill] sm:$0xff] }
 0x9f1   : > { %6675 = vmatmul.bf16.gmra.mxu3 %v9319_v28  ;;  %v6000_v16 = vadd.f32 %v17261_v44, %v5911_v12  ;;  %v17270_v12 = vld [vmem:[#allocation16_spill] sm:$0xff]  ;;  %v10602_v44 = vld [vmem:[%s16813_s6 + $0x16c] sm:$0xf0] }
 0x9f2   : > { %v9411_v36 = vor.u32 %v10602_v44, %v9410_v6 }
 0x9f3   : > { %v6174_v40 = vpop.f32.mrf.mxu1  ;;  %v15172_v39 = vpop.f32.mrf.mxu2 }
 0x9f4   : > { %v6175_v34 = vadd.f32 %v6174_v40, %v6086_v31  ;;  %v15175_v10 = vpop.f32.mrf.mxu3  ;;  %v17269_v31 = vld [vmem:[#allocation84_spill] sm:$0xff] }
 0x9f5   : > { %v5916_v21 = vadd.f32 %v17269_v31, %v17268_v25 }
 0x9f6   : > { %v6264_v2 = vadd.f32 %v6263_v19, %v6175_v34  ;;  %v6088_v37 = vpop.f32.mrf.mxu0  ;;  %v10590_v19 = vld [vmem:[%s16813_s6 + $0x10c] sm:$0xf0] }
 0x9f7   : > { %v6089_v46 = vadd.f32 %v6088_v37, %v6000_v16  ;;  %v9363_v38 = vor.u32 %v10590_v19, %v9362_v8  ;;  %v17271_v37 = vld [vmem:[#allocation91_spill] sm:$0xff]  ;;  %v17272_v8 = vld [vmem:[#allocation29_spill] sm:$0xff] }
 0x9f8   : > { %v15184_v32 = vadd.f32 %v6352_v29, %v6264_v2  ;;  %v10584_v29 = vld [vmem:[%s16813_s6 + $0xe4] sm:$0xf]  ;;  %v10571_v2 = vld [vmem:[%s16813_s6 + $0x7c] sm:$0xf] }
 0x9f9   : > { %6403 = vmatmul.bf16.vlgmr.msra.gmra.mxu0 %v9259_v14  ;;  %v9367_v56 = vor.u32 %v10584_v29, %v9364_v58  ;;  %v9308_v14 = vld [vmem:[%s16813_s6 + $0xa8] sm:$0xf0] }
 0x9fa   : > { %10289 = vmatpush.bf16.msk.msra.mxu0 %vm11131_vm10, %v17262_v35  ;;  %v9311_v55 = vor.u32 %v10571_v2, %v9308_v14  ;;  %v9458_v14 = vld [vmem:[%s16813_s6 + $0x1a0] sm:$0xf] }
 0x9fb   : > { %v6177_v50 = vpop.f32.mrf.mxu1  ;;  %v15195_v3 = vpop.f32.mrf.mxu2 }
 0x9fc   : > { %v6178_v51 = vadd.f32 %v6177_v50, %v6089_v46  ;;  %v15204_v26 = vpop.f32.mrf.mxu3  ;;  %v10596_v46 = vld [vmem:[%s16813_s6 + $0x144] sm:$0xf] }
 0x9fd   : > { %6492 = vmatmul.bf16.vlgmr.msra.gmra.mxu1 %v9263_v57  ;;  %v9412_v57 = vld [vmem:[%s16813_s6 + $0x170] sm:$0xf0] }
 0x9fe   : > { %v6267_v11 = vadd.f32 %v15128_v61, %v6178_v51  ;;  %10797 = vmatpush.bf16.msk.msra.mxu1 %vm11131_vm10, %v17262_v35  ;;  %10291 = vmatpush.bf16.msk.msra.mxu0 %vm11131_vm10, %v17265_v13  ;;  %v6090_v60 = vpop.f32.mrf.mxu0  ;;  %v17267_v61 = vld [vmem:[#allocation20_spill] sm:$0xff]  ;;  %v9415_v30 = vor.u32 %v10596_v46, %v9412_v57 }
 0x9ff   : > { %v6091_v28 = vadd.f32 %v6090_v60, %v6002_v1  ;;  %v17273_v35 = vld [vmem:[#allocation92_spill] sm:$0xff]  ;;  %v9354_v1 = vld [vmem:[%s16813_s6 + $0xd8] sm:$0xf] }
 0xa00   : > { %v15215_v24 = vadd.f32 %v15130_v15, %v6267_v11  ;;  %6591 = vmatmul.bf16.gmra.mxu2 %v9363_v38  ;;  %v10577_v15 = vld [vmem:[%s16813_s6 + $0xa4] sm:$0xf0]  ;;  %v5918_v50 = vadd.f32 %v17273_v35, %v15133_v7  ;;  %v17274_v38 = vld [vmem:[#allocation38_spill] sm:$0xff]  ;;  %v17275_v11 = vld [vmem:[#allocation77_spill] sm:$0xff] }
 0xa01   : > { %6680 = vmatmul.bf16.gmra.mxu3 %v9367_v56  ;;  %v9307_v33 = vor.u32 %v10577_v15, %v9306_v45 }
 0xa02   : > { %10798 = vmatpush.bf16.msk.msra.mxu1 %vm11131_vm10, %v17265_v13  ;;  %10293 = vmatpush.bf16.msk.msra.mxu0 %vm11131_vm10, %v17267_v61  ;;  %v6007_v13 = vadd.f32 %v17275_v11, %v5918_v50 }
 0xa03   : > { %v6179_v27 = vpop.f32.mrf.mxu1  ;;  %v15229_v47 = vpop.f32.mrf.mxu2 }
 0xa04   : > { %v6180_v40 = vadd.f32 %v6179_v27, %v6091_v28  ;;  %v15233_v17 = vpop.f32.mrf.mxu3  ;;  %v17278_v27 = vld [vmem:[#allocation78_spill] sm:$0xff] }
 0xa06   : > { %v6269_v49 = vadd.f32 %v15151_v18, %v6180_v40  ;;  %10799 = vmatpush.bf16.msk.msra.mxu1 %vm11131_vm10, %v17267_v61  ;;  %10295 = vmatpush.bf16.msk.msra.mxu0 %vm11131_vm10, %v17270_v12  ;;  %v6093_v34 = vpop.f32.mrf.mxu0  ;;  %v6005_v18 = vadd.f32 %v17271_v37, %v5916_v21  ;;  %v17277_v61 = vld [vmem:[#allocation63_spill] sm:$0xff]  ;;  %v10614_v37 = vld [vmem:[%s16813_s6 + $0x1cc] sm:$0xf0] }
 0xa07   : > { %v5921_v45 = vadd.f32 %v17278_v27, %v17277_v61  ;;  %v17279_v40 = vld [vmem:[#allocation35_spill] sm:$0xff]  ;;  %v9459_v46 = vor.u32 %v10614_v37, %v9458_v14 }
 0xa08   : > { %v15250_v63 = vadd.f32 %v15159_v20, %v6269_v49  ;;  %v6094_v16 = vadd.f32 %v6093_v34, %v6005_v18  ;;  %v17280_v34 = vld [vmem:[#allocation113_spill] sm:$0xff] }
 0xa09   : > { %6408 = vmatmul.bf16.gmra.mxu0 %v9307_v33  ;;  %v10583_v33 = vld [vmem:[%s16813_s6 + $0xdc] sm:$0xf] }
 0xa0a   : > { %10800 = vmatpush.bf16.msk.msra.mxu1 %vm11131_vm10, %v17270_v12  ;;  %10297 = vmatpush.bf16.msk.msra.mxu0 %vm11131_vm10, %v17272_v8  ;;  %v9356_v12 = vld [vmem:[%s16813_s6 + $0x108] sm:$0xf0] }
 0xa0b   : > { %v6182_v20 = vpop.f32.mrf.mxu1  ;;  %v15264_v19 = vpop.f32.mrf.mxu2  ;;  %v9359_v6 = vor.u32 %v10583_v33, %v9356_v12  ;;  %v17284_v33 = vld [vmem:[#allocation73_spill] sm:$0xff] }
 0xa0c   : > { %v6183_v29 = vadd.f32 %v6182_v20, %v6094_v16  ;;  %v15274_v58 = vpop.f32.mrf.mxu3 }
 0xa0d   : > { %6497 = vmatmul.bf16.gmra.mxu1 %v9311_v55  ;;  %v9460_v55 = vld [vmem:[%s16813_s6 + $0x1d0] sm:$0xf0] }
 0xa0e   : > { %v6272_v51 = vadd.f32 %v15172_v39, %v6183_v29  ;;  %10801 = vmatpush.bf16.msk.msra.mxu1 %vm11131_vm10, %v17272_v8  ;;  %10299 = vmatpush.bf16.msk.msra.mxu0 %vm11131_vm10, %v17274_v38  ;;  %v6095_v56 = vpop.f32.mrf.mxu0  ;;  %v17276_v39 = vld [vmem:[#allocation34_spill] sm:$0xff] }
 0xa0f   : > { %v6096_v60 = vadd.f32 %v6095_v56, %v6007_v13  ;;  %v17281_v29 = vld [vmem:[#allocation74_spill] sm:$0xff]  ;;  %v10601_v56 = vld [vmem:[%s16813_s6 + $0x164] sm:$0xf0] }
 0xa10   : > { %v15285_v7 = vadd.f32 %v15175_v10, %v6272_v51  ;;  %6596 = vmatmul.bf16.gmra.mxu2 %v9411_v36  ;;  %v10589_v10 = vld [vmem:[%s16813_s6 + $0x104] sm:$0xf0] }
 0xa11   : > { %6685 = vmatmul.bf16.gmra.mxu3 %v9415_v30  ;;  %v9355_v21 = vor.u32 %v10589_v10, %v9354_v1  ;;  %v9404_v1 = vld [vmem:[%s16813_s6 + $0x168] sm:$0xf0]  ;;  %v17282_v10 = vld [vmem:[#allocation103_spill] sm:$0xff] }
 0xa12   : > { %10802 = vmatpush.bf16.msk.msra.mxu1 %vm11131_vm10, %v17274_v38  ;;  %10301 = vmatpush.bf16.msk.msra.mxu0 %vm11131_vm10, %v17276_v39  ;;  %v9402_v38 = vld [vmem:[%s16813_s6 + $0x138] sm:$0xf] }
 0xa13   : > { %v6184_v52 = vpop.f32.mrf.mxu1  ;;  %v6281_v28 = vpop.f32.mrf.mxu2 }
 0xa14   : > { %v6185_v15 = vadd.f32 %v6184_v52, %v6096_v60  ;;  %v6370_v25 = vpop.f32.mrf.mxu3 }
 0xa16   : > { %v6274_v31 = vadd.f32 %v15195_v3, %v6185_v15  ;;  %10803 = vmatpush.bf16.msk.msra.mxu1 %vm11131_vm10, %v17276_v39  ;;  %10303 = vmatpush.bf16.msk.msra.mxu0 %vm11131_vm10, %v17279_v40  ;;  %v6098_v49 = vpop.f32.mrf.mxu0  ;;  %v6010_v3 = vadd.f32 %v17280_v34, %v5921_v45  ;;  %v9403_v39 = vor.u32 %v10601_v56, %v9402_v38  ;;  %v9506_v45 = vld [vmem:[%s16813_s6 + $0x200] sm:$0xf]  ;;  %v9452_v56 = vld [vmem:[%s16813_s6 + $0x1c8] sm:$0xf0] }
 0xa18   : > { %v15316_v2 = vadd.f32 %v15204_v26, %v6274_v31  ;;  %v6099_v18 = vadd.f32 %v6098_v49, %v6010_v3  ;;  %v10608_v26 = vld [vmem:[%s16813_s6 + $0x1a4] sm:$0xf]  ;;  %v17283_v49 = vld [vmem:[#allocation117_spill] sm:$0xff] }
 0xa19   : > { %6413 = vmatmul.bf16.gmra.mxu0 %v9355_v21  ;;  %v9463_v57 = vor.u32 %v10608_v26, %v9460_v55  ;;  %v5928_v12 = vadd.f32 %v17284_v33, %v17283_v49  ;;  %v17287_v49 = vld [vmem:[#allocation106_spill] sm:$0xff] }
 0xa1a   : > { %10804 = vmatpush.bf16.msk.msra.mxu1 %vm11131_vm10, %v17279_v40  ;;  %v10620_v40 = vld [vmem:[%s16813_s6 + $0x204] sm:$0xf] }
 0xa1b   : > { %v6187_v44 = vpop.f32.mrf.mxu1  ;;  %v6283_v16 = vpop.f32.mrf.mxu2 }
 0xa1c   : > { %v6188_v8 = vadd.f32 %v6187_v44, %v6099_v18  ;;  %v6372_v20 = vpop.f32.mrf.mxu3  ;;  %v17285_v44 = vld [vmem:[#allocation75_spill] sm:$0xff] }
 0xa1d   : > { %6502 = vmatmul.bf16.gmra.mxu1 %v9359_v6  ;;  %v6017_v26 = vadd.f32 %v17285_v44, %v5928_v12 }
 0xa1e   : > { %v6277_v35 = vadd.f32 %v15229_v47, %v6188_v8  ;;  %v6100_v50 = vpop.f32.mrf.mxu0 }
 0xa1f   : > { %v6101_v36 = vadd.f32 %v6100_v50, %v17281_v29 }
 0xa20   : > { %v15336_v30 = vadd.f32 %v15233_v17, %v6277_v35  ;;  %6601 = vmatmul.bf16.gmra.mxu2 %v9459_v46  ;;  %v10595_v17 = vld [vmem:[%s16813_s6 + $0x13c] sm:$0xf]  ;;  %v10613_v35 = vld [vmem:[%s16813_s6 + $0x1c4] sm:$0xf0] }
 0xa21   : > { %6690 = vmatmul.bf16.gmra.mxu3 %v9463_v57  ;;  %v9407_v15 = vor.u32 %v10595_v17, %v9404_v1  ;;  %v9450_v57 = vld [vmem:[%s16813_s6 + $0x198] sm:$0xf] }
 0xa23   : > { %v6189_v51 = vpop.f32.mrf.mxu1  ;;  %v6286_v11 = vpop.f32.mrf.mxu2 }
 0xa24   : > { %v6190_v47 = vadd.f32 %v6189_v51, %v6101_v36  ;;  %v6375_v13 = vpop.f32.mrf.mxu3  ;;  %v9451_v51 = vor.u32 %v10613_v35, %v9450_v57  ;;  %v17288_v57 = vld [vmem:[#allocation116_spill] sm:$0xff] }
 0xa26   : > { %v6279_v60 = vadd.f32 %v15264_v19, %v6190_v47  ;;  %v6103_v52 = vpop.f32.mrf.mxu0  ;;  %v10626_v19 = vld [vmem:[%s16813_s6 + $0x22c] sm:$0xf0] }
 0xa27   : > { %v6104_v61 = vadd.f32 %v6103_v52, %v17282_v10  ;;  %v9507_v14 = vor.u32 %v10626_v19, %v9506_v45  ;;  %v17286_v47 = vld [vmem:[#allocation105_spill] sm:$0xff]  ;;  %v9554_v52 = vld [vmem:[%s16813_s6 + $0x260] sm:$0xf] }
 0xa28   : > { %v15353_v27 = vadd.f32 %v15274_v58, %v6279_v60  ;;  %v9508_v58 = vld [vmem:[%s16813_s6 + $0x230] sm:$0xf0] }
 0xa29   : > { %6418 = vmatmul.bf16.gmra.mxu0 %v9403_v39  ;;  %v9511_v37 = vor.u32 %v10620_v40, %v9508_v58 }
 0xa2b   : > { %v6192_v31 = vpop.f32.mrf.mxu1  ;;  %v6288_v21 = vpop.f32.mrf.mxu2 }
 0xa2c   : > { %v6193_v34 = vadd.f32 %v6192_v31, %v6104_v61  ;;  %v6377_v3 = vpop.f32.mrf.mxu3  ;;  %v10632_v61 = vld [vmem:[%s16813_s6 + $0x264] sm:$0xf] }
 0xa2d   : > { %6507 = vmatmul.bf16.gmra.mxu1 %v9407_v15 }
 0xa2e   : > { %v6282_v18 = vadd.f32 %v6281_v28, %v6193_v34  ;;  %v6105_v6 = vpop.f32.mrf.mxu0 }
 0xa2f   : > { %v6106_v8 = vadd.f32 %v6105_v6, %v6017_v26 }
 0xa30   : > { %v15370_v55 = vadd.f32 %v6370_v25, %v6282_v18  ;;  %6606 = vmatmul.bf16.gmra.mxu2 %v9507_v14  ;;  %v10607_v25 = vld [vmem:[%s16813_s6 + $0x19c] sm:$0xf]  ;;  %v9498_v14 = vld [vmem:[%s16813_s6 + $0x1f8] sm:$0xf] }
 0xa31   : > { %6695 = vmatmul.bf16.gmra.mxu3 %v9511_v37  ;;  %v9455_v17 = vor.u32 %v10607_v25, %v9452_v56  ;;  %v10625_v37 = vld [vmem:[%s16813_s6 + $0x224] sm:$0xf0]  ;;  %v10644_v56 = vld [vmem:[%s16813_s6 + $0x2c4] sm:$0xf] }
 0xa32   : > { %v9499_v26 = vor.u32 %v10625_v37, %v9498_v14  ;;  %v9548_v37 = vld [vmem:[%s16813_s6 + $0x288] sm:$0xf0] }
 0xa33   : > { %v6194_v46 = vpop.f32.mrf.mxu1  ;;  %v6291_v50 = vpop.f32.mrf.mxu2 }
 0xa34   : > { %v6195_v28 = vadd.f32 %v6194_v46, %v6106_v8  ;;  %v6380_v29 = vpop.f32.mrf.mxu3  ;;  %v9500_v46 = vld [vmem:[%s16813_s6 + $0x228] sm:$0xf0] }
 0xa36   : > { %v6284_v36 = vadd.f32 %v6283_v16, %v6195_v28  ;;  %v6108_v38 = vpop.f32.mrf.mxu0  ;;  %v10638_v16 = vld [vmem:[%s16813_s6 + $0x28c] sm:$0xf0] }
 0xa37   : > { %v6109_v60 = vadd.f32 %v6108_v38, %v17286_v47  ;;  %v9555_v15 = vor.u32 %v10638_v16, %v9554_v52 }
 0xa38   : > { %v15385_v39 = vadd.f32 %v6372_v20, %v6284_v36  ;;  %v9556_v20 = vld [vmem:[%s16813_s6 + $0x290] sm:$0xf0]  ;;  %v9602_v36 = vld [vmem:[%s16813_s6 + $0x2c0] sm:$0xf] }
 0xa39   : > { %6423 = vmatmul.bf16.gmra.mxu0 %v9451_v51  ;;  %v9559_v31 = vor.u32 %v10632_v61, %v9556_v20  ;;  %v17289_v61 = vld [vmem:[#allocation114_spill] sm:$0xff] }
 0xa3b   : > { %v6197_v1 = vpop.f32.mrf.mxu1  ;;  %v6293_v10 = vpop.f32.mrf.mxu2 }
 0xa3c   : > { %v6198_v45 = vadd.f32 %v6197_v1, %v6109_v60  ;;  %v6382_v19 = vpop.f32.mrf.mxu3 }
 0xa3d   : > { %6512 = vmatmul.bf16.gmra.mxu1 %v9455_v17 }
 0xa3e   : > { %v6287_v40 = vadd.f32 %v6286_v11, %v6198_v45  ;;  %v6110_v58 = vpop.f32.mrf.mxu0 }
 0xa3f   : > { %v6111_v33 = vadd.f32 %v6110_v58, %v17287_v49 }
 0xa40   : > { %v15400_v12 = vadd.f32 %v6375_v13, %v6287_v40  ;;  %6611 = vmatmul.bf16.gmra.mxu2 %v9555_v15  ;;  %v10619_v13 = vld [vmem:[%s16813_s6 + $0x1fc] sm:$0xf]  ;;  %v10637_v40 = vld [vmem:[%s16813_s6 + $0x284] sm:$0xf0] }
 0xa41   : > { %6700 = vmatmul.bf16.gmra.mxu3 %v9559_v31  ;;  %v9503_v51 = vor.u32 %v10619_v13, %v9500_v46  ;;  %v9546_v31 = vld [vmem:[%s16813_s6 + $0x258] sm:$0xf] }
 0xa43   : > { %v6199_v34 = vpop.f32.mrf.mxu1  ;;  %v6296_v18 = vpop.f32.mrf.mxu2 }
 0xa44   : > { %v6200_v6 = vadd.f32 %v6199_v34, %v6111_v33  ;;  %v6385_v11 = vpop.f32.mrf.mxu3  ;;  %v9547_v34 = vor.u32 %v10637_v40, %v9546_v31 }
 0xa46   : > { %v6289_v44 = vadd.f32 %v6288_v21, %v6200_v6  ;;  %v6113_v8 = vpop.f32.mrf.mxu0  ;;  %v10650_v21 = vld [vmem:[%s16813_s6 + $0x2ec] sm:$0xf0] }
 0xa47   : > { %v6114_v35 = vadd.f32 %v6113_v8, %v17288_v57  ;;  %v9603_v52 = vor.u32 %v10650_v21, %v9602_v36  ;;  %v17290_v6 = vld [vmem:[#allocation97_spill] sm:$0xff]  ;;  %v9650_v8 = vld [vmem:[%s16813_s6 + $0x320] sm:$0xf] }
 0xa48   : > { %v15415_v28 = vadd.f32 %v6377_v3, %v6289_v44  ;;  %v9604_v3 = vld [vmem:[%s16813_s6 + $0x2f0] sm:$0xf0] }
 0xa49   : > { %6428 = vmatmul.bf16.gmra.mxu0 %v9499_v26  ;;  %v9607_v16 = vor.u32 %v10644_v56, %v9604_v3 }
 0xa4b   : > { %v6202_v38 = vpop.f32.mrf.mxu1  ;;  %v6298_v25 = vpop.f32.mrf.mxu2 }
 0xa4c   : > { %v6203_v47 = vadd.f32 %v6202_v38, %v6114_v35  ;;  %v6387_v60 = vpop.f32.mrf.mxu3  ;;  %v10656_v35 = vld [vmem:[%s16813_s6 + $0x324] sm:$0xf] }
 0xa4d   : > { %6517 = vmatmul.bf16.gmra.mxu1 %v9503_v51 }
 0xa4e   : > { %v6292_v17 = vadd.f32 %v6291_v50, %v6203_v47  ;;  %v6115_v1 = vpop.f32.mrf.mxu0  ;;  %v17291_v47 = vld [vmem:[#allocation76_spill] sm:$0xff] }
 0xa4f   : > { %v6116_v20 = vadd.f32 %v6115_v1, %v17289_v61  ;;  %v9594_v1 = vld [vmem:[%s16813_s6 + $0x2b8] sm:$0xf]  ;;  %v10649_v61 = vld [vmem:[%s16813_s6 + $0x2e4] sm:$0xf0] }
 0xa50   : > { %v15430_v45 = vadd.f32 %v6380_v29, %v6292_v17  ;;  %6616 = vmatmul.bf16.gmra.mxu2 %v9603_v52  ;;  %v10631_v29 = vld [vmem:[%s16813_s6 + $0x25c] sm:$0xf]  ;;  %v9595_v40 = vor.u32 %v10649_v61, %v9594_v1 }
 0xa51   : > { %6705 = vmatmul.bf16.gmra.mxu3 %v9607_v16  ;;  %v9551_v13 = vor.u32 %v10631_v29, %v9548_v37  ;;  %v9698_v37 = vld [vmem:[%s16813_s6 + $0x380] sm:$0xf] }
 0xa53   : > { %v6204_v15 = vpop.f32.mrf.mxu1  ;;  %v6301_v58 = vpop.f32.mrf.mxu2 }
 0xa54   : > { %v6205_v49 = vadd.f32 %v6204_v15, %v6116_v20  ;;  %v6390_v50 = vpop.f32.mrf.mxu3 }
 0xa56   : > { %v6294_v33 = vadd.f32 %v6293_v10, %v6205_v49  ;;  %v6118_v14 = vpop.f32.mrf.mxu0  ;;  %v10662_v10 = vld [vmem:[%s16813_s6 + $0x34c] sm:$0xf0] }
 0xa57   : > { %v6119_v44 = vadd.f32 %v6118_v14, %v17290_v6  ;;  %v9651_v51 = vor.u32 %v10662_v10, %v9650_v8  ;;  %v10668_v10 = vld [vmem:[%s16813_s6 + $0x384] sm:$0xf] }
 0xa58   : > { %v15445_v26 = vadd.f32 %v6382_v19, %v6294_v33  ;;  %v9652_v19 = vld [vmem:[%s16813_s6 + $0x350] sm:$0xf0]  ;;  %v9596_v33 = vld [vmem:[%s16813_s6 + $0x2e8] sm:$0xf0] }
 0xa59   : > { %6433 = vmatmul.bf16.gmra.mxu0 %v9547_v34  ;;  %v9655_v38 = vor.u32 %v10656_v35, %v9652_v19  ;;  %v17292_v34 = vld [vmem:[#allocation115_spill] sm:$0xff] }
 0xa5b   : > { %v6207_v46 = vpop.f32.mrf.mxu1  ;;  %v6303_v57 = vpop.f32.mrf.mxu2 }
 0xa5c   : > { %v6208_v36 = vadd.f32 %v6207_v46, %v6119_v44  ;;  %v6392_v21 = vpop.f32.mrf.mxu3 }
 0xa5d   : > { %6522 = vmatmul.bf16.gmra.mxu1 %v9551_v13 }
 0xa5e   : > { %v6297_v56 = vadd.f32 %v6296_v18, %v6208_v36  ;;  %v6120_v3 = vpop.f32.mrf.mxu0 }
 0xa5f   : > { %v6121_v52 = vadd.f32 %v6120_v3, %v17291_v47 }
 0xa60   : > { %v15460_v16 = vadd.f32 %v6385_v11, %v6297_v56  ;;  %6621 = vmatmul.bf16.gmra.mxu2 %v9651_v51  ;;  %v10643_v11 = vld [vmem:[%s16813_s6 + $0x2bc] sm:$0xf] }
 0xa61   : > { %6710 = vmatmul.bf16.gmra.mxu3 %v9655_v38  ;;  %v9599_v6 = vor.u32 %v10643_v11, %v9596_v33  ;;  %v17293_v38 = vld [vmem:[#allocation104_spill] sm:$0xff] }
 0xa63   : > { %v6209_v17 = vpop.f32.mrf.mxu1  ;;  %v6582_v20 = vpop.f32.mrf.mxu2 }
 0xa64   : > { %v6210_v15 = vadd.f32 %v6209_v17, %v6121_v52  ;;  %v6671_v18 = vpop.f32.mrf.mxu3  ;;  %v9642_v52 = vld [vmem:[%s16813_s6 + $0x318] sm:$0xf]  ;;  %v10661_v17 = vld [vmem:[%s16813_s6 + $0x344] sm:$0xf0] }
 0xa66   : > { %v6299_v31 = vadd.f32 %v6298_v25, %v6210_v15  ;;  %v6123_v49 = vpop.f32.mrf.mxu0  ;;  %v10674_v25 = vld [vmem:[%s16813_s6 + $0x3ac] sm:$0xf0] }
 0xa67   : > { %v6124_v14 = vadd.f32 %v6123_v49, %v17292_v34  ;;  %v9699_v35 = vor.u32 %v10674_v25, %v9698_v37  ;;  %v9644_v49 = vld [vmem:[%s16813_s6 + $0x348] sm:$0xf0]  ;;  %v9746_v34 = vld [vmem:[%s16813_s6 + $0x3e0] sm:$0xf] }
 0xa68   : > { %v15475_v29 = vadd.f32 %v6387_v60, %v6299_v31  ;;  %v9700_v60 = vld [vmem:[%s16813_s6 + $0x3b0] sm:$0xf0]  ;;  %v9643_v31 = vor.u32 %v10661_v17, %v9642_v52 }
 0xa69   : > { %6438 = vmatmul.bf16.gmra.mxu0 %v9595_v40  ;;  %v9703_v19 = vor.u32 %v10668_v10, %v9700_v60 }
 0xa6b   : > { %v6212_v44 = vpop.f32.mrf.mxu1  ;;  %v6584_v8 = vpop.f32.mrf.mxu2 }
 0xa6c   : > { %v6213_v13 = vadd.f32 %v6212_v44, %v6124_v14  ;;  %v6673_v46 = vpop.f32.mrf.mxu3 }
 0xa6d   : > { %6527 = vmatmul.bf16.gmra.mxu1 %v9599_v6  ;;  %v10680_v6 = vld [vmem:[%s16813_s6 + $0x3e4] sm:$0xf] }
 0xa6e   : > { %v6302_v36 = vadd.f32 %v6301_v58, %v6213_v13  ;;  %v6125_v51 = vpop.f32.mrf.mxu0 }
 0xa6f   : > { %v6126_v56 = vadd.f32 %v6125_v51, %v17293_v38 }
 0xa70   : > { %v15490_v3 = vadd.f32 %v6390_v50, %v6302_v36  ;;  %6626 = vmatmul.bf16.gmra.mxu2 %v9699_v35  ;;  %v10655_v50 = vld [vmem:[%s16813_s6 + $0x31c] sm:$0xf] }
 0xa71   : > { %6715 = vmatmul.bf16.gmra.mxu3 %v9703_v19  ;;  %v9647_v14 = vor.u32 %v10655_v50, %v9644_v49  ;;  %v17294_v19 = vld [vmem:[#allocation170_spill] sm:$0xff] }
 0xa72   : > { %v17295_v50 = vld [vmem:[#allocation166_spill] sm:$0xff] }
 0xa73   : > { %v6214_v47 = vpop.f32.mrf.mxu1  ;;  %v6587_v1 = vpop.f32.mrf.mxu2 }
 0xa74   : > { %v6215_v61 = vadd.f32 %v6214_v47, %v6126_v56  ;;  %v6676_v58 = vpop.f32.mrf.mxu3  ;;  %v9690_v56 = vld [vmem:[%s16813_s6 + $0x378] sm:$0xf]  ;;  %v10673_v47 = vld [vmem:[%s16813_s6 + $0x3a4] sm:$0xf0] }
 0xa76   : > { %v6304_v15 = vadd.f32 %v6303_v57, %v6215_v61  ;;  %v6404_v40 = vpop.f32.mrf.mxu0  ;;  %v10686_v57 = vld [vmem:[%s16813_s6 + $0x40c] sm:$0xf0] }
 0xa77   : > { %v6405_v33 = vadd.f32 %v6404_v40, %v14986_v48  ;;  %v9748_v48 = vld [vmem:[%s16813_s6 + $0x410] sm:$0xf0]  ;;  %v9747_v10 = vor.u32 %v10686_v57, %v9746_v34  ;;  %v9692_v40 = vld [vmem:[%s16813_s6 + $0x3a8] sm:$0xf0]  ;;  %v9794_v34 = vld [vmem:[%s16813_s6 + $0x440] sm:$0xf] }
 0xa78   : > { %v15504_v11 = vadd.f32 %v6392_v21, %v6304_v15  ;;  %v9751_v60 = vor.u32 %v10680_v6, %v9748_v48  ;;  %v9691_v15 = vor.u32 %v10673_v47, %v9690_v56  ;;  %v10692_v6 = vld [vmem:[%s16813_s6 + $0x444] sm:$0xf]  ;;  %v9738_v56 = vld [vmem:[%s16813_s6 + $0x3d8] sm:$0xf]  ;;  %v10685_v47 = vld [vmem:[%s16813_s6 + $0x404] sm:$0xf0] }
 0xa79   : > { %6443 = vmatmul.bf16.gmra.mxu0 %v9643_v31 }
 0xa7b   : > { %v6493_v37 = vpop.f32.mrf.mxu1  ;;  %v6589_v25 = vpop.f32.mrf.mxu2 }
 0xa7c   : > { %v6494_v21 = vadd.f32 %v6493_v37, %v6405_v33  ;;  %v6678_v44 = vpop.f32.mrf.mxu3 }
 0xa7d   : > { %6532 = vmatmul.bf16.gmra.mxu1 %v9647_v14 }
 0xa7e   : > { %v6583_v13 = vadd.f32 %v6582_v20, %v6494_v21  ;;  %v6406_v35 = vpop.f32.mrf.mxu0 }
 0xa7f   : > { %v6407_v36 = vadd.f32 %v6406_v35, %v17294_v19 }
 0xa80   : > { %v15520_v51 = vadd.f32 %v6671_v18, %v6583_v13  ;;  %6631 = vmatmul.bf16.gmra.mxu2 %v9747_v10  ;;  %v10667_v18 = vld [vmem:[%s16813_s6 + $0x37c] sm:$0xf] }
 0xa81   : > { %6720 = vmatmul.bf16.gmra.mxu3 %v9751_v60  ;;  %v9695_v57 = vor.u32 %v10667_v18, %v9692_v40 }
 0xa83   : > { %v6495_v38 = vpop.f32.mrf.mxu1  ;;  %v6592_v52 = vpop.f32.mrf.mxu2 }
 0xa84   : > { %v6496_v17 = vadd.f32 %v6495_v38, %v6407_v36  ;;  %v6681_v20 = vpop.f32.mrf.mxu3 }
 0xa86   : > { %v6585_v61 = vadd.f32 %v6584_v8, %v6496_v17  ;;  %v6409_v31 = vpop.f32.mrf.mxu0  ;;  %v10698_v8 = vld [vmem:[%s16813_s6 + $0x46c] sm:$0xf0] }
 0xa87   : > { %v6410_v49 = vadd.f32 %v6409_v31, %v17295_v50  ;;  %v9795_v10 = vor.u32 %v10698_v8, %v9794_v34  ;;  %v9739_v31 = vor.u32 %v10685_v47, %v9738_v56  ;;  %v10697_v56 = vld [vmem:[%s16813_s6 + $0x464] sm:$0xf0] }
 0xa88   : > { %v15535_v33 = vadd.f32 %v6673_v46, %v6585_v61  ;;  %v9796_v46 = vld [vmem:[%s16813_s6 + $0x470] sm:$0xf0] }
 0xa89   : > { %6448 = vmatmul.bf16.gmra.mxu0 %v9691_v15  ;;  %v9799_v60 = vor.u32 %v10692_v6, %v9796_v46 }
 0xa8b   : > { %v6498_v14 = vpop.f32.mrf.mxu1  ;;  %v6594_v37 = vpop.f32.mrf.mxu2 }
 0xa8c   : > { %v6499_v48 = vadd.f32 %v6498_v14, %v6410_v49  ;;  %v6683_v21 = vpop.f32.mrf.mxu3  ;;  %v9842_v49 = vld [vmem:[%s16813_s6 + $0x4a0] sm:$0xf]  ;;  %v10704_v14 = vld [vmem:[%s16813_s6 + $0x4a4] sm:$0xf] }
 0xa8d   : > { %6537 = vmatmul.bf16.gmra.mxu1 %v9695_v57 }
 0xa8e   : > { %v6588_v13 = vadd.f32 %v6587_v1, %v6499_v48  ;;  %v6411_v35 = vpop.f32.mrf.mxu0 }
 0xa8f   : > { %v6412_v19 = vadd.f32 %v6411_v35, %v14953_v22  ;;  %v10679_v22 = vld [vmem:[%s16813_s6 + $0x3dc] sm:$0xf] }
 0xa90   : > { %v15550_v36 = vadd.f32 %v6676_v58, %v6588_v13  ;;  %6636 = vmatmul.bf16.gmra.mxu2 %v9795_v10  ;;  %v9740_v58 = vld [vmem:[%s16813_s6 + $0x408] sm:$0xf0] }
 0xa91   : > { %6725 = vmatmul.bf16.gmra.mxu3 %v9799_v60  ;;  %v9743_v34 = vor.u32 %v10679_v22, %v9740_v58 }
 0xa93   : > { %v6500_v38 = vpop.f32.mrf.mxu1  ;;  %v6597_v17 = vpop.f32.mrf.mxu2 }
 0xa94   : > { %v6501_v61 = vadd.f32 %v6500_v38, %v6412_v19  ;;  %v6686_v1 = vpop.f32.mrf.mxu3  ;;  %v9786_v38 = vld [vmem:[%s16813_s6 + $0x438] sm:$0xf] }
 0xa96   : > { %v6590_v15 = vadd.f32 %v6589_v25, %v6501_v61  ;;  %v6414_v18 = vpop.f32.mrf.mxu0  ;;  %v10710_v25 = vld [vmem:[%s16813_s6 + $0x4cc] sm:$0xf0] }
 0xa97   : > { %v6415_v40 = vadd.f32 %v6414_v18, %v14957_v41  ;;  %v9844_v41 = vld [vmem:[%s16813_s6 + $0x4d0] sm:$0xf0]  ;;  %v9843_v46 = vor.u32 %v10710_v25, %v9842_v49  ;;  %v9788_v18 = vld [vmem:[%s16813_s6 + $0x468] sm:$0xf0] }
 0xa98   : > { %v15565_v50 = vadd.f32 %v6678_v44, %v6590_v15  ;;  %v9847_v48 = vor.u32 %v10704_v14, %v9844_v41 }
 0xa99   : > { %6453 = vmatmul.bf16.gmra.mxu0 %v9739_v31  ;;  %v10691_v31 = vld [vmem:[%s16813_s6 + $0x43c] sm:$0xf] }
 0xa9a   : > { %v9791_v49 = vor.u32 %v10691_v31, %v9788_v18 }
 0xa9b   : > { %v6503_v8 = vpop.f32.mrf.mxu1  ;;  %v6599_v57 = vpop.f32.mrf.mxu2 }
 0xa9c   : > { %v6504_v44 = vadd.f32 %v6503_v8, %v6415_v40  ;;  %v6688_v6 = vpop.f32.mrf.mxu3  ;;  %v9890_v40 = vld [vmem:[%s16813_s6 + $0x500] sm:$0xf]  ;;  %v10716_v8 = vld [vmem:[%s16813_s6 + $0x504] sm:$0xf] }
 0xa9d   : > { %6542 = vmatmul.bf16.gmra.mxu1 %v9743_v34 }
 0xa9e   : > { %v6593_v10 = vadd.f32 %v6592_v52, %v6504_v44  ;;  %v6416_v60 = vpop.f32.mrf.mxu0 }
 0xa9f   : > { %v6417_v13 = vadd.f32 %v6416_v60, %v14983_v62  ;;  %v9787_v62 = vor.u32 %v10697_v56, %v9786_v38  ;;  %v10709_v38 = vld [vmem:[%s16813_s6 + $0x4c4] sm:$0xf0] }
 0xaa0   : > { %v15580_v35 = vadd.f32 %v6681_v20, %v6593_v10  ;;  %6641 = vmatmul.bf16.gmra.mxu2 %v9843_v46 }
 0xaa1   : > { %6730 = vmatmul.bf16.gmra.mxu3 %v9847_v48 }
 0xaa3   : > { %v6505_v19 = vpop.f32.mrf.mxu1  ;;  %v15588_v47 = vpop.f32.mrf.mxu2 }
 0xaa4   : > { %v6506_v52 = vadd.f32 %v6505_v19, %v6417_v13  ;;  %v15590_v61 = vpop.f32.mrf.mxu3  ;;  %v9834_v19 = vld [vmem:[%s16813_s6 + $0x498] sm:$0xf] }
 0xaa6   : > { %v6595_v15 = vadd.f32 %v6594_v37, %v6506_v52  ;;  %v6419_v20 = vpop.f32.mrf.mxu0  ;;  %v10722_v37 = vld [vmem:[%s16813_s6 + $0x52c] sm:$0xf0] }
 0xaa7   : > { %v6420_v22 = vadd.f32 %v6419_v20, %v15005_v59  ;;  %v9892_v59 = vld [vmem:[%s16813_s6 + $0x530] sm:$0xf0]  ;;  %v9891_v41 = vor.u32 %v10722_v37, %v9890_v40  ;;  %v9836_v20 = vld [vmem:[%s16813_s6 + $0x4c8] sm:$0xf0] }
 0xaa8   : > { %v15599_v58 = vadd.f32 %v6683_v21, %v6595_v15  ;;  %v9895_v44 = vor.u32 %v10716_v8, %v9892_v59 }
 0xaa9   : > { %6458 = vmatmul.bf16.gmra.mxu0 %v9787_v62  ;;  %v10703_v62 = vld [vmem:[%s16813_s6 + $0x49c] sm:$0xf] }
 0xaaa   : > { %v9839_v40 = vor.u32 %v10703_v62, %v9836_v20  ;;  %v9986_v62 = vld [vmem:[%s16813_s6 + $0x5c0] sm:$0xf]  ;;  %v10746_v20 = vld [vmem:[%s16813_s6 + $0x5ec] sm:$0xf0] }
 0xaab   : > { %v6508_v25 = vpop.f32.mrf.mxu1  ;;  %v15607_v34 = vpop.f32.mrf.mxu2 }
 0xaac   : > { %v6509_v21 = vadd.f32 %v6508_v25, %v6420_v22  ;;  %v15615_v14 = vpop.f32.mrf.mxu3  ;;  %v9938_v22 = vld [vmem:[%s16813_s6 + $0x560] sm:$0xf]  ;;  %v10728_v25 = vld [vmem:[%s16813_s6 + $0x564] sm:$0xf] }
 0xaad   : > { %6547 = vmatmul.bf16.gmra.mxu1 %v9791_v49 }
 0xaae   : > { %v6598_v46 = vadd.f32 %v6597_v17, %v6509_v21  ;;  %v6421_v48 = vpop.f32.mrf.mxu0 }
 0xaaf   : > { %v6422_v10 = vadd.f32 %v6421_v48, %v15024_v53  ;;  %v9835_v53 = vor.u32 %v10709_v38, %v9834_v19  ;;  %v9882_v48 = vld [vmem:[%s16813_s6 + $0x4f8] sm:$0xf] }
 0xab0   : > { %v15618_v60 = vadd.f32 %v6686_v1, %v6598_v46  ;;  %6646 = vmatmul.bf16.gmra.mxu2 %v9891_v41 }
 0xab1   : > { %6735 = vmatmul.bf16.gmra.mxu3 %v9895_v44 }
 0xab3   : > { %v6510_v13 = vpop.f32.mrf.mxu1  ;;  %v15626_v56 = vpop.f32.mrf.mxu2 }
 0xab4   : > { %v6511_v17 = vadd.f32 %v6510_v13, %v6422_v10  ;;  %v15628_v52 = vpop.f32.mrf.mxu3  ;;  %v10721_v10 = vld [vmem:[%s16813_s6 + $0x524] sm:$0xf0] }
 0xab6   : > { %v6600_v15 = vadd.f32 %v6599_v57, %v6511_v17  ;;  %v6424_v1 = vpop.f32.mrf.mxu0  ;;  %v10734_v57 = vld [vmem:[%s16813_s6 + $0x58c] sm:$0xf0]  ;;  %v9883_v17 = vor.u32 %v10721_v10, %v9882_v48  ;;  %v10733_v48 = vld [vmem:[%s16813_s6 + $0x584] sm:$0xf0] }
 0xab7   : > { %v6425_v31 = vadd.f32 %v6424_v1, %v15043_v9  ;;  %v9940_v9 = vld [vmem:[%s16813_s6 + $0x590] sm:$0xf0]  ;;  %v9939_v59 = vor.u32 %v10734_v57, %v9938_v22  ;;  %v10740_v57 = vld [vmem:[%s16813_s6 + $0x5c4] sm:$0xf] }
 0xab8   : > { %v15637_v18 = vadd.f32 %v6688_v6, %v6600_v15  ;;  %v9943_v21 = vor.u32 %v10728_v25, %v9940_v9 }
 0xab9   : > { %6463 = vmatmul.bf16.gmra.mxu0 %v9835_v53  ;;  %v9884_v53 = vld [vmem:[%s16813_s6 + $0x528] sm:$0xf0] }
 0xabb   : > { %v6513_v37 = vpop.f32.mrf.mxu1  ;;  %v15645_v49 = vpop.f32.mrf.mxu2 }
 0xabc   : > { %v15653_v6 = vadd.f32 %v6513_v37, %v6425_v31  ;;  %v15655_v8 = vpop.f32.mrf.mxu3  ;;  %v9987_v37 = vor.u32 %v10746_v20, %v9986_v62 }
 0xabd   : > { %6552 = vmatmul.bf16.gmra.mxu1 %v9839_v40  ;;  %v9988_v40 = vld [vmem:[%s16813_s6 + $0x5f0] sm:$0xf0] }
 0xabe   : > { %v6426_v41 = vpop.f32.mrf.mxu0  ;;  %v9991_v9 = vor.u32 %v10740_v57, %v9988_v40 }
 0xabf   : > { %v6427_v44 = vadd.f32 %v6426_v41, %v15062_v0  ;;  %v10715_v0 = vld [vmem:[%s16813_s6 + $0x4fc] sm:$0xf] }
 0xac0   : > { %6651 = vmatmul.bf16.gmra.mxu2 %v9939_v59  ;;  %v9887_v31 = vor.u32 %v10715_v0, %v9884_v53  ;;  %v10727_v0 = vld [vmem:[%s16813_s6 + $0x55c] sm:$0xf] }
 0xac1   : > { %6740 = vmatmul.bf16.gmra.mxu3 %v9943_v21 }
 0xac3   : > { %v6515_v46 = vpop.f32.mrf.mxu1  ;;  %v15664_v13 = vpop.f32.mrf.mxu2 }
 0xac4   : > { %v15666_v19 = vadd.f32 %v6515_v46, %v6427_v44  ;;  %v15668_v38 = vpop.f32.mrf.mxu3  ;;  %v9930_v46 = vld [vmem:[%s16813_s6 + $0x558] sm:$0xf] }
 0xac6   : > { %v6429_v15 = vpop.f32.mrf.mxu0 }
 0xac7   : > { %v6430_v1 = vadd.f32 %v6429_v15, %v15079_v43 }
 0xac9   : > { %6468 = vmatmul.bf16.gmra.mxu0 %v9883_v17  ;;  %v9931_v17 = vor.u32 %v10733_v48, %v9930_v46 }
 0xacb   : > { %v6518_v22 = vpop.f32.mrf.mxu1  ;;  %v15691_v25 = vpop.f32.mrf.mxu2 }
 0xacc   : > { %v15689_v43 = vadd.f32 %v6518_v22, %v6430_v1  ;;  %v15693_v21 = vpop.f32.mrf.mxu3 }
 0xacd   : > { %6557 = vmatmul.bf16.gmra.mxu1 %v9887_v31 }
 0xace   : > { %v6431_v59 = vpop.f32.mrf.mxu0 }
 0xacf   : > { %v6432_v41 = vadd.f32 %v6431_v59, %v15100_v54  ;;  %v9932_v54 = vld [vmem:[%s16813_s6 + $0x588] sm:$0xf0]  ;;  %v9978_v59 = vld [vmem:[%s16813_s6 + $0x5b8] sm:$0xf] }
 0xad0   : > { %6656 = vmatmul.bf16.gmra.mxu2 %v9987_v37  ;;  %v9935_v20 = vor.u32 %v10727_v0, %v9932_v54 }
 0xad1   : > { %6745 = vmatmul.bf16.gmra.mxu3 %v9991_v9 }
 0xad3   : > { %v6520_v44 = vpop.f32.mrf.mxu1  ;;  %v15710_v53 = vpop.f32.mrf.mxu2 }
 0xad4   : > { %v15702_v10 = vadd.f32 %v6520_v44, %v6432_v41  ;;  %v15713_v62 = vpop.f32.mrf.mxu3 }
 0xad6   : > { %v6434_v15 = vpop.f32.mrf.mxu0 }
 0xad7   : > { %v6435_v1 = vadd.f32 %v6434_v15, %v15118_v5  ;;  %v10745_v5 = vld [vmem:[%s16813_s6 + $0x5e4] sm:$0xf0] }
 0xad8   : > { %v9979_v46 = vor.u32 %v10745_v5, %v9978_v59  ;;  %v9274_v59 = vld [vmem:[%s16813_s6 + $0x28] sm:$0xf] }
 0xad9   : > { %6473 = vmatmul.bf16.gmra.mxu0 %v9931_v17  ;;  %v9980_v17 = vld [vmem:[%s16813_s6 + $0x5e8] sm:$0xf0] }
 0xadb   : > { %v6523_v31 = vpop.f32.mrf.mxu1  ;;  %v15718_v37 = vpop.f32.mrf.mxu2 }
 0xadc   : > { %v15715_v22 = vadd.f32 %v6523_v31, %v6435_v1  ;;  %17296 = vst [vmem:[#allocation119_spill] sm:$0xff] %v15718_v37  ;;  %v15726_v41 = vpop.f32.mrf.mxu3 }
 0xadd   : > { %6562 = vmatmul.bf16.gmra.mxu1 %v9935_v20  ;;  %17297 = vst [vmem:[#allocation171_spill] sm:$0xff] %v15726_v41 }
 0xade   : > { %v6436_v57 = vpop.f32.mrf.mxu0 }
 0xadf   : > { %v6437_v40 = vadd.f32 %v6436_v57, %v15141_v23  ;;  %v10739_v23 = vld [vmem:[%s16813_s6 + $0x5bc] sm:$0xf] }
 0xae0   : > { %v9983_v0 = vor.u32 %v10739_v23, %v9980_v17  ;;  %v10561_v17 = vld [vmem:[%s16813_s6 + $0x2c] sm:$0xf] }
 0xae3   : > { %v6525_v9 = vpop.f32.mrf.mxu1  ;;  %v6622_v1 = vpop.f32.mrf.mxu2 }
 0xae4   : > { %v15728_v44 = vadd.f32 %v6525_v9, %v6437_v40  ;;  %v6711_v31 = vpop.f32.mrf.mxu3 }
 0xae6   : > { %v6439_v48 = vpop.f32.mrf.mxu0 }
 0xae7   : > { %v6440_v15 = vadd.f32 %v6439_v48, %v15164_v4  ;;  %v10567_v4 = vld [vmem:[%s16813_s6 + $0x54] sm:$0xf0] }
 0xae8   : > { %v9275_v48 = vor.u32 %v10567_v4, %v9274_v59 }
 0xae9   : > { %6478 = vmatmul.bf16.gmra.mxu0 %v9979_v46 }
 0xaeb   : > { %v6528_v54 = vpop.f32.mrf.mxu1  ;;  %v15748_v46 = vpop.f32.mrf.mxu2 }
 0xaec   : > { %v15737_v20 = vadd.f32 %v6528_v54, %v6440_v15  ;;  %17298 = vst [vmem:[#allocation121_spill] sm:$0xff] %v15748_v46  ;;  %v15756_v15 = vpop.f32.mrf.mxu3 }
 0xaed   : > { %6567 = vmatmul.bf16.gmra.mxu1 %v9983_v0  ;;  %17299 = vst [vmem:[#allocation174_spill] sm:$0xff] %v15756_v15  ;;  %v9322_v15 = vld [vmem:[%s16813_s6 + $0x88] sm:$0xf] }
 0xaee   : > { %v6441_v57 = vpop.f32.mrf.mxu0 }
 0xaef   : > { %v6442_v40 = vadd.f32 %v6441_v57, %v15184_v32  ;;  %v9276_v32 = vld [vmem:[%s16813_s6 + $0x58] sm:$0xf0] }
 0xaf0   : > { %v9279_v54 = vor.u32 %v10561_v17, %v9276_v32 }
 0xaf3   : > { %v6530_v9 = vpop.f32.mrf.mxu1  ;;  %v6627_v4 = vpop.f32.mrf.mxu2 }
 0xaf4   : > { %v15746_v5 = vadd.f32 %v6530_v9, %v6442_v40  ;;  %v6716_v41 = vpop.f32.mrf.mxu3 }
 0xaf6   : > { %v6444_v23 = vpop.f32.mrf.mxu0 }
 0xaf7   : > { %v6445_v0 = vadd.f32 %v6444_v23, %v15215_v24  ;;  %v10579_v24 = vld [vmem:[%s16813_s6 + $0xb4] sm:$0xf0] }
 0xaf9   : > { %6759 = vmatmul.bf16.vlgmr.msrb.gmra.mxu0 %v9275_v48 }
 0xafb   : > { %v6533_v57 = vpop.f32.mrf.mxu1  ;;  %v15777_v32 = vpop.f32.mrf.mxu2 }
 0xafc   : > { %v6534_v40 = vadd.f32 %v6533_v57, %v6445_v0  ;;  %v15779_v57 = vpop.f32.mrf.mxu3 }
 0xafd   : > { %6848 = vmatmul.bf16.vlgmr.msrb.gmra.mxu1 %v9279_v54  ;;  %17300 = vst [vmem:[#allocation107_spill] sm:$0xff] %v15779_v57 }
 0xafe   : > { %v6623_v9 = vadd.f32 %v6622_v1, %v6534_v40  ;;  %v6446_v59 = vpop.f32.mrf.mxu0  ;;  %v9323_v1 = vor.u32 %v10579_v24, %v9322_v15  ;;  %v10591_v24 = vld [vmem:[%s16813_s6 + $0x114] sm:$0xf0] }
 0xaff   : > { %v6447_v42 = vadd.f32 %v6446_v59, %v15250_v63  ;;  %v10573_v63 = vld [vmem:[%s16813_s6 + $0x8c] sm:$0xf] }
 0xb00   : > { %v15760_v46 = vadd.f32 %v6711_v31, %v6623_v9  ;;  %v9324_v31 = vld [vmem:[%s16813_s6 + $0xb8] sm:$0xf0] }
 0xb01   : > { %v9327_v0 = vor.u32 %v10573_v63, %v9324_v31 }
 0xb03   : > { %v6535_v37 = vpop.f32.mrf.mxu1 }
 0xb04   : > { %v15768_v48 = vadd.f32 %v6535_v37, %v6447_v42  ;;  %v6721_v63 = vpop.f32.mrf.mxu3 }
 0xb06   : > { %v6449_v23 = vpop.f32.mrf.mxu0 }
 0xb07   : > { %v6450_v17 = vadd.f32 %v6449_v23, %v15285_v7  ;;  %v9370_v7 = vld [vmem:[%s16813_s6 + $0xe8] sm:$0xf] }
 0xb09   : > { %6764 = vmatmul.bf16.gmra.mxu0 %v9323_v1  ;;  %v6632_v1 = vpop.f32.mrf.mxu2 }
 0xb0b   : > { %v6538_v54 = vpop.f32.mrf.mxu1 }
 0xb0c   : > { %v6539_v42 = vadd.f32 %v6538_v54, %v6450_v17 }
 0xb0d   : > { %6853 = vmatmul.bf16.gmra.mxu1 %v9327_v0 }
 0xb0e   : > { %v6628_v37 = vadd.f32 %v6627_v4, %v6539_v42  ;;  %v6451_v15 = vpop.f32.mrf.mxu0  ;;  %v9371_v4 = vor.u32 %v10591_v24, %v9370_v7 }
 0xb0f   : > { %v6452_v40 = vadd.f32 %v6451_v15, %v15316_v2  ;;  %v10585_v2 = vld [vmem:[%s16813_s6 + $0xec] sm:$0xf] }
 0xb10   : > { %v15782_v9 = vadd.f32 %v6716_v41, %v6628_v37  ;;  %v9372_v41 = vld [vmem:[%s16813_s6 + $0x118] sm:$0xf0] }
 0xb11   : > { %v9375_v0 = vor.u32 %v10585_v2, %v9372_v41  ;;  %v15799_v37 = vpop.f32.mrf.mxu2 }
 0xb12   : > { %17301 = vst [vmem:[#allocation61_spill] sm:$0xff] %v15799_v37 }
 0xb13   : > { %v6540_v59 = vpop.f32.mrf.mxu1 }
 0xb14   : > { %v15790_v23 = vadd.f32 %v6540_v59, %v6452_v40  ;;  %v15801_v59 = vpop.f32.mrf.mxu3 }
 0xb15   : > { %17302 = vst [vmem:[#allocation118_spill] sm:$0xff] %v15801_v59 }
 0xb16   : > { %v6454_v31 = vpop.f32.mrf.mxu0 }
 0xb17   : > { %v6455_v17 = vadd.f32 %v6454_v31, %v15336_v30  ;;  %v9418_v30 = vld [vmem:[%s16813_s6 + $0x148] sm:$0xf] }
 0xb19   : > { %6769 = vmatmul.bf16.gmra.mxu0 %v9371_v4  ;;  %v10603_v4 = vld [vmem:[%s16813_s6 + $0x174] sm:$0xf0]  ;;  %v6637_v41 = vpop.f32.mrf.mxu2 }
 0xb1b   : > { %v6543_v54 = vpop.f32.mrf.mxu1 }
 0xb1c   : > { %v6544_v42 = vadd.f32 %v6543_v54, %v6455_v17 }
 0xb1d   : > { %6858 = vmatmul.bf16.gmra.mxu1 %v9375_v0  ;;  %v6726_v0 = vpop.f32.mrf.mxu3 }
 0xb1e   : > { %v6633_v15 = vadd.f32 %v6632_v1, %v6544_v42  ;;  %v6456_v40 = vpop.f32.mrf.mxu0  ;;  %v9419_v1 = vor.u32 %v10603_v4, %v9418_v30 }
 0xb1f   : > { %v6457_v7 = vadd.f32 %v6456_v40, %v15353_v27  ;;  %v10597_v27 = vld [vmem:[%s16813_s6 + $0x14c] sm:$0xf] }
 0xb20   : > { %v15804_v24 = vadd.f32 %v6721_v63, %v6633_v15  ;;  %v9420_v63 = vld [vmem:[%s16813_s6 + $0x178] sm:$0xf0] }
 0xb21   : > { %v9423_v54 = vor.u32 %v10597_v27, %v9420_v63  ;;  %v15824_v4 = vpop.f32.mrf.mxu2  ;;  %v9468_v63 = vld [vmem:[%s16813_s6 + $0x1d8] sm:$0xf0] }
 0xb23   : > { %v6545_v57 = vpop.f32.mrf.mxu1 }
 0xb24   : > { %v15812_v31 = vadd.f32 %v6545_v57, %v6457_v7 }
 0xb25   : > { %v15826_v37 = vpop.f32.mrf.mxu3 }
 0xb26   : > { %v6459_v2 = vpop.f32.mrf.mxu0  ;;  %17303 = vst [vmem:[#allocation160_spill] sm:$0xff] %v15826_v37  ;;  %v9514_v37 = vld [vmem:[%s16813_s6 + $0x208] sm:$0xf] }
 0xb27   : > { %v6460_v17 = vadd.f32 %v6459_v2, %v15370_v55  ;;  %v9466_v55 = vld [vmem:[%s16813_s6 + $0x1a8] sm:$0xf] }
 0xb29   : > { %6774 = vmatmul.bf16.gmra.mxu0 %v9419_v1  ;;  %v10615_v1 = vld [vmem:[%s16813_s6 + $0x1d4] sm:$0xf0] }
 0xb2b   : > { %v6548_v42 = vpop.f32.mrf.mxu1 }
 0xb2c   : > { %v6549_v15 = vadd.f32 %v6548_v42, %v6460_v17  ;;  %v6642_v42 = vpop.f32.mrf.mxu2 }
 0xb2d   : > { %6863 = vmatmul.bf16.gmra.mxu1 %v9423_v54 }
 0xb2e   : > { %v6638_v57 = vadd.f32 %v6637_v41, %v6549_v15  ;;  %v6461_v40 = vpop.f32.mrf.mxu0  ;;  %v9467_v41 = vor.u32 %v10615_v1, %v9466_v55 }
 0xb2f   : > { %v6462_v7 = vadd.f32 %v6461_v40, %v15385_v39  ;;  %v10609_v39 = vld [vmem:[%s16813_s6 + $0x1ac] sm:$0xf] }
 0xb30   : > { %v15822_v30 = vadd.f32 %v6726_v0, %v6638_v57  ;;  %v9471_v0 = vor.u32 %v10609_v39, %v9468_v63  ;;  %v6731_v57 = vpop.f32.mrf.mxu3  ;;  %v10621_v63 = vld [vmem:[%s16813_s6 + $0x20c] sm:$0xf] }
 0xb33   : > { %v6550_v59 = vpop.f32.mrf.mxu1 }
 0xb34   : > { %v15834_v2 = vadd.f32 %v6550_v59, %v6462_v7 }
 0xb36   : > { %v6464_v27 = vpop.f32.mrf.mxu0 }
 0xb37   : > { %v6465_v17 = vadd.f32 %v6464_v27, %v15400_v12  ;;  %v10627_v12 = vld [vmem:[%s16813_s6 + $0x234] sm:$0xf0] }
 0xb38   : > { %v9515_v27 = vor.u32 %v10627_v12, %v9514_v37  ;;  %v10633_v12 = vld [vmem:[%s16813_s6 + $0x26c] sm:$0xf] }
 0xb39   : > { %6779 = vmatmul.bf16.gmra.mxu0 %v9467_v41 }
 0xb3b   : > { %v6553_v54 = vpop.f32.mrf.mxu1 }
 0xb3c   : > { %v6554_v15 = vadd.f32 %v6553_v54, %v6465_v17 }
 0xb3d   : > { %6868 = vmatmul.bf16.gmra.mxu1 %v9471_v0 }
 0xb3e   : > { %v6643_v59 = vadd.f32 %v6642_v42, %v6554_v15  ;;  %v6466_v40 = vpop.f32.mrf.mxu0 }
 0xb3f   : > { %v6467_v7 = vadd.f32 %v6466_v40, %v15415_v28  ;;  %v9516_v28 = vld [vmem:[%s16813_s6 + $0x238] sm:$0xf0]  ;;  %v10639_v40 = vld [vmem:[%s16813_s6 + $0x294] sm:$0xf0] }
 0xb40   : > { %v15844_v55 = vadd.f32 %v6731_v57, %v6643_v59  ;;  %v9519_v0 = vor.u32 %v10621_v63, %v9516_v28  ;;  %v9562_v59 = vld [vmem:[%s16813_s6 + $0x268] sm:$0xf] }
 0xb43   : > { %v6555_v1 = vpop.f32.mrf.mxu1 }
 0xb44   : > { %v15852_v41 = vadd.f32 %v6555_v1, %v6467_v7 }
 0xb46   : > { %v6469_v39 = vpop.f32.mrf.mxu0 }
 0xb47   : > { %v6470_v17 = vadd.f32 %v6469_v39, %v15430_v45  ;;  %v9563_v45 = vor.u32 %v10639_v40, %v9562_v59  ;;  %v10645_v40 = vld [vmem:[%s16813_s6 + $0x2cc] sm:$0xf] }
 0xb49   : > { %6784 = vmatmul.bf16.gmra.mxu0 %v9515_v27 }
 0xb4b   : > { %v6558_v54 = vpop.f32.mrf.mxu1 }
 0xb4c   : > { %v15861_v42 = vadd.f32 %v6558_v54, %v6470_v17 }
 0xb4d   : > { %6873 = vmatmul.bf16.gmra.mxu1 %v9519_v0 }
 0xb4e   : > { %v6471_v15 = vpop.f32.mrf.mxu0 }
 0xb4f   : > { %v6472_v37 = vadd.f32 %v6471_v15, %v15445_v26  ;;  %v9564_v26 = vld [vmem:[%s16813_s6 + $0x298] sm:$0xf0]  ;;  %v9610_v15 = vld [vmem:[%s16813_s6 + $0x2c8] sm:$0xf] }
 0xb50   : > { %v9567_v39 = vor.u32 %v10633_v12, %v9564_v26 }
 0xb53   : > { %v6560_v57 = vpop.f32.mrf.mxu1 }
 0xb54   : > { %v15870_v7 = vadd.f32 %v6560_v57, %v6472_v37  ;;  %v10651_v37 = vld [vmem:[%s16813_s6 + $0x2f4] sm:$0xf0] }
 0xb56   : > { %v6474_v1 = vpop.f32.mrf.mxu0 }
 0xb57   : > { %v6475_v27 = vadd.f32 %v6474_v1, %v15460_v16  ;;  %v9611_v16 = vor.u32 %v10651_v37, %v9610_v15  ;;  %v10657_v37 = vld [vmem:[%s16813_s6 + $0x32c] sm:$0xf] }
 0xb59   : > { %6789 = vmatmul.bf16.gmra.mxu0 %v9563_v45 }
 0xb5b   : > { %v6563_v63 = vpop.f32.mrf.mxu1 }
 0xb5c   : > { %v15879_v28 = vadd.f32 %v6563_v63, %v6475_v27 }
 0xb5d   : > { %6878 = vmatmul.bf16.gmra.mxu1 %v9567_v39 }
 0xb5e   : > { %v6476_v17 = vpop.f32.mrf.mxu0 }
 0xb5f   : > { %v6477_v0 = vadd.f32 %v6476_v17, %v15475_v29  ;;  %v9612_v29 = vld [vmem:[%s16813_s6 + $0x2f8] sm:$0xf0]  ;;  %v9658_v17 = vld [vmem:[%s16813_s6 + $0x328] sm:$0xf] }
 0xb60   : > { %v9615_v1 = vor.u32 %v10645_v40, %v9612_v29 }
 0xb63   : > { %v6565_v54 = vpop.f32.mrf.mxu1 }
 0xb64   : > { %v15888_v57 = vadd.f32 %v6565_v54, %v6477_v0  ;;  %v10663_v0 = vld [vmem:[%s16813_s6 + $0x354] sm:$0xf0] }
 0xb66   : > { %v6479_v59 = vpop.f32.mrf.mxu0 }
 0xb67   : > { %v6480_v45 = vadd.f32 %v6479_v59, %v15490_v3  ;;  %v9659_v3 = vor.u32 %v10663_v0, %v9658_v17 }
 0xb69   : > { %6794 = vmatmul.bf16.gmra.mxu0 %v9611_v16 }
 0xb6b   : > { %v6568_v12 = vpop.f32.mrf.mxu1 }
 0xb6c   : > { %v15897_v26 = vadd.f32 %v6568_v12, %v6480_v45 }
 0xb6d   : > { %6883 = vmatmul.bf16.gmra.mxu1 %v9615_v1 }
 0xb6e   : > { %v6481_v27 = vpop.f32.mrf.mxu0 }
 0xb6f   : > { %v6482_v39 = vadd.f32 %v6481_v27, %v15504_v11  ;;  %v9660_v11 = vld [vmem:[%s16813_s6 + $0x358] sm:$0xf0] }
 0xb70   : > { %v9663_v59 = vor.u32 %v10657_v37, %v9660_v11  ;;  %v10669_v37 = vld [vmem:[%s16813_s6 + $0x38c] sm:$0xf] }
 0xb73   : > { %v6570_v63 = vpop.f32.mrf.mxu1 }
 0xb74   : > { %v15906_v54 = vadd.f32 %v6570_v63, %v6482_v39  ;;  %v9706_v39 = vld [vmem:[%s16813_s6 + $0x388] sm:$0xf]  ;;  %v10675_v63 = vld [vmem:[%s16813_s6 + $0x3b4] sm:$0xf0] }
 0xb76   : > { %v6760_v15 = vpop.f32.mrf.mxu0 }
 0xb77   : > { %v6761_v16 = vadd.f32 %v6760_v15, %v15520_v51 }
 0xb79   : > { %6799 = vmatmul.bf16.gmra.mxu0 %v9659_v3  ;;  %v9707_v3 = vor.u32 %v10675_v63, %v9706_v39 }
 0xb7b   : > { %v6849_v40 = vpop.f32.mrf.mxu1 }
 0xb7c   : > { %v6850_v29 = vadd.f32 %v6849_v40, %v6761_v16 }
 0xb7d   : > { %6888 = vmatmul.bf16.gmra.mxu1 %v9663_v59 }
 0xb7e   : > { %v6762_v45 = vpop.f32.mrf.mxu0  ;;  %v6929_v12 = vmax.f32 %v6850_v29, 0.0 }
 0xb7f   : > { %v6763_v1 = vadd.f32 %v6762_v45, %v15535_v33  ;;  %v9708_v33 = vld [vmem:[%s16813_s6 + $0x3b8] sm:$0xf0] }
 0xb80   : > { %v6961_v51 = vpack.c.bf16 %v6929_v12, %v6929_v12  ;;  %v9711_v29 = vor.u32 %v10669_v37, %v9708_v33 }
 0xb82   : > { %v7025_v59 = vunpack.c.l.b16 %v6961_v51 }
 0xb83   : > { %v6851_v27 = vpop.f32.mrf.mxu1 }
 0xb84   : > { %v6852_v17 = vadd.f32 %v6851_v27, %v6763_v1 }
 0xb86   : > { %v6930_v0 = vmax.f32 %v6852_v17, 0.0  ;;  %v6765_v15 = vpop.f32.mrf.mxu0 }
 0xb87   : > { %v6766_v16 = vadd.f32 %v6765_v15, %v15550_v36  ;;  %v10687_v36 = vld [vmem:[%s16813_s6 + $0x414] sm:$0xf0] }
 0xb88   : > { %v6962_v11 = vpack.c.bf16 %v6930_v0, %v6930_v0  ;;  %v9754_v0 = vld [vmem:[%s16813_s6 + $0x3e8] sm:$0xf] }
 0xb89   : > { %6804 = vmatmul.bf16.gmra.mxu0 %v9707_v3  ;;  %v9755_v37 = vor.u32 %v10687_v36, %v9754_v0 }
 0xb8a   : > { %v7026_v40 = vunpack.c.l.b16 %v6962_v11  ;;  %v10681_v11 = vld [vmem:[%s16813_s6 + $0x3ec] sm:$0xf] }
 0xb8b   : > { %v6854_v45 = vpop.f32.mrf.mxu1 }
 0xb8c   : > { %v15929_v1 = vpack.c.b16 %v7026_v40, %v7025_v59  ;;  %v6855_v12 = vadd.f32 %v6854_v45, %v6766_v16 }
 0xb8d   : > { %6893 = vmatmul.bf16.gmra.mxu1 %v9711_v29 }
 0xb8e   : > { %v6767_v27 = vpop.f32.mrf.mxu0  ;;  %v6931_v63 = vmax.f32 %v6855_v12, 0.0 }
 0xb8f   : > { %v6768_v39 = vadd.f32 %v6767_v27, %v15565_v50  ;;  %v9756_v50 = vld [vmem:[%s16813_s6 + $0x418] sm:$0xf0] }
 0xb90   : > { %v6963_v3 = vpack.c.bf16 %v6931_v63, %v6931_v63  ;;  %v9759_v45 = vor.u32 %v10681_v11, %v9756_v50  ;;  %v10693_v50 = vld [vmem:[%s16813_s6 + $0x44c] sm:$0xf] }
 0xb92   : > { %v7027_v40 = vunpack.c.l.b16 %v6963_v3 }
 0xb93   : > { %v6856_v17 = vpop.f32.mrf.mxu1 }
 0xb94   : > { %v6857_v51 = vadd.f32 %v6856_v17, %v6768_v39 }
 0xb96   : > { %v6932_v15 = vmax.f32 %v6857_v51, 0.0  ;;  %v6770_v33 = vpop.f32.mrf.mxu0  ;;  %v9802_v51 = vld [vmem:[%s16813_s6 + $0x448] sm:$0xf] }
 0xb97   : > { %v6771_v59 = vadd.f32 %v6770_v33, %v15580_v35  ;;  %v10699_v35 = vld [vmem:[%s16813_s6 + $0x474] sm:$0xf0] }
 0xb98   : > { %v6964_v16 = vpack.c.bf16 %v6932_v15, %v6932_v15  ;;  %v9803_v33 = vor.u32 %v10699_v35, %v9802_v51  ;;  %v9850_v35 = vld [vmem:[%s16813_s6 + $0x4a8] sm:$0xf] }
 0xb99   : > { %6809 = vmatmul.bf16.gmra.mxu0 %v9755_v37 }
 0xb9a   : > { %v7028_v29 = vunpack.c.l.b16 %v6964_v16 }
 0xb9b   : > { %v6859_v12 = vpop.f32.mrf.mxu1 }
 0xb9c   : > { %v15945_v27 = vpack.c.b16 %v7028_v29, %v7027_v40  ;;  %v6860_v39 = vadd.f32 %v6859_v12, %v6771_v59 }
 0xb9d   : > { %6898 = vmatmul.bf16.gmra.mxu1 %v9759_v45 }
 0xb9e   : > { %v6772_v63 = vpop.f32.mrf.mxu0  ;;  %v6933_v0 = vmax.f32 %v6860_v39, 0.0 }
 0xb9f   : > { %v6773_v17 = vadd.f32 %v6772_v63, %v15599_v58  ;;  %v9804_v58 = vld [vmem:[%s16813_s6 + $0x478] sm:$0xf0] }
 0xba0   : > { %v6965_v15 = vpack.c.bf16 %v6933_v0, %v6933_v0  ;;  %v9807_v45 = vor.u32 %v10693_v50, %v9804_v58  ;;  %v9852_v58 = vld [vmem:[%s16813_s6 + $0x4d8] sm:$0xf0] }
 0xba2   : > { %v7029_v40 = vunpack.c.l.b16 %v6965_v15  ;;  %v6603_v15 = vadd.f32 %v15588_v47, %v15653_v6  ;;  %v6605_v6 = vadd.f32 %v15607_v34, %v15666_v19  ;;  %v6608_v19 = vadd.f32 %v15626_v56, %v15689_v43 }
 0xba3   : > { %v6861_v36 = vpop.f32.mrf.mxu1  ;;  %v6610_v43 = vadd.f32 %v15645_v49, %v15702_v10  ;;  %v10735_v49 = vld [vmem:[%s16813_s6 + $0x594] sm:$0xf0] }
 0xba4   : > { %v6862_v3 = vadd.f32 %v6861_v36, %v6773_v17 }
 0xba6   : > { %v6934_v37 = vmax.f32 %v6862_v3, 0.0  ;;  %v6775_v11 = vpop.f32.mrf.mxu0 }
 0xba7   : > { %v6776_v59 = vadd.f32 %v6775_v11, %v15618_v60  ;;  %v10711_v60 = vld [vmem:[%s16813_s6 + $0x4d4] sm:$0xf0] }
 0xba8   : > { %v6966_v16 = vpack.c.bf16 %v6934_v37, %v6934_v37  ;;  %v9851_v11 = vor.u32 %v10711_v60, %v9850_v35 }
 0xba9   : > { %6814 = vmatmul.bf16.gmra.mxu0 %v9803_v33 }
 0xbaa   : > { %v7030_v29 = vunpack.c.l.b16 %v6966_v16 }
 0xbab   : > { %v6864_v12 = vpop.f32.mrf.mxu1 }
 0xbac   : > { %v15961_v39 = vpack.c.b16 %v7030_v29, %v7029_v40  ;;  %v6865_v63 = vadd.f32 %v6864_v12, %v6776_v59  ;;  %v6692_v59 = vadd.f32 %v15590_v61, %v6603_v15  ;;  %v9898_v61 = vld [vmem:[%s16813_s6 + $0x508] sm:$0xf] }
 0xbad   : > { %6903 = vmatmul.bf16.gmra.mxu1 %v9807_v45 }
 0xbae   : > { %v6777_v17 = vpop.f32.mrf.mxu0  ;;  %v6935_v36 = vmax.f32 %v6865_v63, 0.0 }
 0xbaf   : > { %v6778_v0 = vadd.f32 %v6777_v17, %v15637_v18  ;;  %v10705_v18 = vld [vmem:[%s16813_s6 + $0x4ac] sm:$0xf] }
 0xbb0   : > { %v6967_v37 = vpack.c.bf16 %v6935_v36, %v6935_v36  ;;  %v9855_v45 = vor.u32 %v10705_v18, %v9852_v58  ;;  %v6694_v36 = vadd.f32 %v15615_v14, %v6605_v6  ;;  %v10717_v14 = vld [vmem:[%s16813_s6 + $0x50c] sm:$0xf]  ;;  %v6697_v58 = vadd.f32 %v15628_v52, %v6608_v19 }
 0xbb2   : > { %v7031_v40 = vunpack.c.l.b16 %v6967_v37 }
 0xbb3   : > { %v6866_v51 = vpop.f32.mrf.mxu1 }
 0xbb4   : > { %v6867_v3 = vadd.f32 %v6866_v51, %v6778_v0 }
 0xbb6   : > { %v6936_v33 = vmax.f32 %v6867_v3, 0.0  ;;  %v6780_v50 = vpop.f32.mrf.mxu0  ;;  %v10723_v3 = vld [vmem:[%s16813_s6 + $0x534] sm:$0xf0] }
 0xbb7   : > { %v6781_v63 = vadd.f32 %v6780_v50, %v6692_v59  ;;  %v9900_v50 = vld [vmem:[%s16813_s6 + $0x538] sm:$0xf0] }
 0xbb8   : > { %v6968_v16 = vpack.c.bf16 %v6936_v33, %v6936_v33  ;;  %v9899_v33 = vor.u32 %v10723_v3, %v9898_v61 }
 0xbb9   : > { %6819 = vmatmul.bf16.gmra.mxu0 %v9851_v11 }
 0xbba   : > { %v7032_v29 = vunpack.c.l.b16 %v6968_v16 }
 0xbbb   : > { %v6869_v47 = vpop.f32.mrf.mxu1 }
 0xbbc   : > { %v15981_v12 = vpack.c.b16 %v7032_v29, %v7031_v40  ;;  %v6870_v17 = vadd.f32 %v6869_v47, %v6781_v63  ;;  %v9903_v40 = vor.u32 %v10717_v14, %v9900_v50  ;;  %v6699_v63 = vadd.f32 %v15655_v8, %v6610_v43  ;;  %v10729_v8 = vld [vmem:[%s16813_s6 + $0x56c] sm:$0xf] }
 0xbbd   : > { %6908 = vmatmul.bf16.gmra.mxu1 %v9855_v45  ;;  %v6618_v43 = vadd.f32 %v15710_v53, %v15737_v20  ;;  %v17304_v20 = vld [vmem:[#allocation119_spill] sm:$0xff] }
 0xbbe   : > { %v6782_v0 = vpop.f32.mrf.mxu0  ;;  %v6937_v51 = vmax.f32 %v6870_v17, 0.0 }
 0xbbf   : > { %v6783_v35 = vadd.f32 %v6782_v0, %v6694_v36  ;;  %v9946_v36 = vld [vmem:[%s16813_s6 + $0x568] sm:$0xf] }
 0xbc0   : > { %v6969_v15 = vpack.c.bf16 %v6937_v51, %v6937_v51  ;;  %v6613_v51 = vadd.f32 %v15664_v13, %v15715_v22  ;;  %v9947_v61 = vor.u32 %v10735_v49, %v9946_v36  ;;  %v6615_v22 = vadd.f32 %v15691_v25, %v15728_v44  ;;  %v10747_v25 = vld [vmem:[%s16813_s6 + $0x5f4] sm:$0xf0] }
 0xbc2   : > { %v7033_v16 = vunpack.c.l.b16 %v6969_v15  ;;  %v6702_v15 = vadd.f32 %v15668_v38, %v6613_v51  ;;  %v6620_v51 = vadd.f32 %v17304_v20, %v15746_v5 }
 0xbc3   : > { %v6871_v60 = vpop.f32.mrf.mxu1 }
 0xbc4   : > { %v6872_v34 = vadd.f32 %v6871_v60, %v6783_v35 }
 0xbc6   : > { %v6938_v37 = vmax.f32 %v6872_v34, 0.0  ;;  %v6785_v11 = vpop.f32.mrf.mxu0  ;;  %v9948_v34 = vld [vmem:[%s16813_s6 + $0x598] sm:$0xf0] }
 0xbc7   : > { %v6786_v45 = vadd.f32 %v6785_v11, %v6697_v58  ;;  %v9951_v11 = vor.u32 %v10729_v8, %v9948_v34  ;;  %v17305_v8 = vld [vmem:[#allocation171_spill] sm:$0xff] }
 0xbc8   : > { %v6970_v18 = vpack.c.bf16 %v6938_v37, %v6938_v37  ;;  %v6709_v34 = vadd.f32 %v17305_v8, %v6620_v51  ;;  %v17308_v51 = vld [vmem:[#allocation107_spill] sm:$0xff] }
 0xbc9   : > { %6824 = vmatmul.bf16.gmra.mxu0 %v9899_v33 }
 0xbca   : > { %v7034_v59 = vunpack.c.l.b16 %v6970_v18 }
 0xbcb   : > { %v6874_v56 = vpop.f32.mrf.mxu1 }
 0xbcc   : > { %v16001_v29 = vpack.c.b16 %v7034_v59, %v7033_v16  ;;  %v6875_v47 = vadd.f32 %v6874_v56, %v6786_v45  ;;  %v6704_v16 = vadd.f32 %v15693_v21, %v6615_v22  ;;  %v9994_v56 = vld [vmem:[%s16813_s6 + $0x5c8] sm:$0xf]  ;;  %v10741_v21 = vld [vmem:[%s16813_s6 + $0x5cc] sm:$0xf] }
 0xbcd   : > { %6913 = vmatmul.bf16.gmra.mxu1 %v9903_v40 }
 0xbce   : > { %7081 = vrot.lane.b32.xlu2 %v16001_v29, %s10910_s30  ;;  %v6787_v6 = vpop.f32.mrf.mxu0  ;;  %v6939_v52 = vmax.f32 %v6875_v47, 0.0 }
 0xbcf   : > { %v6788_v17 = vadd.f32 %v6787_v6, %v6699_v63  ;;  %v9995_v6 = vor.u32 %v10747_v25, %v9994_v56  ;;  %v17307_v25 = vld [vmem:[#allocation174_spill] sm:$0xff] }
 0xbd0   : > { %v6971_v35 = vpack.c.bf16 %v6939_v52, %v6939_v52  ;;  %v9996_v52 = vld [vmem:[%s16813_s6 + $0x5f8] sm:$0xf0] }
 0xbd2   : > { %v7035_v37 = vunpack.c.l.b16 %v6971_v35 }
 0xbd3   : > { %v6876_v0 = vpop.f32.mrf.mxu1 }
 0xbd4   : > { %v6877_v10 = vadd.f32 %v6876_v0, %v6788_v17  ;;  %v6707_v0 = vadd.f32 %v15713_v62, %v6618_v43 }
 0xbd6   : > { %v6940_v60 = vmax.f32 %v6877_v10, 0.0  ;;  %v6790_v3 = vpop.f32.mrf.mxu0  ;;  %v9999_v10 = vor.u32 %v10741_v21, %v9996_v52 }
 0xbd7   : > { %v6791_v50 = vadd.f32 %v6790_v3, %v6702_v15 }
 0xbd8   : > { %v6972_v19 = vpack.c.bf16 %v6940_v60, %v6940_v60 }
 0xbd9   : > { %6829 = vmatmul.bf16.gmra.mxu0 %v9947_v61 }
 0xbda   : > { %v7036_v33 = vunpack.c.l.b16 %v6972_v19 }
 0xbdb   : > { %v6879_v13 = vpop.f32.mrf.mxu1 }
 0xbdc   : > { %v16023_v14 = vpack.c.b16 %v7036_v33, %v7035_v37  ;;  %v6880_v18 = vadd.f32 %v6879_v13, %v6791_v50 }
 0xbdd   : > { %6918 = vmatmul.bf16.gmra.mxu1 %v9951_v11 }
 0xbde   : > { %7083 = vrot.lane.b32.xlu0 %v16023_v14, %s10910_s30  ;;  %v6792_v58 = vpop.f32.mrf.mxu0  ;;  %v6941_v38 = vmax.f32 %v6880_v18, 0.0 }
 0xbdf   : > { %v6793_v59 = vadd.f32 %v6792_v58, %v6704_v16  ;;  %v17306_v16 = vld [vmem:[#allocation121_spill] sm:$0xff] }
 0xbe0   : > { %v6973_v45 = vpack.c.bf16 %v6941_v38, %v6941_v38  ;;  %v6625_v38 = vadd.f32 %v17306_v16, %v15768_v48 }
 0xbe2   : > { %v7037_v36 = vunpack.c.l.b16 %v6973_v45 }
 0xbe3   : > { %v6881_v40 = vpop.f32.mrf.mxu1 }
 0xbe4   : > { %v6882_v44 = vadd.f32 %v6881_v40, %v6793_v59 }
 0xbe6   : > { %v6942_v47 = vmax.f32 %v6882_v44, 0.0  ;;  %v6795_v63 = vpop.f32.mrf.mxu0  ;;  %v6714_v44 = vadd.f32 %v17307_v25, %v6625_v38 }
 0xbe7   : > { %v6796_v60 = vadd.f32 %v6795_v63, %v6707_v0 }
 0xbe8   : > { %v6974_v17 = vpack.c.bf16 %v6942_v47, %v6942_v47 }
 0xbe9   : > { %6834 = vmatmul.bf16.gmra.mxu0 %v9995_v6 }
 0xbea   : > { %v7038_v49 = vunpack.c.l.b16 %v6974_v17 }
 0xbeb   : > { %v6884_v53 = vpop.f32.mrf.mxu1 }
 0xbec   : > { %v16045_v35 = vpack.c.b16 %v7038_v49, %v7037_v36  ;;  %v6885_v61 = vadd.f32 %v6884_v53, %v6796_v60  ;;  %v6630_v49 = vadd.f32 %v15777_v32, %v15790_v23  ;;  %v17309_v32 = vld [vmem:[#allocation61_spill] sm:$0xff] }
 0xbed   : > { %6923 = vmatmul.bf16.gmra.mxu1 %v9999_v10  ;;  %v6635_v23 = vadd.f32 %v17309_v32, %v15812_v31  ;;  %v6640_v31 = vadd.f32 %v15824_v4, %v15834_v2 }
 0xbee   : > { %7085 = vrot.lane.b32.xlu1 %v16045_v35, %s10910_s30  ;;  %v6797_v3 = vpop.f32.mrf.mxu0  ;;  %v6943_v62 = vmax.f32 %v6885_v61, 0.0  ;;  %v6719_v60 = vadd.f32 %v17308_v51, %v6630_v49 }
 0xbef   : > { %v6798_v19 = vadd.f32 %v6797_v3, %v6709_v34 }
 0xbf0   : > { %v6975_v33 = vpack.c.bf16 %v6943_v62, %v6943_v62 }
 0xbf2   : > { %v7039_v50 = vunpack.c.l.b16 %v6975_v33 }
 0xbf3   : > { %v6886_v15 = vpop.f32.mrf.mxu1 }
 0xbf4   : > { %v6887_v37 = vadd.f32 %v6886_v15, %v6798_v19 }
 0xbf6   : > { %v6944_v11 = vmax.f32 %v6887_v37, 0.0  ;;  %v6800_v13 = vpop.f32.mrf.mxu0 }
 0xbf7   : > { %v6801_v5 = vadd.f32 %v6800_v13, %v15760_v46 }
 0xbf8   : > { %v6976_v22 = vpack.c.bf16 %v6944_v11, %v6944_v11 }
 0xbfa   : > { %v7040_v18 = vunpack.c.l.b16 %v6976_v22 }
 0xbfb   : > { %v6889_v58 = vpop.f32.mrf.mxu1 }
 0xbfc   : > { %v16053_v59 = vpack.c.b16 %v7040_v18, %v7039_v50  ;;  %v6890_v40 = vadd.f32 %v6889_v58, %v6801_v5  ;;  %v17310_v18 = vld [vmem:[#allocation118_spill] sm:$0xff] }
 0xbfd   : > { %v6724_v58 = vadd.f32 %v17310_v18, %v6635_v23 }
 0xbfe   : > { %7087 = vrot.lane.b32.xlu2 %v16053_v59, %s10910_s30  ;;  %v6802_v56 = vpop.f32.mrf.mxu0  ;;  %v6945_v43 = vmax.f32 %v6890_v40, 0.0 }
 0xbff   : > { %v6803_v45 = vadd.f32 %v6802_v56, %v6714_v44 }
 0xc00   : > { %v6977_v46 = vpack.c.bf16 %v6945_v43, %v6945_v43 }
 0xc02   : > { %v7041_v48 = vunpack.c.l.b16 %v6977_v46 }
 0xc03   : > { %v6891_v47 = vpop.f32.mrf.mxu1 }
 0xc04   : > { %v6892_v6 = vadd.f32 %v6891_v47, %v6803_v45 }
 0xc06   : > { %v6946_v63 = vmax.f32 %v6892_v6, 0.0  ;;  %v6805_v21 = vpop.f32.mrf.mxu0 }
 0xc07   : > { %v6806_v17 = vadd.f32 %v6805_v21, %v15782_v9 }
 0xc08   : > { %v6978_v52 = vpack.c.bf16 %v6946_v63, %v6946_v63 }
 0xc0a   : > { %v7042_v0 = vunpack.c.l.b16 %v6978_v52  ;;  %v6644_v52 = vpop.f32.mrf.mxu2 }
 0xc0b   : > { %v6894_v36 = vpop.f32.mrf.mxu1 }
 0xc0c   : > { %v16061_v10 = vpack.c.b16 %v7042_v0, %v7041_v48  ;;  %v6895_v53 = vadd.f32 %v6894_v36, %v6806_v17  ;;  %v17311_v48 = vld [vmem:[#allocation160_spill] sm:$0xff]  ;;  %v6733_v36 = vpop.f32.mrf.mxu3 }
 0xc0d   : > { %v6729_v0 = vadd.f32 %v17311_v48, %v6640_v31 }
 0xc0e   : > { %v6807_v20 = vpop.f32.mrf.mxu0  ;;  %v6947_v61 = vmax.f32 %v6895_v53, 0.0 }
 0xc0f   : > { %v6808_v3 = vadd.f32 %v6807_v20, %v6719_v60 }
 0xc10   : > { %v6979_v62 = vpack.c.bf16 %v6947_v61, %v6947_v61 }
 0xc12   : > { %v7043_v33 = vunpack.c.l.b16 %v6979_v62  ;;  %v6647_v61 = vpop.f32.mrf.mxu2 }
 0xc13   : > { %v6896_v8 = vpop.f32.mrf.mxu1 }
 0xc14   : > { %v6897_v34 = vadd.f32 %v6896_v8, %v6808_v3  ;;  %v6736_v62 = vpop.f32.mrf.mxu3 }
 0xc16   : > { %v6948_v19 = vmax.f32 %v6897_v34, 0.0  ;;  %v6810_v15 = vpop.f32.mrf.mxu0 }
 0xc17   : > { %v6811_v37 = vadd.f32 %v6810_v15, %v15804_v24  ;;  %v6645_v15 = vadd.f32 %v6644_v52, %v15852_v41 }
 0xc18   : > { %v6980_v9 = vpack.c.bf16 %v6948_v19, %v6948_v19 }
 0xc1a   : > { %v7044_v11 = vunpack.c.l.b16 %v6980_v9 }
 0xc1b   : > { %v6899_v13 = vpop.f32.mrf.mxu1 }
 0xc1c   : > { %v16067_v22 = vpack.c.b16 %v7044_v11, %v7043_v33  ;;  %v6900_v5 = vadd.f32 %v6899_v13, %v6811_v37  ;;  %v6734_v11 = vadd.f32 %v6733_v36, %v6645_v15  ;;  %v6649_v13 = vpop.f32.mrf.mxu2  ;;  %v6738_v18 = vpop.f32.mrf.mxu3 }
 0xc1e   : > { %v6812_v50 = vpop.f32.mrf.mxu0  ;;  %v6949_v16 = vmax.f32 %v6900_v5, 0.0 }
 0xc1f   : > { %v6813_v38 = vadd.f32 %v6812_v50, %v6724_v58  ;;  %v6648_v58 = vadd.f32 %v6647_v61, %v15861_v42 }
 0xc20   : > { %v6981_v25 = vpack.c.bf16 %v6949_v16, %v6949_v16 }
 0xc22   : > { %v7045_v47 = vunpack.c.l.b16 %v6981_v25 }
 0xc23   : > { %v6901_v40 = vpop.f32.mrf.mxu1 }
 0xc24   : > { %v6902_v56 = vadd.f32 %v6901_v40, %v6813_v38 }
 0xc26   : > { %v6950_v44 = vmax.f32 %v6902_v56, 0.0  ;;  %v6815_v43 = vpop.f32.mrf.mxu0  ;;  %v6737_v56 = vadd.f32 %v6736_v62, %v6648_v58 }
 0xc27   : > { %v6816_v45 = vadd.f32 %v6815_v43, %v15822_v30 }
 0xc28   : > { %v6982_v24 = vpack.c.bf16 %v6950_v44, %v6950_v44  ;;  %v6652_v44 = vpop.f32.mrf.mxu2  ;;  %v7082_v52 = vpop.permute.xlu2 %7081 }
 0xc2a   : > { %v7046_v6 = vunpack.c.l.b16 %v6982_v24  ;;  %v6650_v24 = vadd.f32 %v6649_v13, %v15870_v7 }
 0xc2b   : > { %v6904_v46 = vpop.f32.mrf.mxu1 }
 0xc2c   : > { %v16073_v63 = vpack.c.b16 %v7046_v6, %v7045_v47  ;;  %v6905_v21 = vadd.f32 %v6904_v46, %v6816_v45  ;;  %v6741_v46 = vpop.f32.mrf.mxu3 }
 0xc2e   : > { %v6817_v17 = vpop.f32.mrf.mxu0  ;;  %v6951_v49 = vmax.f32 %v6905_v21, 0.0  ;;  %v6739_v21 = vadd.f32 %v6738_v18, %v6650_v24 }
 0xc2f   : > { %v6818_v53 = vadd.f32 %v6817_v17, %v6729_v0 }
 0xc30   : > { %v6983_v60 = vpack.c.bf16 %v6951_v49, %v6951_v49  ;;  %v6654_v36 = vpop.f32.mrf.mxu2  ;;  %v6653_v49 = vadd.f32 %v6652_v44, %v15879_v28 }
 0xc32   : > { %v7047_v4 = vunpack.c.l.b16 %v6983_v60 }
 0xc33   : > { %v6906_v20 = vpop.f32.mrf.mxu1 }
 0xc34   : > { %v6907_v51 = vadd.f32 %v6906_v20, %v6818_v53 }
 0xc36   : > { %v6952_v30 = vmax.f32 %v6907_v51, 0.0  ;;  %v6820_v3 = vpop.f32.mrf.mxu0 }
 0xc37   : > { %v6821_v34 = vadd.f32 %v6820_v3, %v15844_v55  ;;  %v6742_v3 = vadd.f32 %v6741_v46, %v6653_v49 }
 0xc38   : > { %v6984_v8 = vpack.c.bf16 %v6952_v30, %v6952_v30  ;;  %v6743_v30 = vpop.f32.mrf.mxu3  ;;  %v6657_v28 = vpop.f32.mrf.mxu2 }
 0xc39   : > { %v6658_v18 = vadd.f32 %v6657_v28, %v15897_v26 }
 0xc3a   : > { %v7048_v2 = vunpack.c.l.b16 %v6984_v8 }
 0xc3b   : > { %v6909_v19 = vpop.f32.mrf.mxu1 }
 0xc3c   : > { %v16078_v9 = vpack.c.b16 %v7048_v2, %v7047_v4  ;;  %v6910_v37 = vadd.f32 %v6909_v19, %v6821_v34  ;;  %v6655_v2 = vadd.f32 %v6654_v36, %v15888_v57 }
 0xc3e   : > { %v6822_v33 = vpop.f32.mrf.mxu0  ;;  %v6953_v32 = vmax.f32 %v6910_v37, 0.0 }
 0xc3f   : > { %v6823_v23 = vadd.f32 %v6822_v33, %v6734_v11  ;;  %v6744_v33 = vadd.f32 %v6743_v30, %v6655_v2  ;;  %v10767_v2 = vld [vmem:[%s16815_s8 + $0x94] sm:$0xf0] }
 0xc40   : > { %v6985_v55 = vpack.c.bf16 %v6953_v32, %v6953_v32 }
 0xc42   : > { %v7049_v25 = vunpack.c.l.b16 %v6985_v55 }
 0xc43   : > { %v6911_v5 = vpop.f32.mrf.mxu1 }
 0xc44   : > { %v6912_v50 = vadd.f32 %v6911_v5, %v6823_v23  ;;  %v6746_v23 = vpop.f32.mrf.mxu3 }
 0xc46   : > { %v6954_v16 = vmax.f32 %v6912_v50, 0.0  ;;  %v6825_v38 = vpop.f32.mrf.mxu0 }
 0xc47   : > { %v6826_v47 = vadd.f32 %v6825_v38, %v6737_v56  ;;  %v6747_v56 = vadd.f32 %v6746_v23, %v6658_v18 }
 0xc48   : > { %v6986_v40 = vpack.c.bf16 %v6954_v16, %v6954_v16 }
 0xc4a   : > { %v7050_v41 = vunpack.c.l.b16 %v6986_v40  ;;  %v6659_v40 = vpop.f32.mrf.mxu2 }
 0xc4b   : > { %v6914_v43 = vpop.f32.mrf.mxu1 }
 0xc4c   : > { %v16082_v45 = vpack.c.b16 %v7050_v41, %v7049_v25  ;;  %v6915_v6 = vadd.f32 %v6914_v43, %v6826_v47  ;;  %v6660_v43 = vadd.f32 %v6659_v40, %v15906_v54  ;;  %v6748_v26 = vpop.f32.mrf.mxu3  ;;  %v17313_v40 = vld [vmem:[#allocation33_spill] sm:$0xff] }
 0xc4e   : > { %v6827_v31 = vpop.f32.mrf.mxu0  ;;  %v6955_v42 = vmax.f32 %v6915_v6, 0.0 }
 0xc4f   : > { %v6828_v17 = vadd.f32 %v6827_v31, %v6739_v21  ;;  %v6749_v31 = vadd.f32 %v6748_v26, %v6660_v43  ;;  %v17314_v43 = vld [vmem:[#allocation30_spill] sm:$0xff] }
 0xc50   : > { %v6987_v53 = vpack.c.bf16 %v6955_v42, %v6955_v42  ;;  %v7084_v50 = vpop.permute.xlu0 %7083 }
 0xc52   : > { %v7051_v8 = vunpack.c.l.b16 %v6987_v53 }
 0xc53   : > { %v6916_v48 = vpop.f32.mrf.mxu1 }
 0xc54   : > { %v6917_v0 = vadd.f32 %v6916_v48, %v6828_v17 }
 0xc56   : > { %v6956_v20 = vmax.f32 %v6917_v0, 0.0  ;;  %v6830_v51 = vpop.f32.mrf.mxu0 }
 0xc57   : > { %v6831_v19 = vadd.f32 %v6830_v51, %v6742_v3  ;;  %v7300_v51 = vld [vmem:[%s16816_s9 + $0x18] sm:$0xff]  ;;  %v7302_v3 = vld [vmem:[%s16816_s9 + $0x28] sm:$0xff] }
 0xc58   : > { %v6988_v60 = vpack.c.bf16 %v6956_v20, %v6956_v20  ;;  %v7088_v7 = vpop.permute.xlu2 %7087  ;;  %v7297_v20 = vld [vmem:[%s16816_s9] sm:$0xff] }
 0xc59   : > { %10257 = vmatpush.bf16.msk.msra.mxu2 %vm11131_vm10, %v7088_v7  ;;  %v7299_v7 = vld [vmem:[%s16816_s9 + $0x10] sm:$0xff] }
 0xc5a   : > { %v7052_v34 = vunpack.c.l.b16 %v6988_v60  ;;  %v7304_v60 = vld [vmem:[%s16816_s9 + $0x38] sm:$0xff] }
 0xc5b   : > { %v6919_v4 = vpop.f32.mrf.mxu1 }
 0xc5c   : > { %v16088_v62 = vpack.c.b16 %v7052_v34, %v7051_v8  ;;  %v6920_v15 = vadd.f32 %v6919_v4, %v6831_v19  ;;  %v10074_v8 = vld [vmem:[%s16815_s8 + $0x8] sm:$0xf] }
 0xc5d   : > { %v10122_v4 = vld [vmem:[%s16815_s8 + $0x68] sm:$0xf] }
 0xc5e   : > { %7099 = vrot.lane.b32.xlu1 %v16088_v62, %s10910_s30  ;;  %v6832_v37 = vpop.f32.mrf.mxu0  ;;  %v6957_v13 = vmax.f32 %v6920_v15, 0.0  ;;  %v10123_v19 = vor.u32 %v10767_v2, %v10122_v4  ;;  %v17322_v4 = vld [vmem:[#allocation14_spill] sm:$0xff]  ;;  %v17323_v2 = vld [vmem:[#allocation24_spill] sm:$0xff] }
 0xc5f   : > { %v6833_v32 = vadd.f32 %v6832_v37, %v6744_v33  ;;  %v10170_v33 = vld [vmem:[%s16815_s8 + $0xc8] sm:$0xf] }
 0xc60   : > { %v7086_v11 = vpop.permute.xlu1 %7085  ;;  %v6989_v58 = vpack.c.bf16 %v6957_v13, %v6957_v13 }
 0xc61   : > { %10259 = vmatpush.bf16.msk.msra.mxu2 %vm11131_vm10, %v7086_v11  ;;  %v10779_v11 = vld [vmem:[%s16815_s8 + $0xf4] sm:$0xf0] }
 0xc62   : > { %v7053_v25 = vunpack.c.l.b16 %v6989_v58 }
 0xc63   : > { %v6921_v5 = vpop.f32.mrf.mxu1 }
 0xc64   : > { %v6922_v57 = vadd.f32 %v6921_v5, %v6833_v32  ;;  %v10171_v32 = vor.u32 %v10779_v11, %v10170_v33  ;;  %v17328_v33 = vld [vmem:[#allocation18_spill] sm:$0xff]  ;;  %v17329_v11 = vld [vmem:[#allocation44_spill] sm:$0xff] }
 0xc65   : > { %10261 = vmatpush.bf16.msk.msra.mxu2 %vm11131_vm10, %v7084_v50  ;;  %v10066_v50 = vld [vmem:[%s16815_s8] sm:$0xf] }
 0xc66   : > { %v6958_v55 = vmax.f32 %v6922_v57, 0.0  ;;  %7079 = vrot.lane.b32.xlu1 %v15981_v12, %s10910_s30  ;;  %v6835_v16 = vpop.f32.mrf.mxu0  ;;  %v10754_v57 = vld [vmem:[%s16815_s8 + $0x2c] sm:$0xf0] }
 0xc67   : > { %v6836_v47 = vadd.f32 %v6835_v16, %v6747_v56  ;;  %v10748_v16 = vld [vmem:[%s16815_s8 + $0x4] sm:$0xf] }
 0xc68   : > { %v6990_v38 = vpack.c.bf16 %v6958_v55, %v6958_v55  ;;  %v10067_v55 = vor.u32 %v10754_v57, %v10066_v50  ;;  %v17332_v50 = vld [vmem:[#allocation45_spill] sm:$0xff] }
 0xc69   : > { %10263 = vmatpush.bf16.msk.msra.mxu2 %vm11131_vm10, %v7082_v52 }
 0xc6a   : > { %v7054_v41 = vunpack.c.l.b16 %v6990_v38  ;;  %v10068_v38 = vld [vmem:[%s16815_s8 + $0x30] sm:$0xf0] }
 0xc6b   : > { %v6924_v44 = vpop.f32.mrf.mxu1 }
 0xc6c   : > { %v7071_v24 = vpack.c.b16 %v7054_v41, %v7053_v25  ;;  %v6925_v6 = vadd.f32 %v6924_v44, %v6836_v47  ;;  %v10071_v25 = vor.u32 %v10748_v16, %v10068_v38  ;;  %v10750_v41 = vld [vmem:[%s16815_s8 + $0x14] sm:$0xf]  ;;  %v10084_v44 = vld [vmem:[%s16815_s8 + $0x40] sm:$0xf0] }
 0xc6d   : > { %v17334_v16 = vld [vmem:[#allocation23_spill] sm:$0xff] }
 0xc6e   : > { %7101 = vrot.lane.b32.xlu2 %v7071_v24, %s10910_s30  ;;  %7093 = vrot.lane.b32.xlu1 %v16073_v63, %s10910_s30  ;;  %v6837_v46 = vpop.f32.mrf.mxu0  ;;  %v6959_v21 = vmax.f32 %v6925_v6, 0.0  ;;  %v17315_v6 = vld [vmem:[#allocation28_spill] sm:$0xff]  ;;  %v17335_v38 = vld [vmem:[#allocation47_spill] sm:$0xff] }
 0xc6f   : > { %v6838_v42 = vadd.f32 %v6837_v46, %v6749_v31  ;;  %v10114_v31 = vld [vmem:[%s16815_s8 + $0x60] sm:$0xf] }
 0xc70   : > { %v6991_v48 = vpack.c.bf16 %v6959_v21, %v6959_v21 }
 0xc72   : > { %v7055_v36 = vunpack.c.l.b16 %v6991_v48  ;;  %v10116_v48 = vld [vmem:[%s16815_s8 + $0x90] sm:$0xf0] }
 0xc73   : > { %v6926_v52 = vpop.f32.mrf.mxu1 }
 0xc74   : > { %v6927_v17 = vadd.f32 %v6926_v52, %v6838_v42  ;;  %v17316_v42 = vld [vmem:[#allocation36_spill] sm:$0xff] }
 0xc76   : > { %v6960_v0 = vmax.f32 %v6927_v17, 0.0  ;;  %7095 = vrot.lane.b32.xlu2 %v16078_v9, %s10910_s30  ;;  %7073 = vrot.lane.b32.xlu1 %v15929_v1, %s10910_s30  ;;  %v10760_v17 = vld [vmem:[%s16815_s8 + $0x64] sm:$0xf] }
 0xc78   : > { %v6992_v54 = vpack.c.bf16 %v6960_v0, %v6960_v0 }
 0xc7a   : > { %v7056_v49 = vunpack.c.l.b16 %v6992_v54  ;;  %v17317_v54 = vld [vmem:[#allocation31_spill] sm:$0xff] }
 0xc7c   : > { %v7072_v53 = vpack.c.b16 %v7056_v49, %v7055_v36  ;;  %v10119_v36 = vor.u32 %v10760_v17, %v10116_v48  ;;  %v10756_v17 = vld [vmem:[%s16815_s8 + $0x3c] sm:$0xf0] }
 0xc7d   : > { %v17344_v48 = vld [vmem:[#allocation55_spill] sm:$0xff] }
 0xc7e   : > { %7075 = vrot.lane.b32.xlu2 %v15945_v27, %s10910_s30  ;;  %7730 = vmatpush.bf16.msrb.mxu0 %v7072_v53 }
 0xc7f   : > { %7103 = vrot.lane.b32.xlu0 %v7072_v53, %s10910_s30  ;;  %7165 = vrot.lane.b32.xlu1 %v16045_v35, %s10911_s19 }
 0xc82   : > { %7731 = vmatpush.bf16.msrb.mxu0 %v7071_v24 }
 0xc86   : > { %7089 = vrot.lane.b32.xlu2 %v16061_v10, %s10910_s30  ;;  %7732 = vmatpush.bf16.msrb.mxu0 %v16088_v62 }
 0xc87   : > { %7097 = vrot.lane.b32.xlu0 %v16082_v45, %s10910_s30  ;;  %7159 = vrot.lane.b32.xlu1 %v15981_v12, %s10911_s19 }
 0xc8a   : > { %7733 = vmatpush.bf16.msrb.mxu0 %v16082_v45 }
 0xc8e   : > { %7163 = vrot.lane.b32.xlu2 %v16023_v14, %s10911_s19  ;;  %7734 = vmatpush.bf16.msrb.mxu0 %v16078_v9 }
 0xc8f   : > { %7077 = vrot.lane.b32.xlu0 %v15961_v39, %s10910_s30  ;;  %7153 = vrot.lane.b32.xlu1 %v15929_v1, %s10911_s19 }
 0xc92   : > { %7735 = vmatpush.bf16.msrb.mxu0 %v16073_v63 }
 0xc96   : > { %7157 = vrot.lane.b32.xlu2 %v15961_v39, %s10911_s19  ;;  %7736 = vmatpush.bf16.msrb.mxu0 %v16067_v22 }
 0xc97   : > { %7091 = vrot.lane.b32.xlu0 %v16067_v22, %s10910_s30  ;;  %7179 = vrot.lane.b32.xlu1 %v16088_v62, %s10911_s19  ;;  %s8305_s30 = sshll.u32 %s346_s28, 6 }
 0xc98   : > { %s16757_s11 = scalar_lea.vmem [#allocation2], %s8305_s30 }
 0xc9a   : > { %7737 = vmatpush.bf16.msrb.mxu0 %v16061_v10 }
 0xc9e   : > { %7183 = vrot.lane.b32.xlu2 %v7072_v53, %s10911_s19  ;;  %v17318_v53 = vld [vmem:[#allocation32_spill] sm:$0xff] }
 0xc9f   : > { %7167 = vrot.lane.b32.xlu0 %v16053_v59, %s10911_s19  ;;  %7173 = vrot.lane.b32.xlu1 %v16073_v63, %s10911_s19  ;;  %v7298_v63 = vld [vmem:[%s16816_s9 + $0x8] sm:$0xff] }
 0xca6   : > { %7177 = vrot.lane.b32.xlu2 %v16082_v45, %s10911_s19  ;;  %v7303_v45 = vld [vmem:[%s16816_s9 + $0x30] sm:$0xff] }
 0xca7   : > { %7161 = vrot.lane.b32.xlu0 %v16001_v29, %s10911_s19  ;;  %7307 = vperm.xlu1 %10835, %v7297_v20  }
 0xcae   : > { %7171 = vrot.lane.b32.xlu2 %v16067_v22, %s10911_s19  ;;  %v7301_v22 = vld [vmem:[%s16816_s9 + $0x20] sm:$0xff] }
 0xcaf   : > { %7155 = vrot.lane.b32.xlu0 %v15945_v27, %s10911_s19  ;;  %7322 = vperm.xlu1 %10835, %v7300_v51  }
 0xcb6   : > { %7312 = vperm.xlu2 %10833, %v7298_v63   ;;  %v17319_v63 = vld [vmem:[#allocation39_spill] sm:$0xff] }
 0xcb7   : > { %7181 = vrot.lane.b32.xlu0 %v7071_v24, %s10911_s19  ;;  %7337 = vperm.xlu1 %10835, %v7303_v45   ;;  %v10087_v24 = vor.u32 %v10750_v41, %v10084_v44  ;;  %v10162_v45 = vld [vmem:[%s16815_s8 + $0xc0] sm:$0xf]  ;;  %v10132_v41 = vld [vmem:[%s16815_s8 + $0xa0] sm:$0xf0]  ;;  %v17337_v44 = vld [vmem:[#allocation21_spill] sm:$0xff] }
 0xcbe   : > { %7327 = vperm.xlu2 %10833, %v7301_v22  }
 0xcbf   : > { %7175 = vrot.lane.b32.xlu0 %v16078_v9, %s10911_s19 }
 0xcc6   : > { %7342 = vperm.xlu2 %10833, %v7304_v60   ;;  %v17320_v60 = vld [vmem:[#allocation37_spill] sm:$0xff] }
 0xcc7   : > { %7169 = vrot.lane.b32.xlu0 %v16061_v10, %s10911_s19  ;;  %v10755_v10 = vld [vmem:[%s16815_s8 + $0x34] sm:$0xf0] }
 0xcc8   : > { %v10075_v34 = vor.u32 %v10755_v10, %v10074_v8  ;;  %v7102_v62 = vpop.permute.xlu2 %7101  ;;  %v10164_v10 = vld [vmem:[%s16815_s8 + $0xf0] sm:$0xf0] }
 0xcca   : > { %7651 = vmatmul.bf16.vlgmr.msra.gmra.mxu0 %v10075_v34 }
 0xccf   : > { %7317 = vperm.xlu0 %10834, %v7299_v7   ;;  %v10791_v7 = vld [vmem:[%s16815_s8 + $0x154] sm:$0xf0] }
 0xcd0   : > { %v7100_v30 = vpop.permute.xlu1 %7099  ;;  %v7096_v28 = vpop.permute.xlu2 %7095 }
 0xcd7   : > { %7332 = vperm.xlu0 %10834, %v7302_v3   ;;  %v17321_v3 = vld [vmem:[#allocation15_spill] sm:$0xff] }
 0xcd8   : > { %v7080_v9 = vpop.permute.xlu1 %7079  ;;  %v7076_v5 = vpop.permute.xlu2 %7075 }
 0xcd9   : > { %10265 = vmatpush.bf16.msk.msra.mxu2 %vm11131_vm10, %v7080_v9 }
 0xcda   : > { %7656 = vmatmul.bf16.gmra.mxu0 %v10123_v19 }
 0xce0   : > { %v7094_v13 = vpop.permute.xlu1 %7093  ;;  %v7090_v56 = vpop.permute.xlu2 %7089 }
 0xce8   : > { %v7074_v18 = vpop.permute.xlu1 %7073  ;;  %v7164_v52 = vpop.permute.xlu2 %7163 }
 0xce9   : > { %v7201_v0 = vsel %vm556_vm8, %v7164_v52, 0 }
 0xcea   : > { %7661 = vmatmul.bf16.gmra.mxu0 %v10171_v32  ;;  %v10790_v32 = vld [vmem:[%s16815_s8 + $0x14c] sm:$0xf0] }
 0xcf1   : > { %v7104_v15 = vpop.permute.xlu0 %7103  ;;  %v7166_v46 = vpop.permute.xlu1 %7165 }
 0xcf2   : > { %10273 = vmatpush.bf16.msk.msra.mxu3 %vm11131_vm10, %v7104_v15  ;;  %v7204_v21 = vsel %vm556_vm8, %v7166_v46, 0  ;;  %v17325_v15 = vld [vmem:[#allocation22_spill] sm:$0xff]  ;;  %v10749_v46 = vld [vmem:[%s16815_s8 + $0xc] sm:$0xf] }
 0xcf6   : > { %10275 = vmatpush.bf16.msk.msra.mxu3 %vm11131_vm10, %v7102_v62 }
 0xcf9   : > { %v7098_v37 = vpop.permute.xlu0 %7097  ;;  %v7160_v20 = vpop.permute.xlu1 %7159 }
 0xcfa   : > { %10277 = vmatpush.bf16.msk.msra.mxu3 %vm11131_vm10, %v7100_v30  ;;  %7738 = vmatmul.bf16.vlgmr.msrb.gmra.mxu0 %v10087_v24  ;;  %v7195_v51 = vsel %vm556_vm8, %v7160_v20, 0 }
 0xcfe   : > { %10279 = vmatpush.bf16.msk.msra.mxu3 %vm11131_vm10, %v7098_v37  ;;  %v17327_v37 = vld [vmem:[#allocation12_spill] sm:$0xff] }
 0xd01   : > { %v7078_v23 = vpop.permute.xlu0 %7077  ;;  %v7154_v34 = vpop.permute.xlu1 %7153 }
 0xd02   : > { %10267 = vmatpush.bf16.msk.msra.mxu2 %vm11131_vm10, %v7078_v23  ;;  %10281 = vmatpush.bf16.msk.msra.mxu3 %vm11131_vm10, %v7096_v28  ;;  %v7186_v19 = vsel %vm556_vm8, %v7154_v34, 0  ;;  %v17326_v28 = vld [vmem:[#allocation40_spill] sm:$0xff]  ;;  %v17330_v23 = vld [vmem:[#allocation11_spill] sm:$0xff]  ;;  %v17348_v34 = vld [vmem:[#allocation46_spill] sm:$0xff] }
 0xd06   : > { %10269 = vmatpush.bf16.msk.msra.mxu2 %vm11131_vm10, %v7076_v5  ;;  %10283 = vmatpush.bf16.msk.msra.mxu3 %vm11131_vm10, %v7094_v13  ;;  %v10210_v13 = vld [vmem:[%s16815_s8 + $0x120] sm:$0xf]  ;;  %v17331_v5 = vld [vmem:[#allocation26_spill] sm:$0xff] }
 0xd07   : > { %v10211_v57 = vor.u32 %v10790_v32, %v10210_v13  ;;  %v10172_v13 = vld [vmem:[%s16815_s8 + $0xf8] sm:$0xf0] }
 0xd09   : > { %v7092_v58 = vpop.permute.xlu0 %7091 }
 0xd0a   : > { %10271 = vmatpush.bf16.msk.msra.mxu2 %vm11131_vm10, %v7074_v18  ;;  %10285 = vmatpush.bf16.msk.msra.mxu3 %vm11131_vm10, %v7092_v58  ;;  %v10784_v18 = vld [vmem:[%s16815_s8 + $0x124] sm:$0xf]  ;;  %v10212_v58 = vld [vmem:[%s16815_s8 + $0x150] sm:$0xf0] }
 0xd0d   : > { %7593 = vmatmul.bf16.vlgmr.msra.gmra.mxu2 %v10067_v55  ;;  %v17333_v55 = vld [vmem:[#allocation10_spill] sm:$0xff] }
 0xd0e   : > { %10305 = vmatpush.bf16.msk.msrb.mxu2 %vm11131_vm10, %v17313_v40  ;;  %10287 = vmatpush.bf16.msk.msra.mxu3 %vm11131_vm10, %v7090_v56  ;;  %v10215_v40 = vor.u32 %v10784_v18, %v10212_v58  ;;  %v17336_v56 = vld [vmem:[#allocation9_spill] sm:$0xff]  ;;  %v17352_v58 = vld [vmem:[#allocation54_spill] sm:$0xff] }
 0xd11   : > { %v7168_v47 = vpop.permute.xlu0 %7167  ;;  %7622 = vmatmul.bf16.vlgmr.msra.gmra.mxu3 %v10071_v25  ;;  %v10762_v25 = vld [vmem:[%s16815_s8 + $0x74] sm:$0xf] }
 0xd12   : > { %10307 = vmatpush.bf16.msk.msrb.mxu2 %vm11131_vm10, %v17314_v43  ;;  %7701 = vmatpush.bf16.msrb.mxu3 %v16053_v59  ;;  %v7207_v26 = vsel %vm556_vm8, %v7168_v47, 0  ;;  %v10766_v59 = vld [vmem:[%s16815_s8 + $0x8c] sm:$0xf0]  ;;  %v17338_v43 = vld [vmem:[#allocation50_spill] sm:$0xff]  ;;  %v10135_v24 = vor.u32 %v10762_v25, %v10132_v41  ;;  %v17339_v47 = vld [vmem:[#allocation8_spill] sm:$0xff] }
 0xd13   : > { %7817 = vmatpush.bf16.msra.mxu0 %v7207_v26  ;;  %v17340_v26 = vld [vmem:[#allocation27_spill] sm:$0xff]  ;;  %v10220_v25 = vld [vmem:[%s16815_s8 + $0x158] sm:$0xf0] }
 0xd14   : > { %7743 = vmatmul.bf16.gmra.mxu0 %v10135_v24 }
 0xd16   : > { %10309 = vmatpush.bf16.msk.msrb.mxu2 %vm11131_vm10, %v17315_v6  ;;  %7702 = vmatpush.bf16.msrb.mxu3 %v16045_v35  ;;  %v10115_v35 = vor.u32 %v10766_v59, %v10114_v31  ;;  %v17341_v6 = vld [vmem:[#allocation51_spill] sm:$0xff]  ;;  %v10076_v31 = vld [vmem:[%s16815_s8 + $0x38] sm:$0xf0]  ;;  %v17342_v59 = vld [vmem:[#allocation25_spill] sm:$0xff] }
 0xd17   : > { %7818 = vmatpush.bf16.msra.mxu0 %v7204_v21  ;;  %v17343_v21 = vld [vmem:[#allocation53_spill] sm:$0xff] }
 0xd1a   : > { %10311 = vmatpush.bf16.msk.msrb.mxu2 %vm11131_vm10, %v17316_v42  ;;  %7703 = vmatpush.bf16.msrb.mxu3 %v16023_v14  ;;  %v7162_v14 = vpop.permute.xlu0 %7161  ;;  %v10079_v42 = vor.u32 %v10749_v46, %v10076_v31  ;;  %v10090_v31 = vld [vmem:[%s16815_s8 + $0x18] sm:$0xf] }
 0xd1b   : > { %7819 = vmatpush.bf16.msra.mxu0 %v7201_v0  ;;  %v7198_v49 = vsel %vm556_vm8, %v7162_v14, 0 }
 0xd1d   : > { %7598 = vmatmul.bf16.gmra.mxu2 %v10115_v35  ;;  %v10082_v35 = vld [vmem:[%s16815_s8 + $0x10] sm:$0xf] }
 0xd1e   : > { %10313 = vmatpush.bf16.msk.msrb.mxu2 %vm11131_vm10, %v17317_v54  ;;  %7704 = vmatpush.bf16.msrb.mxu3 %v16001_v29  ;;  %v7158_v29 = vpop.permute.xlu2 %7157  ;;  %v10083_v54 = vor.u32 %v10756_v17, %v10082_v35  ;;  %v10092_v35 = vld [vmem:[%s16815_s8 + $0x48] sm:$0xf0] }
 0xd1f   : > { %7820 = vmatpush.bf16.msra.mxu0 %v7198_v49  ;;  %v7192_v22 = vsel %vm556_vm8, %v7158_v29, 0  ;;  %v10180_v49 = vld [vmem:[%s16815_s8 + $0x100] sm:$0xf0] }
 0xd21   : > { %7627 = vmatmul.bf16.gmra.mxu3 %v10119_v36  ;;  %v10774_v36 = vld [vmem:[%s16815_s8 + $0xd4] sm:$0xf] }
 0xd22   : > { %10315 = vmatpush.bf16.msk.msrb.mxu2 %vm11131_vm10, %v17318_v53  ;;  %7705 = vmatpush.bf16.msrb.mxu3 %v15981_v12  ;;  %v10778_v12 = vld [vmem:[%s16815_s8 + $0xec] sm:$0xf0]  ;;  %v7156_v30 = vpop.permute.xlu0 %7155  ;;  %v10183_v53 = vor.u32 %v10774_v36, %v10180_v49 }
 0xd23   : > { %7821 = vmatpush.bf16.msra.mxu0 %v7195_v51  ;;  %v10163_v8 = vor.u32 %v10778_v12, %v10162_v45  ;;  %v7189_v61 = vsel %vm556_vm8, %v7156_v30, 0  ;;  %v7180_v51 = vpop.permute.xlu1 %7179  ;;  %v17346_v12 = vld [vmem:[#allocation42_spill] sm:$0xff] }
 0xd24   : > { %7748 = vmatmul.bf16.gmra.mxu0 %v10183_v53  ;;  %v7225_v29 = vsel %vm556_vm8, %v7180_v51, 0 }
 0xd26   : > { %10317 = vmatpush.bf16.msk.msrb.mxu2 %vm11131_vm10, %v17319_v63  ;;  %7706 = vmatpush.bf16.msrb.mxu3 %v15961_v39  ;;  %v10218_v39 = vld [vmem:[%s16815_s8 + $0x128] sm:$0xf]  ;;  %v7184_v52 = vpop.permute.xlu2 %7183  ;;  %v17345_v63 = vld [vmem:[#allocation41_spill] sm:$0xff] }
 0xd27   : > { %7822 = vmatpush.bf16.msra.mxu0 %v7192_v22  ;;  %v10219_v9 = vor.u32 %v10791_v7, %v10218_v39  ;;  %v7231_v0 = vsel %vm556_vm8, %v7184_v52, 0  ;;  %v10761_v22 = vld [vmem:[%s16815_s8 + $0x6c] sm:$0xf]  ;;  %v10751_v52 = vld [vmem:[%s16815_s8 + $0x1c] sm:$0xf] }
 0xd28   : > { %v10095_v17 = vor.u32 %v10751_v52, %v10092_v35  ;;  %v10787_v52 = vld [vmem:[%s16815_s8 + $0x13c] sm:$0xf]  ;;  %v10236_v35 = vld [vmem:[%s16815_s8 + $0x168] sm:$0xf0] }
 0xd29   : > { %7666 = vmatmul.bf16.vlgmr.msra.gmra.mxu1 %v10219_v9  ;;  %v10130_v9 = vld [vmem:[%s16815_s8 + $0x70] sm:$0xf] }
 0xd2a   : > { %10319 = vmatpush.bf16.msk.msrb.mxu2 %vm11131_vm10, %v17320_v60  ;;  %7707 = vmatpush.bf16.msrb.mxu3 %v15945_v27  ;;  %v10772_v27 = vld [vmem:[%s16815_s8 + $0xc4] sm:$0xf]  ;;  %v7182_v14 = vpop.permute.xlu0 %7181  ;;  %v10124_v60 = vld [vmem:[%s16815_s8 + $0x98] sm:$0xf0] }
 0xd2b   : > { %7823 = vmatpush.bf16.msra.mxu0 %v7189_v61  ;;  %v10167_v62 = vor.u32 %v10772_v27, %v10164_v10  ;;  %v7228_v20 = vsel %vm556_vm8, %v7182_v14, 0  ;;  %v10127_v7 = vor.u32 %v10761_v22, %v10124_v60  ;;  %v7174_v10 = vpop.permute.xlu1 %7173 }
 0xd2d   : > { %7603 = vmatmul.bf16.gmra.mxu2 %v10163_v8  ;;  %v10768_v8 = vld [vmem:[%s16815_s8 + $0x9c] sm:$0xf0] }
 0xd2e   : > { %7759 = vmatpush.bf16.msra.mxu2 %v17321_v3  ;;  %7708 = vmatpush.bf16.msrb.mxu3 %v15929_v1  ;;  %v17324_v1 = vld [vmem:[#allocation13_spill] sm:$0xff]  ;;  %v7178_v45 = vpop.permute.xlu2 %7177  ;;  %v17347_v3 = vld [vmem:[#allocation43_spill] sm:$0xff]  ;;  %v10131_v27 = vor.u32 %v10768_v8, %v10130_v9 }
 0xd2f   : > { %7824 = vmatpush.bf16.msra.mxu0 %v7186_v19  ;;  %v7222_v39 = vsel %vm556_vm8, %v7178_v45, 0  ;;  %v7216_v19 = vsel %vm556_vm8, %v7174_v10, 0  ;;  %v10769_v45 = vld [vmem:[%s16815_s8 + $0xa4] sm:$0xf0] }
 0xd31   : > { %7632 = vmatmul.bf16.gmra.mxu3 %v10167_v62 }
 0xd32   : > { %7760 = vmatpush.bf16.msra.mxu2 %v17322_v4  ;;  %7788 = vmatpush.bf16.msra.mxu3 %v17323_v2  ;;  %v7176_v30 = vpop.permute.xlu0 %7175  ;;  %v10786_v4 = vld [vmem:[%s16815_s8 + $0x134] sm:$0xf]  ;;  %v10228_v2 = vld [vmem:[%s16815_s8 + $0x160] sm:$0xf0] }
 0xd33   : > { %7904 = vmatpush.bf16.msrb.mxu0 %v17326_v28  ;;  %v7219_v61 = vsel %vm556_vm8, %v7176_v30, 0  ;;  %v10231_v62 = vor.u32 %v10786_v4, %v10228_v2  ;;  %v7308_v14 = vpop.permute.xlu1 %7307  ;;  %v10140_v30 = vld [vmem:[%s16815_s8 + $0xa8] sm:$0xf0]  ;;  %v10794_v4 = vld [vmem:[%s16815_s8 + $0x16c] sm:$0xf0] }
 0xd35   : > { %7753 = vmatmul.bf16.gmra.mxu0 %v10231_v62 }
 0xd36   : > { %7761 = vmatpush.bf16.msra.mxu2 %v17324_v1  ;;  %7789 = vmatpush.bf16.msra.mxu3 %v17325_v15  ;;  %v7172_v1 = vpop.permute.xlu2 %7171  ;;  %v17349_v15 = vld [vmem:[#allocation48_spill] sm:$0xff] }
 0xd37   : > { %7905 = vmatpush.bf16.msrb.mxu0 %v17329_v11  ;;  %v7213_v28 = vsel %vm556_vm8, %v7172_v1, 0  ;;  %v10773_v11 = vld [vmem:[%s16815_s8 + $0xcc] sm:$0xf] }
 0xd3a   : > { %7762 = vmatpush.bf16.msra.mxu2 %v17327_v37  ;;  %7790 = vmatpush.bf16.msra.mxu3 %v17328_v33  ;;  %v7170_v37 = vpop.permute.xlu0 %7169  ;;  %v17350_v33 = vld [vmem:[#allocation49_spill] sm:$0xff] }
 0xd3b   : > { %7906 = vmatpush.bf16.msrb.mxu0 %v17332_v50  ;;  %v7210_v32 = vsel %vm556_vm8, %v7170_v37, 0  ;;  %v10178_v50 = vld [vmem:[%s16815_s8 + $0xd0] sm:$0xf]  ;;  %v10186_v37 = vld [vmem:[%s16815_s8 + $0xd8] sm:$0xf] }
 0xd3d   : > { %7608 = vmatmul.bf16.gmra.mxu2 %v10211_v57  ;;  %v10780_v57 = vld [vmem:[%s16815_s8 + $0xfc] sm:$0xf0] }
 0xd3e   : > { %7763 = vmatpush.bf16.msra.mxu2 %v17330_v23  ;;  %7791 = vmatpush.bf16.msra.mxu3 %v17331_v5  ;;  %v10175_v23 = vor.u32 %v10773_v11, %v10172_v13  ;;  %v17351_v5 = vld [vmem:[#allocation52_spill] sm:$0xff]  ;;  %v10179_v18 = vor.u32 %v10780_v57, %v10178_v50  ;;  %v7313_v22 = vpop.permute.xlu2 %7312  ;;  %v10775_v50 = vld [vmem:[%s16815_s8 + $0xdc] sm:$0xf] }
 0xd3f   : > { %7907 = vmatpush.bf16.msrb.mxu0 %v17335_v38  ;;  %v10188_v57 = vld [vmem:[%s16815_s8 + $0x108] sm:$0xf0] }
 0xd41   : > { %7637 = vmatmul.bf16.gmra.mxu3 %v10215_v40 }
 0xd42   : > { %7764 = vmatpush.bf16.msra.mxu2 %v17333_v55  ;;  %7792 = vmatpush.bf16.msra.mxu3 %v17334_v16  ;;  %v10098_v55 = vld [vmem:[%s16815_s8 + $0x20] sm:$0xf]  ;;  %v10758_v16 = vld [vmem:[%s16815_s8 + $0x4c] sm:$0xf0]  ;;  %v7318_v2 = vpop.permute.xlu0 %7317 }
 0xd43   : > { %7908 = vmatpush.bf16.msrb.mxu0 %v17338_v43  ;;  %v10099_v38 = vor.u32 %v10758_v16, %v10098_v55  ;;  %v10792_v43 = vld [vmem:[%s16815_s8 + $0x15c] sm:$0xf0]  ;;  %v10191_v55 = vor.u32 %v10775_v50, %v10188_v57 }
 0xd45   : > { %7825 = vmatmul.bf16.vlgmr.msra.gmra.mxu0 %v10099_v38 }
 0xd46   : > { %7765 = vmatpush.bf16.msra.mxu2 %v17336_v56  ;;  %7793 = vmatpush.bf16.msra.mxu3 %v17337_v44  ;;  %v10785_v56 = vld [vmem:[%s16815_s8 + $0x12c] sm:$0xf]  ;;  %v10226_v44 = vld [vmem:[%s16815_s8 + $0x130] sm:$0xf] }
 0xd47   : > { %7909 = vmatpush.bf16.msrb.mxu0 %v17341_v6  ;;  %v7652_v40 = vpop.f32.mrf.mxu0  ;;  %v10223_v41 = vor.u32 %v10785_v56, %v10220_v25  ;;  %v10227_v24 = vor.u32 %v10792_v43, %v10226_v44  ;;  %v10770_v6 = vld [vmem:[%s16815_s8 + $0xac] sm:$0xf0]  ;;  %v10753_v56 = vld [vmem:[%s16815_s8 + $0x2c] sm:$0xf]  ;;  %v10108_v25 = vld [vmem:[%s16815_s8 + $0x58] sm:$0xf0]  ;;  %v7328_v44 = vpop.permute.xlu2 %7327 }
 0xd4a   : > { %7766 = vmatpush.bf16.msra.mxu2 %v17339_v47  ;;  %7794 = vmatpush.bf16.msra.mxu3 %v17340_v26  ;;  %v10146_v26 = vld [vmem:[%s16815_s8 + $0x80] sm:$0xf] }
 0xd4b   : > { %7910 = vmatpush.bf16.msrb.mxu0 %v17343_v21  ;;  %v10147_v46 = vor.u32 %v10770_v6, %v10146_v26  ;;  %v10234_v26 = vld [vmem:[%s16815_s8 + $0x138] sm:$0xf]  ;;  %v10793_v6 = vld [vmem:[%s16815_s8 + $0x164] sm:$0xf0] }
 0xd4d   : > { %7680 = vmatmul.bf16.vlgmr.msrb.gmra.mxu2 %v10079_v42 }
 0xd4e   : > { %7795 = vmatpush.bf16.msra.mxu3 %v17342_v59  ;;  %7846 = vmatpush.bf16.msrb.mxu2 %v7231_v0  ;;  %v10757_v59 = vld [vmem:[%s16815_s8 + $0x44] sm:$0xf0]  ;;  %v10194_v0 = vld [vmem:[%s16815_s8 + $0xe0] sm:$0xf] }
 0xd4f   : > { %7911 = vmatpush.bf16.msrb.mxu0 %v17344_v48  ;;  %v7654_v47 = vpop.f32.mrf.mxu0  ;;  %v10091_v21 = vor.u32 %v10757_v59, %v10090_v31 }
 0xd51   : > { %7709 = vmatmul.bf16.vlgmr.msrb.gmra.mxu3 %v10083_v54  ;;  %v10782_v54 = vld [vmem:[%s16815_s8 + $0x10c] sm:$0xf0] }
 0xd52   : > { %7847 = vmatpush.bf16.msrb.mxu2 %v7228_v20  ;;  %7875 = vmatpush.bf16.msrb.mxu3 %v17345_v63  ;;  %v10195_v36 = vor.u32 %v10782_v54, %v10194_v0  ;;  %v10239_v54 = vor.u32 %v10787_v52, %v10236_v35 }
 0xd55   : > { %7830 = vmatmul.bf16.gmra.mxu0 %v10147_v46 }
 0xd56   : > { %7848 = vmatpush.bf16.msrb.mxu2 %v7225_v29  ;;  %7876 = vmatpush.bf16.msrb.mxu3 %v17346_v12  ;;  %v10138_v29 = vld [vmem:[%s16815_s8 + $0x78] sm:$0xf] }
 0xd57   : > { %v7657_v42 = vpop.f32.mrf.mxu0  ;;  %v10139_v60 = vor.u32 %v10769_v45, %v10138_v29 }
 0xd5a   : > { %7849 = vmatpush.bf16.msrb.mxu2 %v7222_v39  ;;  %7877 = vmatpush.bf16.msrb.mxu3 %v17347_v3 }
 0xd5d   : > { %7685 = vmatmul.bf16.gmra.mxu2 %v10127_v7  ;;  %v10763_v7 = vld [vmem:[%s16815_s8 + $0x7c] sm:$0xf] }
 0xd5e   : > { %7850 = vmatpush.bf16.msrb.mxu2 %v7219_v61  ;;  %7878 = vmatpush.bf16.msrb.mxu3 %v17348_v34  ;;  %v10143_v8 = vor.u32 %v10763_v7, %v10140_v30  ;;  %v10242_v34 = vld [vmem:[%s16815_s8 + $0x140] sm:$0xf] }
 0xd5f   : > { %v7659_v20 = vpop.f32.mrf.mxu0  ;;  %v10243_v62 = vor.u32 %v10794_v4, %v10242_v34 }
 0xd61   : > { %7714 = vmatmul.bf16.gmra.mxu3 %v10131_v27 }
 0xd62   : > { %7851 = vmatpush.bf16.msrb.mxu2 %v7216_v19  ;;  %7879 = vmatpush.bf16.msrb.mxu3 %v17349_v15 }
 0xd65   : > { %7835 = vmatmul.bf16.gmra.mxu0 %v10195_v36 }
 0xd66   : > { %7852 = vmatpush.bf16.msrb.mxu2 %v7213_v28  ;;  %7880 = vmatpush.bf16.msrb.mxu3 %v17350_v33  ;;  %v10781_v33 = vld [vmem:[%s16815_s8 + $0x104] sm:$0xf0] }
 0xd67   : > { %v7662_v61 = vpop.f32.mrf.mxu0 }
 0xd6a   : > { %7853 = vmatpush.bf16.msrb.mxu2 %v7210_v32  ;;  %7881 = vmatpush.bf16.msrb.mxu3 %v17351_v5  ;;  %v7323_v32 = vpop.permute.xlu1 %7322 }
 0xd6d   : > { %7690 = vmatmul.bf16.gmra.mxu2 %v10175_v23  ;;  %v10187_v23 = vor.u32 %v10781_v33, %v10186_v37 }
 0xd6e   : > { %7882 = vmatpush.bf16.msrb.mxu3 %v17352_v58 }
 0xd6f   : > { %v7664_v13 = vpop.f32.mrf.mxu0 }
 0xd71   : > { %7719 = vmatmul.bf16.gmra.mxu3 %v10179_v18 }
 0xd72   : > { %v7338_v29 = vpop.permute.xlu1 %7337 }
 0xd75   : > { %7840 = vmatmul.bf16.gmra.mxu0 %v10243_v62  ;;  %v10777_v62 = vld [vmem:[%s16815_s8 + $0xec] sm:$0xf] }
 0xd7d   : > { %7695 = vmatmul.bf16.gmra.mxu2 %v10223_v41  ;;  %v10111_v41 = vor.u32 %v10753_v56, %v10108_v25 }
 0xd81   : > { %7724 = vmatmul.bf16.gmra.mxu3 %v10227_v24 }
 0xd85   : > { %7912 = vmatmul.bf16.vlgmr.msrb.gmra.mxu0 %v10111_v41 }
 0xd8d   : > { %7767 = vmatmul.bf16.vlgmr.msra.gmra.mxu2 %v10091_v21  ;;  %v10235_v21 = vor.u32 %v10793_v6, %v10234_v26 }
 0xd90   : > { %v7594_v48 = vpop.f32.mrf.mxu2 }
 0xd91   : > { %7796 = vmatmul.bf16.vlgmr.msra.gmra.mxu3 %v10095_v17  ;;  %v7595_v49 = vadd.f32 %v7594_v48, %v7308_v14 }
 0xd94   : > { %v7623_v53 = vpop.f32.mrf.mxu3 }
 0xd95   : > { %v7624_v51 = vadd.f32 %v7623_v53, %v7595_v49  ;;  %v10765_v49 = vld [vmem:[%s16815_s8 + $0x8c] sm:$0xf] }
 0xd97   : > { %v16458_v63 = vadd.f32 %v7652_v40, %v7624_v51  ;;  %v7739_v40 = vpop.f32.mrf.mxu0 }
 0xd98   : > { %v7596_v12 = vpop.f32.mrf.mxu2 }
 0xd99   : > { %v7597_v39 = vadd.f32 %v7596_v12, %v7313_v22 }
 0xd9c   : > { %v7625_v3 = vpop.f32.mrf.mxu3 }
 0xd9d   : > { %v7626_v9 = vadd.f32 %v7625_v3, %v7597_v39  ;;  %7772 = vmatmul.bf16.gmra.mxu2 %v10139_v60  ;;  %v10752_v60 = vld [vmem:[%s16815_s8 + $0x24] sm:$0xf]  ;;  %v10100_v39 = vld [vmem:[%s16815_s8 + $0x50] sm:$0xf0] }
 0xd9e   : > { %v10103_v3 = vor.u32 %v10752_v60, %v10100_v39 }
 0xd9f   : > { %v16472_v27 = vadd.f32 %v7654_v47, %v7626_v9  ;;  %v7741_v59 = vpop.f32.mrf.mxu0  ;;  %v7343_v9 = vpop.permute.xlu2 %7342 }
 0xda0   : > { %v7599_v10 = vpop.f32.mrf.mxu2 }
 0xda1   : > { %7801 = vmatmul.bf16.gmra.mxu3 %v10143_v8  ;;  %v7600_v19 = vadd.f32 %v7599_v10, %v7318_v2  ;;  %v10106_v8 = vld [vmem:[%s16815_s8 + $0x28] sm:$0xf] }
 0xda4   : > { %v7628_v1 = vpop.f32.mrf.mxu3 }
 0xda5   : > { %v7629_v15 = vadd.f32 %v7628_v1, %v7600_v19 }
 0xda7   : > { %v16480_v28 = vadd.f32 %v7657_v42, %v7629_v15  ;;  %v7333_v42 = vpop.permute.xlu0 %7332  ;;  %v7744_v36 = vpop.f32.mrf.mxu0  ;;  %v10204_v15 = vld [vmem:[%s16815_s8 + $0x118] sm:$0xf0] }
 0xda8   : > { %v7601_v11 = vpop.f32.mrf.mxu2  ;;  %v10207_v33 = vor.u32 %v10777_v62, %v10204_v15 }
 0xda9   : > { %v7602_v5 = vadd.f32 %v7601_v11, %v7323_v32  ;;  %v10764_v32 = vld [vmem:[%s16815_s8 + $0x84] sm:$0xf] }
 0xdac   : > { %v7630_v18 = vpop.f32.mrf.mxu3 }
 0xdad   : > { %v7631_v58 = vadd.f32 %v7630_v18, %v7602_v5  ;;  %7777 = vmatmul.bf16.gmra.mxu2 %v10187_v23  ;;  %v10148_v23 = vld [vmem:[%s16815_s8 + $0xb0] sm:$0xf0] }
 0xdae   : > { %v10151_v18 = vor.u32 %v10764_v32, %v10148_v23 }
 0xdaf   : > { %v16494_v16 = vadd.f32 %v7659_v20, %v7631_v58  ;;  %v10156_v20 = vld [vmem:[%s16815_s8 + $0xb8] sm:$0xf0]  ;;  %v7746_v7 = vpop.f32.mrf.mxu0  ;;  %v10771_v58 = vld [vmem:[%s16815_s8 + $0xb4] sm:$0xf0] }
 0xdb0   : > { %v7604_v38 = vpop.f32.mrf.mxu2  ;;  %v10159_v51 = vor.u32 %v10765_v49, %v10156_v20 }
 0xdb1   : > { %7806 = vmatmul.bf16.gmra.mxu3 %v10191_v55  ;;  %v7605_v43 = vadd.f32 %v7604_v38, %v7328_v44  ;;  %v10252_v44 = vld [vmem:[%s16815_s8 + $0x178] sm:$0xf0] }
 0xdb2   : > { %7917 = vmatmul.bf16.gmra.mxu0 %v10159_v51 }
 0xdb4   : > { %v7633_v24 = vpop.f32.mrf.mxu3 }
 0xdb5   : > { %v7634_v47 = vadd.f32 %v7633_v24, %v7605_v43 }
 0xdb7   : > { %v16508_v46 = vadd.f32 %v7662_v61, %v7634_v47  ;;  %v10759_v61 = vld [vmem:[%s16815_s8 + $0x54] sm:$0xf0]  ;;  %v7749_v1 = vpop.f32.mrf.mxu0 }
 0xdb8   : > { %v7606_v31 = vpop.f32.mrf.mxu2  ;;  %v10107_v2 = vor.u32 %v10759_v61, %v10106_v8 }
 0xdb9   : > { %v7607_v17 = vadd.f32 %v7606_v31, %v7333_v42  ;;  %v10776_v31 = vld [vmem:[%s16815_s8 + $0xe4] sm:$0xf] }
 0xdbc   : > { %v7635_v48 = vpop.f32.mrf.mxu3 }
 0xdbd   : > { %v7636_v0 = vadd.f32 %v7635_v48, %v7607_v17  ;;  %7782 = vmatmul.bf16.gmra.mxu2 %v10235_v21  ;;  %v10783_v17 = vld [vmem:[%s16815_s8 + $0x114] sm:$0xf0] }
 0xdbf   : > { %v16516_v14 = vadd.f32 %v7664_v13, %v7636_v0  ;;  %v7751_v55 = vpop.f32.mrf.mxu0 }
 0xdc0   : > { %v7609_v53 = vpop.f32.mrf.mxu2 }
 0xdc1   : > { %7811 = vmatmul.bf16.gmra.mxu3 %v10239_v54  ;;  %v7610_v45 = vadd.f32 %v7609_v53, %v7338_v29  ;;  %v10788_v29 = vld [vmem:[%s16815_s8 + $0x144] sm:$0xf] }
 0xdc2   : > { %7922 = vmatmul.bf16.gmra.mxu0 %v10207_v33 }
 0xdc4   : > { %v7638_v12 = vpop.f32.mrf.mxu3 }
 0xdc5   : > { %v16524_v22 = vadd.f32 %v7638_v12, %v7610_v45  ;;  %v10244_v45 = vld [vmem:[%s16815_s8 + $0x170] sm:$0xf0] }
 0xdc7   : > { %v7754_v26 = vpop.f32.mrf.mxu0 }
 0xdc8   : > { %v7611_v30 = vpop.f32.mrf.mxu2 }
 0xdc9   : > { %v7612_v10 = vadd.f32 %v7611_v30, %v7343_v9  ;;  %v10247_v30 = vor.u32 %v10788_v29, %v10244_v45  ;;  %v10795_v9 = vld [vmem:[%s16815_s8 + $0x174] sm:$0xf0] }
 0xdcc   : > { %v7640_v34 = vpop.f32.mrf.mxu3 }
 0xdcd   : > { %v16538_v4 = vadd.f32 %v7640_v34, %v7612_v10  ;;  %7854 = vmatmul.bf16.vlgmr.msrb.gmra.mxu2 %v10103_v3  ;;  %v7667_v3 = vpop.f32.mrf.mxu1 }
 0xdce   : > { %v7668_v34 = vadd.f32 %v7667_v3, %v16524_v22 }
 0xdcf   : > { %v7756_v49 = vpop.f32.mrf.mxu0 }
 0xdd0   : > { %v7681_v19 = vpop.f32.mrf.mxu2 }
 0xdd1   : > { %v7682_v37 = vadd.f32 %v7681_v19, %v16458_v63  ;;  %7883 = vmatmul.bf16.vlgmr.msrb.gmra.mxu3 %v10107_v2  ;;  %v10154_v63 = vld [vmem:[%s16815_s8 + $0x88] sm:$0xf] }
 0xdd2   : > { %v10155_v25 = vor.u32 %v10771_v58, %v10154_v63 }
 0xdd4   : > { %v7710_v11 = vpop.f32.mrf.mxu3 }
 0xdd5   : > { %v7711_v13 = vadd.f32 %v7710_v11, %v7682_v37 }
 0xdd7   : > { %v16553_v5 = vadd.f32 %v7739_v40, %v7711_v13  ;;  %v7826_v39 = vpop.f32.mrf.mxu0 }
 0xdd8   : > { %v7683_v50 = vpop.f32.mrf.mxu2 }
 0xdd9   : > { %v7684_v57 = vadd.f32 %v7683_v50, %v16472_v27  ;;  %v10789_v27 = vld [vmem:[%s16815_s8 + $0x14c] sm:$0xf] }
 0xdda   : > { %v10255_v24 = vor.u32 %v10789_v27, %v10252_v44 }
 0xddc   : > { %v7712_v38 = vpop.f32.mrf.mxu3  ;;  %7927 = vmatmul.bf16.gmra.mxu0 %v10255_v24 }
 0xddd   : > { %v7713_v56 = vadd.f32 %v7712_v38, %v7684_v57  ;;  %7859 = vmatmul.bf16.gmra.mxu2 %v10151_v18 }
 0xddf   : > { %v16562_v41 = vadd.f32 %v7741_v59, %v7713_v56  ;;  %v10196_v59 = vld [vmem:[%s16815_s8 + $0x110] sm:$0xf0]  ;;  %v7828_v19 = vpop.f32.mrf.mxu0 }
 0xde0   : > { %v7686_v40 = vpop.f32.mrf.mxu2  ;;  %v10199_v35 = vor.u32 %v10776_v31, %v10196_v59 }
 0xde1   : > { %v7687_v43 = vadd.f32 %v7686_v40, %v16480_v28  ;;  %7888 = vmatmul.bf16.gmra.mxu3 %v10155_v25  ;;  %v10202_v28 = vld [vmem:[%s16815_s8 + $0xe8] sm:$0xf] }
 0xde2   : > { %v10203_v54 = vor.u32 %v10783_v17, %v10202_v28 }
 0xde4   : > { %v7715_v47 = vpop.f32.mrf.mxu3 }
 0xde5   : > { %v7716_v6 = vadd.f32 %v7715_v47, %v7687_v43 }
 0xde7   : > { %v7745_v21 = vadd.f32 %v7744_v36, %v7716_v6  ;;  %v7831_v50 = vpop.f32.mrf.mxu0 }
 0xde8   : > { %v7688_v42 = vpop.f32.mrf.mxu2 }
 0xde9   : > { %v7689_v52 = vadd.f32 %v7688_v42, %v16494_v16 }
 0xdec   : > { %v7717_v48 = vpop.f32.mrf.mxu3 }
 0xded   : > { %v7718_v0 = vadd.f32 %v7717_v48, %v7689_v52  ;;  %7864 = vmatmul.bf16.gmra.mxu2 %v10199_v35 }
 0xdef   : > { %v7747_v53 = vadd.f32 %v7746_v7, %v7718_v0  ;;  %v7833_v38 = vpop.f32.mrf.mxu0 }
 0xdf0   : > { %v7691_v20 = vpop.f32.mrf.mxu2 }
 0xdf1   : > { %v7692_v36 = vadd.f32 %v7691_v20, %v16508_v46  ;;  %7893 = vmatmul.bf16.gmra.mxu3 %v10203_v54  ;;  %v10250_v46 = vld [vmem:[%s16815_s8 + $0x148] sm:$0xf] }
 0xdf2   : > { %v10251_v10 = vor.u32 %v10795_v9, %v10250_v46 }
 0xdf4   : > { %v7720_v16 = vpop.f32.mrf.mxu3 }
 0xdf5   : > { %v7721_v51 = vadd.f32 %v7720_v16, %v7692_v36 }
 0xdf7   : > { %v16591_v12 = vadd.f32 %v7749_v1, %v7721_v51  ;;  %v7669_v1 = vpop.f32.mrf.mxu1  ;;  %v7836_v24 = vpop.f32.mrf.mxu0 }
 0xdf8   : > { %v7693_v60 = vpop.f32.mrf.mxu2  ;;  %v7670_v33 = vadd.f32 %v7669_v1, %v16538_v4 }
 0xdf9   : > { %v7694_v7 = vadd.f32 %v7693_v60, %v16516_v14 }
 0xdfc   : > { %v7722_v8 = vpop.f32.mrf.mxu3 }
 0xdfd   : > { %v7723_v61 = vadd.f32 %v7722_v8, %v7694_v7  ;;  %7869 = vmatmul.bf16.gmra.mxu2 %v10247_v30 }
 0xdff   : > { %v16601_v2 = vadd.f32 %v7751_v55, %v7723_v61  ;;  %v7838_v52 = vpop.f32.mrf.mxu0 }
 0xe00   : > { %v7696_v62 = vpop.f32.mrf.mxu2 }
 0xe01   : > { %v7697_v14 = vadd.f32 %v7696_v62, %v7668_v34  ;;  %7898 = vmatmul.bf16.gmra.mxu3 %v10251_v10 }
 0xe04   : > { %v7725_v15 = vpop.f32.mrf.mxu3 }
 0xe05   : > { %v7726_v37 = vadd.f32 %v7725_v15, %v7697_v14 }
 0xe07   : > { %v16604_v11 = vadd.f32 %v7754_v26, %v7726_v37  ;;  %v16610_v0 = vpop.f32.mrf.mxu0 }
 0xe08   : > { %v7698_v13 = vpop.f32.mrf.mxu2 }
 0xe09   : > { %v7699_v32 = vadd.f32 %v7698_v13, %v7670_v33 }
 0xe0c   : > { %v7727_v23 = vpop.f32.mrf.mxu3 }
 0xe0d   : > { %v7728_v57 = vadd.f32 %v7727_v23, %v7699_v32 }
 0xe0f   : > { %v16606_v18 = vadd.f32 %v7756_v49, %v7728_v57  ;;  %v16612_v49 = vpop.f32.mrf.mxu0 }
 0xe10   : > { %v7768_v22 = vpop.f32.mrf.mxu2 }
 0xe11   : > { %v7769_v63 = vadd.f32 %v7768_v22, %v16553_v5 }
 0xe14   : > { %v7797_v58 = vpop.f32.mrf.mxu3 }
 0xe15   : > { %v7798_v55 = vadd.f32 %v7797_v58, %v7769_v63 }
 0xe17   : > { %v7827_v56 = vadd.f32 %v7826_v39, %v7798_v55  ;;  %v7913_v16 = vpop.f32.mrf.mxu0 }
 0xe18   : > { %v7770_v25 = vpop.f32.mrf.mxu2 }
 0xe19   : > { %v7771_v27 = vadd.f32 %v7770_v25, %v16562_v41 }
 0xe1c   : > { %v7799_v4 = vpop.f32.mrf.mxu3 }
 0xe1d   : > { %v7800_v40 = vadd.f32 %v7799_v4, %v7771_v27 }
 0xe1f   : > { %v7829_v44 = vadd.f32 %v7828_v19, %v7800_v40  ;;  %v7915_v29 = vpop.f32.mrf.mxu0 }
 0xe20   : > { %v7773_v43 = vpop.f32.mrf.mxu2 }
 0xe21   : > { %v7774_v47 = vadd.f32 %v7773_v43, %v7745_v21 }
 0xe24   : > { %v7802_v26 = vpop.f32.mrf.mxu3 }
 0xe25   : > { %v7803_v6 = vadd.f32 %v7802_v26, %v7774_v47 }
 0xe27   : > { %v7832_v31 = vadd.f32 %v7831_v50, %v7803_v6 }
 0xe28   : > { %v7775_v59 = vpop.f32.mrf.mxu2 }
 0xe29   : > { %v7776_v42 = vadd.f32 %v7775_v59, %v7747_v53 }
 0xe2c   : > { %v7804_v5 = vpop.f32.mrf.mxu3 }
 0xe2d   : > { %v7805_v35 = vadd.f32 %v7804_v5, %v7776_v42 }
 0xe2f   : > { %v7834_v28 = vadd.f32 %v7833_v38, %v7805_v35  ;;  %v7918_v3 = vpop.f32.mrf.mxu0 }
 0xe30   : > { %v7778_v17 = vpop.f32.mrf.mxu2 }
 0xe31   : > { %v7779_v37 = vadd.f32 %v7778_v17, %v16591_v12 }
 0xe34   : > { %v7807_v48 = vpop.f32.mrf.mxu3 }
 0xe35   : > { %v7808_v23 = vadd.f32 %v7807_v48, %v7779_v37 }
 0xe37   : > { %v7920_v62 = vpop.f32.mrf.mxu0  ;;  %v7837_v58 = vadd.f32 %v7836_v24, %v7808_v23 }
 0xe38   : > { %v7780_v41 = vpop.f32.mrf.mxu2 }
 0xe3c   : > { %v7809_v54 = vpop.f32.mrf.mxu3 }
 0xe3f   : > { %v7923_v63 = vpop.f32.mrf.mxu0 }
 0xe40   : > { %v7783_v20 = vpop.f32.mrf.mxu2 }
 0xe41   : > { %v7784_v5 = vadd.f32 %v7783_v20, %v16604_v11 }
 0xe44   : > { %v7812_v36 = vpop.f32.mrf.mxu3 }
 0xe45   : > { %v7813_v48 = vadd.f32 %v7812_v36, %v7784_v5 }
 0xe47   : > { %v7925_v42 = vpop.f32.mrf.mxu0 }
 0xe48   : > { %v16614_v21 = vpop.f32.mrf.mxu2 }
 0xe4c   : > { %v16616_v51 = vpop.f32.mrf.mxu3 }
 0xe50   : > { %v7855_v53 = vpop.f32.mrf.mxu2 }
 0xe51   : > { %v7856_v39 = vadd.f32 %v7855_v53, %v7827_v56  ;;  %v7781_v56 = vadd.f32 %v7780_v41, %v16601_v2 }
 0xe53   : > { %v7810_v4 = vadd.f32 %v7809_v54, %v7781_v56 }
 0xe54   : > { %v7884_v45 = vpop.f32.mrf.mxu3 }
 0xe55   : > { %v7885_v7 = vadd.f32 %v7884_v45, %v7856_v39  ;;  %v7839_v6 = vadd.f32 %v7838_v52, %v7810_v4  ;;  %v7842_v45 = vadd.f32 %v16610_v0, %v7813_v48  ;;  %v7786_v39 = vadd.f32 %v16614_v21, %v16606_v18 }
 0xe57   : > { %v7914_v46 = vadd.f32 %v7913_v16, %v7885_v7 }
 0xe58   : > { %v7857_v60 = vpop.f32.mrf.mxu2 }
 0xe59   : > { %v7858_v8 = vadd.f32 %v7857_v60, %v7829_v44  ;;  %v10320_v61 = vmul.f32 -1.442695, %v7914_v46  ;;  %v7815_v46 = vadd.f32 %v16616_v51, %v7786_v39 }
 0xe5b   : > { %10844 = vpow2.f32 %v10320_v61  ;;  %v7844_v21 = vadd.f32 %v16612_v49, %v7815_v46 }
 0xe5c   : > { %v7886_v30 = vpop.f32.mrf.mxu3 }
 0xe5d   : > { %v7887_v10 = vadd.f32 %v7886_v30, %v7858_v8 }
 0xe5f   : > { %v7916_v19 = vadd.f32 %v7915_v29, %v7887_v10 }
 0xe60   : > { %v7860_v9 = vpop.f32.mrf.mxu2 }
 0xe61   : > { %v7861_v14 = vadd.f32 %v7860_v9, %v7832_v31  ;;  %v10321_v33 = vmul.f32 -1.442695, %v7916_v19  ;;  %v10845_v32 = vpop.eup %10844 }
 0xe62   : > { %v16619_v57 = vadd.f32 1.0, %v10845_v32 }
 0xe63   : > { %10846 = vpow2.f32 %v10321_v33 }
 0xe64   : > { %v7889_v34 = vpop.f32.mrf.mxu3  ;;  %10848 = vrcp.f32 %v16619_v57  ;;  %vm7970_vm13 = vweird.f32 %v16619_v57  ;;  %v7974_v32 = vand.u32 2147483647, %v16619_v57  ;;  %v7976_v49 = vand.u32 2147483648, %v16619_v57 }
 0xe65   : > { %v7890_v15 = vadd.f32 %v7889_v34, %v7861_v14 }
 0xe66   : > { %vm7975_vm0 = vcmp.eq.f32.partialorder %v7974_v32, 8.507059e+37 }
 0xe67   : > { %v7919_v50 = vadd.f32 %v7918_v3, %v7890_v15  ;;  %v7928_v3 = vpop.f32.mrf.mxu0 }
 0xe68   : > { %v7862_v1 = vpop.f32.mrf.mxu2 }
 0xe69   : > { %v10322_v55 = vmul.f32 -1.442695, %v7919_v50  ;;  %v7863_v38 = vadd.f32 %v7862_v1, %v7834_v28  ;;  %v10847_v44 = vpop.eup %10846 }
 0xe6a   : > { %v16623_v31 = vadd.f32 1.0, %v10847_v44  ;;  %v16625_v59 = vpop.eup %10848 }
 0xe6b   : > { %10850 = vpow2.f32 %v10322_v55  ;;  %v7966_v52 = vmul.f32 %v16625_v59, %v16619_v57  ;;  %vm7971_vm12 = vweird.f32 %v16625_v59 }
 0xe6c   : > { %v7891_v13 = vpop.f32.mrf.mxu3  ;;  %vm16660_vm14 = vmor %vm7970_vm13, %vm7971_vm12  ;;  %v7991_v4 = vand.u32 2147483648, %v16623_v31  ;;  %vm7985_vm4 = vweird.f32 %v16623_v31 }
 0xe6d   : > { %v7892_v27 = vadd.f32 %v7891_v13, %v7863_v38  ;;  %v7967_v20 = vsub.f32 1.0, %v7966_v52 }
 0xe6e   : > { %v7992_v39 = vor.u32 1.1754944e-38, %v7991_v4 }
 0xe6f   : > { %v7921_v47 = vadd.f32 %v7920_v62, %v7892_v27  ;;  %v7968_v8 = vmul.f32 %v16625_v59, %v7967_v20  ;;  %v7930_v38 = vpop.f32.mrf.mxu0 }
 0xe70   : > { %v7865_v22 = vpop.f32.mrf.mxu2 }
 0xe71   : > { %v7866_v25 = vadd.f32 %v7865_v22, %v7837_v58  ;;  %v10851_v2 = vpop.eup %10850  ;;  %v10323_v28 = vmul.f32 -1.442695, %v7921_v47  ;;  %v7969_v51 = vadd.f32 %v16625_v59, %v7968_v8 }
 0xe72   : > { %v16631_v54 = vadd.f32 1.0, %v10851_v2 }
 0xe73   : > { %v7973_v57 = vsel %vm16660_vm14, %v16625_v59, %v7969_v51 }
 0xe74   : > { %v7894_v12 = vpop.f32.mrf.mxu3  ;;  %vm8000_vm12 = vweird.f32 %v16631_v54 }
 0xe75   : > { %v7895_v40 = vadd.f32 %v7894_v12, %v7866_v25  ;;  %v7977_v12 = vor.u32 1.1754944e-38, %v7976_v49 }
 0xe77   : > { %v7924_v43 = vadd.f32 %v7923_v63, %v7895_v40  ;;  %v7978_v59 = vsel %vm7975_vm0, %v7977_v12, %v7973_v57 }
 0xe78   : > { %v7867_v26 = vpop.f32.mrf.mxu2 }
 0xe79   : > { %v10324_v24 = vmul.f32 -1.442695, %v7924_v43  ;;  %v7868_v35 = vadd.f32 %v7867_v26, %v7839_v6 }
 0xe7b   : > { %10852 = vpow2.f32 %v10324_v24 }
 0xe7c   : > { %v7896_v17 = vpop.f32.mrf.mxu3  ;;  %10854 = vrcp.f32 %v16623_v31 }
 0xe7d   : > { %v7897_v41 = vadd.f32 %v7896_v17, %v7868_v35  ;;  %10856 = vpow2.f32 %v10323_v28  ;;  %v7989_v17 = vand.u32 2147483647, %v16623_v31 }
 0xe7e   : > { %10858 = vrcp.f32 %v16631_v54 }
 0xe7f   : > { %v7926_v16 = vadd.f32 %v7925_v42, %v7897_v41  ;;  %vm7990_vm8 = vcmp.eq.f32.partialorder %v7989_v17, 8.507059e+37 }
 0xe80   : > { %v7870_v53 = vpop.f32.mrf.mxu2 }
 0xe81   : > { %v10853_v29 = vpop.eup %10852  ;;  %v10325_v11 = vmul.f32 -1.442695, %v7926_v16  ;;  %v7871_v7 = vadd.f32 %v7870_v53, %v7842_v45  ;;  %v8085_v16 = vmul.f32 %v7978_v59, %v7978_v59 }
 0xe82   : > { %v16635_v60 = vadd.f32 1.0, %v10853_v29  ;;  %v16637_v36 = vpop.eup %10854 }
 0xe83   : > { %10860 = vpow2.f32 %v10325_v11  ;;  %v10857_v9 = vpop.eup %10856  ;;  %v7981_v61 = vmul.f32 %v16637_v36, %v16623_v31  ;;  %vm7986_vm3 = vweird.f32 %v16637_v36 }
 0xe84   : > { %10862 = vrcp.f32 %v16635_v60  ;;  %v7899_v30 = vpop.f32.mrf.mxu3  ;;  %v16646_v34 = vpop.eup %10858  ;;  %v16649_v14 = vadd.f32 1.0, %v10857_v9  ;;  %v8036_v25 = vand.u32 2147483648, %v16635_v60  ;;  %v8034_v40 = vand.u32 2147483647, %v16635_v60  ;;  %vm16686_vm6 = vmor %vm7985_vm4, %vm7986_vm3 }
 0xe85   : > { %v7900_v0 = vadd.f32 %v7899_v30, %v7871_v7  ;;  %v7982_v15 = vsub.f32 1.0, %v7981_v61  ;;  %v7996_v22 = vmul.f32 %v16646_v34, %v16631_v54  ;;  %vm8030_vm1 = vweird.f32 %v16635_v60 }
 0xe86   : > { %v8037_v28 = vor.u32 1.1754944e-38, %v8036_v25  ;;  %vm8035_vm5 = vcmp.eq.f32.partialorder %v8034_v40, 8.507059e+37  ;;  %vm8001_vm9 = vweird.f32 %v16646_v34  ;;  %vm8015_vm0 = vweird.f32 %v16649_v14 }
 0xe87   : > { %v7929_v10 = vadd.f32 %v7928_v3, %v7900_v0  ;;  %v7983_v55 = vmul.f32 %v16637_v36, %v7982_v15  ;;  %v7997_v43 = vsub.f32 1.0, %v7996_v22  ;;  %vm16709_vm14 = vmor %vm8000_vm12, %vm8001_vm9  ;;  %v8105_v22 = vadd.f32 5e-11, %v8085_v16 }
 0xe88   : > { %v7872_v62 = vpop.f32.mrf.mxu2  ;;  %v8021_v40 = vand.u32 2147483648, %v16649_v14  ;;  %vm8137_vm12 = vcmask 523264  }
 0xe89   : > { %v10861_v18 = vpop.eup %10860  ;;  %v10326_v19 = vmul.f32 -1.442695, %v7929_v10  ;;  %v7873_v13 = vadd.f32 %v7872_v62, %v7844_v21  ;;  %v7984_v42 = vadd.f32 %v16637_v36, %v7983_v55  ;;  %v7998_v48 = vmul.f32 %v16646_v34, %v7997_v43 }
 0xe8a   : > { %v10863_v1 = vpop.eup %10862  ;;  %v16653_v37 = vadd.f32 1.0, %v10861_v18  ;;  %v8006_v21 = vand.u32 2147483648, %v16631_v54 }
 0xe8b   : > { %v8026_v33 = vmul.f32 %v10863_v1, %v16635_v60  ;;  %10864 = vpow2.f32 %v10326_v19  ;;  %vm8031_vm15 = vweird.f32 %v10863_v1  ;;  %v7988_v20 = vsel %vm16686_vm6, %v16637_v36, %v7984_v42 }
 0xe8c   : > { %10866 = vrcp.f32 %v16653_v37  ;;  %v7901_v23 = vpop.f32.mrf.mxu3  ;;  %vm8032_vm2 = vmor %vm8030_vm1, %vm8031_vm15  ;;  %v8051_v45 = vand.u32 2147483648, %v16653_v37  ;;  %v8049_v60 = vand.u32 2147483647, %v16653_v37  ;;  %vm8045_vm10 = vweird.f32 %v16653_v37 }
 0xe8d   : > { %10868 = vrcp.f32 %v16649_v14  ;;  %v8027_v63 = vsub.f32 1.0, %v8026_v33  ;;  %v7902_v58 = vadd.f32 %v7901_v23, %v7873_v13  ;;  %v7993_v46 = vsel %vm7990_vm8, %v7992_v39, %v7988_v20 }
 0xe8e   : > { %v7999_v0 = vadd.f32 %v16646_v34, %v7998_v48  ;;  %v8052_v36 = vor.u32 1.1754944e-38, %v8051_v45  ;;  %vm8050_vm13 = vcmp.eq.f32.partialorder %v8049_v60, 8.507059e+37  ;;  %v8086_v15 = vmul.f32 %v7993_v46, %v7993_v46 }
 0xe8f   : > { %v8028_v56 = vmul.f32 %v10863_v1, %v8027_v63  ;;  %v7931_v27 = vadd.f32 %v7930_v38, %v7902_v58  ;;  %v8007_v63 = vor.u32 1.1754944e-38, %v8006_v21  ;;  %v8022_v48 = vor.u32 1.1754944e-38, %v8021_v40 }
 0xe90   : > { %v8003_v49 = vsel %vm16709_vm14, %v16646_v34, %v7999_v0 }
 0xe91   : > { %v10865_v44 = vpop.eup %10864  ;;  %v10327_v47 = vmul.f32 -1.442695, %v7931_v27  ;;  %v8029_v26 = vadd.f32 %v10863_v1, %v8028_v56 }
 0xe92   : > { %v10867_v6 = vpop.eup %10866  ;;  %v16675_v24 = vadd.f32 1.0, %v10865_v44 }
 0xe93   : > { %v16679_v2 = vpop.eup %10868  ;;  %v8041_v5 = vmul.f32 %v10867_v6, %v16653_v37  ;;  %10870 = vpow2.f32 %v10327_v47  ;;  %v8033_v35 = vsel %vm8032_vm2, %v10863_v1, %v8029_v26  ;;  %vm8046_vm7 = vweird.f32 %v10867_v6 }
 0xe94   : > { %10872 = vrcp.f32 %v16675_v24  ;;  %v8038_v52 = vsel %vm8035_vm5, %v8037_v28, %v8033_v35  ;;  %v8011_v29 = vmul.f32 %v16679_v2, %v16649_v14  ;;  %vm8047_vm11 = vmor %vm8045_vm10, %vm8046_vm7  ;;  %v8004_v1 = vand.u32 2147483647, %v16631_v54 }
 0xe95   : > { %v8042_v41 = vsub.f32 1.0, %v8041_v5  ;;  %v8089_v11 = vmul.f32 %v8038_v52, %v8038_v52  ;;  %v8066_v32 = vand.u32 2147483648, %v16675_v24  ;;  %v8064_v54 = vand.u32 2147483647, %v16675_v24 }
 0xe96   : > { %v8012_v8 = vsub.f32 1.0, %v8011_v29  ;;  %vm8005_vm1 = vcmp.eq.f32.partialorder %v8004_v1, 8.507059e+37  ;;  %vm8016_vm2 = vweird.f32 %v16679_v2  ;;  %vm8060_vm3 = vweird.f32 %v16675_v24 }
 0xe97   : > { %v8043_v31 = vmul.f32 %v10867_v6, %v8042_v41  ;;  %v8093_v7 = vadd.f32 %v8089_v11, %v8085_v16  ;;  %v8067_v34 = vor.u32 1.1754944e-38, %v8066_v32  ;;  %v8113_v56 = vadd.f32 5e-11, %v8089_v11  ;;  %vm16733_vm6 = vmor %vm8015_vm0, %vm8016_vm2 }
 0xe98   : > { %v8013_v13 = vmul.f32 %v16679_v2, %v8012_v8  ;;  %v8008_v25 = vsel %vm8005_vm1, %v8007_v63, %v8003_v49  ;;  %vm8065_vm5 = vcmp.eq.f32.partialorder %v8064_v54, 8.507059e+37  ;;  %v8106_v41 = vadd.f32 5e-11, %v8086_v15  ;;  %v17362_v49 = vld [vmem:[#allocation4_spill] sm:$0xff] }
 0xe99   : > { %v10871_v30 = vpop.eup %10870  ;;  %v8044_v3 = vadd.f32 %v10867_v6, %v8043_v31  ;;  %v8097_v10 = vadd.f32 1e-10, %v8093_v7  ;;  %v8087_v59 = vmul.f32 %v8008_v25, %v8008_v25 }
 0xe9a   : > { %v10873_v9 = vpop.eup %10872  ;;  %v16700_v61 = vadd.f32 1.0, %v10871_v30  ;;  %v8014_v57 = vadd.f32 %v16679_v2, %v8013_v13 }
 0xe9b   : > { %v8056_v62 = vmul.f32 %v10873_v9, %v16675_v24  ;;  %v8048_v18 = vsel %vm8047_vm11, %v10867_v6, %v8044_v3  ;;  %vm8061_vm15 = vweird.f32 %v10873_v9  ;;  %v8019_v6 = vand.u32 2147483647, %v16649_v14 }
 0xe9c   : > { %10874 = vrcp.f32 %v16700_v61  ;;  %v8053_v19 = vsel %vm8050_vm13, %v8052_v36, %v8048_v18  ;;  %vm8062_vm4 = vmor %vm8060_vm3, %vm8061_vm15  ;;  %v8081_v5 = vand.u32 2147483648, %v16700_v61  ;;  %v8018_v35 = vsel %vm16733_vm6, %v16679_v2, %v8014_v57 }
 0xe9d   : > { %v8057_v51 = vsub.f32 1.0, %v8056_v62  ;;  %10876 = vrcp.f32 %v8097_v10  ;;  %v8090_v37 = vmul.f32 %v8053_v19, %v8053_v19  ;;  %v8079_v14 = vand.u32 2147483647, %v16700_v61 }
 0xe9e   : > { %vm8020_vm8 = vcmp.eq.f32.partialorder %v8019_v6, 8.507059e+37  ;;  %vm8075_vm9 = vweird.f32 %v16700_v61  ;;  %v8082_v31 = vor.u32 1.1754944e-38, %v8081_v5  ;;  %v8107_v3 = vadd.f32 5e-11, %v8087_v59 }
 0xe9f   : > { %v8058_v23 = vmul.f32 %v10873_v9, %v8057_v51  ;;  %v8094_v50 = vadd.f32 %v8090_v37, %v8086_v15  ;;  %v8114_v52 = vadd.f32 5e-11, %v8090_v37  ;;  %v8023_v20 = vsel %vm8020_vm8, %v8022_v48, %v8018_v35  ;;  %v17361_v51 = vld [vmem:[#allocation5_spill] sm:$0xff] }
 0xea0   : > { %vm8080_vm11 = vcmp.eq.f32.partialorder %v8079_v14, 8.507059e+37  ;;  %v8088_v39 = vmul.f32 %v8023_v20, %v8023_v20 }
 0xea1   : > { %v8059_v58 = vadd.f32 %v10873_v9, %v8058_v23  ;;  %v8098_v55 = vadd.f32 1e-10, %v8094_v50 }
 0xea2   : > { %v10875_v38 = vpop.eup %10874  ;;  %v8108_v10 = vadd.f32 5e-11, %v8088_v39 }
 0xea3   : > { %v10877_v27 = vpop.eup %10876  ;;  %v8071_v12 = vmul.f32 %v10875_v38, %v16700_v61  ;;  %10878 = vrcp.f32 %v8098_v55  ;;  %v8063_v4 = vsel %vm8062_vm4, %v10873_v9, %v8059_v58  ;;  %vm8076_vm7 = vweird.f32 %v10875_v38 }
 0xea4   : > { %v16725_v44 = vmul.f32 %v10877_v27, %v8113_v56  ;;  %v16727_v43 = vmul.f32 %v10877_v27, %v8105_v22  ;;  %v8068_v47 = vsel %vm8065_vm5, %v8067_v34, %v8063_v4  ;;  %vm8077_vm10 = vmor %vm8075_vm9, %vm8076_vm7  ;;  %v17363_v22 = vld [vmem:[#allocation3_spill] sm:$0xff]  ;;  %v17364_v27 = vld [vmem:[#allocation6_spill] sm:$0xff] }
 0xea5   : > { %v8072_v24 = vsub.f32 1.0, %v8071_v12  ;;  %v8091_v42 = vmul.f32 %v8068_v47, %v8068_v47 }
 0xea6   : > { %8154 = vrot.lane.b32.xlu1 %v16725_v44, %s10908_s29  ;;  %8125 = vrot.lane.b32.xlu0 %v16727_v43, %s10908_s29 }
 0xea7   : > { %v8073_v28 = vmul.f32 %v10875_v38, %v8072_v24  ;;  %v8095_v17 = vadd.f32 %v8091_v42, %v8087_v59  ;;  %v8115_v46 = vadd.f32 5e-11, %v8091_v42 }
 0xea9   : > { %v10879_v16 = vpop.eup %10878  ;;  %v8099_v53 = vadd.f32 1e-10, %v8095_v17  ;;  %v8074_v29 = vadd.f32 %v10875_v38, %v8073_v28 }
 0xeaa   : > { %v8110_v45 = vmul.f32 %v10879_v16, %v8106_v41  ;;  %v8118_v11 = vmul.f32 %v10879_v16, %v8114_v52 }
 0xeab   : > { %10880 = vrcp.f32 %v8099_v53  ;;  %v8078_v2 = vsel %vm8077_vm10, %v10875_v38, %v8074_v29 }
 0xeac   : > { %v8083_v60 = vsel %vm8080_vm11, %v8082_v31, %v8078_v2 }
 0xead   : > { %v8092_v7 = vmul.f32 %v8083_v60, %v8083_v60 }
 0xeae   : > { %8127 = vrot.lane.b32.xlu1 %v8110_v45, %s10908_s29 }
 0xeaf   : > { %v8096_v30 = vadd.f32 %v8092_v7, %v8088_v39  ;;  %v8116_v61 = vadd.f32 5e-11, %v8092_v7 }
 0xeb1   : > { %v10881_v0 = vpop.eup %10880  ;;  %v8100_v9 = vadd.f32 1e-10, %v8096_v30 }
 0xeb2   : > { %v8111_v8 = vmul.f32 %v10881_v0, %v8107_v3  ;;  %v8119_v36 = vmul.f32 %v10881_v0, %v8115_v46 }
 0xeb3   : > { %10882 = vrcp.f32 %v8100_v9 }
 0xeb4   : > { %8129 = vrot.lane.b32.xlu2 %v8111_v8, %s10908_s29 }
 0xeb9   : > { %v10883_v62 = vpop.eup %10882 }
 0xeba   : > { %v8120_v18 = vmul.f32 %v10883_v62, %v8116_v61  ;;  %v8112_v21 = vmul.f32 %v10883_v62, %v8108_v10 }
 0xebc   : > { %8156 = vrot.lane.b32.xlu2 %v8118_v11, %s10908_s29  ;;  %8160 = vrot.lane.b32.xlu1 %v8120_v18, %s10908_s29 }
 0xebd   : > { %8131 = vrot.lane.b32.xlu0 %v8112_v21, %s10908_s29 }
 0xec5   : > { %8158 = vrot.lane.b32.xlu0 %v8119_v36, %s10908_s29 }
 0xf0e   : > { %v8130_v19 = vpop.permute.xlu2 %8129 }
 0xf0f   : > { %v8140_v1 = vsel %vm8137_vm12, %v8111_v8, %v8130_v19 }
 0xf10   : > { %v8144_v15 = vmul.f32 %v8140_v1, %v17361_v51 }
 0xf12   : > { %8148 = vst [vmem:[%s16757_s11 + $0x10] sm:$0xff] %v8144_v15 }
 0xf16   : > { %v8157_v37 = vpop.permute.xlu2 %8156 }
 0xf17   : > { %v8167_v33 = vsel %vm8137_vm12, %v8118_v11, %v8157_v37 }
 0xf18   : > { %v8155_v13 = vpop.permute.xlu1 %8154  ;;  %v8126_v32 = vpop.permute.xlu0 %8125  ;;  %v8171_v23 = vmul.f32 %v8167_v33, %v17362_v49 }
 0xf19   : > { %v8166_v54 = vsel %vm8137_vm12, %v16725_v44, %v8155_v13  ;;  %v8138_v50 = vsel %vm8137_vm12, %v16727_v43, %v8126_v32  ;;  %v8235_v24 = vld [vmem:[%s16757_s11 + $0x10] sm:$0xff] (%p10992_p4) }
 0xf1a   : > { %v8170_v63 = vmul.f32 %v8166_v54, %v17363_v22  ;;  %v8142_v58 = vmul.f32 %v8138_v50, %v17363_v22  ;;  %10329 = vst [vmem:[%s16757_s11 + $0x28] sm:$0xff] %v8171_v23 }
 0xf1b   : > { %8236 = vst [vmem:[%s8188_s15 + $0x10] sm:$0xff] (%p10992_p4), %v8235_v24 }
 0xf1c   : > { %10328 = vst [vmem:[%s16757_s11 + $0x20] sm:$0xff] %v8170_v63 }
 0xf1d   : > { %8146 = vst [vmem:[%s16757_s11] sm:$0xff] %v8142_v58 }
 0xf20   : > { %v8128_v55 = vpop.permute.xlu1 %8127 }
 0xf21   : > { %v8139_v38 = vsel %vm8137_vm12, %v8110_v45, %v8128_v55  ;;  %v8241_v5 = vld [vmem:[%s16757_s11 + $0x28] sm:$0xff] (%p10992_p4) }
 0xf22   : > { %v8143_v57 = vmul.f32 %v8139_v38, %v17362_v49  ;;  %8242 = vst [vmem:[%s8188_s15 + $0x68] sm:$0xff] (%p10992_p4), %v8241_v5 }
 0xf23   : > { %v8239_v42 = vld [vmem:[%s16757_s11 + $0x20] sm:$0xff] (%p10992_p4) }
 0xf24   : > { %8147 = vst [vmem:[%s16757_s11 + $0x8] sm:$0xff] %v8143_v57  ;;  %v8231_v26 = vld [vmem:[%s16757_s11] sm:$0xff] (%p10992_p4) }
 0xf25   : > { %8232 = vst [vmem:[%s8188_s15] sm:$0xff] (%p10992_p4), %v8231_v26 }
 0xf26   : > { %8240 = vst [vmem:[%s8188_s15 + $0x60] sm:$0xff] (%p10992_p4), %v8239_v42 }
 0xf2b   : > { %v8233_v6 = vld [vmem:[%s16757_s11 + $0x8] sm:$0xff] (%p10992_p4) }
 0xf2c   : > { %8234 = vst [vmem:[%s8188_s15 + $0x8] sm:$0xff] (%p10992_p4), %v8233_v6 }
 0xf2e   : > { %v8161_v34 = vpop.permute.xlu1 %8160 }
 0xf2f   : > { %v8169_v56 = vsel %vm8137_vm12, %v8120_v18, %v8161_v34  ;;  %v8132_v25 = vpop.permute.xlu0 %8131 }
 0xf30   : > { %v8173_v12 = vmul.f32 %v8169_v56, %v17364_v27  ;;  %v8141_v4 = vsel %vm8137_vm12, %v8112_v21, %v8132_v25 }
 0xf31   : > { %v8145_v40 = vmul.f32 %v8141_v4, %v17364_v27 }
 0xf32   : > { %10331 = vst [vmem:[%s16757_s11 + $0x38] sm:$0xff] %v8173_v12 }
 0xf33   : > { %8149 = vst [vmem:[%s16757_s11 + $0x18] sm:$0xff] %v8145_v40 }
 0xf37   : > { %v8159_v44 = vpop.permute.xlu0 %8158  ;;  %8185 = sbr.rel (!%p10992_p4) target bundleno = 3908 (0xf44), region = 64 }
 0xf38   : > { %v8168_v43 = vsel %vm8137_vm12, %v8119_v36, %v8159_v44 }
 0xf39   : > { %v8172_v47 = vmul.f32 %v8168_v43, %v17361_v51  ;;  %v8245_v28 = vld [vmem:[%s16757_s11 + $0x38] sm:$0xff] (%p10992_p4) }
 0xf3a   : > { %v8237_v59 = vld [vmem:[%s16757_s11 + $0x18] sm:$0xff] (%p10992_p4)  ;;  %8246 = vst [vmem:[%s8188_s15 + $0x78] sm:$0xff] (%p10992_p4), %v8245_v28 }
 0xf3b   : > { %10330 = vst [vmem:[%s16757_s11 + $0x30] sm:$0xff] %v8172_v47 }
 0xf3c   : > { %8238 = vst [vmem:[%s8188_s15 + $0x18] sm:$0xff] %v8237_v59 }
 0xf42   : > { %v8243_v35 = vld [vmem:[%s16757_s11 + $0x30] sm:$0xff] }
 0xf43   : > { %8244 = vst [vmem:[%s8188_s15 + $0x70] sm:$0xff] %v8243_v35 }
 0xf44 PF: > { %p17_p8 = scmp.ge.s32.totalorder %s10982_s17, 5   ;;  %s17365_s13 = smov %s10902_s14 }
 0xf45   : > { %s17366_s14 = smov %s10990_s20  ;;  %s17367_s15 = smov %s10982_s17 }
 0xf46   :  { %19 = sbr.rel (!%p17_p8) target bundleno = 2 (0x2), region = 129 }

</bundles_post_ra>
